<compile_context>
chip_gen: v7x
topology: tpu7x:2x2x1
jax: 0.10.0
libtpu: 0.0.40
codegen_flags: <defaults>
</compile_context>

<pallas_src>
import jax
import jax.numpy as jnp
from jax import lax
from jax.experimental import pallas as pl
from jax.experimental.pallas import tpu as pltpu

NHEAD = 8          # nn.TransformerEncoderLayer(nhead=8)
FF = 2048          # PyTorch default dim_feedforward
LN_EPS = 1e-5      # PyTorch default layer_norm_eps


def _layer_norm(x, gamma, beta):
    mu = jnp.mean(x, axis=-1, keepdims=True)
    var = jnp.mean(jnp.square(x - mu), axis=-1, keepdims=True)
    return (x - mu) * lax.rsqrt(var + LN_EPS) * gamma + beta


def stim_kernel(x_ref, wqkv_ref, bqkv_ref, wo_ref, bo_ref,
                w1_ref, b1_ref, w2_ref, b2_ref,
                g1_ref, be1_ref, g2_ref, be2_ref, o_ref):
    TB, N, D = x_ref.shape
    L = wqkv_ref.shape[0]
    Hd = D // NHEAD
    scale = 1.0 / (Hd ** 0.5)

    x = x_ref[...].astype(jnp.float32).reshape(TB * N, D)   # token-flattened M = TB*N

    for l in range(L):                                       # static unroll over layers
        # ---- self-attention (post-norm TransformerEncoderLayer, norm_first=False) ----
        qkv = jnp.dot(x.astype(jnp.bfloat16), wqkv_ref[l],
                      preferred_element_type=jnp.float32) + bqkv_ref[l]   # (TB*N, 3D)
        qkv3 = qkv.reshape(TB, N, 3 * D)                     # leading-dim split only

        head_outs = []
        for h in range(NHEAD):                               # static head loop, batched over TB
            lo = h * Hd
            qh = qkv3[:, :, lo:lo + Hd].astype(jnp.bfloat16)                # (TB, N, Hd)
            kh = qkv3[:, :, D + lo:D + lo + Hd].astype(jnp.bfloat16)        # (TB, N, Hd)
            vh = qkv3[:, :, 2 * D + lo:2 * D + lo + Hd].astype(jnp.bfloat16)
            # scores[b, i, j] = sum_d qh[b,i,d] * kh[b,j,d]  (batched over TB rows)
            s = lax.dot_general(qh, kh, (((2,), (2,)), ((0,), (0,))),
                                preferred_element_type=jnp.float32) * scale  # (TB, N, N)
            s = s - jnp.max(s, axis=-1, keepdims=True)
            p = jnp.exp(s)
            p = p * pl.reciprocal(jnp.sum(p, axis=-1, keepdims=True), approx=True)
            oh = lax.dot_general(p.astype(jnp.bfloat16), vh,
                                 (((2,), (1,)), ((0,), (0,))),
                                 preferred_element_type=jnp.float32)         # (TB, N, Hd)
            head_outs.append(oh)

        attn = jnp.concatenate(head_outs, axis=-1).reshape(TB * N, D)        # (TB*N, D)
        attn_out = jnp.dot(attn.astype(jnp.bfloat16), wo_ref[l],
                           preferred_element_type=jnp.float32) + bo_ref[l]

        y = _layer_norm(x + attn_out, g1_ref[l], be1_ref[l])

        # ---- feed-forward (ReLU) ----
        hdn = jnp.maximum(
            jnp.dot(y.astype(jnp.bfloat16), w1_ref[l],
                    preferred_element_type=jnp.float32) + b1_ref[l], 0.0)
        ffn = jnp.dot(hdn.astype(jnp.bfloat16), w2_ref[l],
                      preferred_element_type=jnp.float32) + b2_ref[l]

        x = _layer_norm(y + ffn, g2_ref[l], be2_ref[l])

    o_ref[...] = x.reshape(TB, N, D).astype(o_ref.dtype)


def _pick_tb(bt, n):
    """Pick rows-per-block so TB*N ~ 256 MXU rows, but keep grid >= 2 when BT > 1."""
    requested = max(1, 256 // max(n, 1))
    tb = max(1, min(requested, bt))
    if bt > 1 and tb >= bt:          # would collapse to a single grid step
        tb = (bt + 1) // 2           # split across 2 TensorCores (v7x megacore)
    return tb


_ARG_NAMES = ('wqkv', 'bqkv', 'wo', 'bo', 'w1', 'b1', 'w2', 'b2',
              'g1', 'be1', 'g2', 'be2')


def stim_encoder(x, params, tb):
    BT, N, D = x.shape
    assert BT % tb == 0
    L = params['wqkv'].shape[0]
    grid = (BT // tb,)

    args = tuple(params[k] for k in _ARG_NAMES)
    in_specs = [pl.BlockSpec((tb, N, D), lambda b: (b, 0, 0))] + [
        pl.BlockSpec(a.shape, lambda b: (0, 0, 0)) for a in args
    ]

    tokens = BT * N
    flops = L * tokens * (2 * D * 3 * D      # QKV projection
                          + 4 * N * D        # scores + p@v
                          + 2 * D * D        # output projection
                          + 4 * D * FF)      # FFN
    transcendentals = L * (BT * NHEAD * N * N + 4 * tokens)
    bytes_accessed = (2 * tokens * D * 4                           # activations in/out (f32)
                      + L * (3 * D * D + D * D + 2 * D * FF) * 2   # bf16 weights
                      + L * (3 * D + 2 * D + FF + 4 * D) * 4)      # biases + LN params

    return pl.pallas_call(
        stim_kernel,
        out_shape=jax.ShapeDtypeStruct((BT, N, D), x.dtype),
        grid=grid,
        in_specs=in_specs,
        out_specs=pl.BlockSpec((tb, N, D), lambda b: (b, 0, 0)),
        compiler_params=pltpu.CompilerParams(
            dimension_semantics=("parallel",),
            vmem_limit_bytes=32 * 1024 * 1024),
        cost_estimate=pl.CostEstimate(
            flops=flops,
            transcendentals=transcendentals,
            bytes_accessed=bytes_accessed),
    )(x, *args)


def init_layer_params(key, dim):
    ks = jax.random.split(key, 8)
    s = 0.02
    wqkv = jax.random.normal(ks[0], (3 * dim, dim), jnp.float32) * s   # in_proj_weight
    wo = jax.random.normal(ks[1], (dim, dim), jnp.float32) * s         # out_proj.weight
    w1 = jax.random.normal(ks[2], (FF, dim), jnp.float32) * s          # linear1.weight
    w2 = jax.random.normal(ks[3], (dim, FF), jnp.float32) * s          # linear2.weight
    bqkv = jax.random.normal(ks[4], (3 * dim,), jnp.float32) * s
    bo = jax.random.normal(ks[5], (dim,), jnp.float32) * s
    b1 = jax.random.normal(ks[6], (FF,), jnp.float32) * s
    b2 = jax.random.normal(ks[7], (dim,), jnp.float32) * s
    return {
        # weights pre-transposed to (in, out) and cast to bf16 for native MXU matmuls
        'wqkv': wqkv.T.astype(jnp.bfloat16), 'bqkv': bqkv.reshape(1, 3 * dim),
        'wo': wo.T.astype(jnp.bfloat16),     'bo': bo.reshape(1, dim),
        'w1': w1.T.astype(jnp.bfloat16),     'b1': b1.reshape(1, FF),
        'w2': w2.T.astype(jnp.bfloat16),     'b2': b2.reshape(1, dim),
        'g1': jnp.ones((1, dim), jnp.float32), 'be1': jnp.zeros((1, dim), jnp.float32),
        'g2': jnp.ones((1, dim), jnp.float32), 'be2': jnp.zeros((1, dim), jnp.float32),
    }


def init_params(key, dim, layers):
    """Per-layer params stacked along a leading L axis (single fused kernel consumes them)."""
    per = [init_layer_params(jax.random.fold_in(key, i), dim) for i in range(layers)]
    return {k: jnp.stack([p[k] for p in per], axis=0) for k in per[0]}


def stim_forward(feats, params):
    B, T, N, D = feats.shape
    # Matches torch: feats.permute(0,2,1,3).reshape(B*T, N, D)   (the seq-first permute(1,0,2)
    # is undone by the final permute, so we keep batch-major; attention is per batch row over N).
    x = jnp.transpose(feats, (0, 2, 1, 3)).reshape(B * T, N, D)
    BT = B * T

    tb = _pick_tb(BT, N)
    pad = (-BT) % tb
    if pad:
        x = jnp.concatenate([x, jnp.zeros((pad, N, D), x.dtype)], axis=0)

    x = stim_encoder(x, params, tb)

    # Matches torch: out.permute(1,0,2).view(B, T, N, D)
    return x[:BT].reshape(B, T, N, D)


if __name__ == "__main__":
    B, T, N, D = 2, 3, 8, 32       # dim=32 (divisible by nhead=8)
    layers = 2
    feats = jax.random.normal(jax.random.PRNGKey(0), (B, T, N, D), jnp.float32)
    params = init_params(jax.random.PRNGKey(1), dim=D, layers=layers)

    out = stim_forward(feats, params)
    out = jax.block_until_ready(out)
    assert out.shape == (B, T, N, D) and out.dtype == jnp.float32
    assert bool(jnp.all(jnp.isfinite(out)))
    print("KERNEL_OK")
</pallas_src>

<mosaic_0001>
module attributes {stable_mosaic.version = 11 : i64} {
  func.func @stim_kernel(%arg0: i32, %arg1: memref<3x8x32xf32, #tpu.memory_space<vmem>>, %arg2: memref<2x32x96xbf16, #tpu.memory_space<vmem>>, %arg3: memref<2x1x96xf32, #tpu.memory_space<vmem>>, %arg4: memref<2x32x32xbf16, #tpu.memory_space<vmem>>, %arg5: memref<2x1x32xf32, #tpu.memory_space<vmem>>, %arg6: memref<2x32x2048xbf16, #tpu.memory_space<vmem>>, %arg7: memref<2x1x2048xf32, #tpu.memory_space<vmem>>, %arg8: memref<2x2048x32xbf16, #tpu.memory_space<vmem>>, %arg9: memref<2x1x32xf32, #tpu.memory_space<vmem>>, %arg10: memref<2x1x32xf32, #tpu.memory_space<vmem>>, %arg11: memref<2x1x32xf32, #tpu.memory_space<vmem>>, %arg12: memref<2x1x32xf32, #tpu.memory_space<vmem>>, %arg13: memref<2x1x32xf32, #tpu.memory_space<vmem>>, %arg14: memref<3x8x32xf32, #tpu.memory_space<vmem>>) attributes {dimension_semantics = [#tpu.dimension_semantics<parallel>], iteration_bounds = array<i64: 2>, scalar_prefetch = 0 : i64, scratch_operands = 0 : i64, tpu.core_type = #tpu.core_type<tc>, window_params = [{transform_indices = @transform_0, window_bounds = array<i64: 3, 8, 32>}, {pipeline_mode = #tpu.pipeline_mode<synchronous>, transform_indices = @transform_1, window_bounds = array<i64: 2, 32, 96>}, {pipeline_mode = #tpu.pipeline_mode<synchronous>, transform_indices = @transform_2, window_bounds = array<i64: 2, 1, 96>}, {pipeline_mode = #tpu.pipeline_mode<synchronous>, transform_indices = @transform_3, window_bounds = array<i64: 2, 32, 32>}, {pipeline_mode = #tpu.pipeline_mode<synchronous>, transform_indices = @transform_4, window_bounds = array<i64: 2, 1, 32>}, {pipeline_mode = #tpu.pipeline_mode<synchronous>, transform_indices = @transform_5, window_bounds = array<i64: 2, 32, 2048>}, {pipeline_mode = #tpu.pipeline_mode<synchronous>, transform_indices = @transform_6, window_bounds = array<i64: 2, 1, 2048>}, {pipeline_mode = #tpu.pipeline_mode<synchronous>, transform_indices = @transform_7, window_bounds = array<i64: 2, 2048, 32>}, {pipeline_mode = #tpu.pipeline_mode<synchronous>, transform_indices = @transform_8, window_bounds = array<i64: 2, 1, 32>}, {pipeline_mode = #tpu.pipeline_mode<synchronous>, transform_indices = @transform_9, window_bounds = array<i64: 2, 1, 32>}, {pipeline_mode = #tpu.pipeline_mode<synchronous>, transform_indices = @transform_10, window_bounds = array<i64: 2, 1, 32>}, {pipeline_mode = #tpu.pipeline_mode<synchronous>, transform_indices = @transform_11, window_bounds = array<i64: 2, 1, 32>}, {pipeline_mode = #tpu.pipeline_mode<synchronous>, transform_indices = @transform_12, window_bounds = array<i64: 2, 1, 32>}, {transform_indices = @transform_13, window_bounds = array<i64: 3, 8, 32>}]} {
    %c0 = arith.constant 0 : index
    %c0_0 = arith.constant 0 : index
    %c0_1 = arith.constant 0 : index
    %0 = vector.load %arg1[%c0, %c0_0, %c0_1] : memref<3x8x32xf32, #tpu.memory_space<vmem>>, vector<3x8x32xf32>
    %1 = vector.shape_cast %0 : vector<3x8x32xf32> to vector<24x32xf32>
    %2 = arith.truncf %1 : vector<24x32xf32> to vector<24x32xbf16>
    %c0_2 = arith.constant 0 : index
    %c0_3 = arith.constant 0 : index
    %c0_4 = arith.constant 0 : index
    %3 = vector.load %arg2[%c0_2, %c0_3, %c0_4] : memref<2x32x96xbf16, #tpu.memory_space<vmem>>, vector<1x32x96xbf16>
    %4 = vector.shape_cast %3 : vector<1x32x96xbf16> to vector<32x96xbf16>
    %cst = arith.constant dense<0.000000e+00> : vector<24x96xf32>
    %5 = tpu.matmul %2, %4, %cst {dimension_numbers = #tpu.dot_dimension_numbers<[1], [0], [0], [1], [0, 0, 1, 1], [], []>} : vector<24x32xbf16>, vector<32x96xbf16>, vector<24x96xf32> -> vector<24x96xf32>
    %c0_5 = arith.constant 0 : index
    %c0_6 = arith.constant 0 : index
    %c0_7 = arith.constant 0 : index
    %6 = vector.load %arg3[%c0_5, %c0_6, %c0_7] : memref<2x1x96xf32, #tpu.memory_space<vmem>>, vector<1x1x96xf32>
    %7 = vector.shape_cast %6 : vector<1x1x96xf32> to vector<1x96xf32>
    %8 = vector.broadcast %7 : vector<1x96xf32> to vector<24x96xf32>
    %9 = arith.addf %5, %8 : vector<24x96xf32>
    %10 = vector.shape_cast %9 : vector<24x96xf32> to vector<3x8x96xf32>
    %11 = vector.extract_strided_slice %10 {offsets = [0, 0, 0], sizes = [3, 8, 4], strides = [1, 1, 1]} : vector<3x8x96xf32> to vector<3x8x4xf32>
    %12 = arith.truncf %11 : vector<3x8x4xf32> to vector<3x8x4xbf16>
    %13 = vector.extract_strided_slice %10 {offsets = [0, 0, 32], sizes = [3, 8, 4], strides = [1, 1, 1]} : vector<3x8x96xf32> to vector<3x8x4xf32>
    %14 = arith.truncf %13 : vector<3x8x4xf32> to vector<3x8x4xbf16>
    %15 = vector.extract_strided_slice %10 {offsets = [0, 0, 64], sizes = [3, 8, 4], strides = [1, 1, 1]} : vector<3x8x96xf32> to vector<3x8x4xf32>
    %16 = arith.truncf %15 : vector<3x8x4xf32> to vector<3x8x4xbf16>
    %cst_8 = arith.constant dense<0.000000e+00> : vector<3x8x8xf32>
    %17 = tpu.matmul %12, %14, %cst_8 {dimension_numbers = #tpu.dot_dimension_numbers<[2], [2], [1], [1], [0, 0, 0, 1, 1, 1], [0], [0]>} : vector<3x8x4xbf16>, vector<3x8x4xbf16>, vector<3x8x8xf32> -> vector<3x8x8xf32>
    %cst_9 = arith.constant 5.000000e-01 : f32
    %18 = vector.broadcast %cst_9 : f32 to vector<3x8x8xf32>
    %19 = arith.mulf %17, %18 : vector<3x8x8xf32>
    %cst_10 = arith.constant dense<0xFF800000> : vector<3x8xf32>
    %20 = vector.multi_reduction <maximumf>, %19, %cst_10 [2] : vector<3x8x8xf32> to vector<3x8xf32>
    %21 = vector.shape_cast %20 : vector<3x8xf32> to vector<3x8x1xf32>
    %22 = vector.broadcast %21 : vector<3x8x1xf32> to vector<3x8x8xf32>
    %23 = arith.subf %19, %22 : vector<3x8x8xf32>
    %24 = math.exp %23 : vector<3x8x8xf32>
    %cst_11 = arith.constant dense<0.000000e+00> : vector<3x8xf32>
    %25 = vector.multi_reduction <add>, %24, %cst_11 [2] : vector<3x8x8xf32> to vector<3x8xf32>
    %26 = vector.shape_cast %25 : vector<3x8xf32> to vector<3x8x1xf32>
    %27 = tpu.reciprocal %26 {approx = true} : vector<3x8x1xf32> -> vector<3x8x1xf32>
    %28 = vector.broadcast %27 : vector<3x8x1xf32> to vector<3x8x8xf32>
    %29 = arith.mulf %24, %28 : vector<3x8x8xf32>
    %30 = arith.truncf %29 : vector<3x8x8xf32> to vector<3x8x8xbf16>
    %cst_12 = arith.constant dense<0.000000e+00> : vector<3x8x4xf32>
    %31 = tpu.matmul %30, %16, %cst_12 {dimension_numbers = #tpu.dot_dimension_numbers<[2], [1], [1], [2], [0, 0, 0, 1, 1, 2], [0], [0]>} : vector<3x8x8xbf16>, vector<3x8x4xbf16>, vector<3x8x4xf32> -> vector<3x8x4xf32>
    %32 = vector.extract_strided_slice %10 {offsets = [0, 0, 4], sizes = [3, 8, 4], strides = [1, 1, 1]} : vector<3x8x96xf32> to vector<3x8x4xf32>
    %33 = arith.truncf %32 : vector<3x8x4xf32> to vector<3x8x4xbf16>
    %34 = vector.extract_strided_slice %10 {offsets = [0, 0, 36], sizes = [3, 8, 4], strides = [1, 1, 1]} : vector<3x8x96xf32> to vector<3x8x4xf32>
    %35 = arith.truncf %34 : vector<3x8x4xf32> to vector<3x8x4xbf16>
    %36 = vector.extract_strided_slice %10 {offsets = [0, 0, 68], sizes = [3, 8, 4], strides = [1, 1, 1]} : vector<3x8x96xf32> to vector<3x8x4xf32>
    %37 = arith.truncf %36 : vector<3x8x4xf32> to vector<3x8x4xbf16>
    %cst_13 = arith.constant dense<0.000000e+00> : vector<3x8x8xf32>
    %38 = tpu.matmul %33, %35, %cst_13 {dimension_numbers = #tpu.dot_dimension_numbers<[2], [2], [1], [1], [0, 0, 0, 1, 1, 1], [0], [0]>} : vector<3x8x4xbf16>, vector<3x8x4xbf16>, vector<3x8x8xf32> -> vector<3x8x8xf32>
    %cst_14 = arith.constant 5.000000e-01 : f32
    %39 = vector.broadcast %cst_14 : f32 to vector<3x8x8xf32>
    %40 = arith.mulf %38, %39 : vector<3x8x8xf32>
    %cst_15 = arith.constant dense<0xFF800000> : vector<3x8xf32>
    %41 = vector.multi_reduction <maximumf>, %40, %cst_15 [2] : vector<3x8x8xf32> to vector<3x8xf32>
    %42 = vector.shape_cast %41 : vector<3x8xf32> to vector<3x8x1xf32>
    %43 = vector.broadcast %42 : vector<3x8x1xf32> to vector<3x8x8xf32>
    %44 = arith.subf %40, %43 : vector<3x8x8xf32>
    %45 = math.exp %44 : vector<3x8x8xf32>
    %cst_16 = arith.constant dense<0.000000e+00> : vector<3x8xf32>
    %46 = vector.multi_reduction <add>, %45, %cst_16 [2] : vector<3x8x8xf32> to vector<3x8xf32>
    %47 = vector.shape_cast %46 : vector<3x8xf32> to vector<3x8x1xf32>
    %48 = tpu.reciprocal %47 {approx = true} : vector<3x8x1xf32> -> vector<3x8x1xf32>
    %49 = vector.broadcast %48 : vector<3x8x1xf32> to vector<3x8x8xf32>
    %50 = arith.mulf %45, %49 : vector<3x8x8xf32>
    %51 = arith.truncf %50 : vector<3x8x8xf32> to vector<3x8x8xbf16>
    %cst_17 = arith.constant dense<0.000000e+00> : vector<3x8x4xf32>
    %52 = tpu.matmul %51, %37, %cst_17 {dimension_numbers = #tpu.dot_dimension_numbers<[2], [1], [1], [2], [0, 0, 0, 1, 1, 2], [0], [0]>} : vector<3x8x8xbf16>, vector<3x8x4xbf16>, vector<3x8x4xf32> -> vector<3x8x4xf32>
    %53 = vector.extract_strided_slice %10 {offsets = [0, 0, 8], sizes = [3, 8, 4], strides = [1, 1, 1]} : vector<3x8x96xf32> to vector<3x8x4xf32>
    %54 = arith.truncf %53 : vector<3x8x4xf32> to vector<3x8x4xbf16>
    %55 = vector.extract_strided_slice %10 {offsets = [0, 0, 40], sizes = [3, 8, 4], strides = [1, 1, 1]} : vector<3x8x96xf32> to vector<3x8x4xf32>
    %56 = arith.truncf %55 : vector<3x8x4xf32> to vector<3x8x4xbf16>
    %57 = vector.extract_strided_slice %10 {offsets = [0, 0, 72], sizes = [3, 8, 4], strides = [1, 1, 1]} : vector<3x8x96xf32> to vector<3x8x4xf32>
    %58 = arith.truncf %57 : vector<3x8x4xf32> to vector<3x8x4xbf16>
    %cst_18 = arith.constant dense<0.000000e+00> : vector<3x8x8xf32>
    %59 = tpu.matmul %54, %56, %cst_18 {dimension_numbers = #tpu.dot_dimension_numbers<[2], [2], [1], [1], [0, 0, 0, 1, 1, 1], [0], [0]>} : vector<3x8x4xbf16>, vector<3x8x4xbf16>, vector<3x8x8xf32> -> vector<3x8x8xf32>
    %cst_19 = arith.constant 5.000000e-01 : f32
    %60 = vector.broadcast %cst_19 : f32 to vector<3x8x8xf32>
    %61 = arith.mulf %59, %60 : vector<3x8x8xf32>
    %cst_20 = arith.constant dense<0xFF800000> : vector<3x8xf32>
    %62 = vector.multi_reduction <maximumf>, %61, %cst_20 [2] : vector<3x8x8xf32> to vector<3x8xf32>
    %63 = vector.shape_cast %62 : vector<3x8xf32> to vector<3x8x1xf32>
    %64 = vector.broadcast %63 : vector<3x8x1xf32> to vector<3x8x8xf32>
    %65 = arith.subf %61, %64 : vector<3x8x8xf32>
    %66 = math.exp %65 : vector<3x8x8xf32>
    %cst_21 = arith.constant dense<0.000000e+00> : vector<3x8xf32>
    %67 = vector.multi_reduction <add>, %66, %cst_21 [2] : vector<3x8x8xf32> to vector<3x8xf32>
    %68 = vector.shape_cast %67 : vector<3x8xf32> to vector<3x8x1xf32>
    %69 = tpu.reciprocal %68 {approx = true} : vector<3x8x1xf32> -> vector<3x8x1xf32>
    %70 = vector.broadcast %69 : vector<3x8x1xf32> to vector<3x8x8xf32>
    %71 = arith.mulf %66, %70 : vector<3x8x8xf32>
    %72 = arith.truncf %71 : vector<3x8x8xf32> to vector<3x8x8xbf16>
    %cst_22 = arith.constant dense<0.000000e+00> : vector<3x8x4xf32>
    %73 = tpu.matmul %72, %58, %cst_22 {dimension_numbers = #tpu.dot_dimension_numbers<[2], [1], [1], [2], [0, 0, 0, 1, 1, 2], [0], [0]>} : vector<3x8x8xbf16>, vector<3x8x4xbf16>, vector<3x8x4xf32> -> vector<3x8x4xf32>
    %74 = vector.extract_strided_slice %10 {offsets = [0, 0, 12], sizes = [3, 8, 4], strides = [1, 1, 1]} : vector<3x8x96xf32> to vector<3x8x4xf32>
    %75 = arith.truncf %74 : vector<3x8x4xf32> to vector<3x8x4xbf16>
    %76 = vector.extract_strided_slice %10 {offsets = [0, 0, 44], sizes = [3, 8, 4], strides = [1, 1, 1]} : vector<3x8x96xf32> to vector<3x8x4xf32>
    %77 = arith.truncf %76 : vector<3x8x4xf32> to vector<3x8x4xbf16>
    %78 = vector.extract_strided_slice %10 {offsets = [0, 0, 76], sizes = [3, 8, 4], strides = [1, 1, 1]} : vector<3x8x96xf32> to vector<3x8x4xf32>
    %79 = arith.truncf %78 : vector<3x8x4xf32> to vector<3x8x4xbf16>
    %cst_23 = arith.constant dense<0.000000e+00> : vector<3x8x8xf32>
    %80 = tpu.matmul %75, %77, %cst_23 {dimension_numbers = #tpu.dot_dimension_numbers<[2], [2], [1], [1], [0, 0, 0, 1, 1, 1], [0], [0]>} : vector<3x8x4xbf16>, vector<3x8x4xbf16>, vector<3x8x8xf32> -> vector<3x8x8xf32>
    %cst_24 = arith.constant 5.000000e-01 : f32
    %81 = vector.broadcast %cst_24 : f32 to vector<3x8x8xf32>
    %82 = arith.mulf %80, %81 : vector<3x8x8xf32>
    %cst_25 = arith.constant dense<0xFF800000> : vector<3x8xf32>
    %83 = vector.multi_reduction <maximumf>, %82, %cst_25 [2] : vector<3x8x8xf32> to vector<3x8xf32>
    %84 = vector.shape_cast %83 : vector<3x8xf32> to vector<3x8x1xf32>
    %85 = vector.broadcast %84 : vector<3x8x1xf32> to vector<3x8x8xf32>
    %86 = arith.subf %82, %85 : vector<3x8x8xf32>
    %87 = math.exp %86 : vector<3x8x8xf32>
    %cst_26 = arith.constant dense<0.000000e+00> : vector<3x8xf32>
    %88 = vector.multi_reduction <add>, %87, %cst_26 [2] : vector<3x8x8xf32> to vector<3x8xf32>
    %89 = vector.shape_cast %88 : vector<3x8xf32> to vector<3x8x1xf32>
    %90 = tpu.reciprocal %89 {approx = true} : vector<3x8x1xf32> -> vector<3x8x1xf32>
    %91 = vector.broadcast %90 : vector<3x8x1xf32> to vector<3x8x8xf32>
    %92 = arith.mulf %87, %91 : vector<3x8x8xf32>
    %93 = arith.truncf %92 : vector<3x8x8xf32> to vector<3x8x8xbf16>
    %cst_27 = arith.constant dense<0.000000e+00> : vector<3x8x4xf32>
    %94 = tpu.matmul %93, %79, %cst_27 {dimension_numbers = #tpu.dot_dimension_numbers<[2], [1], [1], [2], [0, 0, 0, 1, 1, 2], [0], [0]>} : vector<3x8x8xbf16>, vector<3x8x4xbf16>, vector<3x8x4xf32> -> vector<3x8x4xf32>
    %95 = vector.extract_strided_slice %10 {offsets = [0, 0, 16], sizes = [3, 8, 4], strides = [1, 1, 1]} : vector<3x8x96xf32> to vector<3x8x4xf32>
    %96 = arith.truncf %95 : vector<3x8x4xf32> to vector<3x8x4xbf16>
    %97 = vector.extract_strided_slice %10 {offsets = [0, 0, 48], sizes = [3, 8, 4], strides = [1, 1, 1]} : vector<3x8x96xf32> to vector<3x8x4xf32>
    %98 = arith.truncf %97 : vector<3x8x4xf32> to vector<3x8x4xbf16>
    %99 = vector.extract_strided_slice %10 {offsets = [0, 0, 80], sizes = [3, 8, 4], strides = [1, 1, 1]} : vector<3x8x96xf32> to vector<3x8x4xf32>
    %100 = arith.truncf %99 : vector<3x8x4xf32> to vector<3x8x4xbf16>
    %cst_28 = arith.constant dense<0.000000e+00> : vector<3x8x8xf32>
    %101 = tpu.matmul %96, %98, %cst_28 {dimension_numbers = #tpu.dot_dimension_numbers<[2], [2], [1], [1], [0, 0, 0, 1, 1, 1], [0], [0]>} : vector<3x8x4xbf16>, vector<3x8x4xbf16>, vector<3x8x8xf32> -> vector<3x8x8xf32>
    %cst_29 = arith.constant 5.000000e-01 : f32
    %102 = vector.broadcast %cst_29 : f32 to vector<3x8x8xf32>
    %103 = arith.mulf %101, %102 : vector<3x8x8xf32>
    %cst_30 = arith.constant dense<0xFF800000> : vector<3x8xf32>
    %104 = vector.multi_reduction <maximumf>, %103, %cst_30 [2] : vector<3x8x8xf32> to vector<3x8xf32>
    %105 = vector.shape_cast %104 : vector<3x8xf32> to vector<3x8x1xf32>
    %106 = vector.broadcast %105 : vector<3x8x1xf32> to vector<3x8x8xf32>
    %107 = arith.subf %103, %106 : vector<3x8x8xf32>
    %108 = math.exp %107 : vector<3x8x8xf32>
    %cst_31 = arith.constant dense<0.000000e+00> : vector<3x8xf32>
    %109 = vector.multi_reduction <add>, %108, %cst_31 [2] : vector<3x8x8xf32> to vector<3x8xf32>
    %110 = vector.shape_cast %109 : vector<3x8xf32> to vector<3x8x1xf32>
    %111 = tpu.reciprocal %110 {approx = true} : vector<3x8x1xf32> -> vector<3x8x1xf32>
    %112 = vector.broadcast %111 : vector<3x8x1xf32> to vector<3x8x8xf32>
    %113 = arith.mulf %108, %112 : vector<3x8x8xf32>
    %114 = arith.truncf %113 : vector<3x8x8xf32> to vector<3x8x8xbf16>
    %cst_32 = arith.constant dense<0.000000e+00> : vector<3x8x4xf32>
    %115 = tpu.matmul %114, %100, %cst_32 {dimension_numbers = #tpu.dot_dimension_numbers<[2], [1], [1], [2], [0, 0, 0, 1, 1, 2], [0], [0]>} : vector<3x8x8xbf16>, vector<3x8x4xbf16>, vector<3x8x4xf32> -> vector<3x8x4xf32>
    %116 = vector.extract_strided_slice %10 {offsets = [0, 0, 20], sizes = [3, 8, 4], strides = [1, 1, 1]} : vector<3x8x96xf32> to vector<3x8x4xf32>
    %117 = arith.truncf %116 : vector<3x8x4xf32> to vector<3x8x4xbf16>
    %118 = vector.extract_strided_slice %10 {offsets = [0, 0, 52], sizes = [3, 8, 4], strides = [1, 1, 1]} : vector<3x8x96xf32> to vector<3x8x4xf32>
    %119 = arith.truncf %118 : vector<3x8x4xf32> to vector<3x8x4xbf16>
    %120 = vector.extract_strided_slice %10 {offsets = [0, 0, 84], sizes = [3, 8, 4], strides = [1, 1, 1]} : vector<3x8x96xf32> to vector<3x8x4xf32>
    %121 = arith.truncf %120 : vector<3x8x4xf32> to vector<3x8x4xbf16>
    %cst_33 = arith.constant dense<0.000000e+00> : vector<3x8x8xf32>
    %122 = tpu.matmul %117, %119, %cst_33 {dimension_numbers = #tpu.dot_dimension_numbers<[2], [2], [1], [1], [0, 0, 0, 1, 1, 1], [0], [0]>} : vector<3x8x4xbf16>, vector<3x8x4xbf16>, vector<3x8x8xf32> -> vector<3x8x8xf32>
    %cst_34 = arith.constant 5.000000e-01 : f32
    %123 = vector.broadcast %cst_34 : f32 to vector<3x8x8xf32>
    %124 = arith.mulf %122, %123 : vector<3x8x8xf32>
    %cst_35 = arith.constant dense<0xFF800000> : vector<3x8xf32>
    %125 = vector.multi_reduction <maximumf>, %124, %cst_35 [2] : vector<3x8x8xf32> to vector<3x8xf32>
    %126 = vector.shape_cast %125 : vector<3x8xf32> to vector<3x8x1xf32>
    %127 = vector.broadcast %126 : vector<3x8x1xf32> to vector<3x8x8xf32>
    %128 = arith.subf %124, %127 : vector<3x8x8xf32>
    %129 = math.exp %128 : vector<3x8x8xf32>
    %cst_36 = arith.constant dense<0.000000e+00> : vector<3x8xf32>
    %130 = vector.multi_reduction <add>, %129, %cst_36 [2] : vector<3x8x8xf32> to vector<3x8xf32>
    %131 = vector.shape_cast %130 : vector<3x8xf32> to vector<3x8x1xf32>
    %132 = tpu.reciprocal %131 {approx = true} : vector<3x8x1xf32> -> vector<3x8x1xf32>
    %133 = vector.broadcast %132 : vector<3x8x1xf32> to vector<3x8x8xf32>
    %134 = arith.mulf %129, %133 : vector<3x8x8xf32>
    %135 = arith.truncf %134 : vector<3x8x8xf32> to vector<3x8x8xbf16>
    %cst_37 = arith.constant dense<0.000000e+00> : vector<3x8x4xf32>
    %136 = tpu.matmul %135, %121, %cst_37 {dimension_numbers = #tpu.dot_dimension_numbers<[2], [1], [1], [2], [0, 0, 0, 1, 1, 2], [0], [0]>} : vector<3x8x8xbf16>, vector<3x8x4xbf16>, vector<3x8x4xf32> -> vector<3x8x4xf32>
    %137 = vector.extract_strided_slice %10 {offsets = [0, 0, 24], sizes = [3, 8, 4], strides = [1, 1, 1]} : vector<3x8x96xf32> to vector<3x8x4xf32>
    %138 = arith.truncf %137 : vector<3x8x4xf32> to vector<3x8x4xbf16>
    %139 = vector.extract_strided_slice %10 {offsets = [0, 0, 56], sizes = [3, 8, 4], strides = [1, 1, 1]} : vector<3x8x96xf32> to vector<3x8x4xf32>
    %140 = arith.truncf %139 : vector<3x8x4xf32> to vector<3x8x4xbf16>
    %141 = vector.extract_strided_slice %10 {offsets = [0, 0, 88], sizes = [3, 8, 4], strides = [1, 1, 1]} : vector<3x8x96xf32> to vector<3x8x4xf32>
    %142 = arith.truncf %141 : vector<3x8x4xf32> to vector<3x8x4xbf16>
    %cst_38 = arith.constant dense<0.000000e+00> : vector<3x8x8xf32>
    %143 = tpu.matmul %138, %140, %cst_38 {dimension_numbers = #tpu.dot_dimension_numbers<[2], [2], [1], [1], [0, 0, 0, 1, 1, 1], [0], [0]>} : vector<3x8x4xbf16>, vector<3x8x4xbf16>, vector<3x8x8xf32> -> vector<3x8x8xf32>
    %cst_39 = arith.constant 5.000000e-01 : f32
    %144 = vector.broadcast %cst_39 : f32 to vector<3x8x8xf32>
    %145 = arith.mulf %143, %144 : vector<3x8x8xf32>
    %cst_40 = arith.constant dense<0xFF800000> : vector<3x8xf32>
    %146 = vector.multi_reduction <maximumf>, %145, %cst_40 [2] : vector<3x8x8xf32> to vector<3x8xf32>
    %147 = vector.shape_cast %146 : vector<3x8xf32> to vector<3x8x1xf32>
    %148 = vector.broadcast %147 : vector<3x8x1xf32> to vector<3x8x8xf32>
    %149 = arith.subf %145, %148 : vector<3x8x8xf32>
    %150 = math.exp %149 : vector<3x8x8xf32>
    %cst_41 = arith.constant dense<0.000000e+00> : vector<3x8xf32>
    %151 = vector.multi_reduction <add>, %150, %cst_41 [2] : vector<3x8x8xf32> to vector<3x8xf32>
    %152 = vector.shape_cast %151 : vector<3x8xf32> to vector<3x8x1xf32>
    %153 = tpu.reciprocal %152 {approx = true} : vector<3x8x1xf32> -> vector<3x8x1xf32>
    %154 = vector.broadcast %153 : vector<3x8x1xf32> to vector<3x8x8xf32>
    %155 = arith.mulf %150, %154 : vector<3x8x8xf32>
    %156 = arith.truncf %155 : vector<3x8x8xf32> to vector<3x8x8xbf16>
    %cst_42 = arith.constant dense<0.000000e+00> : vector<3x8x4xf32>
    %157 = tpu.matmul %156, %142, %cst_42 {dimension_numbers = #tpu.dot_dimension_numbers<[2], [1], [1], [2], [0, 0, 0, 1, 1, 2], [0], [0]>} : vector<3x8x8xbf16>, vector<3x8x4xbf16>, vector<3x8x4xf32> -> vector<3x8x4xf32>
    %158 = vector.extract_strided_slice %10 {offsets = [0, 0, 28], sizes = [3, 8, 4], strides = [1, 1, 1]} : vector<3x8x96xf32> to vector<3x8x4xf32>
    %159 = arith.truncf %158 : vector<3x8x4xf32> to vector<3x8x4xbf16>
    %160 = vector.extract_strided_slice %10 {offsets = [0, 0, 60], sizes = [3, 8, 4], strides = [1, 1, 1]} : vector<3x8x96xf32> to vector<3x8x4xf32>
    %161 = arith.truncf %160 : vector<3x8x4xf32> to vector<3x8x4xbf16>
    %162 = vector.extract_strided_slice %10 {offsets = [0, 0, 92], sizes = [3, 8, 4], strides = [1, 1, 1]} : vector<3x8x96xf32> to vector<3x8x4xf32>
    %163 = arith.truncf %162 : vector<3x8x4xf32> to vector<3x8x4xbf16>
    %cst_43 = arith.constant dense<0.000000e+00> : vector<3x8x8xf32>
    %164 = tpu.matmul %159, %161, %cst_43 {dimension_numbers = #tpu.dot_dimension_numbers<[2], [2], [1], [1], [0, 0, 0, 1, 1, 1], [0], [0]>} : vector<3x8x4xbf16>, vector<3x8x4xbf16>, vector<3x8x8xf32> -> vector<3x8x8xf32>
    %cst_44 = arith.constant 5.000000e-01 : f32
    %165 = vector.broadcast %cst_44 : f32 to vector<3x8x8xf32>
    %166 = arith.mulf %164, %165 : vector<3x8x8xf32>
    %cst_45 = arith.constant dense<0xFF800000> : vector<3x8xf32>
    %167 = vector.multi_reduction <maximumf>, %166, %cst_45 [2] : vector<3x8x8xf32> to vector<3x8xf32>
    %168 = vector.shape_cast %167 : vector<3x8xf32> to vector<3x8x1xf32>
    %169 = vector.broadcast %168 : vector<3x8x1xf32> to vector<3x8x8xf32>
    %170 = arith.subf %166, %169 : vector<3x8x8xf32>
    %171 = math.exp %170 : vector<3x8x8xf32>
    %cst_46 = arith.constant dense<0.000000e+00> : vector<3x8xf32>
    %172 = vector.multi_reduction <add>, %171, %cst_46 [2] : vector<3x8x8xf32> to vector<3x8xf32>
    %173 = vector.shape_cast %172 : vector<3x8xf32> to vector<3x8x1xf32>
    %174 = tpu.reciprocal %173 {approx = true} : vector<3x8x1xf32> -> vector<3x8x1xf32>
    %175 = vector.broadcast %174 : vector<3x8x1xf32> to vector<3x8x8xf32>
    %176 = arith.mulf %171, %175 : vector<3x8x8xf32>
    %177 = arith.truncf %176 : vector<3x8x8xf32> to vector<3x8x8xbf16>
    %cst_47 = arith.constant dense<0.000000e+00> : vector<3x8x4xf32>
    %178 = tpu.matmul %177, %163, %cst_47 {dimension_numbers = #tpu.dot_dimension_numbers<[2], [1], [1], [2], [0, 0, 0, 1, 1, 2], [0], [0]>} : vector<3x8x8xbf16>, vector<3x8x4xbf16>, vector<3x8x4xf32> -> vector<3x8x4xf32>
    %179 = tpu.concatenate %31, %52, %73, %94, %115, %136, %157, %178 in 2 : vector<3x8x4xf32>, vector<3x8x4xf32>, vector<3x8x4xf32>, vector<3x8x4xf32>, vector<3x8x4xf32>, vector<3x8x4xf32>, vector<3x8x4xf32>, vector<3x8x4xf32> -> vector<3x8x32xf32>
    %180 = vector.shape_cast %179 : vector<3x8x32xf32> to vector<24x32xf32>
    %181 = arith.truncf %180 : vector<24x32xf32> to vector<24x32xbf16>
    %c0_48 = arith.constant 0 : index
    %c0_49 = arith.constant 0 : index
    %c0_50 = arith.constant 0 : index
    %182 = vector.load %arg4[%c0_48, %c0_49, %c0_50] : memref<2x32x32xbf16, #tpu.memory_space<vmem>>, vector<1x32x32xbf16>
    %183 = vector.shape_cast %182 : vector<1x32x32xbf16> to vector<32x32xbf16>
    %cst_51 = arith.constant dense<0.000000e+00> : vector<24x32xf32>
    %184 = tpu.matmul %181, %183, %cst_51 {dimension_numbers = #tpu.dot_dimension_numbers<[1], [0], [0], [1], [0, 0, 1, 1], [], []>} : vector<24x32xbf16>, vector<32x32xbf16>, vector<24x32xf32> -> vector<24x32xf32>
    %c0_52 = arith.constant 0 : index
    %c0_53 = arith.constant 0 : index
    %c0_54 = arith.constant 0 : index
    %185 = vector.load %arg5[%c0_52, %c0_53, %c0_54] : memref<2x1x32xf32, #tpu.memory_space<vmem>>, vector<1x1x32xf32>
    %186 = vector.shape_cast %185 : vector<1x1x32xf32> to vector<1x32xf32>
    %187 = vector.broadcast %186 : vector<1x32xf32> to vector<24x32xf32>
    %188 = arith.addf %184, %187 : vector<24x32xf32>
    %189 = arith.addf %1, %188 : vector<24x32xf32>
    %c0_55 = arith.constant 0 : index
    %c0_56 = arith.constant 0 : index
    %c0_57 = arith.constant 0 : index
    %190 = vector.load %arg10[%c0_55, %c0_56, %c0_57] : memref<2x1x32xf32, #tpu.memory_space<vmem>>, vector<1x1x32xf32>
    %191 = vector.shape_cast %190 : vector<1x1x32xf32> to vector<1x32xf32>
    %c0_58 = arith.constant 0 : index
    %c0_59 = arith.constant 0 : index
    %c0_60 = arith.constant 0 : index
    %192 = vector.load %arg11[%c0_58, %c0_59, %c0_60] : memref<2x1x32xf32, #tpu.memory_space<vmem>>, vector<1x1x32xf32>
    %193 = vector.shape_cast %192 : vector<1x1x32xf32> to vector<1x32xf32>
    %cst_61 = arith.constant dense<0.000000e+00> : vector<24xf32>
    %194 = vector.multi_reduction <add>, %189, %cst_61 [1] : vector<24x32xf32> to vector<24xf32>
    %195 = vector.shape_cast %194 : vector<24xf32> to vector<24x1xf32>
    %cst_62 = arith.constant 3.200000e+01 : f32
    %196 = vector.broadcast %cst_62 : f32 to vector<24x1xf32>
    %197 = arith.divf %195, %196 : vector<24x1xf32>
    %198 = vector.broadcast %197 : vector<24x1xf32> to vector<24x32xf32>
    %199 = arith.subf %189, %198 : vector<24x32xf32>
    %200 = arith.mulf %199, %199 : vector<24x32xf32>
    %cst_63 = arith.constant dense<0.000000e+00> : vector<24xf32>
    %201 = vector.multi_reduction <add>, %200, %cst_63 [1] : vector<24x32xf32> to vector<24xf32>
    %202 = vector.shape_cast %201 : vector<24xf32> to vector<24x1xf32>
    %cst_64 = arith.constant 3.200000e+01 : f32
    %203 = vector.broadcast %cst_64 : f32 to vector<24x1xf32>
    %204 = arith.divf %202, %203 : vector<24x1xf32>
    %205 = vector.broadcast %197 : vector<24x1xf32> to vector<24x32xf32>
    %206 = arith.subf %189, %205 : vector<24x32xf32>
    %cst_65 = arith.constant 9.99999974E-6 : f32
    %207 = vector.broadcast %cst_65 : f32 to vector<24x1xf32>
    %208 = arith.addf %204, %207 : vector<24x1xf32>
    %209 = math.rsqrt %208 : vector<24x1xf32>
    %210 = vector.broadcast %209 : vector<24x1xf32> to vector<24x32xf32>
    %211 = arith.mulf %206, %210 : vector<24x32xf32>
    %212 = vector.broadcast %191 : vector<1x32xf32> to vector<24x32xf32>
    %213 = arith.mulf %211, %212 : vector<24x32xf32>
    %214 = vector.broadcast %193 : vector<1x32xf32> to vector<24x32xf32>
    %215 = arith.addf %213, %214 : vector<24x32xf32>
    %216 = arith.truncf %215 : vector<24x32xf32> to vector<24x32xbf16>
    %c0_66 = arith.constant 0 : index
    %c0_67 = arith.constant 0 : index
    %c0_68 = arith.constant 0 : index
    %217 = vector.load %arg6[%c0_66, %c0_67, %c0_68] : memref<2x32x2048xbf16, #tpu.memory_space<vmem>>, vector<1x32x2048xbf16>
    %218 = vector.shape_cast %217 : vector<1x32x2048xbf16> to vector<32x2048xbf16>
    %cst_69 = arith.constant dense<0.000000e+00> : vector<24x2048xf32>
    %219 = tpu.matmul %216, %218, %cst_69 {dimension_numbers = #tpu.dot_dimension_numbers<[1], [0], [0], [1], [0, 0, 1, 1], [], []>} : vector<24x32xbf16>, vector<32x2048xbf16>, vector<24x2048xf32> -> vector<24x2048xf32>
    %c0_70 = arith.constant 0 : index
    %c0_71 = arith.constant 0 : index
    %c0_72 = arith.constant 0 : index
    %220 = vector.load %arg7[%c0_70, %c0_71, %c0_72] : memref<2x1x2048xf32, #tpu.memory_space<vmem>>, vector<1x1x2048xf32>
    %221 = vector.shape_cast %220 : vector<1x1x2048xf32> to vector<1x2048xf32>
    %222 = vector.broadcast %221 : vector<1x2048xf32> to vector<24x2048xf32>
    %223 = arith.addf %219, %222 : vector<24x2048xf32>
    %cst_73 = arith.constant 0.000000e+00 : f32
    %224 = vector.broadcast %cst_73 : f32 to vector<24x2048xf32>
    %225 = arith.maximumf %223, %224 : vector<24x2048xf32>
    %226 = arith.truncf %225 : vector<24x2048xf32> to vector<24x2048xbf16>
    %c0_74 = arith.constant 0 : index
    %c0_75 = arith.constant 0 : index
    %c0_76 = arith.constant 0 : index
    %227 = vector.load %arg8[%c0_74, %c0_75, %c0_76] : memref<2x2048x32xbf16, #tpu.memory_space<vmem>>, vector<1x2048x32xbf16>
    %228 = vector.shape_cast %227 : vector<1x2048x32xbf16> to vector<2048x32xbf16>
    %cst_77 = arith.constant dense<0.000000e+00> : vector<24x32xf32>
    %229 = tpu.matmul %226, %228, %cst_77 {dimension_numbers = #tpu.dot_dimension_numbers<[1], [0], [0], [1], [0, 0, 1, 1], [], []>} : vector<24x2048xbf16>, vector<2048x32xbf16>, vector<24x32xf32> -> vector<24x32xf32>
    %c0_78 = arith.constant 0 : index
    %c0_79 = arith.constant 0 : index
    %c0_80 = arith.constant 0 : index
    %230 = vector.load %arg9[%c0_78, %c0_79, %c0_80] : memref<2x1x32xf32, #tpu.memory_space<vmem>>, vector<1x1x32xf32>
    %231 = vector.shape_cast %230 : vector<1x1x32xf32> to vector<1x32xf32>
    %232 = vector.broadcast %231 : vector<1x32xf32> to vector<24x32xf32>
    %233 = arith.addf %229, %232 : vector<24x32xf32>
    %234 = arith.addf %215, %233 : vector<24x32xf32>
    %c0_81 = arith.constant 0 : index
    %c0_82 = arith.constant 0 : index
    %c0_83 = arith.constant 0 : index
    %235 = vector.load %arg12[%c0_81, %c0_82, %c0_83] : memref<2x1x32xf32, #tpu.memory_space<vmem>>, vector<1x1x32xf32>
    %236 = vector.shape_cast %235 : vector<1x1x32xf32> to vector<1x32xf32>
    %c0_84 = arith.constant 0 : index
    %c0_85 = arith.constant 0 : index
    %c0_86 = arith.constant 0 : index
    %237 = vector.load %arg13[%c0_84, %c0_85, %c0_86] : memref<2x1x32xf32, #tpu.memory_space<vmem>>, vector<1x1x32xf32>
    %238 = vector.shape_cast %237 : vector<1x1x32xf32> to vector<1x32xf32>
    %cst_87 = arith.constant dense<0.000000e+00> : vector<24xf32>
    %239 = vector.multi_reduction <add>, %234, %cst_87 [1] : vector<24x32xf32> to vector<24xf32>
    %240 = vector.shape_cast %239 : vector<24xf32> to vector<24x1xf32>
    %cst_88 = arith.constant 3.200000e+01 : f32
    %241 = vector.broadcast %cst_88 : f32 to vector<24x1xf32>
    %242 = arith.divf %240, %241 : vector<24x1xf32>
    %243 = vector.broadcast %242 : vector<24x1xf32> to vector<24x32xf32>
    %244 = arith.subf %234, %243 : vector<24x32xf32>
    %245 = arith.mulf %244, %244 : vector<24x32xf32>
    %cst_89 = arith.constant dense<0.000000e+00> : vector<24xf32>
    %246 = vector.multi_reduction <add>, %245, %cst_89 [1] : vector<24x32xf32> to vector<24xf32>
    %247 = vector.shape_cast %246 : vector<24xf32> to vector<24x1xf32>
    %cst_90 = arith.constant 3.200000e+01 : f32
    %248 = vector.broadcast %cst_90 : f32 to vector<24x1xf32>
    %249 = arith.divf %247, %248 : vector<24x1xf32>
    %250 = vector.broadcast %242 : vector<24x1xf32> to vector<24x32xf32>
    %251 = arith.subf %234, %250 : vector<24x32xf32>
    %cst_91 = arith.constant 9.99999974E-6 : f32
    %252 = vector.broadcast %cst_91 : f32 to vector<24x1xf32>
    %253 = arith.addf %249, %252 : vector<24x1xf32>
    %254 = math.rsqrt %253 : vector<24x1xf32>
    %255 = vector.broadcast %254 : vector<24x1xf32> to vector<24x32xf32>
    %256 = arith.mulf %251, %255 : vector<24x32xf32>
    %257 = vector.broadcast %236 : vector<1x32xf32> to vector<24x32xf32>
    %258 = arith.mulf %256, %257 : vector<24x32xf32>
    %259 = vector.broadcast %238 : vector<1x32xf32> to vector<24x32xf32>
    %260 = arith.addf %258, %259 : vector<24x32xf32>
    %261 = arith.truncf %260 : vector<24x32xf32> to vector<24x32xbf16>
    %c1 = arith.constant 1 : index
    %c0_92 = arith.constant 0 : index
    %c0_93 = arith.constant 0 : index
    %262 = vector.load %arg2[%c1, %c0_92, %c0_93] : memref<2x32x96xbf16, #tpu.memory_space<vmem>>, vector<1x32x96xbf16>
    %263 = vector.shape_cast %262 : vector<1x32x96xbf16> to vector<32x96xbf16>
    %cst_94 = arith.constant dense<0.000000e+00> : vector<24x96xf32>
    %264 = tpu.matmul %261, %263, %cst_94 {dimension_numbers = #tpu.dot_dimension_numbers<[1], [0], [0], [1], [0, 0, 1, 1], [], []>} : vector<24x32xbf16>, vector<32x96xbf16>, vector<24x96xf32> -> vector<24x96xf32>
    %c1_95 = arith.constant 1 : index
    %c0_96 = arith.constant 0 : index
    %c0_97 = arith.constant 0 : index
    %265 = vector.load %arg3[%c1_95, %c0_96, %c0_97] : memref<2x1x96xf32, #tpu.memory_space<vmem>>, vector<1x1x96xf32>
    %266 = vector.shape_cast %265 : vector<1x1x96xf32> to vector<1x96xf32>
    %267 = vector.broadcast %266 : vector<1x96xf32> to vector<24x96xf32>
    %268 = arith.addf %264, %267 : vector<24x96xf32>
    %269 = vector.shape_cast %268 : vector<24x96xf32> to vector<3x8x96xf32>
    %270 = vector.extract_strided_slice %269 {offsets = [0, 0, 0], sizes = [3, 8, 4], strides = [1, 1, 1]} : vector<3x8x96xf32> to vector<3x8x4xf32>
    %271 = arith.truncf %270 : vector<3x8x4xf32> to vector<3x8x4xbf16>
    %272 = vector.extract_strided_slice %269 {offsets = [0, 0, 32], sizes = [3, 8, 4], strides = [1, 1, 1]} : vector<3x8x96xf32> to vector<3x8x4xf32>
    %273 = arith.truncf %272 : vector<3x8x4xf32> to vector<3x8x4xbf16>
    %274 = vector.extract_strided_slice %269 {offsets = [0, 0, 64], sizes = [3, 8, 4], strides = [1, 1, 1]} : vector<3x8x96xf32> to vector<3x8x4xf32>
    %275 = arith.truncf %274 : vector<3x8x4xf32> to vector<3x8x4xbf16>
    %cst_98 = arith.constant dense<0.000000e+00> : vector<3x8x8xf32>
    %276 = tpu.matmul %271, %273, %cst_98 {dimension_numbers = #tpu.dot_dimension_numbers<[2], [2], [1], [1], [0, 0, 0, 1, 1, 1], [0], [0]>} : vector<3x8x4xbf16>, vector<3x8x4xbf16>, vector<3x8x8xf32> -> vector<3x8x8xf32>
    %cst_99 = arith.constant 5.000000e-01 : f32
    %277 = vector.broadcast %cst_99 : f32 to vector<3x8x8xf32>
    %278 = arith.mulf %276, %277 : vector<3x8x8xf32>
    %cst_100 = arith.constant dense<0xFF800000> : vector<3x8xf32>
    %279 = vector.multi_reduction <maximumf>, %278, %cst_100 [2] : vector<3x8x8xf32> to vector<3x8xf32>
    %280 = vector.shape_cast %279 : vector<3x8xf32> to vector<3x8x1xf32>
    %281 = vector.broadcast %280 : vector<3x8x1xf32> to vector<3x8x8xf32>
    %282 = arith.subf %278, %281 : vector<3x8x8xf32>
    %283 = math.exp %282 : vector<3x8x8xf32>
    %cst_101 = arith.constant dense<0.000000e+00> : vector<3x8xf32>
    %284 = vector.multi_reduction <add>, %283, %cst_101 [2] : vector<3x8x8xf32> to vector<3x8xf32>
    %285 = vector.shape_cast %284 : vector<3x8xf32> to vector<3x8x1xf32>
    %286 = tpu.reciprocal %285 {approx = true} : vector<3x8x1xf32> -> vector<3x8x1xf32>
    %287 = vector.broadcast %286 : vector<3x8x1xf32> to vector<3x8x8xf32>
    %288 = arith.mulf %283, %287 : vector<3x8x8xf32>
    %289 = arith.truncf %288 : vector<3x8x8xf32> to vector<3x8x8xbf16>
    %cst_102 = arith.constant dense<0.000000e+00> : vector<3x8x4xf32>
    %290 = tpu.matmul %289, %275, %cst_102 {dimension_numbers = #tpu.dot_dimension_numbers<[2], [1], [1], [2], [0, 0, 0, 1, 1, 2], [0], [0]>} : vector<3x8x8xbf16>, vector<3x8x4xbf16>, vector<3x8x4xf32> -> vector<3x8x4xf32>
    %291 = vector.extract_strided_slice %269 {offsets = [0, 0, 4], sizes = [3, 8, 4], strides = [1, 1, 1]} : vector<3x8x96xf32> to vector<3x8x4xf32>
    %292 = arith.truncf %291 : vector<3x8x4xf32> to vector<3x8x4xbf16>
    %293 = vector.extract_strided_slice %269 {offsets = [0, 0, 36], sizes = [3, 8, 4], strides = [1, 1, 1]} : vector<3x8x96xf32> to vector<3x8x4xf32>
    %294 = arith.truncf %293 : vector<3x8x4xf32> to vector<3x8x4xbf16>
    %295 = vector.extract_strided_slice %269 {offsets = [0, 0, 68], sizes = [3, 8, 4], strides = [1, 1, 1]} : vector<3x8x96xf32> to vector<3x8x4xf32>
    %296 = arith.truncf %295 : vector<3x8x4xf32> to vector<3x8x4xbf16>
    %cst_103 = arith.constant dense<0.000000e+00> : vector<3x8x8xf32>
    %297 = tpu.matmul %292, %294, %cst_103 {dimension_numbers = #tpu.dot_dimension_numbers<[2], [2], [1], [1], [0, 0, 0, 1, 1, 1], [0], [0]>} : vector<3x8x4xbf16>, vector<3x8x4xbf16>, vector<3x8x8xf32> -> vector<3x8x8xf32>
    %cst_104 = arith.constant 5.000000e-01 : f32
    %298 = vector.broadcast %cst_104 : f32 to vector<3x8x8xf32>
    %299 = arith.mulf %297, %298 : vector<3x8x8xf32>
    %cst_105 = arith.constant dense<0xFF800000> : vector<3x8xf32>
    %300 = vector.multi_reduction <maximumf>, %299, %cst_105 [2] : vector<3x8x8xf32> to vector<3x8xf32>
    %301 = vector.shape_cast %300 : vector<3x8xf32> to vector<3x8x1xf32>
    %302 = vector.broadcast %301 : vector<3x8x1xf32> to vector<3x8x8xf32>
    %303 = arith.subf %299, %302 : vector<3x8x8xf32>
    %304 = math.exp %303 : vector<3x8x8xf32>
    %cst_106 = arith.constant dense<0.000000e+00> : vector<3x8xf32>
    %305 = vector.multi_reduction <add>, %304, %cst_106 [2] : vector<3x8x8xf32> to vector<3x8xf32>
    %306 = vector.shape_cast %305 : vector<3x8xf32> to vector<3x8x1xf32>
    %307 = tpu.reciprocal %306 {approx = true} : vector<3x8x1xf32> -> vector<3x8x1xf32>
    %308 = vector.broadcast %307 : vector<3x8x1xf32> to vector<3x8x8xf32>
    %309 = arith.mulf %304, %308 : vector<3x8x8xf32>
    %310 = arith.truncf %309 : vector<3x8x8xf32> to vector<3x8x8xbf16>
    %cst_107 = arith.constant dense<0.000000e+00> : vector<3x8x4xf32>
    %311 = tpu.matmul %310, %296, %cst_107 {dimension_numbers = #tpu.dot_dimension_numbers<[2], [1], [1], [2], [0, 0, 0, 1, 1, 2], [0], [0]>} : vector<3x8x8xbf16>, vector<3x8x4xbf16>, vector<3x8x4xf32> -> vector<3x8x4xf32>
    %312 = vector.extract_strided_slice %269 {offsets = [0, 0, 8], sizes = [3, 8, 4], strides = [1, 1, 1]} : vector<3x8x96xf32> to vector<3x8x4xf32>
    %313 = arith.truncf %312 : vector<3x8x4xf32> to vector<3x8x4xbf16>
    %314 = vector.extract_strided_slice %269 {offsets = [0, 0, 40], sizes = [3, 8, 4], strides = [1, 1, 1]} : vector<3x8x96xf32> to vector<3x8x4xf32>
    %315 = arith.truncf %314 : vector<3x8x4xf32> to vector<3x8x4xbf16>
    %316 = vector.extract_strided_slice %269 {offsets = [0, 0, 72], sizes = [3, 8, 4], strides = [1, 1, 1]} : vector<3x8x96xf32> to vector<3x8x4xf32>
    %317 = arith.truncf %316 : vector<3x8x4xf32> to vector<3x8x4xbf16>
    %cst_108 = arith.constant dense<0.000000e+00> : vector<3x8x8xf32>
    %318 = tpu.matmul %313, %315, %cst_108 {dimension_numbers = #tpu.dot_dimension_numbers<[2], [2], [1], [1], [0, 0, 0, 1, 1, 1], [0], [0]>} : vector<3x8x4xbf16>, vector<3x8x4xbf16>, vector<3x8x8xf32> -> vector<3x8x8xf32>
    %cst_109 = arith.constant 5.000000e-01 : f32
    %319 = vector.broadcast %cst_109 : f32 to vector<3x8x8xf32>
    %320 = arith.mulf %318, %319 : vector<3x8x8xf32>
    %cst_110 = arith.constant dense<0xFF800000> : vector<3x8xf32>
    %321 = vector.multi_reduction <maximumf>, %320, %cst_110 [2] : vector<3x8x8xf32> to vector<3x8xf32>
    %322 = vector.shape_cast %321 : vector<3x8xf32> to vector<3x8x1xf32>
    %323 = vector.broadcast %322 : vector<3x8x1xf32> to vector<3x8x8xf32>
    %324 = arith.subf %320, %323 : vector<3x8x8xf32>
    %325 = math.exp %324 : vector<3x8x8xf32>
    %cst_111 = arith.constant dense<0.000000e+00> : vector<3x8xf32>
    %326 = vector.multi_reduction <add>, %325, %cst_111 [2] : vector<3x8x8xf32> to vector<3x8xf32>
    %327 = vector.shape_cast %326 : vector<3x8xf32> to vector<3x8x1xf32>
    %328 = tpu.reciprocal %327 {approx = true} : vector<3x8x1xf32> -> vector<3x8x1xf32>
    %329 = vector.broadcast %328 : vector<3x8x1xf32> to vector<3x8x8xf32>
    %330 = arith.mulf %325, %329 : vector<3x8x8xf32>
    %331 = arith.truncf %330 : vector<3x8x8xf32> to vector<3x8x8xbf16>
    %cst_112 = arith.constant dense<0.000000e+00> : vector<3x8x4xf32>
    %332 = tpu.matmul %331, %317, %cst_112 {dimension_numbers = #tpu.dot_dimension_numbers<[2], [1], [1], [2], [0, 0, 0, 1, 1, 2], [0], [0]>} : vector<3x8x8xbf16>, vector<3x8x4xbf16>, vector<3x8x4xf32> -> vector<3x8x4xf32>
    %333 = vector.extract_strided_slice %269 {offsets = [0, 0, 12], sizes = [3, 8, 4], strides = [1, 1, 1]} : vector<3x8x96xf32> to vector<3x8x4xf32>
    %334 = arith.truncf %333 : vector<3x8x4xf32> to vector<3x8x4xbf16>
    %335 = vector.extract_strided_slice %269 {offsets = [0, 0, 44], sizes = [3, 8, 4], strides = [1, 1, 1]} : vector<3x8x96xf32> to vector<3x8x4xf32>
    %336 = arith.truncf %335 : vector<3x8x4xf32> to vector<3x8x4xbf16>
    %337 = vector.extract_strided_slice %269 {offsets = [0, 0, 76], sizes = [3, 8, 4], strides = [1, 1, 1]} : vector<3x8x96xf32> to vector<3x8x4xf32>
    %338 = arith.truncf %337 : vector<3x8x4xf32> to vector<3x8x4xbf16>
    %cst_113 = arith.constant dense<0.000000e+00> : vector<3x8x8xf32>
    %339 = tpu.matmul %334, %336, %cst_113 {dimension_numbers = #tpu.dot_dimension_numbers<[2], [2], [1], [1], [0, 0, 0, 1, 1, 1], [0], [0]>} : vector<3x8x4xbf16>, vector<3x8x4xbf16>, vector<3x8x8xf32> -> vector<3x8x8xf32>
    %cst_114 = arith.constant 5.000000e-01 : f32
    %340 = vector.broadcast %cst_114 : f32 to vector<3x8x8xf32>
    %341 = arith.mulf %339, %340 : vector<3x8x8xf32>
    %cst_115 = arith.constant dense<0xFF800000> : vector<3x8xf32>
    %342 = vector.multi_reduction <maximumf>, %341, %cst_115 [2] : vector<3x8x8xf32> to vector<3x8xf32>
    %343 = vector.shape_cast %342 : vector<3x8xf32> to vector<3x8x1xf32>
    %344 = vector.broadcast %343 : vector<3x8x1xf32> to vector<3x8x8xf32>
    %345 = arith.subf %341, %344 : vector<3x8x8xf32>
    %346 = math.exp %345 : vector<3x8x8xf32>
    %cst_116 = arith.constant dense<0.000000e+00> : vector<3x8xf32>
    %347 = vector.multi_reduction <add>, %346, %cst_116 [2] : vector<3x8x8xf32> to vector<3x8xf32>
    %348 = vector.shape_cast %347 : vector<3x8xf32> to vector<3x8x1xf32>
    %349 = tpu.reciprocal %348 {approx = true} : vector<3x8x1xf32> -> vector<3x8x1xf32>
    %350 = vector.broadcast %349 : vector<3x8x1xf32> to vector<3x8x8xf32>
    %351 = arith.mulf %346, %350 : vector<3x8x8xf32>
    %352 = arith.truncf %351 : vector<3x8x8xf32> to vector<3x8x8xbf16>
    %cst_117 = arith.constant dense<0.000000e+00> : vector<3x8x4xf32>
    %353 = tpu.matmul %352, %338, %cst_117 {dimension_numbers = #tpu.dot_dimension_numbers<[2], [1], [1], [2], [0, 0, 0, 1, 1, 2], [0], [0]>} : vector<3x8x8xbf16>, vector<3x8x4xbf16>, vector<3x8x4xf32> -> vector<3x8x4xf32>
    %354 = vector.extract_strided_slice %269 {offsets = [0, 0, 16], sizes = [3, 8, 4], strides = [1, 1, 1]} : vector<3x8x96xf32> to vector<3x8x4xf32>
    %355 = arith.truncf %354 : vector<3x8x4xf32> to vector<3x8x4xbf16>
    %356 = vector.extract_strided_slice %269 {offsets = [0, 0, 48], sizes = [3, 8, 4], strides = [1, 1, 1]} : vector<3x8x96xf32> to vector<3x8x4xf32>
    %357 = arith.truncf %356 : vector<3x8x4xf32> to vector<3x8x4xbf16>
    %358 = vector.extract_strided_slice %269 {offsets = [0, 0, 80], sizes = [3, 8, 4], strides = [1, 1, 1]} : vector<3x8x96xf32> to vector<3x8x4xf32>
    %359 = arith.truncf %358 : vector<3x8x4xf32> to vector<3x8x4xbf16>
    %cst_118 = arith.constant dense<0.000000e+00> : vector<3x8x8xf32>
    %360 = tpu.matmul %355, %357, %cst_118 {dimension_numbers = #tpu.dot_dimension_numbers<[2], [2], [1], [1], [0, 0, 0, 1, 1, 1], [0], [0]>} : vector<3x8x4xbf16>, vector<3x8x4xbf16>, vector<3x8x8xf32> -> vector<3x8x8xf32>
    %cst_119 = arith.constant 5.000000e-01 : f32
    %361 = vector.broadcast %cst_119 : f32 to vector<3x8x8xf32>
    %362 = arith.mulf %360, %361 : vector<3x8x8xf32>
    %cst_120 = arith.constant dense<0xFF800000> : vector<3x8xf32>
    %363 = vector.multi_reduction <maximumf>, %362, %cst_120 [2] : vector<3x8x8xf32> to vector<3x8xf32>
    %364 = vector.shape_cast %363 : vector<3x8xf32> to vector<3x8x1xf32>
    %365 = vector.broadcast %364 : vector<3x8x1xf32> to vector<3x8x8xf32>
    %366 = arith.subf %362, %365 : vector<3x8x8xf32>
    %367 = math.exp %366 : vector<3x8x8xf32>
    %cst_121 = arith.constant dense<0.000000e+00> : vector<3x8xf32>
    %368 = vector.multi_reduction <add>, %367, %cst_121 [2] : vector<3x8x8xf32> to vector<3x8xf32>
    %369 = vector.shape_cast %368 : vector<3x8xf32> to vector<3x8x1xf32>
    %370 = tpu.reciprocal %369 {approx = true} : vector<3x8x1xf32> -> vector<3x8x1xf32>
    %371 = vector.broadcast %370 : vector<3x8x1xf32> to vector<3x8x8xf32>
    %372 = arith.mulf %367, %371 : vector<3x8x8xf32>
    %373 = arith.truncf %372 : vector<3x8x8xf32> to vector<3x8x8xbf16>
    %cst_122 = arith.constant dense<0.000000e+00> : vector<3x8x4xf32>
    %374 = tpu.matmul %373, %359, %cst_122 {dimension_numbers = #tpu.dot_dimension_numbers<[2], [1], [1], [2], [0, 0, 0, 1, 1, 2], [0], [0]>} : vector<3x8x8xbf16>, vector<3x8x4xbf16>, vector<3x8x4xf32> -> vector<3x8x4xf32>
    %375 = vector.extract_strided_slice %269 {offsets = [0, 0, 20], sizes = [3, 8, 4], strides = [1, 1, 1]} : vector<3x8x96xf32> to vector<3x8x4xf32>
    %376 = arith.truncf %375 : vector<3x8x4xf32> to vector<3x8x4xbf16>
    %377 = vector.extract_strided_slice %269 {offsets = [0, 0, 52], sizes = [3, 8, 4], strides = [1, 1, 1]} : vector<3x8x96xf32> to vector<3x8x4xf32>
    %378 = arith.truncf %377 : vector<3x8x4xf32> to vector<3x8x4xbf16>
    %379 = vector.extract_strided_slice %269 {offsets = [0, 0, 84], sizes = [3, 8, 4], strides = [1, 1, 1]} : vector<3x8x96xf32> to vector<3x8x4xf32>
    %380 = arith.truncf %379 : vector<3x8x4xf32> to vector<3x8x4xbf16>
    %cst_123 = arith.constant dense<0.000000e+00> : vector<3x8x8xf32>
    %381 = tpu.matmul %376, %378, %cst_123 {dimension_numbers = #tpu.dot_dimension_numbers<[2], [2], [1], [1], [0, 0, 0, 1, 1, 1], [0], [0]>} : vector<3x8x4xbf16>, vector<3x8x4xbf16>, vector<3x8x8xf32> -> vector<3x8x8xf32>
    %cst_124 = arith.constant 5.000000e-01 : f32
    %382 = vector.broadcast %cst_124 : f32 to vector<3x8x8xf32>
    %383 = arith.mulf %381, %382 : vector<3x8x8xf32>
    %cst_125 = arith.constant dense<0xFF800000> : vector<3x8xf32>
    %384 = vector.multi_reduction <maximumf>, %383, %cst_125 [2] : vector<3x8x8xf32> to vector<3x8xf32>
    %385 = vector.shape_cast %384 : vector<3x8xf32> to vector<3x8x1xf32>
    %386 = vector.broadcast %385 : vector<3x8x1xf32> to vector<3x8x8xf32>
    %387 = arith.subf %383, %386 : vector<3x8x8xf32>
    %388 = math.exp %387 : vector<3x8x8xf32>
    %cst_126 = arith.constant dense<0.000000e+00> : vector<3x8xf32>
    %389 = vector.multi_reduction <add>, %388, %cst_126 [2] : vector<3x8x8xf32> to vector<3x8xf32>
    %390 = vector.shape_cast %389 : vector<3x8xf32> to vector<3x8x1xf32>
    %391 = tpu.reciprocal %390 {approx = true} : vector<3x8x1xf32> -> vector<3x8x1xf32>
    %392 = vector.broadcast %391 : vector<3x8x1xf32> to vector<3x8x8xf32>
    %393 = arith.mulf %388, %392 : vector<3x8x8xf32>
    %394 = arith.truncf %393 : vector<3x8x8xf32> to vector<3x8x8xbf16>
    %cst_127 = arith.constant dense<0.000000e+00> : vector<3x8x4xf32>
    %395 = tpu.matmul %394, %380, %cst_127 {dimension_numbers = #tpu.dot_dimension_numbers<[2], [1], [1], [2], [0, 0, 0, 1, 1, 2], [0], [0]>} : vector<3x8x8xbf16>, vector<3x8x4xbf16>, vector<3x8x4xf32> -> vector<3x8x4xf32>
    %396 = vector.extract_strided_slice %269 {offsets = [0, 0, 24], sizes = [3, 8, 4], strides = [1, 1, 1]} : vector<3x8x96xf32> to vector<3x8x4xf32>
    %397 = arith.truncf %396 : vector<3x8x4xf32> to vector<3x8x4xbf16>
    %398 = vector.extract_strided_slice %269 {offsets = [0, 0, 56], sizes = [3, 8, 4], strides = [1, 1, 1]} : vector<3x8x96xf32> to vector<3x8x4xf32>
    %399 = arith.truncf %398 : vector<3x8x4xf32> to vector<3x8x4xbf16>
    %400 = vector.extract_strided_slice %269 {offsets = [0, 0, 88], sizes = [3, 8, 4], strides = [1, 1, 1]} : vector<3x8x96xf32> to vector<3x8x4xf32>
    %401 = arith.truncf %400 : vector<3x8x4xf32> to vector<3x8x4xbf16>
    %cst_128 = arith.constant dense<0.000000e+00> : vector<3x8x8xf32>
    %402 = tpu.matmul %397, %399, %cst_128 {dimension_numbers = #tpu.dot_dimension_numbers<[2], [2], [1], [1], [0, 0, 0, 1, 1, 1], [0], [0]>} : vector<3x8x4xbf16>, vector<3x8x4xbf16>, vector<3x8x8xf32> -> vector<3x8x8xf32>
    %cst_129 = arith.constant 5.000000e-01 : f32
    %403 = vector.broadcast %cst_129 : f32 to vector<3x8x8xf32>
    %404 = arith.mulf %402, %403 : vector<3x8x8xf32>
    %cst_130 = arith.constant dense<0xFF800000> : vector<3x8xf32>
    %405 = vector.multi_reduction <maximumf>, %404, %cst_130 [2] : vector<3x8x8xf32> to vector<3x8xf32>
    %406 = vector.shape_cast %405 : vector<3x8xf32> to vector<3x8x1xf32>
    %407 = vector.broadcast %406 : vector<3x8x1xf32> to vector<3x8x8xf32>
    %408 = arith.subf %404, %407 : vector<3x8x8xf32>
    %409 = math.exp %408 : vector<3x8x8xf32>
    %cst_131 = arith.constant dense<0.000000e+00> : vector<3x8xf32>
    %410 = vector.multi_reduction <add>, %409, %cst_131 [2] : vector<3x8x8xf32> to vector<3x8xf32>
    %411 = vector.shape_cast %410 : vector<3x8xf32> to vector<3x8x1xf32>
    %412 = tpu.reciprocal %411 {approx = true} : vector<3x8x1xf32> -> vector<3x8x1xf32>
    %413 = vector.broadcast %412 : vector<3x8x1xf32> to vector<3x8x8xf32>
    %414 = arith.mulf %409, %413 : vector<3x8x8xf32>
    %415 = arith.truncf %414 : vector<3x8x8xf32> to vector<3x8x8xbf16>
    %cst_132 = arith.constant dense<0.000000e+00> : vector<3x8x4xf32>
    %416 = tpu.matmul %415, %401, %cst_132 {dimension_numbers = #tpu.dot_dimension_numbers<[2], [1], [1], [2], [0, 0, 0, 1, 1, 2], [0], [0]>} : vector<3x8x8xbf16>, vector<3x8x4xbf16>, vector<3x8x4xf32> -> vector<3x8x4xf32>
    %417 = vector.extract_strided_slice %269 {offsets = [0, 0, 28], sizes = [3, 8, 4], strides = [1, 1, 1]} : vector<3x8x96xf32> to vector<3x8x4xf32>
    %418 = arith.truncf %417 : vector<3x8x4xf32> to vector<3x8x4xbf16>
    %419 = vector.extract_strided_slice %269 {offsets = [0, 0, 60], sizes = [3, 8, 4], strides = [1, 1, 1]} : vector<3x8x96xf32> to vector<3x8x4xf32>
    %420 = arith.truncf %419 : vector<3x8x4xf32> to vector<3x8x4xbf16>
    %421 = vector.extract_strided_slice %269 {offsets = [0, 0, 92], sizes = [3, 8, 4], strides = [1, 1, 1]} : vector<3x8x96xf32> to vector<3x8x4xf32>
    %422 = arith.truncf %421 : vector<3x8x4xf32> to vector<3x8x4xbf16>
    %cst_133 = arith.constant dense<0.000000e+00> : vector<3x8x8xf32>
    %423 = tpu.matmul %418, %420, %cst_133 {dimension_numbers = #tpu.dot_dimension_numbers<[2], [2], [1], [1], [0, 0, 0, 1, 1, 1], [0], [0]>} : vector<3x8x4xbf16>, vector<3x8x4xbf16>, vector<3x8x8xf32> -> vector<3x8x8xf32>
    %cst_134 = arith.constant 5.000000e-01 : f32
    %424 = vector.broadcast %cst_134 : f32 to vector<3x8x8xf32>
    %425 = arith.mulf %423, %424 : vector<3x8x8xf32>
    %cst_135 = arith.constant dense<0xFF800000> : vector<3x8xf32>
    %426 = vector.multi_reduction <maximumf>, %425, %cst_135 [2] : vector<3x8x8xf32> to vector<3x8xf32>
    %427 = vector.shape_cast %426 : vector<3x8xf32> to vector<3x8x1xf32>
    %428 = vector.broadcast %427 : vector<3x8x1xf32> to vector<3x8x8xf32>
    %429 = arith.subf %425, %428 : vector<3x8x8xf32>
    %430 = math.exp %429 : vector<3x8x8xf32>
    %cst_136 = arith.constant dense<0.000000e+00> : vector<3x8xf32>
    %431 = vector.multi_reduction <add>, %430, %cst_136 [2] : vector<3x8x8xf32> to vector<3x8xf32>
    %432 = vector.shape_cast %431 : vector<3x8xf32> to vector<3x8x1xf32>
    %433 = tpu.reciprocal %432 {approx = true} : vector<3x8x1xf32> -> vector<3x8x1xf32>
    %434 = vector.broadcast %433 : vector<3x8x1xf32> to vector<3x8x8xf32>
    %435 = arith.mulf %430, %434 : vector<3x8x8xf32>
    %436 = arith.truncf %435 : vector<3x8x8xf32> to vector<3x8x8xbf16>
    %cst_137 = arith.constant dense<0.000000e+00> : vector<3x8x4xf32>
    %437 = tpu.matmul %436, %422, %cst_137 {dimension_numbers = #tpu.dot_dimension_numbers<[2], [1], [1], [2], [0, 0, 0, 1, 1, 2], [0], [0]>} : vector<3x8x8xbf16>, vector<3x8x4xbf16>, vector<3x8x4xf32> -> vector<3x8x4xf32>
    %438 = tpu.concatenate %290, %311, %332, %353, %374, %395, %416, %437 in 2 : vector<3x8x4xf32>, vector<3x8x4xf32>, vector<3x8x4xf32>, vector<3x8x4xf32>, vector<3x8x4xf32>, vector<3x8x4xf32>, vector<3x8x4xf32>, vector<3x8x4xf32> -> vector<3x8x32xf32>
    %439 = vector.shape_cast %438 : vector<3x8x32xf32> to vector<24x32xf32>
    %440 = arith.truncf %439 : vector<24x32xf32> to vector<24x32xbf16>
    %c1_138 = arith.constant 1 : index
    %c0_139 = arith.constant 0 : index
    %c0_140 = arith.constant 0 : index
    %441 = vector.load %arg4[%c1_138, %c0_139, %c0_140] : memref<2x32x32xbf16, #tpu.memory_space<vmem>>, vector<1x32x32xbf16>
    %442 = vector.shape_cast %441 : vector<1x32x32xbf16> to vector<32x32xbf16>
    %cst_141 = arith.constant dense<0.000000e+00> : vector<24x32xf32>
    %443 = tpu.matmul %440, %442, %cst_141 {dimension_numbers = #tpu.dot_dimension_numbers<[1], [0], [0], [1], [0, 0, 1, 1], [], []>} : vector<24x32xbf16>, vector<32x32xbf16>, vector<24x32xf32> -> vector<24x32xf32>
    %c1_142 = arith.constant 1 : index
    %c0_143 = arith.constant 0 : index
    %c0_144 = arith.constant 0 : index
    %444 = vector.load %arg5[%c1_142, %c0_143, %c0_144] : memref<2x1x32xf32, #tpu.memory_space<vmem>>, vector<1x1x32xf32>
    %445 = vector.shape_cast %444 : vector<1x1x32xf32> to vector<1x32xf32>
    %446 = vector.broadcast %445 : vector<1x32xf32> to vector<24x32xf32>
    %447 = arith.addf %443, %446 : vector<24x32xf32>
    %448 = arith.addf %260, %447 : vector<24x32xf32>
    %c1_145 = arith.constant 1 : index
    %c0_146 = arith.constant 0 : index
    %c0_147 = arith.constant 0 : index
    %449 = vector.load %arg10[%c1_145, %c0_146, %c0_147] : memref<2x1x32xf32, #tpu.memory_space<vmem>>, vector<1x1x32xf32>
    %450 = vector.shape_cast %449 : vector<1x1x32xf32> to vector<1x32xf32>
    %c1_148 = arith.constant 1 : index
    %c0_149 = arith.constant 0 : index
    %c0_150 = arith.constant 0 : index
    %451 = vector.load %arg11[%c1_148, %c0_149, %c0_150] : memref<2x1x32xf32, #tpu.memory_space<vmem>>, vector<1x1x32xf32>
    %452 = vector.shape_cast %451 : vector<1x1x32xf32> to vector<1x32xf32>
    %cst_151 = arith.constant dense<0.000000e+00> : vector<24xf32>
    %453 = vector.multi_reduction <add>, %448, %cst_151 [1] : vector<24x32xf32> to vector<24xf32>
    %454 = vector.shape_cast %453 : vector<24xf32> to vector<24x1xf32>
    %cst_152 = arith.constant 3.200000e+01 : f32
    %455 = vector.broadcast %cst_152 : f32 to vector<24x1xf32>
    %456 = arith.divf %454, %455 : vector<24x1xf32>
    %457 = vector.broadcast %456 : vector<24x1xf32> to vector<24x32xf32>
    %458 = arith.subf %448, %457 : vector<24x32xf32>
    %459 = arith.mulf %458, %458 : vector<24x32xf32>
    %cst_153 = arith.constant dense<0.000000e+00> : vector<24xf32>
    %460 = vector.multi_reduction <add>, %459, %cst_153 [1] : vector<24x32xf32> to vector<24xf32>
    %461 = vector.shape_cast %460 : vector<24xf32> to vector<24x1xf32>
    %cst_154 = arith.constant 3.200000e+01 : f32
    %462 = vector.broadcast %cst_154 : f32 to vector<24x1xf32>
    %463 = arith.divf %461, %462 : vector<24x1xf32>
    %464 = vector.broadcast %456 : vector<24x1xf32> to vector<24x32xf32>
    %465 = arith.subf %448, %464 : vector<24x32xf32>
    %cst_155 = arith.constant 9.99999974E-6 : f32
    %466 = vector.broadcast %cst_155 : f32 to vector<24x1xf32>
    %467 = arith.addf %463, %466 : vector<24x1xf32>
    %468 = math.rsqrt %467 : vector<24x1xf32>
    %469 = vector.broadcast %468 : vector<24x1xf32> to vector<24x32xf32>
    %470 = arith.mulf %465, %469 : vector<24x32xf32>
    %471 = vector.broadcast %450 : vector<1x32xf32> to vector<24x32xf32>
    %472 = arith.mulf %470, %471 : vector<24x32xf32>
    %473 = vector.broadcast %452 : vector<1x32xf32> to vector<24x32xf32>
    %474 = arith.addf %472, %473 : vector<24x32xf32>
    %475 = arith.truncf %474 : vector<24x32xf32> to vector<24x32xbf16>
    %c1_156 = arith.constant 1 : index
    %c0_157 = arith.constant 0 : index
    %c0_158 = arith.constant 0 : index
    %476 = vector.load %arg6[%c1_156, %c0_157, %c0_158] : memref<2x32x2048xbf16, #tpu.memory_space<vmem>>, vector<1x32x2048xbf16>
    %477 = vector.shape_cast %476 : vector<1x32x2048xbf16> to vector<32x2048xbf16>
    %cst_159 = arith.constant dense<0.000000e+00> : vector<24x2048xf32>
    %478 = tpu.matmul %475, %477, %cst_159 {dimension_numbers = #tpu.dot_dimension_numbers<[1], [0], [0], [1], [0, 0, 1, 1], [], []>} : vector<24x32xbf16>, vector<32x2048xbf16>, vector<24x2048xf32> -> vector<24x2048xf32>
    %c1_160 = arith.constant 1 : index
    %c0_161 = arith.constant 0 : index
    %c0_162 = arith.constant 0 : index
    %479 = vector.load %arg7[%c1_160, %c0_161, %c0_162] : memref<2x1x2048xf32, #tpu.memory_space<vmem>>, vector<1x1x2048xf32>
    %480 = vector.shape_cast %479 : vector<1x1x2048xf32> to vector<1x2048xf32>
    %481 = vector.broadcast %480 : vector<1x2048xf32> to vector<24x2048xf32>
    %482 = arith.addf %478, %481 : vector<24x2048xf32>
    %cst_163 = arith.constant 0.000000e+00 : f32
    %483 = vector.broadcast %cst_163 : f32 to vector<24x2048xf32>
    %484 = arith.maximumf %482, %483 : vector<24x2048xf32>
    %485 = arith.truncf %484 : vector<24x2048xf32> to vector<24x2048xbf16>
    %c1_164 = arith.constant 1 : index
    %c0_165 = arith.constant 0 : index
    %c0_166 = arith.constant 0 : index
    %486 = vector.load %arg8[%c1_164, %c0_165, %c0_166] : memref<2x2048x32xbf16, #tpu.memory_space<vmem>>, vector<1x2048x32xbf16>
    %487 = vector.shape_cast %486 : vector<1x2048x32xbf16> to vector<2048x32xbf16>
    %cst_167 = arith.constant dense<0.000000e+00> : vector<24x32xf32>
    %488 = tpu.matmul %485, %487, %cst_167 {dimension_numbers = #tpu.dot_dimension_numbers<[1], [0], [0], [1], [0, 0, 1, 1], [], []>} : vector<24x2048xbf16>, vector<2048x32xbf16>, vector<24x32xf32> -> vector<24x32xf32>
    %c1_168 = arith.constant 1 : index
    %c0_169 = arith.constant 0 : index
    %c0_170 = arith.constant 0 : index
    %489 = vector.load %arg9[%c1_168, %c0_169, %c0_170] : memref<2x1x32xf32, #tpu.memory_space<vmem>>, vector<1x1x32xf32>
    %490 = vector.shape_cast %489 : vector<1x1x32xf32> to vector<1x32xf32>
    %491 = vector.broadcast %490 : vector<1x32xf32> to vector<24x32xf32>
    %492 = arith.addf %488, %491 : vector<24x32xf32>
    %493 = arith.addf %474, %492 : vector<24x32xf32>
    %c1_171 = arith.constant 1 : index
    %c0_172 = arith.constant 0 : index
    %c0_173 = arith.constant 0 : index
    %494 = vector.load %arg12[%c1_171, %c0_172, %c0_173] : memref<2x1x32xf32, #tpu.memory_space<vmem>>, vector<1x1x32xf32>
    %495 = vector.shape_cast %494 : vector<1x1x32xf32> to vector<1x32xf32>
    %c1_174 = arith.constant 1 : index
    %c0_175 = arith.constant 0 : index
    %c0_176 = arith.constant 0 : index
    %496 = vector.load %arg13[%c1_174, %c0_175, %c0_176] : memref<2x1x32xf32, #tpu.memory_space<vmem>>, vector<1x1x32xf32>
    %497 = vector.shape_cast %496 : vector<1x1x32xf32> to vector<1x32xf32>
    %cst_177 = arith.constant dense<0.000000e+00> : vector<24xf32>
    %498 = vector.multi_reduction <add>, %493, %cst_177 [1] : vector<24x32xf32> to vector<24xf32>
    %499 = vector.shape_cast %498 : vector<24xf32> to vector<24x1xf32>
    %cst_178 = arith.constant 3.200000e+01 : f32
    %500 = vector.broadcast %cst_178 : f32 to vector<24x1xf32>
    %501 = arith.divf %499, %500 : vector<24x1xf32>
    %502 = vector.broadcast %501 : vector<24x1xf32> to vector<24x32xf32>
    %503 = arith.subf %493, %502 : vector<24x32xf32>
    %504 = arith.mulf %503, %503 : vector<24x32xf32>
    %cst_179 = arith.constant dense<0.000000e+00> : vector<24xf32>
    %505 = vector.multi_reduction <add>, %504, %cst_179 [1] : vector<24x32xf32> to vector<24xf32>
    %506 = vector.shape_cast %505 : vector<24xf32> to vector<24x1xf32>
    %cst_180 = arith.constant 3.200000e+01 : f32
    %507 = vector.broadcast %cst_180 : f32 to vector<24x1xf32>
    %508 = arith.divf %506, %507 : vector<24x1xf32>
    %509 = vector.broadcast %501 : vector<24x1xf32> to vector<24x32xf32>
    %510 = arith.subf %493, %509 : vector<24x32xf32>
    %cst_181 = arith.constant 9.99999974E-6 : f32
    %511 = vector.broadcast %cst_181 : f32 to vector<24x1xf32>
    %512 = arith.addf %508, %511 : vector<24x1xf32>
    %513 = math.rsqrt %512 : vector<24x1xf32>
    %514 = vector.broadcast %513 : vector<24x1xf32> to vector<24x32xf32>
    %515 = arith.mulf %510, %514 : vector<24x32xf32>
    %516 = vector.broadcast %495 : vector<1x32xf32> to vector<24x32xf32>
    %517 = arith.mulf %515, %516 : vector<24x32xf32>
    %518 = vector.broadcast %497 : vector<1x32xf32> to vector<24x32xf32>
    %519 = arith.addf %517, %518 : vector<24x32xf32>
    %520 = vector.shape_cast %519 : vector<24x32xf32> to vector<3x8x32xf32>
    %c0_182 = arith.constant 0 : index
    %c0_183 = arith.constant 0 : index
    %c0_184 = arith.constant 0 : index
    %521 = vector.load %arg14[%c0_182, %c0_183, %c0_184] : memref<3x8x32xf32, #tpu.memory_space<vmem>>, vector<3x8x32xf32>
    tpu.vector_store %arg14[%c0_182, %c0_183, %c0_184], %520 {strides = array<i32>} : memref<3x8x32xf32, #tpu.memory_space<vmem>>, vector<3x8x32xf32>,
    return
  }
  func.func @transform_0(%arg0: i32) -> (i32, i32, i32) {
    %c0_i32 = arith.constant 0 : i32
    %c0_i32_0 = arith.constant 0 : i32
    %c0_i32_1 = arith.constant 0 : i32
    return %arg0, %c0_i32, %c0_i32_0 : i32, i32, i32
  }
  func.func @transform_1(%arg0: i32) -> (i32, i32, i32) {
    %c0_i32 = arith.constant 0 : i32
    %c0_i32_0 = arith.constant 0 : i32
    %c0_i32_1 = arith.constant 0 : i32
    %c0_i32_2 = arith.constant 0 : i32
    return %c0_i32, %c0_i32_0, %c0_i32_1 : i32, i32, i32
  }
  func.func @transform_2(%arg0: i32) -> (i32, i32, i32) {
    %c0_i32 = arith.constant 0 : i32
    %c0_i32_0 = arith.constant 0 : i32
    %c0_i32_1 = arith.constant 0 : i32
    %c0_i32_2 = arith.constant 0 : i32
    return %c0_i32, %c0_i32_0, %c0_i32_1 : i32, i32, i32
  }
  func.func @transform_3(%arg0: i32) -> (i32, i32, i32) {
    %c0_i32 = arith.constant 0 : i32
    %c0_i32_0 = arith.constant 0 : i32
    %c0_i32_1 = arith.constant 0 : i32
    %c0_i32_2 = arith.constant 0 : i32
    return %c0_i32, %c0_i32_0, %c0_i32_1 : i32, i32, i32
  }
  func.func @transform_4(%arg0: i32) -> (i32, i32, i32) {
    %c0_i32 = arith.constant 0 : i32
    %c0_i32_0 = arith.constant 0 : i32
    %c0_i32_1 = arith.constant 0 : i32
    %c0_i32_2 = arith.constant 0 : i32
    return %c0_i32, %c0_i32_0, %c0_i32_1 : i32, i32, i32
  }
  func.func @transform_5(%arg0: i32) -> (i32, i32, i32) {
    %c0_i32 = arith.constant 0 : i32
    %c0_i32_0 = arith.constant 0 : i32
    %c0_i32_1 = arith.constant 0 : i32
    %c0_i32_2 = arith.constant 0 : i32
    return %c0_i32, %c0_i32_0, %c0_i32_1 : i32, i32, i32
  }
  func.func @transform_6(%arg0: i32) -> (i32, i32, i32) {
    %c0_i32 = arith.constant 0 : i32
    %c0_i32_0 = arith.constant 0 : i32
    %c0_i32_1 = arith.constant 0 : i32
    %c0_i32_2 = arith.constant 0 : i32
    return %c0_i32, %c0_i32_0, %c0_i32_1 : i32, i32, i32
  }
  func.func @transform_7(%arg0: i32) -> (i32, i32, i32) {
    %c0_i32 = arith.constant 0 : i32
    %c0_i32_0 = arith.constant 0 : i32
    %c0_i32_1 = arith.constant 0 : i32
    %c0_i32_2 = arith.constant 0 : i32
    return %c0_i32, %c0_i32_0, %c0_i32_1 : i32, i32, i32
  }
  func.func @transform_8(%arg0: i32) -> (i32, i32, i32) {
    %c0_i32 = arith.constant 0 : i32
    %c0_i32_0 = arith.constant 0 : i32
    %c0_i32_1 = arith.constant 0 : i32
    %c0_i32_2 = arith.constant 0 : i32
    return %c0_i32, %c0_i32_0, %c0_i32_1 : i32, i32, i32
  }
  func.func @transform_9(%arg0: i32) -> (i32, i32, i32) {
    %c0_i32 = arith.constant 0 : i32
    %c0_i32_0 = arith.constant 0 : i32
    %c0_i32_1 = arith.constant 0 : i32
    %c0_i32_2 = arith.constant 0 : i32
    return %c0_i32, %c0_i32_0, %c0_i32_1 : i32, i32, i32
  }
  func.func @transform_10(%arg0: i32) -> (i32, i32, i32) {
    %c0_i32 = arith.constant 0 : i32
    %c0_i32_0 = arith.constant 0 : i32
    %c0_i32_1 = arith.constant 0 : i32
    %c0_i32_2 = arith.constant 0 : i32
    return %c0_i32, %c0_i32_0, %c0_i32_1 : i32, i32, i32
  }
  func.func @transform_11(%arg0: i32) -> (i32, i32, i32) {
    %c0_i32 = arith.constant 0 : i32
    %c0_i32_0 = arith.constant 0 : i32
    %c0_i32_1 = arith.constant 0 : i32
    %c0_i32_2 = arith.constant 0 : i32
    return %c0_i32, %c0_i32_0, %c0_i32_1 : i32, i32, i32
  }
  func.func @transform_12(%arg0: i32) -> (i32, i32, i32) {
    %c0_i32 = arith.constant 0 : i32
    %c0_i32_0 = arith.constant 0 : i32
    %c0_i32_1 = arith.constant 0 : i32
    %c0_i32_2 = arith.constant 0 : i32
    return %c0_i32, %c0_i32_0, %c0_i32_1 : i32, i32, i32
  }
  func.func @transform_13(%arg0: i32) -> (i32, i32, i32) {
    %c0_i32 = arith.constant 0 : i32
    %c0_i32_0 = arith.constant 0 : i32
    %c0_i32_1 = arith.constant 0 : i32
    return %arg0, %c0_i32, %c0_i32_0 : i32, i32, i32
  }
}

</mosaic_0001>

<bundles_post_ra>
// kernel: tpu_custom_call.1
= control target key start
LH: loop header
LB: loop body
LE: loop exit
PB: predicated region body
PF: predicated region fallthrough
CT: control target
= control target key end

     0   :  { %s16656_s0 = inlined_call_operand.vmem [shape: f32[6,8,32], index: 0, kind: input, shape index: {}]   ;;  %s16657_s1 = inlined_call_operand.vmem [shape: bf16[2,32,96], index: 1, kind: input, shape index: {}]   ;;  %s16658_s2 = inlined_call_operand.vmem [shape: f32[2,1,96], index: 2, kind: input, shape index: {}]   ;;  %s16659_s3 = inlined_call_operand.vmem [shape: bf16[2,32,32], index: 3, kind: input, shape index: {}]   ;;  %s16660_s4 = inlined_call_operand.vmem [shape: f32[2,1,32], index: 4, kind: input, shape index: {}]   ;;  %s16661_s5 = inlined_call_operand.vmem [shape: bf16[2,32,2048], index: 5, kind: input, shape index: {}]   ;;  %s16662_s6 = inlined_call_operand.vmem [shape: f32[2,1,2048], index: 6, kind: input, shape index: {}]   ;;  %s16663_s7 = inlined_call_operand.vmem [shape: bf16[2,2048,32], index: 7, kind: input, shape index: {}]   ;;  %s16664_s8 = inlined_call_operand.vmem [shape: f32[2,1,32], index: 8, kind: input, shape index: {}]   ;;  %s16665_s9 = inlined_call_operand.vmem [shape: f32[2,1,32], index: 9, kind: input, shape index: {}]   ;;  %s16666_s10 = inlined_call_operand.vmem [shape: f32[2,1,32], index: 10, kind: input, shape index: {}]   ;;  %s16667_s11 = inlined_call_operand.vmem [shape: f32[2,1,32], index: 11, kind: input, shape index: {}]   ;;  %s16668_s12 = inlined_call_operand.vmem [shape: f32[2,1,32], index: 12, kind: input, shape index: {}]   ;;  %s16669_s13 = inlined_call_operand.hbm [shape: f32[6,8,32], index: 13, kind: output, shape index: {}]  }
   0x1   :  { %16730 = sst [smem:[#allocation6_spill]] %s16656_s0 }
   0x2   :  { %16731 = sst [smem:[#allocation7_spill]] %s16657_s1 }
   0x3   :  { %18 = vsyncpa [#allocation3], 0 }
   0x4   :  { %20 = vsyncpa [#allocation3 + $0x1], 0  ;;  %s13875_s25 = smov 0   ;;  %s13877_s26 = smov 0  }
   0x5   :  { %s13879_s27 = smov 0   ;;  %s13881_s28 = smov 0  }
   0x6 LB: > { %s13896_s29 = sadd.s32 4294967295, %s13768_s28   ;;  %s11023_s30 = sadd.s32 4294967294, %s13768_s28   ;;  %s13768_s28 = sphi %s13881_s28, %s16771_s28   ;;  %s13764_s27 = sphi %s13879_s27, %s16770_s27   ;;  %s13760_s26 = sphi %s13877_s26, %s16769_s26   ;;  %s13756_s25 = sphi %s13875_s25, %s16768_s25  }
   0x7   : > { %s13900_s14 = sadd.s32 1, %s13768_s28   ;;  %s311_s15 = sadd.s32 1, %s13764_s27 }
   0x8   : > { %s308_s16 = ssub.s32 %s13768_s28, %s13900_s14  ;;  %p321_p0 = scmp.ne.s32.totalorder %s13764_s27, %s13760_s26 }
   0x9   : > { %p309_p1 = scmp.eq.s32.totalorder %s308_s16, 0  ;;  %p322_p2 = scmp.eq.s32.totalorder %s13896_s29, 1 }
   0xa   : > { %p327_p3 = scmp.ne.s32.totalorder %s13760_s26, %s13756_s25  ;;  %p328_p4 = scmp.eq.s32.totalorder %s11023_s30, 1 }
   0xb   : > { %s13911_s17 = scalar_select %p309_p1, %s13764_s27, %s311_s15  }
   0xc   : > { %p13913_p5 = por %p322_p2, %p321_p0  ;;  %p13917_p6 = por %p328_p4, %p327_p3 }
   0xd   : > { %16732 = sst [smem:[#allocation5_spill]] %s13911_s17  ;;  %p11026_p7 = scmp.ge.s32.totalorder %s13768_s28, 1 }
   0xe   : > { %p391_p8 = scmp.lt.s32.totalorder %s13768_s28, 3 }
  0x10   : > { %p392_p9 = pnand %p11026_p7, %p391_p8 }
  0x11   : > { %s16735_s1 = sld [smem:[#allocation7_spill]] (!%p392_p9)  ;;  %s435_s22 = smul.u32 (!%p392_p9), 3, %s13896_s29  ;;  %vm471_vm0 = vcmask (!%p392_p9), 261120   ;;  %v13770_v7 = vmov (!%p392_p9), 0.0   ;;  %v11028_v8 = vld [vmem:[%s16658_s2] ss:$0 sm:$0xff] (!%p392_p9) }
  0x12   : > { %395 = sbr.rel (%p392_p9) target bundleno = 13207 (0x3397), region = 72  ;;  %s16736_s0 = sld [smem:[#allocation6_spill]] (!%p392_p9)  ;;  %12479 = vmatprep.subr.bf16.mxu1 (!%p392_p9), %v13770_v7  ;;  %vm13771_vm1 = vmmov (!%p392_p9), 0   ;;  %vm532_vm2 = vcmask (!%p392_p9), 31744   ;;  %vm680_vm3 = vcmask (!%p392_p9), 64512   ;;  %vm722_vm4 = vcmask (!%p392_p9), 1043456  }
  0x13   : > { %p436_p10 = scmp.lt.s32.totalorder (!%p392_p9), %s435_s22, 5  ;;  %12481 = vmatprep.mubr.msk.bf16.mxu1 (!%p392_p9), %vm13771_vm1, %v13770_v7  ;;  %s16726_s23 = smov (!%p392_p9), 64   ;;  %vm3283_vm5 = vcmask (!%p392_p9), 97280   ;;  %vm3287_vm6 = vcmask (!%p392_p9), 130048   ;;  %vm3291_vm7 = vcmask (!%p392_p9), 162816   ;;  %vm3295_vm8 = vcmask (!%p392_p9), 195584  }
  0x14   : > { %s16724_s24 = smov (!%p392_p9), 92   ;;  %s16704_s15 = smov (!%p392_p9), 60   ;;  %vm3299_vm9 = vcmask (!%p392_p9), 228352  }
  0x15   : > { %s16702_s16 = smov (!%p392_p9), 88   ;;  %s16672_s20 = smov (!%p392_p9), 120  }
  0x16   : > { %s16670_s21 = smov (!%p392_p9), 56  }
  0x17   : > { %v13223_v0 = vld [vmem:[%s16735_s1] sm:$0xff] (!%p392_p9)   ;;  %v13224_v1 = vld [vmem:[%s16735_s1 + $0x8] sm:$0xff] (!%p392_p9)  }
  0x18   : > { %12471 = vmatprep.subr.bf16.mxu0 (!%p392_p9), %v13223_v0 }
  0x19   : > { %12472 = vmatpush3.bf16.msra.mxu0 %v13223_v0  ;;  %s16773_s22 = smov (!%p436_p10, %s435_s22), 5 }
  0x1a   : > { %12473 = vmatprep.subr.bf16.mxu0 %v13224_v1  ;;  %s11027_s30 = sshll.u32 %s16773_s22, 3  ;;  %s16728_s22 = smov 96  }
  0x1b   : > { %s13933_s17 = scalar_lea.vmem %s16736_s0, %s11027_s30  ;;  %s16706_s30 = smov 124  }
  0x1c   : > { %v443_v2 = vld [vmem:[%s13933_s17] sm:$0xff]  ;;  %v444_v3 = vld [vmem:[%s13933_s17 + $0x8] sm:$0xff]  ;;  %v445_v4 = vld [vmem:[%s13933_s17 + $0x10] sm:$0xff]  ;;  %s16737_s0 = smov 96  }
  0x1d   : > { %12474 = vmatpush3.bf16.msra.mxu0 %v13224_v1  ;;  %v446_v5 = vpack.c.bf16 %v444_v3, %v443_v2  ;;  %v447_v6 = vpack.c.bf16 %v445_v4, %v445_v4 }
  0x1e   : > { %12485 = vmatprep.subr.bf16.mxu0 %v13770_v7 }
  0x1f   : > { %12475 = vmatprep.mubr.msk.bf16.mxu0 %vm471_vm0, %v446_v5 }
  0x20   : > { %12476 = vmatmul.mubr.msk.bf16.vlgmr.msra.gmra.mrb[0].mxu0 %vm471_vm0, %v447_v6 }
  0x21   : > { %12487 = vmatprep.mubr.msk.bf16.mxu0 %vm13771_vm1, %v13770_v7 }
  0xf3   : > { %v12477_v9 = vpop.f32.mrb[0].mxu0 }
  0xf4   : > { %v521_v10 = vadd.f32 %v12477_v9, %v11028_v8  ;;  %v512_v11 = vpop.f32.mrb[1].mxu0 }
  0xf5   : > { %v513_v12 = vadd.f32 %v11028_v8, %v512_v11  ;;  %v12478_v13 = vpop.f32.mrb[2].mxu0 }
  0xf6   : > { %v13949_v14 = vpack.c.bf16 %v521_v10, %v521_v10  ;;  %v515_v15 = vpop.f32.mrb[3].mxu0 }
  0xf7   : > { %v13951_v16 = vpack.c.bf16 %v513_v12, %v513_v12  ;;  %v516_v17 = vadd.f32 %v11028_v8, %v515_v15 }
  0xf8   : > { %629 = vrot.lane.b32.xlu1 %v13949_v14, %s16728_s22 }
  0xf9   : > { %530 = vrot.lane.b32.xlu0 %v13951_v16, %s16728_s22  ;;  %v13957_v18 = vpack.c.bf16 %v516_v17, %v516_v17 }
  0xfd   : > { %580 = vrot.lane.b32.xlu0 %v13957_v18, %s16728_s22  ;;  %s16738_s22 = smov 64  }
 0x16a   : > { %v630_v23 = vpop.permute.xlu1 %629 }
 0x16b   : > { %v531_v19 = vpop.permute.xlu0 %530  ;;  %v635_v24 = vsel %vm532_vm2, %v630_v23, 0 }
 0x16c   : > { %v537_v20 = vsel %vm532_vm2, %v531_v19, 0 }
 0x16d   : > { %12480 = vmatpush3.bf16.xpose.msra.mxu1 %v537_v20 }
 0x16e   : > { %12491 = vmatprep.subr.bf16.mxu1 %v13770_v7 }
 0x16f   : > { %v581_v21 = vpop.permute.xlu0 %580 }
 0x170   : > { %v586_v22 = vsel %vm532_vm2, %v581_v21, 0 }
 0x171   : > { %12486 = vmatpush3.bf16.xpose.msra.mxu0 %v586_v22 }
 0x172   : > { %12497 = vmatprep.subr.bf16.mxu0 %v13770_v7 }
 0x174   : > { %12482 = vmatmul.mubr.msk.bf16.vlgmr.msra.gmra.mrb[0].mxu1 %vm532_vm2, %v13951_v16 }
 0x175   : > { %12492 = vmatpush3.bf16.xpose.msra.mxu1 %v635_v24  ;;  %12493 = vmatprep.mubr.msk.bf16.mxu1 %vm13771_vm1, %v13770_v7 }
 0x176   : > { %12503 = vmatprep.subr.bf16.mxu1 %v13770_v7 }
 0x178   : > { %12488 = vmatmul.mubr.msk.bf16.vlgmr.msra.gmra.mrb[4].mxu0 %vm532_vm2, %v13957_v18 }
 0x179   : > { %12499 = vmatprep.mubr.msk.bf16.mxu0 %vm13771_vm1, %v13770_v7 }
 0x17c   : > { %12494 = vmatmul.mubr.msk.bf16.vlgmr.msra.gmra.mrb[4].mxu1 %vm532_vm2, %v13949_v14 }
 0x17d   : > { %12505 = vmatprep.mubr.msk.bf16.mxu1 %vm13771_vm1, %v13770_v7 }
 0x247   : > { %v573_v25 = vpop.f32.mrb[0].mxu1 }
 0x248   : > { %v12483_v26 = vpop.f32.mrb[1].mxu1  ;;  %v677_v27 = vmul.f32 0.5, %v573_v25 }
 0x249   : > { %v576_v28 = vpop.f32.mrb[2].mxu1 }
 0x24a   : > { %v12484_v29 = vpop.f32.mrb[3].mxu1  ;;  %v681_v30 = vsel %vm680_vm3, %v677_v27, -inf }
 0x24b   : > { %682 = vmax.xlane.f32.xlu1 %v681_v30  ;;  %v622_v31 = vpop.f32.mrb[4].mxu0 }
 0x24c   : > { %v12489_v32 = vpop.f32.mrb[5].mxu0  ;;  %v678_v33 = vmul.f32 0.5, %v622_v31 }
 0x24d   : > { %v625_v34 = vpop.f32.mrb[6].mxu0 }
 0x24e   : > { %v12490_v35 = vpop.f32.mrb[7].mxu0  ;;  %v684_v36 = vsel %vm680_vm3, %v678_v33, -inf }
 0x24f   : > { %v671_v37 = vpop.f32.mrb[4].mxu1  ;;  %685 = vmax.xlane.f32.xlu0 %v684_v36 }
 0x250   : > { %v12495_v38 = vpop.f32.mrb[5].mxu1  ;;  %v679_v39 = vmul.f32 0.5, %v671_v37 }
 0x251   : > { %v674_v40 = vpop.f32.mrb[6].mxu1 }
 0x252   : > { %v12496_v41 = vpop.f32.mrb[7].mxu1  ;;  %v687_v42 = vsel %vm680_vm3, %v679_v39, -inf }
 0x253   : > { %688 = vmax.xlane.f32.xlu0 %v687_v42 }
 0x25c   : > { %717 = vrot.lane.b32.xlu1 %v13951_v16, %s16726_s23 }
 0x260   : > { %814 = vrot.lane.b32.xlu1 %v13949_v14, %s16726_s23 }
 0x269   : > { %766 = vrot.lane.b32.xlu0 %v13957_v18, %s16726_s23  ;;  %s16743_s23 = smov 120  }
 0x2d8   : > { %v683_v43 = vpop.xlane.xlu1 %682 }
 0x2d9   : > { %v690_v44 = vsub.f32 %v677_v27, %v683_v43 }
 0x2db   : > { %v693_v45 = vmul.f32 1.442695, %v690_v44 }
 0x2dc   : > { %v718_v46 = vpop.permute.xlu1 %717  ;;  %v686_v47 = vpop.xlane.xlu0 %685 }
 0x2dd   : > { %13487 = vpow2.f32 %v693_v45  ;;  %v724_v48 = vsel %vm722_vm4, %v718_v46, 0  ;;  %v691_v49 = vsub.f32 %v678_v33, %v686_v47 }
 0x2de   : > { %12498 = vmatpush3.bf16.msra.mxu0 %v724_v48 }
 0x2df   : > { %v695_v50 = vmul.f32 1.442695, %v691_v49  ;;  %12509 = vmatprep.subr.bf16.mxu0 %v13770_v7 }
 0x2e0   : > { %v689_v51 = vpop.xlane.xlu0 %688  ;;  %v815_v62 = vpop.permute.xlu1 %814 }
 0x2e1   : > { %13489 = vpow2.f32 %v695_v50  ;;  %v692_v58 = vsub.f32 %v679_v39, %v689_v51  ;;  %v820_v5 = vsel %vm722_vm4, %v815_v62, 0 }
 0x2e3   : > { %v697_v59 = vmul.f32 1.442695, %v692_v58 }
 0x2e4   : > { %v767_v52 = vpop.permute.xlu0 %766 }
 0x2e5   : > { %v772_v53 = vsel %vm722_vm4, %v767_v52, 0  ;;  %13491 = vpow2.f32 %v697_v59 }
 0x2e6   : > { %12504 = vmatpush3.bf16.msra.mxu1 %v772_v53 }
 0x2e7   : > { %v13488_v54 = vpop.eup %13487  ;;  %12515 = vmatprep.subr.bf16.mxu1 %v13770_v7 }
 0x2e8   : > { %v699_v55 = vsel %vm680_vm3, %v13488_v54, 0.0 }
 0x2e9   : > { %700 = vadd.xlane.f32.xlu1 %v699_v55 }
 0x2eb   : > { %v13490_v56 = vpop.eup %13489 }
 0x2ec   : > { %v702_v57 = vsel %vm680_vm3, %v13490_v56, 0.0 }
 0x2ed   : > { %703 = vadd.xlane.f32.xlu0 %v702_v57 }
 0x2ef   : > { %v13492_v60 = vpop.eup %13491 }
 0x2f0   : > { %v705_v61 = vsel %vm680_vm3, %v13492_v60, 0.0 }
 0x2fa   : > { %914 = vrot.lane.b32.xlu1 %v13957_v18, %s16724_s24 }
 0x303   : > { %864 = vrot.lane.b32.xlu0 %v13951_v16, %s16724_s24 }
 0x307   : > { %862 = vrot.lane.b32.xlu0 %v13951_v16, %s16706_s30 }
 0x30b   : > { %912 = vrot.lane.b32.xlu0 %v13957_v18, %s16706_s30 }
 0x31e   : > { %706 = vadd.xlane.f32.xlu1 %v705_v61 }
 0x32f   : > { %964 = vrot.lane.b32.xlu1 %v13949_v14, %s16724_s24  ;;  %s16744_s24 = smov 56  }
 0x333   : > { %962 = vrot.lane.b32.xlu1 %v13949_v14, %s16706_s30  ;;  %s16716_s30 = smov 16  }
 0x376   : > { %v701_v63 = vpop.xlane.xlu1 %700 }
 0x377   : > { %13493 = vrcp.f32 %v701_v63 }
 0x37a   : > { %v704_v0 = vpop.xlane.xlu0 %703  ;;  %v915_v12 = vpop.permute.xlu1 %914 }
 0x37b   : > { %13495 = vrcp.f32 %v704_v0  ;;  %v920_v23 = vsel %vm532_vm2, %v915_v12, 0 }
 0x37e   : > { %v865_v8 = vpop.permute.xlu0 %864 }
 0x37f   : > { %v870_v10 = vsel %vm532_vm2, %v865_v8, 0 }
 0x381   : > { %v13494_v1 = vpop.eup %13493 }
 0x382   : > { %v711_v2 = vmul.f32 %v13494_v1, %v13488_v54  ;;  %v863_v11 = vpop.permute.xlu0 %862 }
 0x384   : > { %v714_v3 = vpack.c.bf16 %v711_v2, %v711_v2 }
 0x385   : > { %v13496_v4 = vpop.eup %13495 }
 0x386   : > { %12500 = vmatmul.mubr.msk.bf16.vlgmr.msra.gmra.mrb[8].mxu0 %vm680_vm3, %v714_v3  ;;  %v712_v6 = vmul.f32 %v13496_v4, %v13490_v56  ;;  %v913_v24 = vpop.permute.xlu0 %912 }
 0x387   : > { %12510 = vmatpush3.bf16.msra.mxu0 %v820_v5  ;;  %12511 = vmatprep.mubr.msk.bf16.mxu0 %vm13771_vm1, %v13770_v7 }
 0x388   : > { %v715_v9 = vpack.c.bf16 %v712_v6, %v712_v6  ;;  %12521 = vmatprep.subr.bf16.mxu0 %v13770_v7 }
 0x38a   : > { %12506 = vmatmul.mubr.msk.bf16.vlgmr.msra.gmra.mrb[8].mxu1 %vm680_vm3, %v715_v9 }
 0x38b   : > { %12516 = vmatpush3.bf16.xpose.msra.mxu1 %v870_v10  ;;  %12517 = vmatprep.mubr.msk.bf16.mxu1 %vm13771_vm1, %v13770_v7 }
 0x38c   : > { %12527 = vmatprep.subr.bf16.mxu1 %v13770_v7 }
 0x392   : > { %12518 = vmatmul.mubr.msk.bf16.vlgmr.msra.gmra.mrb[12].mxu1 %vm532_vm2, %v863_v11 }
 0x393   : > { %12529 = vmatprep.mubr.msk.bf16.mxu1 %vm13771_vm1, %v13770_v7 }
 0x3ab   : > { %v707_v13 = vpop.xlane.xlu1 %706 }
 0x3ac   : > { %13497 = vrcp.f32 %v707_v13 }
 0x3af   : > { %v965_v15 = vpop.permute.xlu1 %964 }
 0x3b0   : > { %v970_v17 = vsel %vm532_vm2, %v965_v15, 0 }
 0x3b1   : > { %12528 = vmatpush3.bf16.xpose.msra.mxu1 %v970_v17 }
 0x3b2   : > { %12539 = vmatprep.subr.bf16.mxu1 %v13770_v7 }
 0x3b3   : > { %v963_v20 = vpop.permute.xlu1 %962 }
 0x3b6   : > { %v13498_v19 = vpop.eup %13497 }
 0x3b7   : > { %v713_v21 = vmul.f32 %v13498_v19, %v13492_v60 }
 0x3b8   : > { %12530 = vmatmul.mubr.msk.bf16.vlgmr.msra.gmra.mrb[16].mxu1 %vm532_vm2, %v963_v20 }
 0x3b9   : > { %v716_v22 = vpack.c.bf16 %v713_v21, %v713_v21  ;;  %12541 = vmatprep.mubr.msk.bf16.mxu1 %vm13771_vm1, %v13770_v7 }
 0x3bb   : > { %12512 = vmatmul.mubr.msk.bf16.vlgmr.msra.gmra.mrb[12].mxu0 %vm680_vm3, %v716_v22 }
 0x3bc   : > { %12522 = vmatpush3.bf16.xpose.msra.mxu0 %v920_v23  ;;  %12523 = vmatprep.mubr.msk.bf16.mxu0 %vm13771_vm1, %v13770_v7 }
 0x3bd   : > { %12533 = vmatprep.subr.bf16.mxu0 %v13770_v7 }
 0x3c3   : > { %12524 = vmatmul.mubr.msk.bf16.vlgmr.msra.gmra.mrb[16].mxu0 %vm532_vm2, %v913_v24 }
 0x3c4   : > { %12535 = vmatprep.mubr.msk.bf16.mxu0 %vm13771_vm1, %v13770_v7 }
 0x459   : > { %v14033_v25 = vpop.f32.mrb[8].mxu0 }
 0x45a   : > { %v12501_v26 = vpop.f32.mrb[9].mxu0 }
 0x45b   : > { %v763_v27 = vpop.f32.mrb[10].mxu0 }
 0x45c   : > { %v12502_v28 = vpop.f32.mrb[11].mxu0 }
 0x45d   : > { %v14035_v29 = vpop.f32.mrb[8].mxu1 }
 0x45e   : > { %v12507_v30 = vpop.f32.mrb[9].mxu1 }
 0x45f   : > { %v811_v31 = vpop.f32.mrb[10].mxu1 }
 0x460   : > { %v12508_v32 = vpop.f32.mrb[11].mxu1 }
 0x465   : > { %v906_v33 = vpop.f32.mrb[12].mxu1 }
 0x466   : > { %v12519_v34 = vpop.f32.mrb[13].mxu1  ;;  %v1012_v35 = vmul.f32 0.5, %v906_v33 }
 0x467   : > { %v909_v36 = vpop.f32.mrb[14].mxu1 }
 0x468   : > { %v12520_v37 = vpop.f32.mrb[15].mxu1  ;;  %v1015_v38 = vsel %vm680_vm3, %v1012_v35, -inf }
 0x469   : > { %1016 = vmax.xlane.f32.xlu0 %v1015_v38 }
 0x48b   : > { %v1006_v39 = vpop.f32.mrb[16].mxu1 }
 0x48c   : > { %v12531_v40 = vpop.f32.mrb[17].mxu1  ;;  %v1014_v41 = vmul.f32 0.5, %v1006_v39 }
 0x48d   : > { %v1009_v42 = vpop.f32.mrb[18].mxu1 }
 0x48e   : > { %v14038_v43 = vpop.f32.mrb[12].mxu0  ;;  %v12532_v44 = vpop.f32.mrb[19].mxu1  ;;  %v1021_v45 = vsel %vm680_vm3, %v1014_v41, -inf }
 0x48f   : > { %1022 = vmax.xlane.f32.xlu0 %v1021_v45  ;;  %v12513_v46 = vpop.f32.mrb[13].mxu0 }
 0x490   : > { %v859_v47 = vpop.f32.mrb[14].mxu0 }
 0x491   : > { %v12514_v48 = vpop.f32.mrb[15].mxu0 }
 0x496   : > { %v956_v49 = vpop.f32.mrb[16].mxu0 }
 0x497   : > { %v12525_v50 = vpop.f32.mrb[17].mxu0  ;;  %v1013_v51 = vmul.f32 0.5, %v956_v49 }
 0x498   : > { %v959_v52 = vpop.f32.mrb[18].mxu0 }
 0x499   : > { %v12526_v53 = vpop.f32.mrb[19].mxu0  ;;  %v1018_v54 = vsel %vm680_vm3, %v1013_v51, -inf }
 0x49a   : > { %1019 = vmax.xlane.f32.xlu1 %v1018_v54 }
 0x4ab   : > { %1051 = vrot.lane.b32.xlu1 %v13951_v16, %s16704_s15 }
 0x4af   : > { %1147 = vrot.lane.b32.xlu1 %v13949_v14, %s16704_s15 }
 0x4b3   : > { %1197 = vrot.lane.b32.xlu1 %v13951_v16, %s16702_s16 }
 0x4f6   : > { %v1017_v55 = vpop.xlane.xlu0 %1016 }
 0x4f7   : > { %v1024_v56 = vsub.f32 %v1012_v35, %v1017_v55 }
 0x4f9   : > { %v1027_v57 = vmul.f32 1.442695, %v1024_v56 }
 0x4fb   : > { %13499 = vpow2.f32 %v1027_v57 }
 0x505   : > { %v13500_v58 = vpop.eup %13499 }
 0x506   : > { %v1033_v59 = vsel %vm680_vm3, %v13500_v58, 0.0 }
 0x507   : > { %1034 = vadd.xlane.f32.xlu0 %v1033_v59 }
 0x51c   : > { %v1023_v60 = vpop.xlane.xlu0 %1022 }
 0x51d   : > { %1099 = vrot.lane.b32.xlu0 %v13957_v18, %s16704_s15  ;;  %v1026_v61 = vsub.f32 %v1014_v41, %v1023_v60  ;;  %s16718_s15 = smov 12  }
 0x51f   : > { %v1031_v0 = vmul.f32 1.442695, %v1026_v61 }
 0x527   : > { %v1020_v62 = vpop.xlane.xlu1 %1019 }
 0x528   : > { %v1025_v63 = vsub.f32 %v1013_v51, %v1020_v62 }
 0x52a   : > { %v1029_v1 = vmul.f32 1.442695, %v1025_v63 }
 0x52b   : > { %v1052_v2 = vpop.permute.xlu1 %1051 }
 0x52c   : > { %13501 = vpow2.f32 %v1029_v1  ;;  %v1057_v3 = vsel %vm722_vm4, %v1052_v2, 0 }
 0x52d   : > { %12534 = vmatpush3.bf16.msra.mxu0 %v1057_v3  ;;  %13503 = vpow2.f32 %v1031_v0 }
 0x52e   : > { %12545 = vmatprep.subr.bf16.mxu0 %v13770_v7 }
 0x52f   : > { %v1148_v15 = vpop.permute.xlu1 %1147 }
 0x530   : > { %v1153_v19 = vsel %vm722_vm4, %v1148_v15, 0 }
 0x533   : > { %v1198_v20 = vpop.permute.xlu1 %1197 }
 0x534   : > { %v1203_v30 = vsel %vm532_vm2, %v1198_v20, 0 }
 0x536   : > { %v13502_v4 = vpop.eup %13501 }
 0x537   : > { %v1036_v5 = vsel %vm680_vm3, %v13502_v4, 0.0  ;;  %v13504_v6 = vpop.eup %13503 }
 0x538   : > { %1037 = vadd.xlane.f32.xlu1 %v1036_v5  ;;  %v1039_v8 = vsel %vm680_vm3, %v13504_v6, 0.0 }
 0x53c   : > { %1040 = vadd.xlane.f32.xlu0 %v1039_v8 }
 0x549   : > { %1195 = vrot.lane.b32.xlu1 %v13951_v16, %s16672_s20 }
 0x54d   : > { %1245 = vrot.lane.b32.xlu1 %v13957_v18, %s16672_s20 }
 0x552   : > { %1247 = vrot.lane.b32.xlu0 %v13957_v18, %s16702_s16 }
 0x556   : > { %1297 = vrot.lane.b32.xlu0 %v13949_v14, %s16702_s16  ;;  %s16720_s16 = smov 8  }
 0x55a   : > { %1295 = vrot.lane.b32.xlu0 %v13949_v14, %s16672_s20  ;;  %s16674_s20 = smov 116  }
 0x594   : > { %v1035_v9 = vpop.xlane.xlu0 %1034 }
 0x595   : > { %13505 = vrcp.f32 %v1035_v9 }
 0x598   : > { %v1100_v10 = vpop.permute.xlu0 %1099 }
 0x599   : > { %v1105_v11 = vsel %vm722_vm4, %v1100_v10, 0 }
 0x59a   : > { %12540 = vmatpush3.bf16.msra.mxu1 %v1105_v11 }
 0x59b   : > { %12551 = vmatprep.subr.bf16.mxu1 %v13770_v7 }
 0x59f   : > { %v13506_v12 = vpop.eup %13505 }
 0x5a0   : > { %v1045_v13 = vmul.f32 %v13506_v12, %v13500_v58 }
 0x5a2   : > { %v1048_v17 = vpack.c.bf16 %v1045_v13, %v1045_v13 }
 0x5a4   : > { %12536 = vmatmul.mubr.msk.bf16.vlgmr.msra.gmra.mrb[20].mxu0 %vm680_vm3, %v1048_v17 }
 0x5a5   : > { %12546 = vmatpush3.bf16.msra.mxu0 %v1153_v19  ;;  %12547 = vmatprep.mubr.msk.bf16.mxu0 %vm13771_vm1, %v13770_v7 }
 0x5a6   : > { %12557 = vmatprep.subr.bf16.mxu0 %v13770_v7 }
 0x5c5   : > { %v1038_v21 = vpop.xlane.xlu1 %1037 }
 0x5c6   : > { %13507 = vrcp.f32 %v1038_v21 }
 0x5c9   : > { %v1041_v22 = vpop.xlane.xlu0 %1040  ;;  %v1196_v34 = vpop.permute.xlu1 %1195 }
 0x5ca   : > { %13509 = vrcp.f32 %v1041_v22 }
 0x5cd   : > { %v1248_v28 = vpop.permute.xlu0 %1247  ;;  %v1246_v37 = vpop.permute.xlu1 %1245 }
 0x5ce   : > { %v1253_v33 = vsel %vm532_vm2, %v1248_v28, 0 }
 0x5d0   : > { %v13508_v23 = vpop.eup %13507 }
 0x5d1   : > { %v1046_v24 = vmul.f32 %v13508_v23, %v13502_v4  ;;  %v1298_v35 = vpop.permute.xlu0 %1297 }
 0x5d2   : > { %v1303_v36 = vsel %vm532_vm2, %v1298_v35, 0 }
 0x5d3   : > { %v1049_v26 = vpack.c.bf16 %v1046_v24, %v1046_v24 }
 0x5d4   : > { %v13510_v27 = vpop.eup %13509 }
 0x5d5   : > { %12542 = vmatmul.mubr.msk.bf16.vlgmr.msra.gmra.mrb[20].mxu1 %vm680_vm3, %v1049_v26  ;;  %v1047_v31 = vmul.f32 %v13510_v27, %v13504_v6  ;;  %v1296_v38 = vpop.permute.xlu0 %1295 }
 0x5d6   : > { %12552 = vmatpush3.bf16.xpose.msra.mxu1 %v1203_v30  ;;  %12553 = vmatprep.mubr.msk.bf16.mxu1 %vm13771_vm1, %v13770_v7 }
 0x5d7   : > { %v1050_v32 = vpack.c.bf16 %v1047_v31, %v1047_v31  ;;  %12563 = vmatprep.subr.bf16.mxu1 %v13770_v7 }
 0x5d9   : > { %12548 = vmatmul.mubr.msk.bf16.vlgmr.msra.gmra.mrb[24].mxu0 %vm680_vm3, %v1050_v32 }
 0x5da   : > { %12558 = vmatpush3.bf16.xpose.msra.mxu0 %v1253_v33  ;;  %12559 = vmatprep.mubr.msk.bf16.mxu0 %vm13771_vm1, %v13770_v7 }
 0x5db   : > { %12569 = vmatprep.subr.bf16.mxu0 %v13770_v7 }
 0x5dd   : > { %12554 = vmatmul.mubr.msk.bf16.vlgmr.msra.gmra.mrb[24].mxu1 %vm532_vm2, %v1196_v34 }
 0x5de   : > { %12564 = vmatpush3.bf16.xpose.msra.mxu1 %v1303_v36  ;;  %12565 = vmatprep.mubr.msk.bf16.mxu1 %vm13771_vm1, %v13770_v7 }
 0x5df   : > { %12575 = vmatprep.subr.bf16.mxu1 %v13770_v7 }
 0x5e1   : > { %12560 = vmatmul.mubr.msk.bf16.vlgmr.msra.gmra.mrb[28].mxu0 %vm532_vm2, %v1246_v37 }
 0x5e2   : > { %12571 = vmatprep.mubr.msk.bf16.mxu0 %vm13771_vm1, %v13770_v7 }
 0x5e5   : > { %12566 = vmatmul.mubr.msk.bf16.vlgmr.msra.gmra.mrb[28].mxu1 %vm532_vm2, %v1296_v38 }
 0x5e6   : > { %12577 = vmatprep.mubr.msk.bf16.mxu1 %vm13771_vm1, %v13770_v7 }
 0x677   : > { %v14093_v39 = vpop.f32.mrb[20].mxu0 }
 0x678   : > { %v12537_v40 = vpop.f32.mrb[21].mxu0 }
 0x679   : > { %v1096_v41 = vpop.f32.mrb[22].mxu0 }
 0x67a   : > { %v12538_v42 = vpop.f32.mrb[23].mxu0 }
 0x6a8   : > { %v14095_v44 = vpop.f32.mrb[20].mxu1 }
 0x6a9   : > { %v13153_v45 = vpack.i.bf16 %v14095_v44, %v14093_v39  ;;  %v12543_v46 = vpop.f32.mrb[21].mxu1 }
 0x6aa   : > { %v1144_v47 = vpop.f32.mrb[22].mxu1 }
 0x6ab   : > { %v12544_v48 = vpop.f32.mrb[23].mxu1 }
 0x6ac   : > { %v14099_v49 = vpop.f32.mrb[24].mxu0 }
 0x6ad   : > { %v12549_v50 = vpop.f32.mrb[25].mxu0 }
 0x6ae   : > { %v1192_v51 = vpop.f32.mrb[26].mxu0 }
 0x6af   : > { %v12550_v52 = vpop.f32.mrb[27].mxu0 }
 0x6b0   : > { %v1239_v53 = vpop.f32.mrb[24].mxu1 }
 0x6b1   : > { %v12555_v54 = vpop.f32.mrb[25].mxu1  ;;  %v1345_v55 = vmul.f32 0.5, %v1239_v53 }
 0x6b2   : > { %v1242_v56 = vpop.f32.mrb[26].mxu1 }
 0x6b3   : > { %v12556_v57 = vpop.f32.mrb[27].mxu1  ;;  %v1348_v58 = vsel %vm680_vm3, %v1345_v55, -inf }
 0x6b4   : > { %1349 = vmax.xlane.f32.xlu1 %v1348_v58  ;;  %v1289_v59 = vpop.f32.mrb[28].mxu0 }
 0x6b5   : > { %v12561_v60 = vpop.f32.mrb[29].mxu0  ;;  %v1346_v61 = vmul.f32 0.5, %v1289_v59 }
 0x6b6   : > { %v1292_v62 = vpop.f32.mrb[30].mxu0 }
 0x6b7   : > { %v12562_v63 = vpop.f32.mrb[31].mxu0  ;;  %v1351_v0 = vsel %vm680_vm3, %v1346_v61, -inf }
 0x6b8   : > { %v1339_v1 = vpop.f32.mrb[28].mxu1  ;;  %1352 = vmax.xlane.f32.xlu0 %v1351_v0 }
 0x6b9   : > { %v12567_v2 = vpop.f32.mrb[29].mxu1  ;;  %v1347_v3 = vmul.f32 0.5, %v1339_v1 }
 0x6ba   : > { %v1342_v4 = vpop.f32.mrb[30].mxu1 }
 0x6bb   : > { %v12568_v5 = vpop.f32.mrb[31].mxu1  ;;  %v1354_v6 = vsel %vm680_vm3, %v1347_v3, -inf }
 0x6bc   : > { %1355 = vmax.xlane.f32.xlu0 %v1354_v6 }
 0x6c5   : > { %1384 = vrot.lane.b32.xlu1 %v13951_v16, %s16670_s21 }
 0x6c9   : > { %1480 = vrot.lane.b32.xlu1 %v13949_v14, %s16670_s21 }
 0x6d2   : > { %1432 = vrot.lane.b32.xlu0 %v13957_v18, %s16670_s21  ;;  %s16676_s21 = smov 84  }
 0x741   : > { %v1350_v8 = vpop.xlane.xlu1 %1349 }
 0x742   : > { %v1357_v9 = vsub.f32 %v1345_v55, %v1350_v8 }
 0x744   : > { %v1360_v10 = vmul.f32 1.442695, %v1357_v9 }
 0x745   : > { %v1385_v11 = vpop.permute.xlu1 %1384  ;;  %v1353_v12 = vpop.xlane.xlu0 %1352 }
 0x746   : > { %13511 = vpow2.f32 %v1360_v10  ;;  %v1390_v13 = vsel %vm722_vm4, %v1385_v11, 0  ;;  %v1358_v15 = vsub.f32 %v1346_v61, %v1353_v12 }
 0x747   : > { %12570 = vmatpush3.bf16.msra.mxu0 %v1390_v13 }
 0x748   : > { %v1362_v17 = vmul.f32 1.442695, %v1358_v15  ;;  %12581 = vmatprep.subr.bf16.mxu0 %v13770_v7 }
 0x749   : > { %v1356_v19 = vpop.xlane.xlu0 %1355  ;;  %v1481_v32 = vpop.permute.xlu1 %1480 }
 0x74a   : > { %13513 = vpow2.f32 %v1362_v17  ;;  %v1359_v27 = vsub.f32 %v1347_v3, %v1356_v19  ;;  %v1486_v40 = vsel %vm722_vm4, %v1481_v32, 0 }
 0x74c   : > { %v1364_v28 = vmul.f32 1.442695, %v1359_v27 }
 0x74d   : > { %v1433_v20 = vpop.permute.xlu0 %1432 }
 0x74e   : > { %v1438_v21 = vsel %vm722_vm4, %v1433_v20, 0  ;;  %13515 = vpow2.f32 %v1364_v28 }
 0x74f   : > { %12576 = vmatpush3.bf16.msra.mxu1 %v1438_v21 }
 0x750   : > { %v13512_v22 = vpop.eup %13511  ;;  %12587 = vmatprep.subr.bf16.mxu1 %v13770_v7 }
 0x751   : > { %v1366_v23 = vsel %vm680_vm3, %v13512_v22, 0.0 }
 0x752   : > { %1367 = vadd.xlane.f32.xlu1 %v1366_v23 }
 0x754   : > { %v13514_v24 = vpop.eup %13513 }
 0x755   : > { %v1369_v26 = vsel %vm680_vm3, %v13514_v24, 0.0 }
 0x756   : > { %1370 = vadd.xlane.f32.xlu0 %v1369_v26 }
 0x758   : > { %v13516_v30 = vpop.eup %13515 }
 0x759   : > { %v1372_v31 = vsel %vm680_vm3, %v13516_v30, 0.0 }
 0x763   : > { %1580 = vrot.lane.b32.xlu1 %v13957_v18, %s16676_s21 }
 0x76c   : > { %1530 = vrot.lane.b32.xlu0 %v13951_v16, %s16676_s21 }
 0x770   : > { %1528 = vrot.lane.b32.xlu0 %v13951_v16, %s16674_s20 }
 0x774   : > { %1578 = vrot.lane.b32.xlu0 %v13957_v18, %s16674_s20 }
 0x787   : > { %1373 = vadd.xlane.f32.xlu1 %v1372_v31 }
 0x798   : > { %1630 = vrot.lane.b32.xlu1 %v13949_v14, %s16676_s21  ;;  %s16684_s21 = smov 80  }
 0x79c   : > { %1628 = vrot.lane.b32.xlu1 %v13949_v14, %s16674_s20  ;;  %s16678_s20 = smov 52  }
 0x7df   : > { %v1368_v33 = vpop.xlane.xlu1 %1367 }
 0x7e0   : > { %13517 = vrcp.f32 %v1368_v33 }
 0x7e3   : > { %v1371_v34 = vpop.xlane.xlu0 %1370  ;;  %v1581_v50 = vpop.permute.xlu1 %1580 }
 0x7e4   : > { %13519 = vrcp.f32 %v1371_v34  ;;  %v1586_v58 = vsel %vm532_vm2, %v1581_v50, 0 }
 0x7e7   : > { %v1531_v42 = vpop.permute.xlu0 %1530 }
 0x7e8   : > { %v1536_v47 = vsel %vm532_vm2, %v1531_v42, 0 }
 0x7ea   : > { %v13518_v35 = vpop.eup %13517 }
 0x7eb   : > { %v1378_v36 = vmul.f32 %v13518_v35, %v13512_v22  ;;  %v1529_v48 = vpop.permute.xlu0 %1528 }
 0x7ed   : > { %v1381_v37 = vpack.c.bf16 %v1378_v36, %v1378_v36 }
 0x7ee   : > { %v13520_v38 = vpop.eup %13519 }
 0x7ef   : > { %12572 = vmatmul.mubr.msk.bf16.vlgmr.msra.gmra.mrb[32].mxu0 %vm680_vm3, %v1381_v37  ;;  %v1379_v41 = vmul.f32 %v13520_v38, %v13514_v24  ;;  %v1579_v59 = vpop.permute.xlu0 %1578 }
 0x7f0   : > { %12582 = vmatpush3.bf16.msra.mxu0 %v1486_v40  ;;  %12583 = vmatprep.mubr.msk.bf16.mxu0 %vm13771_vm1, %v13770_v7 }
 0x7f1   : > { %v1382_v46 = vpack.c.bf16 %v1379_v41, %v1379_v41  ;;  %12593 = vmatprep.subr.bf16.mxu0 %v13770_v7 }
 0x7f3   : > { %12578 = vmatmul.mubr.msk.bf16.vlgmr.msra.gmra.mrb[32].mxu1 %vm680_vm3, %v1382_v46 }
 0x7f4   : > { %12588 = vmatpush3.bf16.xpose.msra.mxu1 %v1536_v47  ;;  %12589 = vmatprep.mubr.msk.bf16.mxu1 %vm13771_vm1, %v13770_v7 }
 0x7f5   : > { %12599 = vmatprep.subr.bf16.mxu1 %v13770_v7 }
 0x7fb   : > { %12590 = vmatmul.mubr.msk.bf16.vlgmr.msra.gmra.mrb[36].mxu1 %vm532_vm2, %v1529_v48 }
 0x7fc   : > { %12601 = vmatprep.mubr.msk.bf16.mxu1 %vm13771_vm1, %v13770_v7 }
 0x814   : > { %v1374_v51 = vpop.xlane.xlu1 %1373 }
 0x815   : > { %13521 = vrcp.f32 %v1374_v51 }
 0x818   : > { %v1631_v52 = vpop.permute.xlu1 %1630 }
 0x819   : > { %v1636_v53 = vsel %vm532_vm2, %v1631_v52, 0 }
 0x81a   : > { %12600 = vmatpush3.bf16.xpose.msra.mxu1 %v1636_v53 }
 0x81b   : > { %12611 = vmatprep.subr.bf16.mxu1 %v13770_v7 }
 0x81c   : > { %v1629_v55 = vpop.permute.xlu1 %1628 }
 0x81f   : > { %v13522_v54 = vpop.eup %13521 }
 0x820   : > { %v1380_v56 = vmul.f32 %v13522_v54, %v13516_v30 }
 0x821   : > { %12602 = vmatmul.mubr.msk.bf16.vlgmr.msra.gmra.mrb[40].mxu1 %vm532_vm2, %v1629_v55 }
 0x822   : > { %v1383_v57 = vpack.c.bf16 %v1380_v56, %v1380_v56  ;;  %12613 = vmatprep.mubr.msk.bf16.mxu1 %vm13771_vm1, %v13770_v7 }
 0x824   : > { %12584 = vmatmul.mubr.msk.bf16.vlgmr.msra.gmra.mrb[36].mxu0 %vm680_vm3, %v1383_v57 }
 0x825   : > { %12594 = vmatpush3.bf16.xpose.msra.mxu0 %v1586_v58  ;;  %12595 = vmatprep.mubr.msk.bf16.mxu0 %vm13771_vm1, %v13770_v7 }
 0x826   : > { %12605 = vmatprep.subr.bf16.mxu0 %v13770_v7 }
 0x82c   : > { %12596 = vmatmul.mubr.msk.bf16.vlgmr.msra.gmra.mrb[40].mxu0 %vm532_vm2, %v1579_v59 }
 0x82d   : > { %12607 = vmatprep.mubr.msk.bf16.mxu0 %vm13771_vm1, %v13770_v7 }
 0x8c2   : > { %v14155_v60 = vpop.f32.mrb[32].mxu0 }
 0x8c3   : > { %v12573_v61 = vpop.f32.mrb[33].mxu0 }
 0x8c4   : > { %v1429_v62 = vpop.f32.mrb[34].mxu0 }
 0x8c5   : > { %v12574_v63 = vpop.f32.mrb[35].mxu0 }
 0x8c6   : > { %v14157_v0 = vpop.f32.mrb[32].mxu1 }
 0x8c7   : > { %v13158_v1 = vpack.i.bf16 %v14157_v0, %v14155_v60  ;;  %v12579_v2 = vpop.f32.mrb[33].mxu1 }
 0x8c8   : > { %v1477_v3 = vpop.f32.mrb[34].mxu1 }
 0x8c9   : > { %v12580_v4 = vpop.f32.mrb[35].mxu1 }
 0x8ce   : > { %v1572_v5 = vpop.f32.mrb[36].mxu1 }
 0x8cf   : > { %v12591_v6 = vpop.f32.mrb[37].mxu1  ;;  %v1678_v8 = vmul.f32 0.5, %v1572_v5 }
 0x8d0   : > { %v1575_v9 = vpop.f32.mrb[38].mxu1 }
 0x8d1   : > { %v12592_v10 = vpop.f32.mrb[39].mxu1  ;;  %v1681_v11 = vsel %vm680_vm3, %v1678_v8, -inf }
 0x8d2   : > { %1682 = vmax.xlane.f32.xlu0 %v1681_v11 }
 0x8f4   : > { %v1672_v12 = vpop.f32.mrb[40].mxu1 }
 0x8f5   : > { %v12603_v13 = vpop.f32.mrb[41].mxu1  ;;  %v1680_v15 = vmul.f32 0.5, %v1672_v12 }
 0x8f6   : > { %v1675_v17 = vpop.f32.mrb[42].mxu1 }
 0x8f7   : > { %v14162_v19 = vpop.f32.mrb[36].mxu0  ;;  %v12604_v20 = vpop.f32.mrb[43].mxu1  ;;  %v1687_v21 = vsel %vm680_vm3, %v1680_v15, -inf }
 0x8f8   : > { %1688 = vmax.xlane.f32.xlu0 %v1687_v21  ;;  %v12585_v22 = vpop.f32.mrb[37].mxu0 }
 0x8f9   : > { %v1525_v23 = vpop.f32.mrb[38].mxu0 }
 0x8fa   : > { %v12586_v24 = vpop.f32.mrb[39].mxu0 }
 0x8ff   : > { %v1622_v26 = vpop.f32.mrb[40].mxu0 }
 0x900   : > { %v12597_v27 = vpop.f32.mrb[41].mxu0  ;;  %v1679_v28 = vmul.f32 0.5, %v1622_v26 }
 0x901   : > { %v1625_v30 = vpop.f32.mrb[42].mxu0 }
 0x902   : > { %v12598_v31 = vpop.f32.mrb[43].mxu0  ;;  %v1684_v32 = vsel %vm680_vm3, %v1679_v28, -inf }
 0x903   : > { %1685 = vmax.xlane.f32.xlu1 %v1684_v32 }
 0x914   : > { %1717 = vrot.lane.b32.xlu1 %v13951_v16, %s16678_s20 }
 0x918   : > { %1813 = vrot.lane.b32.xlu1 %v13949_v14, %s16678_s20 }
 0x91c   : > { %1863 = vrot.lane.b32.xlu1 %v13951_v16, %s16684_s21 }
 0x95f   : > { %v1683_v33 = vpop.xlane.xlu0 %1682 }
 0x960   : > { %v1690_v34 = vsub.f32 %v1678_v8, %v1683_v33 }
 0x962   : > { %v1693_v35 = vmul.f32 1.442695, %v1690_v34 }
 0x964   : > { %13523 = vpow2.f32 %v1693_v35 }
 0x96e   : > { %v13524_v36 = vpop.eup %13523 }
 0x96f   : > { %v1699_v37 = vsel %vm680_vm3, %v13524_v36, 0.0 }
 0x970   : > { %1700 = vadd.xlane.f32.xlu0 %v1699_v37 }
 0x985   : > { %v1689_v38 = vpop.xlane.xlu0 %1688 }
 0x986   : > { %1765 = vrot.lane.b32.xlu0 %v13957_v18, %s16678_s20  ;;  %v1692_v40 = vsub.f32 %v1680_v15, %v1689_v38  ;;  %s16680_s20 = smov 112  }
 0x988   : > { %v1697_v46 = vmul.f32 1.442695, %v1692_v40 }
 0x990   : > { %v1686_v41 = vpop.xlane.xlu1 %1685 }
 0x991   : > { %v1691_v42 = vsub.f32 %v1679_v28, %v1686_v41 }
 0x993   : > { %v1695_v47 = vmul.f32 1.442695, %v1691_v42 }
 0x994   : > { %v1718_v48 = vpop.permute.xlu1 %1717 }
 0x995   : > { %13525 = vpow2.f32 %v1695_v47  ;;  %v1723_v50 = vsel %vm722_vm4, %v1718_v48, 0 }
 0x996   : > { %12606 = vmatpush3.bf16.msra.mxu0 %v1723_v50  ;;  %13527 = vpow2.f32 %v1697_v46 }
 0x997   : > { %12617 = vmatprep.subr.bf16.mxu0 %v13770_v7 }
 0x998   : > { %v1814_v61 = vpop.permute.xlu1 %1813 }
 0x999   : > { %v1819_v63 = vsel %vm722_vm4, %v1814_v61, 0 }
 0x99c   : > { %v1864_v2 = vpop.permute.xlu1 %1863 }
 0x99d   : > { %v1869_v11 = vsel %vm532_vm2, %v1864_v2, 0 }
 0x99f   : > { %v13526_v51 = vpop.eup %13525 }
 0x9a0   : > { %v1702_v52 = vsel %vm680_vm3, %v13526_v51, 0.0  ;;  %v13528_v53 = vpop.eup %13527 }
 0x9a1   : > { %1703 = vadd.xlane.f32.xlu1 %v1702_v52  ;;  %v1705_v54 = vsel %vm680_vm3, %v13528_v53, 0.0 }
 0x9a5   : > { %1706 = vadd.xlane.f32.xlu0 %v1705_v54 }
 0x9b2   : > { %1861 = vrot.lane.b32.xlu1 %v13951_v16, %s16680_s20 }
 0x9b6   : > { %1911 = vrot.lane.b32.xlu1 %v13957_v18, %s16680_s20 }
 0x9bb   : > { %1913 = vrot.lane.b32.xlu0 %v13957_v18, %s16684_s21 }
 0x9bf   : > { %1963 = vrot.lane.b32.xlu0 %v13949_v14, %s16684_s21  ;;  %s16686_s21 = smov 108  }
 0x9c3   : > { %1961 = vrot.lane.b32.xlu0 %v13949_v14, %s16680_s20  ;;  %s16682_s20 = smov 48  }
 0x9fd   : > { %v1701_v55 = vpop.xlane.xlu0 %1700 }
 0x9fe   : > { %13529 = vrcp.f32 %v1701_v55 }
 0xa01   : > { %v1766_v56 = vpop.permute.xlu0 %1765 }
 0xa02   : > { %v1771_v57 = vsel %vm722_vm4, %v1766_v56, 0 }
 0xa03   : > { %12612 = vmatpush3.bf16.msra.mxu1 %v1771_v57 }
 0xa04   : > { %12623 = vmatprep.subr.bf16.mxu1 %v13770_v7 }
 0xa08   : > { %v13530_v58 = vpop.eup %13529 }
 0xa09   : > { %v1711_v59 = vmul.f32 %v13530_v58, %v13524_v36 }
 0xa0b   : > { %v1714_v62 = vpack.c.bf16 %v1711_v59, %v1711_v59 }
 0xa0d   : > { %12608 = vmatmul.mubr.msk.bf16.vlgmr.msra.gmra.mrb[44].mxu0 %vm680_vm3, %v1714_v62 }
 0xa0e   : > { %12618 = vmatpush3.bf16.msra.mxu0 %v1819_v63  ;;  %12619 = vmatprep.mubr.msk.bf16.mxu0 %vm13771_vm1, %v13770_v7 }
 0xa0f   : > { %12629 = vmatprep.subr.bf16.mxu0 %v13770_v7 }
 0xa2e   : > { %v1704_v3 = vpop.xlane.xlu1 %1703 }
 0xa2f   : > { %13531 = vrcp.f32 %v1704_v3 }
 0xa32   : > { %v1707_v4 = vpop.xlane.xlu0 %1706  ;;  %v1862_v17 = vpop.permute.xlu1 %1861 }
 0xa33   : > { %13533 = vrcp.f32 %v1707_v4 }
 0xa36   : > { %v1914_v10 = vpop.permute.xlu0 %1913  ;;  %v1912_v22 = vpop.permute.xlu1 %1911 }
 0xa37   : > { %v1919_v15 = vsel %vm532_vm2, %v1914_v10, 0 }
 0xa39   : > { %v13532_v5 = vpop.eup %13531 }
 0xa3a   : > { %v1712_v6 = vmul.f32 %v13532_v5, %v13526_v51  ;;  %v1964_v20 = vpop.permute.xlu0 %1963 }
 0xa3b   : > { %v1969_v21 = vsel %vm532_vm2, %v1964_v20, 0 }
 0xa3c   : > { %v1715_v8 = vpack.c.bf16 %v1712_v6, %v1712_v6 }
 0xa3d   : > { %v13534_v9 = vpop.eup %13533 }
 0xa3e   : > { %12614 = vmatmul.mubr.msk.bf16.vlgmr.msra.gmra.mrb[44].mxu1 %vm680_vm3, %v1715_v8  ;;  %v1713_v12 = vmul.f32 %v13534_v9, %v13528_v53  ;;  %v1962_v23 = vpop.permute.xlu0 %1961 }
 0xa3f   : > { %12624 = vmatpush3.bf16.xpose.msra.mxu1 %v1869_v11  ;;  %12625 = vmatprep.mubr.msk.bf16.mxu1 %vm13771_vm1, %v13770_v7 }
 0xa40   : > { %v1716_v13 = vpack.c.bf16 %v1713_v12, %v1713_v12  ;;  %12635 = vmatprep.subr.bf16.mxu1 %v13770_v7 }
 0xa42   : > { %12620 = vmatmul.mubr.msk.bf16.vlgmr.msra.gmra.mrb[48].mxu0 %vm680_vm3, %v1716_v13 }
 0xa43   : > { %12630 = vmatpush3.bf16.xpose.msra.mxu0 %v1919_v15  ;;  %12631 = vmatprep.mubr.msk.bf16.mxu0 %vm13771_vm1, %v13770_v7 }
 0xa44   : > { %12641 = vmatprep.subr.bf16.mxu0 %v13770_v7 }
 0xa46   : > { %12626 = vmatmul.mubr.msk.bf16.vlgmr.msra.gmra.mrb[48].mxu1 %vm532_vm2, %v1862_v17 }
 0xa47   : > { %12636 = vmatpush3.bf16.xpose.msra.mxu1 %v1969_v21  ;;  %12637 = vmatprep.mubr.msk.bf16.mxu1 %vm13771_vm1, %v13770_v7 }
 0xa48   : > { %12647 = vmatprep.subr.bf16.mxu1 %v13770_v7 }
 0xa4a   : > { %12632 = vmatmul.mubr.msk.bf16.vlgmr.msra.gmra.mrb[52].mxu0 %vm532_vm2, %v1912_v22 }
 0xa4b   : > { %12643 = vmatprep.mubr.msk.bf16.mxu0 %vm13771_vm1, %v13770_v7 }
 0xa4e   : > { %12638 = vmatmul.mubr.msk.bf16.vlgmr.msra.gmra.mrb[52].mxu1 %vm532_vm2, %v1962_v23 }
 0xa4f   : > { %12649 = vmatprep.mubr.msk.bf16.mxu1 %vm13771_vm1, %v13770_v7 }
 0xae0   : > { %v14217_v24 = vpop.f32.mrb[44].mxu0 }
 0xae1   : > { %v12609_v26 = vpop.f32.mrb[45].mxu0 }
 0xae2   : > { %v1762_v27 = vpop.f32.mrb[46].mxu0 }
 0xae3   : > { %v12610_v28 = vpop.f32.mrb[47].mxu0 }
 0xb11   : > { %v14219_v30 = vpop.f32.mrb[44].mxu1 }
 0xb12   : > { %v13163_v31 = vpack.i.bf16 %v14219_v30, %v14217_v24  ;;  %v12615_v32 = vpop.f32.mrb[45].mxu1 }
 0xb13   : > { %v1810_v33 = vpop.f32.mrb[46].mxu1 }
 0xb14   : > { %v12616_v34 = vpop.f32.mrb[47].mxu1 }
 0xb15   : > { %v14223_v35 = vpop.f32.mrb[48].mxu0 }
 0xb16   : > { %v12621_v36 = vpop.f32.mrb[49].mxu0 }
 0xb17   : > { %v1858_v37 = vpop.f32.mrb[50].mxu0 }
 0xb18   : > { %v12622_v38 = vpop.f32.mrb[51].mxu0 }
 0xb19   : > { %v1905_v40 = vpop.f32.mrb[48].mxu1 }
 0xb1a   : > { %v12627_v41 = vpop.f32.mrb[49].mxu1  ;;  %v2011_v42 = vmul.f32 0.5, %v1905_v40 }
 0xb1b   : > { %v1908_v46 = vpop.f32.mrb[50].mxu1 }
 0xb1c   : > { %v12628_v47 = vpop.f32.mrb[51].mxu1  ;;  %v2014_v48 = vsel %vm680_vm3, %v2011_v42, -inf }
 0xb1d   : > { %2015 = vmax.xlane.f32.xlu1 %v2014_v48  ;;  %v1955_v50 = vpop.f32.mrb[52].mxu0 }
 0xb1e   : > { %v12633_v51 = vpop.f32.mrb[53].mxu0  ;;  %v2012_v52 = vmul.f32 0.5, %v1955_v50 }
 0xb1f   : > { %v1958_v53 = vpop.f32.mrb[54].mxu0 }
 0xb20   : > { %v12634_v54 = vpop.f32.mrb[55].mxu0  ;;  %v2017_v55 = vsel %vm680_vm3, %v2012_v52, -inf }
 0xb21   : > { %v2005_v56 = vpop.f32.mrb[52].mxu1  ;;  %2018 = vmax.xlane.f32.xlu0 %v2017_v55 }
 0xb22   : > { %v12639_v57 = vpop.f32.mrb[53].mxu1  ;;  %v2013_v58 = vmul.f32 0.5, %v2005_v56 }
 0xb23   : > { %v2008_v59 = vpop.f32.mrb[54].mxu1 }
 0xb24   : > { %v12640_v61 = vpop.f32.mrb[55].mxu1  ;;  %v2020_v62 = vsel %vm680_vm3, %v2013_v58, -inf }
 0xb25   : > { %2021 = vmax.xlane.f32.xlu0 %v2020_v62 }
 0xb2e   : > { %2050 = vrot.lane.b32.xlu1 %v13951_v16, %s16682_s20 }
 0xb32   : > { %2146 = vrot.lane.b32.xlu1 %v13949_v14, %s16682_s20 }
 0xb3b   : > { %2098 = vrot.lane.b32.xlu0 %v13957_v18, %s16682_s20  ;;  %s16688_s20 = smov 76  }
 0xbaa   : > { %v2016_v63 = vpop.xlane.xlu1 %2015 }
 0xbab   : > { %v2023_v2 = vsub.f32 %v2011_v42, %v2016_v63 }
 0xbad   : > { %v2026_v3 = vmul.f32 1.442695, %v2023_v2 }
 0xbae   : > { %v2051_v4 = vpop.permute.xlu1 %2050  ;;  %v2019_v5 = vpop.xlane.xlu0 %2018 }
 0xbaf   : > { %13535 = vpow2.f32 %v2026_v3  ;;  %v2056_v6 = vsel %vm722_vm4, %v2051_v4, 0  ;;  %v2024_v8 = vsub.f32 %v2012_v52, %v2019_v5 }
 0xbb0   : > { %12642 = vmatpush3.bf16.msra.mxu0 %v2056_v6 }
 0xbb1   : > { %v2028_v9 = vmul.f32 1.442695, %v2024_v8  ;;  %12653 = vmatprep.subr.bf16.mxu0 %v13770_v7 }
 0xbb2   : > { %v2022_v10 = vpop.xlane.xlu0 %2021  ;;  %v2147_v27 = vpop.permute.xlu1 %2146 }
 0xbb3   : > { %13537 = vpow2.f32 %v2028_v9  ;;  %v2025_v21 = vsub.f32 %v2013_v58, %v2022_v10  ;;  %v2152_v38 = vsel %vm722_vm4, %v2147_v27, 0 }
 0xbb5   : > { %v2030_v22 = vmul.f32 1.442695, %v2025_v21 }
 0xbb6   : > { %v2099_v11 = vpop.permute.xlu0 %2098 }
 0xbb7   : > { %v2104_v12 = vsel %vm722_vm4, %v2099_v11, 0  ;;  %13539 = vpow2.f32 %v2030_v22 }
 0xbb8   : > { %12648 = vmatpush3.bf16.msra.mxu1 %v2104_v12 }
 0xbb9   : > { %v13536_v13 = vpop.eup %13535  ;;  %12659 = vmatprep.subr.bf16.mxu1 %v13770_v7 }
 0xbba   : > { %v2032_v15 = vsel %vm680_vm3, %v13536_v13, 0.0 }
 0xbbb   : > { %2033 = vadd.xlane.f32.xlu1 %v2032_v15 }
 0xbbd   : > { %v13538_v17 = vpop.eup %13537 }
 0xbbe   : > { %v2035_v20 = vsel %vm680_vm3, %v13538_v17, 0.0 }
 0xbbf   : > { %2036 = vadd.xlane.f32.xlu0 %v2035_v20 }
 0xbc1   : > { %v13540_v23 = vpop.eup %13539 }
 0xbc2   : > { %v2038_v26 = vsel %vm680_vm3, %v13540_v23, 0.0 }
 0xbcc   : > { %2246 = vrot.lane.b32.xlu1 %v13957_v18, %s16688_s20 }
 0xbd5   : > { %2196 = vrot.lane.b32.xlu0 %v13951_v16, %s16688_s20 }
 0xbd9   : > { %2194 = vrot.lane.b32.xlu0 %v13951_v16, %s16686_s21 }
 0xbdd   : > { %2244 = vrot.lane.b32.xlu0 %v13957_v18, %s16686_s21 }
 0xbf0   : > { %2039 = vadd.xlane.f32.xlu1 %v2038_v26 }
 0xc01   : > { %2296 = vrot.lane.b32.xlu1 %v13949_v14, %s16688_s20  ;;  %s16696_s20 = smov 72  }
 0xc05   : > { %2294 = vrot.lane.b32.xlu1 %v13949_v14, %s16686_s21  ;;  %s16690_s21 = smov 44  }
 0xc48   : > { %v2034_v28 = vpop.xlane.xlu1 %2033 }
 0xc49   : > { %13541 = vrcp.f32 %v2034_v28 }
 0xc4c   : > { %v2037_v32 = vpop.xlane.xlu0 %2036  ;;  %v2247_v48 = vpop.permute.xlu1 %2246 }
 0xc4d   : > { %13543 = vrcp.f32 %v2037_v32  ;;  %v2252_v57 = vsel %vm532_vm2, %v2247_v48, 0 }
 0xc50   : > { %v2197_v41 = vpop.permute.xlu0 %2196 }
 0xc51   : > { %v2202_v46 = vsel %vm532_vm2, %v2197_v41, 0 }
 0xc53   : > { %v13542_v33 = vpop.eup %13541 }
 0xc54   : > { %v2044_v34 = vmul.f32 %v13542_v33, %v13536_v13  ;;  %v2195_v47 = vpop.permute.xlu0 %2194 }
 0xc56   : > { %v2047_v36 = vpack.c.bf16 %v2044_v34, %v2044_v34 }
 0xc57   : > { %v13544_v37 = vpop.eup %13543 }
 0xc58   : > { %12644 = vmatmul.mubr.msk.bf16.vlgmr.msra.gmra.mrb[56].mxu0 %vm680_vm3, %v2047_v36  ;;  %v2045_v40 = vmul.f32 %v13544_v37, %v13538_v17  ;;  %v2245_v58 = vpop.permute.xlu0 %2244 }
 0xc59   : > { %12654 = vmatpush3.bf16.msra.mxu0 %v2152_v38  ;;  %12655 = vmatprep.mubr.msk.bf16.mxu0 %vm13771_vm1, %v13770_v7 }
 0xc5a   : > { %v2048_v42 = vpack.c.bf16 %v2045_v40, %v2045_v40  ;;  %12665 = vmatprep.subr.bf16.mxu0 %v13770_v7 }
 0xc5c   : > { %12650 = vmatmul.mubr.msk.bf16.vlgmr.msra.gmra.mrb[56].mxu1 %vm680_vm3, %v2048_v42 }
 0xc5d   : > { %12660 = vmatpush3.bf16.xpose.msra.mxu1 %v2202_v46  ;;  %12661 = vmatprep.mubr.msk.bf16.mxu1 %vm13771_vm1, %v13770_v7 }
 0xc5e   : > { %12671 = vmatprep.subr.bf16.mxu1 %v13770_v7 }
 0xc64   : > { %12662 = vmatmul.mubr.msk.bf16.vlgmr.msra.gmra.mrb[60].mxu1 %vm532_vm2, %v2195_v47 }
 0xc65   : > { %12673 = vmatprep.mubr.msk.bf16.mxu1 %vm13771_vm1, %v13770_v7 }
 0xc7d   : > { %v2040_v50 = vpop.xlane.xlu1 %2039 }
 0xc7e   : > { %13545 = vrcp.f32 %v2040_v50 }
 0xc81   : > { %v2297_v51 = vpop.permute.xlu1 %2296 }
 0xc82   : > { %v2302_v52 = vsel %vm532_vm2, %v2297_v51, 0 }
 0xc83   : > { %12672 = vmatpush3.bf16.xpose.msra.mxu1 %v2302_v52 }
 0xc84   : > { %12683 = vmatprep.subr.bf16.mxu1 %v13770_v7 }
 0xc85   : > { %v2295_v54 = vpop.permute.xlu1 %2294 }
 0xc88   : > { %v13546_v53 = vpop.eup %13545 }
 0xc89   : > { %v2046_v55 = vmul.f32 %v13546_v53, %v13540_v23 }
 0xc8a   : > { %12674 = vmatmul.mubr.msk.bf16.vlgmr.msra.gmra.mrb[64].mxu1 %vm532_vm2, %v2295_v54 }
 0xc8b   : > { %v2049_v56 = vpack.c.bf16 %v2046_v55, %v2046_v55  ;;  %12685 = vmatprep.mubr.msk.bf16.mxu1 %vm13771_vm1, %v13770_v7 }
 0xc8d   : > { %12656 = vmatmul.mubr.msk.bf16.vlgmr.msra.gmra.mrb[60].mxu0 %vm680_vm3, %v2049_v56 }
 0xc8e   : > { %12666 = vmatpush3.bf16.xpose.msra.mxu0 %v2252_v57  ;;  %12667 = vmatprep.mubr.msk.bf16.mxu0 %vm13771_vm1, %v13770_v7 }
 0xc8f   : > { %12677 = vmatprep.subr.bf16.mxu0 %v13770_v7 }
 0xc95   : > { %12668 = vmatmul.mubr.msk.bf16.vlgmr.msra.gmra.mrb[64].mxu0 %vm532_vm2, %v2245_v58 }
 0xc96   : > { %12679 = vmatprep.mubr.msk.bf16.mxu0 %vm13771_vm1, %v13770_v7 }
 0xd2b   : > { %v14279_v59 = vpop.f32.mrb[56].mxu0 }
 0xd2c   : > { %v12645_v61 = vpop.f32.mrb[57].mxu0 }
 0xd2d   : > { %v2095_v62 = vpop.f32.mrb[58].mxu0 }
 0xd2e   : > { %v12646_v63 = vpop.f32.mrb[59].mxu0 }
 0xd2f   : > { %v14281_v2 = vpop.f32.mrb[56].mxu1 }
 0xd30   : > { %v13168_v3 = vpack.i.bf16 %v14281_v2, %v14279_v59  ;;  %v12651_v4 = vpop.f32.mrb[57].mxu1 }
 0xd31   : > { %v2143_v5 = vpop.f32.mrb[58].mxu1 }
 0xd32   : > { %v12652_v6 = vpop.f32.mrb[59].mxu1 }
 0xd37   : > { %v2238_v8 = vpop.f32.mrb[60].mxu1 }
 0xd38   : > { %v12663_v9 = vpop.f32.mrb[61].mxu1  ;;  %v2344_v10 = vmul.f32 0.5, %v2238_v8 }
 0xd39   : > { %v2241_v11 = vpop.f32.mrb[62].mxu1 }
 0xd3a   : > { %v12664_v12 = vpop.f32.mrb[63].mxu1  ;;  %v2347_v13 = vsel %vm680_vm3, %v2344_v10, -inf }
 0xd3b   : > { %2348 = vmax.xlane.f32.xlu0 %v2347_v13 }
 0xd5d   : > { %v2338_v15 = vpop.f32.mrb[64].mxu1 }
 0xd5e   : > { %v12675_v17 = vpop.f32.mrb[65].mxu1  ;;  %v2346_v20 = vmul.f32 0.5, %v2338_v15 }
 0xd5f   : > { %v2341_v21 = vpop.f32.mrb[66].mxu1 }
 0xd60   : > { %v14286_v22 = vpop.f32.mrb[60].mxu0  ;;  %v12676_v23 = vpop.f32.mrb[67].mxu1  ;;  %v2353_v26 = vsel %vm680_vm3, %v2346_v20, -inf }
 0xd61   : > { %2354 = vmax.xlane.f32.xlu0 %v2353_v26  ;;  %v12657_v27 = vpop.f32.mrb[61].mxu0 }
 0xd62   : > { %v2191_v28 = vpop.f32.mrb[62].mxu0 }
 0xd63   : > { %v12658_v32 = vpop.f32.mrb[63].mxu0 }
 0xd68   : > { %v2288_v33 = vpop.f32.mrb[64].mxu0 }
 0xd69   : > { %v12669_v34 = vpop.f32.mrb[65].mxu0  ;;  %v2345_v36 = vmul.f32 0.5, %v2288_v33 }
 0xd6a   : > { %v2291_v37 = vpop.f32.mrb[66].mxu0 }
 0xd6b   : > { %v12670_v38 = vpop.f32.mrb[67].mxu0  ;;  %v2350_v40 = vsel %vm680_vm3, %v2345_v36, -inf }
 0xd6c   : > { %2351 = vmax.xlane.f32.xlu1 %v2350_v40 }
 0xd7d   : > { %2383 = vrot.lane.b32.xlu1 %v13951_v16, %s16690_s21 }
 0xd81   : > { %2479 = vrot.lane.b32.xlu1 %v13949_v14, %s16690_s21 }
 0xd85   : > { %2529 = vrot.lane.b32.xlu1 %v13951_v16, %s16696_s20 }
 0xdc8   : > { %v2349_v41 = vpop.xlane.xlu0 %2348 }
 0xdc9   : > { %v2356_v42 = vsub.f32 %v2344_v10, %v2349_v41 }
 0xdcb   : > { %v2359_v46 = vmul.f32 1.442695, %v2356_v42 }
 0xdcd   : > { %13547 = vpow2.f32 %v2359_v46 }
 0xdd7   : > { %v13548_v47 = vpop.eup %13547 }
 0xdd8   : > { %v2365_v48 = vsel %vm680_vm3, %v13548_v47, 0.0 }
 0xdd9   : > { %2366 = vadd.xlane.f32.xlu0 %v2365_v48 }
 0xdee   : > { %v2355_v50 = vpop.xlane.xlu0 %2354 }
 0xdef   : > { %2431 = vrot.lane.b32.xlu0 %v13957_v18, %s16690_s21  ;;  %v2358_v51 = vsub.f32 %v2346_v20, %v2355_v50  ;;  %s16692_s21 = smov 104  }
 0xdf1   : > { %v2363_v54 = vmul.f32 1.442695, %v2358_v51 }
 0xdf9   : > { %v2352_v52 = vpop.xlane.xlu1 %2351 }
 0xdfa   : > { %v2357_v53 = vsub.f32 %v2345_v36, %v2352_v52 }
 0xdfc   : > { %v2361_v55 = vmul.f32 1.442695, %v2357_v53 }
 0xdfd   : > { %v2384_v56 = vpop.permute.xlu1 %2383 }
 0xdfe   : > { %13549 = vpow2.f32 %v2361_v55  ;;  %v2389_v57 = vsel %vm722_vm4, %v2384_v56, 0 }
 0xdff   : > { %12678 = vmatpush3.bf16.msra.mxu0 %v2389_v57  ;;  %13551 = vpow2.f32 %v2363_v54 }
 0xe00   : > { %12689 = vmatprep.subr.bf16.mxu0 %v13770_v7 }
 0xe01   : > { %v2480_v10 = vpop.permute.xlu1 %2479 }
 0xe02   : > { %v2485_v12 = vsel %vm722_vm4, %v2480_v10, 0 }
 0xe05   : > { %v2530_v13 = vpop.permute.xlu1 %2529 }
 0xe06   : > { %v2535_v28 = vsel %vm532_vm2, %v2530_v13, 0 }
 0xe08   : > { %v13550_v58 = vpop.eup %13549 }
 0xe09   : > { %v2368_v61 = vsel %vm680_vm3, %v13550_v58, 0.0  ;;  %v13552_v62 = vpop.eup %13551 }
 0xe0a   : > { %2369 = vadd.xlane.f32.xlu1 %v2368_v61  ;;  %v2371_v63 = vsel %vm680_vm3, %v13552_v62, 0.0 }
 0xe0e   : > { %2372 = vadd.xlane.f32.xlu0 %v2371_v63 }
 0xe1b   : > { %2527 = vrot.lane.b32.xlu1 %v13951_v16, %s16692_s21 }
 0xe1f   : > { %2577 = vrot.lane.b32.xlu1 %v13957_v18, %s16692_s21 }
 0xe24   : > { %2579 = vrot.lane.b32.xlu0 %v13957_v18, %s16696_s20 }
 0xe28   : > { %2629 = vrot.lane.b32.xlu0 %v13949_v14, %s16696_s20  ;;  %s16698_s20 = smov 100  }
 0xe2c   : > { %2627 = vrot.lane.b32.xlu0 %v13949_v14, %s16692_s21  ;;  %s16694_s21 = smov 40  }
 0xe66   : > { %v2367_v4 = vpop.xlane.xlu0 %2366 }
 0xe67   : > { %13553 = vrcp.f32 %v2367_v4 }
 0xe6a   : > { %v2432_v5 = vpop.permute.xlu0 %2431 }
 0xe6b   : > { %v2437_v6 = vsel %vm722_vm4, %v2432_v5, 0 }
 0xe6c   : > { %12684 = vmatpush3.bf16.msra.mxu1 %v2437_v6 }
 0xe6d   : > { %12695 = vmatprep.subr.bf16.mxu1 %v13770_v7 }
 0xe71   : > { %v13554_v8 = vpop.eup %13553 }
 0xe72   : > { %v2377_v9 = vmul.f32 %v13554_v8, %v13548_v47 }
 0xe74   : > { %v2380_v11 = vpack.c.bf16 %v2377_v9, %v2377_v9 }
 0xe76   : > { %12680 = vmatmul.mubr.msk.bf16.vlgmr.msra.gmra.mrb[68].mxu0 %vm680_vm3, %v2380_v11 }
 0xe77   : > { %12690 = vmatpush3.bf16.msra.mxu0 %v2485_v12  ;;  %12691 = vmatprep.mubr.msk.bf16.mxu0 %vm13771_vm1, %v13770_v7 }
 0xe78   : > { %12701 = vmatprep.subr.bf16.mxu0 %v13770_v7 }
 0xe97   : > { %v2370_v15 = vpop.xlane.xlu1 %2369 }
 0xe98   : > { %13555 = vrcp.f32 %v2370_v15 }
 0xe9b   : > { %v2373_v17 = vpop.xlane.xlu0 %2372  ;;  %v2528_v36 = vpop.permute.xlu1 %2527 }
 0xe9c   : > { %13557 = vrcp.f32 %v2373_v17 }
 0xe9f   : > { %v2580_v27 = vpop.permute.xlu0 %2579  ;;  %v2578_v40 = vpop.permute.xlu1 %2577 }
 0xea0   : > { %v2585_v34 = vsel %vm532_vm2, %v2580_v27, 0 }
 0xea2   : > { %v13556_v20 = vpop.eup %13555 }
 0xea3   : > { %v2378_v21 = vmul.f32 %v13556_v20, %v13550_v58  ;;  %v2630_v37 = vpop.permute.xlu0 %2629 }
 0xea4   : > { %v2635_v38 = vsel %vm532_vm2, %v2630_v37, 0 }
 0xea5   : > { %v2381_v23 = vpack.c.bf16 %v2378_v21, %v2378_v21 }
 0xea6   : > { %v13558_v26 = vpop.eup %13557 }
 0xea7   : > { %12686 = vmatmul.mubr.msk.bf16.vlgmr.msra.gmra.mrb[68].mxu1 %vm680_vm3, %v2381_v23  ;;  %v2379_v32 = vmul.f32 %v13558_v26, %v13552_v62  ;;  %v2628_v41 = vpop.permute.xlu0 %2627 }
 0xea8   : > { %12696 = vmatpush3.bf16.xpose.msra.mxu1 %v2535_v28  ;;  %12697 = vmatprep.mubr.msk.bf16.mxu1 %vm13771_vm1, %v13770_v7 }
 0xea9   : > { %v2382_v33 = vpack.c.bf16 %v2379_v32, %v2379_v32  ;;  %12707 = vmatprep.subr.bf16.mxu1 %v13770_v7 }
 0xeab   : > { %12692 = vmatmul.mubr.msk.bf16.vlgmr.msra.gmra.mrb[72].mxu0 %vm680_vm3, %v2382_v33 }
 0xeac   : > { %12702 = vmatpush3.bf16.xpose.msra.mxu0 %v2585_v34  ;;  %12703 = vmatprep.mubr.msk.bf16.mxu0 %vm13771_vm1, %v13770_v7 }
 0xead   : > { %12713 = vmatprep.subr.bf16.mxu0 %v13770_v7 }
 0xeaf   : > { %12698 = vmatmul.mubr.msk.bf16.vlgmr.msra.gmra.mrb[72].mxu1 %vm532_vm2, %v2528_v36 }
 0xeb0   : > { %12708 = vmatpush3.bf16.xpose.msra.mxu1 %v2635_v38  ;;  %12709 = vmatprep.mubr.msk.bf16.mxu1 %vm13771_vm1, %v13770_v7 }
 0xeb1   : > { %12719 = vmatprep.subr.bf16.mxu1 %v13770_v7 }
 0xeb3   : > { %12704 = vmatmul.mubr.msk.bf16.vlgmr.msra.gmra.mrb[76].mxu0 %vm532_vm2, %v2578_v40 }
 0xeb4   : > { %12715 = vmatprep.mubr.msk.bf16.mxu0 %vm13771_vm1, %v13770_v7 }
 0xeb7   : > { %12710 = vmatmul.mubr.msk.bf16.vlgmr.msra.gmra.mrb[76].mxu1 %vm532_vm2, %v2628_v41 }
 0xeb8   : > { %12721 = vmatprep.mubr.msk.bf16.mxu1 %vm13771_vm1, %v13770_v7 }
 0xf49   : > { %v14341_v42 = vpop.f32.mrb[68].mxu0 }
 0xf4a   : > { %v12681_v46 = vpop.f32.mrb[69].mxu0 }
 0xf4b   : > { %v2428_v47 = vpop.f32.mrb[70].mxu0 }
 0xf4c   : > { %v12682_v48 = vpop.f32.mrb[71].mxu0 }
 0xf7a   : > { %v14343_v50 = vpop.f32.mrb[68].mxu1 }
 0xf7b   : > { %v13173_v51 = vpack.i.bf16 %v14343_v50, %v14341_v42  ;;  %v12687_v52 = vpop.f32.mrb[69].mxu1 }
 0xf7c   : > { %v2476_v53 = vpop.f32.mrb[70].mxu1 }
 0xf7d   : > { %v12688_v54 = vpop.f32.mrb[71].mxu1 }
 0xf7e   : > { %v14347_v55 = vpop.f32.mrb[72].mxu0 }
 0xf7f   : > { %v12693_v56 = vpop.f32.mrb[73].mxu0 }
 0xf80   : > { %v2524_v57 = vpop.f32.mrb[74].mxu0 }
 0xf81   : > { %v12694_v58 = vpop.f32.mrb[75].mxu0 }
 0xf82   : > { %v2571_v61 = vpop.f32.mrb[72].mxu1 }
 0xf83   : > { %v2677_v62 = vmul.f32 0.5, %v2571_v61  ;;  %v12699_v63 = vpop.f32.mrb[73].mxu1 }
 0xf84   : > { %v2574_v4 = vpop.f32.mrb[74].mxu1 }
 0xf85   : > { %v12700_v5 = vpop.f32.mrb[75].mxu1  ;;  %v2680_v6 = vsel %vm680_vm3, %v2677_v62, -inf }
 0xf86   : > { %2681 = vmax.xlane.f32.xlu1 %v2680_v6  ;;  %v2621_v8 = vpop.f32.mrb[76].mxu0 }
 0xf87   : > { %v2678_v9 = vmul.f32 0.5, %v2621_v8  ;;  %v12705_v10 = vpop.f32.mrb[77].mxu0 }
 0xf88   : > { %v2624_v11 = vpop.f32.mrb[78].mxu0 }
 0xf89   : > { %v12706_v12 = vpop.f32.mrb[79].mxu0  ;;  %v2683_v13 = vsel %vm680_vm3, %v2678_v9, -inf }
 0xf8a   : > { %v2671_v15 = vpop.f32.mrb[76].mxu1  ;;  %2684 = vmax.xlane.f32.xlu0 %v2683_v13 }
 0xf8b   : > { %v2679_v17 = vmul.f32 0.5, %v2671_v15  ;;  %v12711_v20 = vpop.f32.mrb[77].mxu1 }
 0xf8c   : > { %v2674_v21 = vpop.f32.mrb[78].mxu1 }
 0xf8d   : > { %v12712_v23 = vpop.f32.mrb[79].mxu1  ;;  %v2686_v26 = vsel %vm680_vm3, %v2679_v17, -inf }
 0xf8e   : > { %2687 = vmax.xlane.f32.xlu0 %v2686_v26 }
 0xf97   : > { %2716 = vrot.lane.b32.xlu1 %v13951_v16, %s16694_s21 }
 0xf9b   : > { %2812 = vrot.lane.b32.xlu1 %v13949_v14, %s16694_s21 }
 0xfa4   : > { %2764 = vrot.lane.b32.xlu0 %v13957_v18, %s16694_s21  ;;  %s16700_s21 = smov 68  }
0x1013   : > { %v2682_v27 = vpop.xlane.xlu1 %2681 }
0x1014   : > { %v2689_v28 = vsub.f32 %v2677_v62, %v2682_v27 }
0x1016   : > { %v2692_v32 = vmul.f32 1.442695, %v2689_v28 }
0x1017   : > { %v2717_v33 = vpop.permute.xlu1 %2716  ;;  %v2685_v34 = vpop.xlane.xlu0 %2684 }
0x1018   : > { %13559 = vpow2.f32 %v2692_v32  ;;  %v2722_v36 = vsel %vm722_vm4, %v2717_v33, 0  ;;  %v2690_v37 = vsub.f32 %v2678_v9, %v2685_v34 }
0x1019   : > { %12714 = vmatpush3.bf16.msra.mxu0 %v2722_v36 }
0x101a   : > { %v2694_v38 = vmul.f32 1.442695, %v2690_v37  ;;  %12725 = vmatprep.subr.bf16.mxu0 %v13770_v7 }
0x101b   : > { %v2688_v40 = vpop.xlane.xlu0 %2687  ;;  %v2813_v61 = vpop.permute.xlu1 %2812 }
0x101c   : > { %13561 = vpow2.f32 %v2694_v38  ;;  %v2691_v54 = vsub.f32 %v2679_v17, %v2688_v40  ;;  %v2818_v9 = vsel %vm722_vm4, %v2813_v61, 0 }
0x101e   : > { %v2696_v56 = vmul.f32 1.442695, %v2691_v54 }
0x101f   : > { %v2765_v41 = vpop.permute.xlu0 %2764 }
0x1020   : > { %v2770_v46 = vsel %vm722_vm4, %v2765_v41, 0  ;;  %13563 = vpow2.f32 %v2696_v56 }
0x1021   : > { %12720 = vmatpush3.bf16.msra.mxu1 %v2770_v46 }
0x1022   : > { %v13560_v47 = vpop.eup %13559  ;;  %12731 = vmatprep.subr.bf16.mxu1 %v13770_v7 }
0x1023   : > { %v2698_v48 = vsel %vm680_vm3, %v13560_v47, 0.0 }
0x1024   : > { %2699 = vadd.xlane.f32.xlu1 %v2698_v48 }
0x1026   : > { %v13562_v52 = vpop.eup %13561 }
0x1027   : > { %v2701_v53 = vsel %vm680_vm3, %v13562_v52, 0.0 }
0x1028   : > { %2702 = vadd.xlane.f32.xlu0 %v2701_v53 }
0x102a   : > { %v13564_v57 = vpop.eup %13563 }
0x102b   : > { %v2704_v58 = vsel %vm680_vm3, %v13564_v57, 0.0 }
0x1035   : > { %2912 = vrot.lane.b32.xlu1 %v13957_v18, %s16700_s21 }
0x103e   : > { %2862 = vrot.lane.b32.xlu0 %v13951_v16, %s16700_s21 }
0x1042   : > { %2860 = vrot.lane.b32.xlu0 %v13951_v16, %s16698_s20 }
0x1046   : > { %2910 = vrot.lane.b32.xlu0 %v13957_v18, %s16698_s20 }
0x1059   : > { %2705 = vadd.xlane.f32.xlu1 %v2704_v58 }
0x106a   : > { %2962 = vrot.lane.b32.xlu1 %v13949_v14, %s16700_s21  ;;  %s16710_s21 = smov 4  }
0x106e   : > { %2960 = vrot.lane.b32.xlu1 %v13949_v14, %s16698_s20  ;;  %s16708_s20 = smov 36  }
0x10b1   : > { %v2700_v62 = vpop.xlane.xlu1 %2699 }
0x10b2   : > { %13565 = vrcp.f32 %v2700_v62 }
0x10b5   : > { %v2703_v63 = vpop.xlane.xlu0 %2702  ;;  %v2913_v17 = vpop.permute.xlu1 %2912 }
0x10b6   : > { %13567 = vrcp.f32 %v2703_v63  ;;  %v2918_v33 = vsel %vm532_vm2, %v2913_v17, 0 }
0x10b9   : > { %v2863_v11 = vpop.permute.xlu0 %2862 }
0x10ba   : > { %v2868_v13 = vsel %vm532_vm2, %v2863_v11, 0 }
0x10bc   : > { %v13566_v4 = vpop.eup %13565 }
0x10bd   : > { %v2710_v5 = vmul.f32 %v13566_v4, %v13560_v47  ;;  %v2861_v15 = vpop.permute.xlu0 %2860 }
0x10bf   : > { %v2713_v6 = vpack.c.bf16 %v2710_v5, %v2710_v5 }
0x10c0   : > { %v13568_v8 = vpop.eup %13567 }
0x10c1   : > { %12716 = vmatmul.mubr.msk.bf16.vlgmr.msra.gmra.mrb[80].mxu0 %vm680_vm3, %v2713_v6  ;;  %v2711_v10 = vmul.f32 %v13568_v8, %v13562_v52  ;;  %v2911_v34 = vpop.permute.xlu0 %2910 }
0x10c2   : > { %12726 = vmatpush3.bf16.msra.mxu0 %v2818_v9  ;;  %12727 = vmatprep.mubr.msk.bf16.mxu0 %vm13771_vm1, %v13770_v7 }
0x10c3   : > { %v2714_v12 = vpack.c.bf16 %v2711_v10, %v2711_v10  ;;  %12737 = vmatprep.subr.bf16.mxu0 %v13770_v7 }
0x10c5   : > { %12722 = vmatmul.mubr.msk.bf16.vlgmr.msra.gmra.mrb[80].mxu1 %vm680_vm3, %v2714_v12 }
0x10c6   : > { %12732 = vmatpush3.bf16.xpose.msra.mxu1 %v2868_v13  ;;  %12733 = vmatprep.mubr.msk.bf16.mxu1 %vm13771_vm1, %v13770_v7 }
0x10c7   : > { %12743 = vmatprep.subr.bf16.mxu1 %v13770_v7 }
0x10cd   : > { %12734 = vmatmul.mubr.msk.bf16.vlgmr.msra.gmra.mrb[84].mxu1 %vm532_vm2, %v2861_v15 }
0x10ce   : > { %12745 = vmatprep.mubr.msk.bf16.mxu1 %vm13771_vm1, %v13770_v7 }
0x10e6   : > { %v2706_v20 = vpop.xlane.xlu1 %2705 }
0x10e7   : > { %13569 = vrcp.f32 %v2706_v20 }
0x10ea   : > { %v2963_v21 = vpop.permute.xlu1 %2962 }
0x10eb   : > { %v2968_v23 = vsel %vm532_vm2, %v2963_v21, 0 }
0x10ec   : > { %12744 = vmatpush3.bf16.xpose.msra.mxu1 %v2968_v23 }
0x10ed   : > { %12755 = vmatprep.subr.bf16.mxu1 %v13770_v7 }
0x10ee   : > { %v2961_v27 = vpop.permute.xlu1 %2960 }
0x10f1   : > { %v13570_v26 = vpop.eup %13569 }
0x10f2   : > { %v2712_v28 = vmul.f32 %v13570_v26, %v13564_v57 }
0x10f3   : > { %12746 = vmatmul.mubr.msk.bf16.vlgmr.msra.gmra.mrb[88].mxu1 %vm532_vm2, %v2961_v27 }
0x10f4   : > { %v2715_v32 = vpack.c.bf16 %v2712_v28, %v2712_v28  ;;  %12757 = vmatprep.mubr.msk.bf16.mxu1 %vm13771_vm1, %v13770_v7 }
0x10f6   : > { %12728 = vmatmul.mubr.msk.bf16.vlgmr.msra.gmra.mrb[84].mxu0 %vm680_vm3, %v2715_v32 }
0x10f7   : > { %12738 = vmatpush3.bf16.xpose.msra.mxu0 %v2918_v33  ;;  %12739 = vmatprep.mubr.msk.bf16.mxu0 %vm13771_vm1, %v13770_v7 }
0x10f8   : > { %12749 = vmatprep.subr.bf16.mxu0 %v13770_v7 }
0x10fe   : > { %12740 = vmatmul.mubr.msk.bf16.vlgmr.msra.gmra.mrb[88].mxu0 %vm532_vm2, %v2911_v34 }
0x10ff   : > { %12751 = vmatprep.mubr.msk.bf16.mxu0 %vm13771_vm1, %v13770_v7 }
0x1194   : > { %v14403_v36 = vpop.f32.mrb[80].mxu0 }
0x1195   : > { %v12717_v37 = vpop.f32.mrb[81].mxu0 }
0x1196   : > { %v2761_v38 = vpop.f32.mrb[82].mxu0 }
0x1197   : > { %v12718_v40 = vpop.f32.mrb[83].mxu0 }
0x1198   : > { %v14405_v41 = vpop.f32.mrb[80].mxu1 }
0x1199   : > { %v13178_v46 = vpack.i.bf16 %v14405_v41, %v14403_v36  ;;  %v12723_v47 = vpop.f32.mrb[81].mxu1 }
0x119a   : > { %v2809_v48 = vpop.f32.mrb[82].mxu1 }
0x119b   : > { %v12724_v52 = vpop.f32.mrb[83].mxu1 }
0x11a0   : > { %v2904_v53 = vpop.f32.mrb[84].mxu1 }
0x11a1   : > { %v3010_v54 = vmul.f32 0.5, %v2904_v53  ;;  %v12735_v56 = vpop.f32.mrb[85].mxu1 }
0x11a2   : > { %v2907_v57 = vpop.f32.mrb[86].mxu1 }
0x11a3   : > { %v12736_v58 = vpop.f32.mrb[87].mxu1  ;;  %v3013_v61 = vsel %vm680_vm3, %v3010_v54, -inf }
0x11a4   : > { %3014 = vmax.xlane.f32.xlu0 %v3013_v61 }
0x11c6   : > { %v3004_v62 = vpop.f32.mrb[88].mxu1 }
0x11c7   : > { %v3012_v63 = vmul.f32 0.5, %v3004_v62  ;;  %v12747_v4 = vpop.f32.mrb[89].mxu1 }
0x11c8   : > { %v3007_v5 = vpop.f32.mrb[90].mxu1 }
0x11c9   : > { %v2854_v6 = vpop.f32.mrb[84].mxu0  ;;  %v12748_v8 = vpop.f32.mrb[91].mxu1  ;;  %v3019_v9 = vsel %vm680_vm3, %v3012_v63, -inf }
0x11ca   : > { %3020 = vmax.xlane.f32.xlu0 %v3019_v9  ;;  %v12729_v10 = vpop.f32.mrb[85].mxu0 }
0x11cb   : > { %v2857_v11 = vpop.f32.mrb[86].mxu0 }
0x11cc   : > { %v12730_v12 = vpop.f32.mrb[87].mxu0 }
0x11d1   : > { %v2954_v13 = vpop.f32.mrb[88].mxu0 }
0x11d2   : > { %v3011_v15 = vmul.f32 0.5, %v2954_v13  ;;  %v12741_v17 = vpop.f32.mrb[89].mxu0 }
0x11d3   : > { %v2957_v20 = vpop.f32.mrb[90].mxu0 }
0x11d4   : > { %v12742_v21 = vpop.f32.mrb[91].mxu0  ;;  %v3016_v23 = vsel %vm680_vm3, %v3011_v15, -inf }
0x11d5   : > { %3017 = vmax.xlane.f32.xlu1 %v3016_v23 }
0x11e6   : > { %3049 = vrot.lane.b32.xlu1 %v13951_v16, %s16708_s20 }
0x1231   : > { %v3015_v26 = vpop.xlane.xlu0 %3014 }
0x1232   : > { %v3022_v27 = vsub.f32 %v3010_v54, %v3015_v26 }
0x1234   : > { %v3025_v28 = vmul.f32 1.442695, %v3022_v27 }
0x1236   : > { %13571 = vpow2.f32 %v3025_v28 }
0x1240   : > { %v13572_v32 = vpop.eup %13571 }
0x1241   : > { %v3031_v33 = vsel %vm680_vm3, %v13572_v32, 0.0 }
0x1242   : > { %3032 = vadd.xlane.f32.xlu0 %v3031_v33 }
0x1257   : > { %v3021_v34 = vpop.xlane.xlu0 %3020 }
0x1258   : > { %v3024_v37 = vsub.f32 %v3012_v63, %v3021_v34 }
0x125a   : > { %v3029_v38 = vmul.f32 1.442695, %v3024_v37 }
0x125c   : > { %13573 = vpow2.f32 %v3029_v38 }
0x1262   : > { %v3018_v40 = vpop.xlane.xlu1 %3017 }
0x1263   : > { %v3023_v47 = vsub.f32 %v3011_v15, %v3018_v40 }
0x1265   : > { %v3027_v48 = vmul.f32 1.442695, %v3023_v47 }
0x1266   : > { %v13574_v52 = vpop.eup %13573  ;;  %v3050_v53 = vpop.permute.xlu1 %3049 }
0x1267   : > { %13575 = vpow2.f32 %v3027_v48  ;;  %v3055_v16 = vsel %vm722_vm4, %v3050_v53, 0  ;;  %v3037_v54 = vsel %vm680_vm3, %v13574_v52, 0.0 }
0x1268   : > { %3038 = vadd.xlane.f32.xlu0 %v3037_v54  ;;  %12750 = vmatpush3.bf16.msra.mxu0 %v3055_v16 }
0x1269   : > { %12761 = vmatprep.subr.bf16.mxu0 %v13770_v7 }
0x1271   : > { %v13576_v56 = vpop.eup %13575 }
0x1272   : > { %v3034_v57 = vsel %vm680_vm3, %v13576_v56, 0.0 }
0x1273   : > { %3035 = vadd.xlane.f32.xlu1 %v3034_v57 }
0x127e   : > { %3097 = vrot.lane.b32.xlu0 %v13957_v18, %s16708_s20 }
0x1282   : > { %3200 = vrot.lane.b32.xlu0 %v14099_v49, %s16710_s21 }
0x1284   : > { %3145 = vrot.lane.b32.xlu1 %v13949_v14, %s16708_s20  ;;  %s16714_s20 = smov 20  }
0x1286   : > { %3212 = vrot.lane.b32.xlu0 %v14162_v19, %s16720_s16 }
0x1288   : > { %13154 = vrot.lane.b32.xlu1 %v13153_v45, %s16710_s21  ;;  %s16712_s21 = smov 24  }
0x128a   : > { %3224 = vrot.lane.b32.xlu0 %v14223_v35, %s16718_s15 }
0x128c   : > { %13159 = vrot.lane.b32.xlu1 %v13158_v1, %s16720_s16  ;;  %s16722_s16 = smov 28  }
0x128e   : > { %3236 = vrot.lane.b32.xlu0 %v14286_v22, %s16716_s30 }
0x1290   : > { %13164 = vrot.lane.b32.xlu1 %v13163_v31, %s16718_s15  ;;  %s16742_s15 = smov 88  }
0x1292   : > { %3248 = vrot.lane.b32.xlu0 %v14347_v55, %s16714_s20  ;;  %v13226_v55 = vld [vmem:[%s16659_s3 + $0x8] sm:$0xff]  }
0x1294   : > { %13169 = vrot.lane.b32.xlu1 %v13168_v3, %s16716_s30  ;;  %s16740_s30 = smov 124  }
0x1296   : > { %3260 = vrot.lane.b32.xlu0 %v2854_v6, %s16712_s21 }
0x1298   : > { %13174 = vrot.lane.b32.xlu1 %v13173_v51, %s16714_s20  ;;  %v13225_v51 = vld [vmem:[%s16659_s3] sm:$0xff]   ;;  %s16746_s20 = smov 116  }
0x129c   : > { %13179 = vrot.lane.b32.xlu1 %v13178_v46, %s16712_s21  ;;  %s16739_s21 = smov 92  }
0x12cf   : > { %v3033_v14 = vpop.xlane.xlu0 %3032 }
0x12d0   : > { %13577 = vrcp.f32 %v3033_v14 }
0x12da   : > { %v13578_v18 = vpop.eup %13577 }
0x12db   : > { %v3043_v39 = vmul.f32 %v13578_v18, %v13572_v32 }
0x12dd   : > { %v3046_v44 = vpack.c.bf16 %v3043_v39, %v3043_v39 }
0x12df   : > { %12752 = vmatmul.mubr.msk.bf16.vlgmr.msra.gmra.mrb[92].mxu0 %vm680_vm3, %v3046_v44 }
0x12e0   : > { %12763 = vmatprep.mubr.msk.bf16.mxu0 %vm13771_vm1, %v13770_v7 }
0x12f5   : > { %v3039_v45 = vpop.xlane.xlu0 %3038 }
0x12f6   : > { %13579 = vrcp.f32 %v3039_v45 }
0x12f9   : > { %v3098_v49 = vpop.permute.xlu0 %3097 }
0x12fa   : > { %v3103_v60 = vsel %vm722_vm4, %v3098_v49, 0 }
0x12fb   : > { %12756 = vmatpush3.bf16.msra.mxu1 %v3103_v60 }
0x12fc   : > { %12767 = vmatprep.subr.bf16.mxu1 %v13225_v51 }
0x12fd   : > { %v3201_v6 = vpop.permute.xlu0 %3200 }
0x12fe   : > { %v3279_v21 = vsel %vm532_vm2, %v14038_v43, %v3201_v6 }
0x1300   : > { %v13580_v0 = vpop.eup %13579  ;;  %v3036_v1 = vpop.xlane.xlu1 %3035 }
0x1301   : > { %13581 = vrcp.f32 %v3036_v1  ;;  %v3045_v19 = vmul.f32 %v13580_v0, %v13574_v52  ;;  %v3213_v9 = vpop.permute.xlu0 %3212 }
0x1302   : > { %v3282_v27 = vsel %vm680_vm3, %v3279_v21, %v3213_v9 }
0x1303   : > { %v3048_v31 = vpack.c.bf16 %v3045_v19, %v3045_v19 }
0x1304   : > { %v3146_v24 = vpop.permute.xlu1 %3145 }
0x1305   : > { %v3151_v30 = vsel %vm722_vm4, %v3146_v24, 0  ;;  %v3225_v11 = vpop.permute.xlu0 %3224 }
0x1306   : > { %12762 = vmatpush3.bf16.msra.mxu0 %v3151_v30  ;;  %v3286_v33 = vsel %vm3283_vm5, %v3282_v27, %v3225_v11 }
0x1308   : > { %v13155_v8 = vpop.permute.xlu1 %13154 }
0x1309   : > { %12764 = vmatmul.mubr.msk.bf16.vlgmr.msra.gmra.mrb[96].mxu0 %vm680_vm3, %v3048_v31  ;;  %v3237_v13 = vpop.permute.xlu0 %3236  ;;  %v13157_v23 = vunpack.i.h.bf16 %v13155_v8  ;;  %v13156_v26 = vunpack.i.l.bf16 %v13155_v8  ;;  %v13705_v8 = vld [vmem:[%s13933_s17 + $0x10] sm:$0xff] }
0x130a   : > { %v3290_v47 = vsel %vm3287_vm6, %v3286_v33, %v3237_v13 }
0x130b   : > { %v13582_v35 = vpop.eup %13581  ;;  %v3278_v43 = vsel %vm532_vm2, %v14035_v29, %v13157_v23  ;;  %v3277_v53 = vsel %vm532_vm2, %v14033_v25, %v13156_v26 }
0x130c   : > { %v3044_v59 = vmul.f32 %v13582_v35, %v13576_v56  ;;  %v13160_v10 = vpop.permute.xlu1 %13159 }
0x130d   : > { %v3249_v17 = vpop.permute.xlu0 %3248  ;;  %v13162_v28 = vunpack.i.h.bf16 %v13160_v10  ;;  %v13161_v32 = vunpack.i.l.bf16 %v13160_v10 }
0x130e   : > { %v3047_v2 = vpack.c.bf16 %v3044_v59, %v3044_v59  ;;  %v3294_v39 = vsel %vm3291_vm7, %v3290_v47, %v3249_v17  ;;  %v3455_v47 = vld [vmem:[%s16661_s5 + $0x40] sm:$0xff] }
0x130f   : > { %v3280_v56 = vsel %vm680_vm3, %v3277_v53, %v13161_v32  ;;  %v3281_v57 = vsel %vm680_vm3, %v3278_v43, %v13162_v28  ;;  %v3456_v43 = vld [vmem:[%s16661_s5 + $0x48] sm:$0xff] }
0x1310   : > { %12758 = vmatmul.mubr.msk.bf16.vlgmr.msra.gmra.mrb[92].mxu1 %vm680_vm3, %v3047_v2  ;;  %v13165_v12 = vpop.permute.xlu1 %13164 }
0x1311   : > { %12768 = vmatpush3.bf16.msra.mxu1 %v13225_v51  ;;  %v13167_v34 = vunpack.i.h.bf16 %v13165_v12  ;;  %v13166_v37 = vunpack.i.l.bf16 %v13165_v12  ;;  %v3261_v38 = vpop.permute.xlu0 %3260 }
0x1312   : > { %12769 = vmatprep.subr.bf16.mxu1 %v13226_v55  ;;  %v3298_v29 = vsel %vm3295_vm8, %v3294_v39, %v3261_v38  ;;  %v3472_v39 = vld [vmem:[%s16661_s5 + $0xc8] sm:$0xff] }
0x1313   : > { %v3284_v44 = vsel %vm3283_vm5, %v3280_v56, %v13166_v37  ;;  %v3285_v45 = vsel %vm3283_vm5, %v3281_v57, %v13167_v34  ;;  %v3463_v56 = vld [vmem:[%s16661_s5 + $0x80] sm:$0xff] }
0x1314   : > { %v13170_v15 = vpop.permute.xlu1 %13169  ;;  %v3471_v57 = vld [vmem:[%s16661_s5 + $0xc0] sm:$0xff] }
0x1315   : > { %12770 = vmatpush3.bf16.msra.mxu1 %v13226_v55  ;;  %v13172_v48 = vunpack.i.h.bf16 %v13170_v15  ;;  %v13171_v52 = vunpack.i.l.bf16 %v13170_v15 }
0x1317   : > { %v3288_v25 = vsel %vm3287_vm6, %v3284_v44, %v13171_v52  ;;  %v3289_v60 = vsel %vm3287_vm6, %v3285_v45, %v13172_v48  ;;  %v3448_v48 = vld [vmem:[%s16661_s5 + $0x8] sm:$0xff]  ;;  %v11104_v44 = vcombine.low %v3463_v56, %v3471_v57 }
0x1318   : > { %v13175_v20 = vpop.permute.xlu1 %13174 }
0x1319   : > { %v13177_v16 = vunpack.i.h.bf16 %v13175_v20  ;;  %v13176_v54 = vunpack.i.l.bf16 %v13175_v20 }
0x131b   : > { %v3292_v1 = vsel %vm3291_vm7, %v3288_v25, %v13176_v54  ;;  %v3293_v19 = vsel %vm3291_vm7, %v3289_v60, %v13177_v16  ;;  %v11090_v16 = vcombine.low %v3448_v48, %v3456_v43  ;;  %v11091_v54 = vcombine.high %v3448_v48, %v3456_v43  ;;  %v3449_v25 = vld [vmem:[%s16661_s5 + $0x10] sm:$0xff]  ;;  %v3475_v48 = vld [vmem:[%s16661_s5 + $0xe0] sm:$0xff]  ;;  %v3476_v43 = vld [vmem:[%s16661_s5 + $0xe8] sm:$0xff] }
0x131c   : > { %v13180_v40 = vpop.permute.xlu1 %13179  ;;  %v3457_v60 = vld [vmem:[%s16661_s5 + $0x50] sm:$0xff] }
0x131d   : > { %v13182_v14 = vunpack.i.h.bf16 %v13180_v40  ;;  %v13181_v18 = vunpack.i.l.bf16 %v13180_v40  ;;  %v3447_v40 = vld [vmem:[%s16661_s5] sm:$0xff]  ;;  %3780 = vmatprep.subr.bf16.mxu1 %v11091_v54 }
0x131e   : > { %v11089_v52 = vcombine.high %v3447_v40, %v3455_v47  ;;  %v11088_v53 = vcombine.low %v3447_v40, %v3455_v47  ;;  %v3467_v47 = vld [vmem:[%s16661_s5 + $0xa0] sm:$0xff] }
0x131f   : > { %v3296_v31 = vsel %vm3295_vm8, %v3292_v1, %v13181_v18  ;;  %v3297_v35 = vsel %vm3295_vm8, %v3293_v19, %v13182_v14  ;;  %v3464_v14 = vld [vmem:[%s16661_s5 + $0x88] sm:$0xff]  ;;  %v11105_v18 = vcombine.high %v3463_v56, %v3471_v57  ;;  %v11093_v1 = vcombine.high %v3449_v25, %v3457_v60  ;;  %v3458_v19 = vld [vmem:[%s16661_s5 + $0x58] sm:$0xff]  ;;  %v3453_v57 = vld [vmem:[%s16661_s5 + $0x30] sm:$0xff] }
0x1320   : > { %3729 = vmatprep.subr.bf16.mxu0 %v11089_v52  ;;  %v11106_v45 = vcombine.low %v3464_v14, %v3472_v39  ;;  %v3468_v52 = vld [vmem:[%s16661_s5 + $0xa8] sm:$0xff]  ;;  %v11113_v54 = vcombine.high %v3467_v47, %v3475_v48 }
0x1321   : > { %3730 = vmatpush1.bf16.msra.mxu0 %v11088_v53  ;;  %v11115_v56 = vcombine.high %v3468_v52, %v3476_v43 }
0x1322   : > { %3731 = vmatprep.subr.bf16.mxu0 %v11105_v18  ;;  %v3454_v18 = vld [vmem:[%s16661_s5 + $0x38] sm:$0xff] }
0x1325   : > { %3732 = vmatpush1.bf16.msra.mxu0 %v11104_v44  ;;  %v11112_v44 = vcombine.low %v3467_v47, %v3475_v48  ;;  %v13260_v47 = vld [vmem:[%s16663_s7 + $0x1c0] sm:$0xff]   ;;  %v3483_v48 = vlaneseq }
0x1326   : > { %3831 = vmatprep.subr.bf16.mxu0 %v11093_v1  ;;  %v3470_v1 = vld [vmem:[%s16661_s5 + $0xb8] sm:$0xff] }
0x13b2   : > { %v3091_v3 = vpop.f32.mrb[92].mxu0 }
0x13b3   : > { %v12753_v22 = vpop.f32.mrb[93].mxu0 }
0x13b4   : > { %v3094_v42 = vpop.f32.mrb[94].mxu0 }
0x13b5   : > { %v12754_v50 = vpop.f32.mrb[95].mxu0 }
0x13b6   : > { %v11081_v50 = vld [vmem:[%s16660_s4] ss:$0 sm:$0xff] }
0x13dc   : > { %v3187_v36 = vpop.f32.mrb[96].mxu0 }
0x13dd   : > { %3272 = vrot.lane.b32.xlu0 %v3187_v36, %s16722_s16  ;;  %v12765_v41 = vpop.f32.mrb[97].mxu0 }
0x13de   : > { %v3190_v46 = vpop.f32.mrb[98].mxu0 }
0x13df   : > { %v12766_v58 = vpop.f32.mrb[99].mxu0 }
0x13e3   : > { %v3139_v61 = vpop.f32.mrb[92].mxu1 }
0x13e4   : > { %v13183_v62 = vpack.i.bf16 %v3139_v61, %v3091_v3  ;;  %v12759_v63 = vpop.f32.mrb[93].mxu1  ;;  %v13703_v61 = vld [vmem:[%s13933_s17] sm:$0xff] }
0x13e5   : > { %v3142_v4 = vpop.f32.mrb[94].mxu1 }
0x13e6   : > { %v12760_v5 = vpop.f32.mrb[95].mxu1  ;;  %13184 = vrot.lane.b32.xlu1 %v13183_v62, %s16722_s16  ;;  %v13704_v4 = vld [vmem:[%s13933_s17 + $0x8] sm:$0xff]  ;;  %s16741_s16 = smov 60   ;;  %s16745_s17 = smov 84  }
0x144f   : > { %v3273_v49 = vpop.permute.xlu0 %3272 }
0x1450   : > { %v3302_v59 = vsel %vm3299_vm9, %v3298_v29, %v3273_v49  ;;  %v11107_v49 = vcombine.high %v3464_v14, %v3472_v39  ;;  %v13802_v29 = vmov 0   ;;  %v3461_v14 = vld [vmem:[%s16661_s5 + $0x70] sm:$0xff]  ;;  %v3462_v39 = vld [vmem:[%s16661_s5 + $0x78] sm:$0xff] }
0x1451   : > { %v3304_v42 = vpack.c.bf16 %v3302_v59, %v3302_v59  ;;  %3761 = vmatprep.mubr.bf16.mxu0 %v13802_v29 }
0x1458   : > { %v13185_v0 = vpop.permute.xlu1 %13184 }
0x1459   : > { %v13187_v24 = vunpack.i.h.bf16 %v13185_v0  ;;  %v13186_v30 = vunpack.i.l.bf16 %v13185_v0  ;;  %v3450_v0 = vld [vmem:[%s16661_s5 + $0x18] sm:$0xff] }
0x145b   : > { %v3301_v2 = vsel %vm3299_vm9, %v3297_v35, %v13187_v24  ;;  %v3300_v3 = vsel %vm3299_vm9, %v3296_v31, %v13186_v30  ;;  %v11092_v24 = vcombine.low %v3449_v25, %v3457_v60  ;;  %v11094_v30 = vcombine.low %v3450_v0, %v3458_v19  ;;  %v3469_v60 = vld [vmem:[%s16661_s5 + $0xb0] sm:$0xff] }
0x145c   : > { %v3303_v22 = vpack.c.bf16 %v3301_v2, %v3300_v3  ;;  %v11095_v31 = vcombine.high %v3450_v0, %v3458_v19  ;;  %v11103_v25 = vcombine.high %v3454_v18, %v3462_v39  ;;  %v3477_v0 = vld [vmem:[%s16661_s5 + $0xf0] sm:$0xff]  ;;  %v3478_v19 = vld [vmem:[%s16661_s5 + $0xf8] sm:$0xff] }
0x145e   : > { %12771 = vmatprep.mubr.msk.bf16.mxu1 %vm471_vm0, %v3303_v22 }
0x145f   : > { %12772 = vmatmul.mubr.msk.bf16.vlgmr.msra.gmra.mrb[96].mxu1 %vm471_vm0, %v3304_v42 }
0x1460   : > { %3781 = vmatpush1.bf16.msra.mxu1 %v11090_v16  ;;  %3812 = vmatprep.mubr.bf16.mxu1 %v13802_v29 }
0x1461   : > { %3782 = vmatprep.subr.bf16.mxu1 %v11107_v49  ;;  %v11101_v49 = vcombine.high %v3453_v57, %v3461_v14 }
0x1464   : > { %3783 = vmatpush1.bf16.msra.mxu1 %v11106_v45  ;;  %v11114_v45 = vcombine.low %v3468_v52, %v3476_v43  ;;  %v3484_v52 = vshrl.u32 %v3483_v48, 7 }
0x1465   : > { %3882 = vmatprep.subr.bf16.mxu1 %v11095_v31  ;;  %v11117_v31 = vcombine.high %v3469_v60, %v3477_v0 }
0x1466   : > { %v14792_v43 = vsub.s32 0, %v3484_v52 }
0x1532   : > { %v12773_v51 = vpop.f32.mrb[96].mxu1 }
0x1533   : > { %v3368_v55 = vpop.f32.mrb[97].mxu1  ;;  %v3377_v58 = vadd.f32 %v12773_v51, %v11081_v50 }
0x1534   : > { %v3369_v36 = vadd.f32 %v11081_v50, %v3368_v55  ;;  %v12774_v41 = vpop.f32.mrb[98].mxu1 }
0x1535   : > { %v3371_v46 = vpop.f32.mrb[99].mxu1  ;;  %v3384_v9 = vadd.f32 %v13705_v8, %v3377_v58  ;;  %v11086_v41 = vld [vmem:[%s16665_s9] ss:$0 sm:$0xff] }
0x1536   : > { %v3382_v62 = vadd.f32 %v13703_v61, %v3369_v36  ;;  %v3372_v63 = vadd.f32 %v11081_v50, %v3371_v46 }
0x1537   : > { %v3393_v11 = vsel %vm471_vm0, %v3384_v9, 0.0 }
0x1538   : > { %v3383_v5 = vadd.f32 %v13704_v4, %v3372_v63  ;;  %v3387_v6 = vsel %vm471_vm0, %v3382_v62, 0.0  ;;  %v11087_v63 = vld [vmem:[%s16666_s10] ss:$0 sm:$0xff] }
0x1539   : > { %3388 = vadd.xlane.f32.xlu1 %v3387_v6  ;;  %v3465_v6 = vld [vmem:[%s16661_s5 + $0x90] sm:$0xff] }
0x153a   : > { %v3390_v10 = vsel %vm471_vm0, %v3383_v5, 0.0 }
0x153b   : > { %3391 = vadd.xlane.f32.xlu0 %v3390_v10 }
0x153f   : > { %3394 = vadd.xlane.f32.xlu0 %v3393_v11  ;;  %v3473_v11 = vld [vmem:[%s16661_s5 + $0xd0] sm:$0xff] }
0x15c6   : > { %v3389_v12 = vpop.xlane.xlu1 %3388 }
0x15c7   : > { %v3397_v13 = vmul.f32 0.03125, %v3389_v12  ;;  %v3466_v12 = vld [vmem:[%s16661_s5 + $0x98] sm:$0xff] }
0x15c8   : > { %v3392_v15 = vpop.xlane.xlu0 %3391 }
0x15c9   : > { %v14508_v17 = vsub.f32 %v3382_v62, %v3397_v13  ;;  %v3398_v20 = vmul.f32 0.03125, %v3392_v15  ;;  %v3474_v13 = vld [vmem:[%s16661_s5 + $0xd8] sm:$0xff] }
0x15cb   : > { %v14510_v21 = vsub.f32 %v3383_v5, %v3398_v20  ;;  %v3403_v23 = vmul.f32 %v14508_v17, %v14508_v17  ;;  %v11109_v20 = vcombine.high %v3465_v6, %v3473_v11 }
0x15cc   : > { %v3395_v26 = vpop.xlane.xlu0 %3394 }
0x15cd   : > { %v3399_v27 = vmul.f32 0.03125, %v3395_v26  ;;  %v3406_v28 = vsel %vm471_vm0, %v3403_v23, 0.0  ;;  %v3404_v32 = vmul.f32 %v14510_v21, %v14510_v21  ;;  %v3451_v23 = vld [vmem:[%s16661_s5 + $0x20] sm:$0xff] }
0x15ce   : > { %3407 = vadd.xlane.f32.xlu1 %v3406_v28  ;;  %v3459_v26 = vld [vmem:[%s16661_s5 + $0x60] sm:$0xff]  ;;  %v3460_v28 = vld [vmem:[%s16661_s5 + $0x68] sm:$0xff] }
0x15cf   : > { %v14517_v33 = vsub.f32 %v3384_v9, %v3399_v27  ;;  %v3409_v34 = vsel %vm471_vm0, %v3404_v32, 0.0  ;;  %v3452_v27 = vld [vmem:[%s16661_s5 + $0x28] sm:$0xff]  ;;  %v11096_v53 = vcombine.low %v3451_v23, %v3459_v26 }
0x15d0   : > { %3410 = vadd.xlane.f32.xlu0 %v3409_v34  ;;  %v11110_v34 = vcombine.low %v3466_v12, %v3474_v13  ;;  %v11098_v16 = vcombine.low %v3452_v27, %v3460_v28 }
0x15d1   : > { %v3405_v37 = vmul.f32 %v14517_v33, %v14517_v33 }
0x15d3   : > { %v3412_v38 = vsel %vm471_vm0, %v3405_v37, 0.0  ;;  %v11097_v37 = vcombine.high %v3451_v23, %v3459_v26  ;;  %v13251_v23 = vld [vmem:[%s16663_s7 + $0x70] sm:$0xff]  }
0x15d4   : > { %3413 = vadd.xlane.f32.xlu1 %v3412_v38  ;;  %v11099_v38 = vcombine.high %v3452_v27, %v3460_v28  ;;  %v13252_v26 = vld [vmem:[%s16663_s7 + $0xf0] sm:$0xff]  }
0x15d5   : > { %v13253_v27 = vld [vmem:[%s16663_s7 + $0x30] sm:$0xff]  }
0x15d6   : > { %v13254_v28 = vld [vmem:[%s16663_s7 + $0xb0] sm:$0xff]  }
0x165b   : > { %v3408_v35 = vpop.xlane.xlu1 %3407 }
0x165c   : > { %v3415_v59 = vmul.f32 0.03125, %v3408_v35  ;;  %v11119_v35 = vcombine.high %v3470_v1, %v3478_v19 }
0x165d   : > { %v3411_v2 = vpop.xlane.xlu0 %3410 }
0x165e   : > { %v3418_v3 = vadd.f32 1e-05, %v3415_v59  ;;  %v3416_v22 = vmul.f32 0.03125, %v3411_v2  ;;  %v11116_v59 = vcombine.low %v3469_v60, %v3477_v0  ;;  %v11118_v2 = vcombine.low %v3470_v1, %v3478_v19 }
0x1660   : > { %13583 = vrsqrt.f32 %v3418_v3  ;;  %v3419_v42 = vadd.f32 1e-05, %v3416_v22  ;;  %v13227_v3 = vld [vmem:[%s16663_s7 + $0x40] sm:$0xff]  }
0x1661   : > { %v3414_v50 = vpop.xlane.xlu1 %3413  ;;  %v13228_v22 = vld [vmem:[%s16663_s7 + $0xc0] sm:$0xff]  }
0x1662   : > { %13585 = vrsqrt.f32 %v3419_v42  ;;  %v3417_v51 = vmul.f32 0.03125, %v3414_v50  ;;  %v13229_v42 = vld [vmem:[%s16663_s7] sm:$0xff]  }
0x1663   : > { %v13230_v50 = vld [vmem:[%s16663_s7 + $0x80] sm:$0xff]  }
0x1664   : > { %v3420_v55 = vadd.f32 1e-05, %v3417_v51  ;;  %v13231_v51 = vld [vmem:[%s16663_s7 + $0x48] sm:$0xff]  }
0x1666   : > { %13587 = vrsqrt.f32 %v3420_v55  ;;  %v13232_v55 = vld [vmem:[%s16663_s7 + $0xc8] sm:$0xff]  }
0x166a   : > { %v13584_v36 = vpop.eup %13583 }
0x166b   : > { %v3424_v46 = vmul.f32 %v13584_v36, %v14508_v17  ;;  %v13233_v36 = vld [vmem:[%s16663_s7 + $0x8] sm:$0xff]  }
0x166c   : > { %v13586_v58 = vpop.eup %13585 }
0x166d   : > { %v3433_v61 = vmul.f32 %v11086_v41, %v3424_v46  ;;  %v3425_v62 = vmul.f32 %v13586_v58, %v14510_v21  ;;  %v11111_v21 = vcombine.high %v3466_v12, %v3474_v13  ;;  %v13235_v46 = vld [vmem:[%s16663_s7 + $0x50] sm:$0xff]   ;;  %v13245_v12 = vld [vmem:[%s16663_s7 + $0x20] sm:$0xff]  }
0x166e   : > { %v13236_v58 = vld [vmem:[%s16663_s7 + $0xd0] sm:$0xff]   ;;  %v13246_v13 = vld [vmem:[%s16663_s7 + $0xa0] sm:$0xff]  }
0x166f   : > { %v3434_v4 = vmul.f32 %v11086_v41, %v3425_v62  ;;  %v14572_v8 = vadd.f32 %v11087_v63, %v3433_v61  ;;  %v13237_v61 = vld [vmem:[%s16663_s7 + $0x10] sm:$0xff]  }
0x1670   : > { %v13588_v5 = vpop.eup %13587  ;;  %v13238_v62 = vld [vmem:[%s16663_s7 + $0x90] sm:$0xff]  }
0x1671   : > { %v14574_v9 = vadd.f32 %v11087_v63, %v3434_v4  ;;  %v3426_v10 = vmul.f32 %v13588_v5, %v14517_v33  ;;  %v11108_v33 = vcombine.low %v3465_v6, %v3473_v11  ;;  %v13240_v4 = vld [vmem:[%s16663_s7 + $0xd8] sm:$0xff]   ;;  %v13244_v11 = vld [vmem:[%s16663_s7 + $0xe0] sm:$0xff]  }
0x1672   : > { %v13241_v5 = vld [vmem:[%s16663_s7 + $0x18] sm:$0xff]  }
0x1673   : > { %v14588_v15 = vpack.c.bf16 %v14574_v9, %v14572_v8  ;;  %v3435_v17 = vmul.f32 %v11086_v41, %v3426_v10  ;;  %v13234_v41 = vld [vmem:[%s16663_s7 + $0x88] sm:$0xff]   ;;  %v13242_v6 = vld [vmem:[%s16663_s7 + $0x98] sm:$0xff]   ;;  %v13243_v10 = vld [vmem:[%s16663_s7 + $0x60] sm:$0xff]  }
0x1675   : > { %11120 = vmatmul.mubr.msk.bf16.vlgmr.msra.gmra.mrb[100].mxu0 %vm471_vm0, %v14588_v15  ;;  %11122 = vmatmul.mubr.msk.bf16.vlgmr.msra.gmra.mrb[100].mxu1 %vm471_vm0, %v14588_v15  ;;  %v14608_v32 = vadd.f32 %v11087_v63, %v3435_v17  ;;  %v13239_v63 = vld [vmem:[%s16663_s7 + $0x58] sm:$0xff]   ;;  %v13248_v17 = vld [vmem:[%s16663_s7 + $0xe8] sm:$0xff]  }
0x1676   : > { %3771 = vmatprep.mubr.bf16.mxu0 %v13802_v29  ;;  %3822 = vmatprep.mubr.bf16.mxu1 %v13802_v29 }
0x1677   : > { %3832 = vmatpush1.bf16.msra.mxu0 %v11092_v24  ;;  %3883 = vmatpush1.bf16.msra.mxu1 %v11094_v30  ;;  %v14612_v40 = vpack.c.bf16 %v14608_v32, %v14608_v32  ;;  %v11100_v24 = vcombine.low %v3453_v57, %v3461_v14  ;;  %v11102_v30 = vcombine.low %v3454_v18, %v3462_v39 }
0x1678   : > { %3833 = vmatprep.subr.bf16.mxu0 %v11109_v20  ;;  %3884 = vmatprep.subr.bf16.mxu1 %v11111_v21  ;;  %v13249_v20 = vld [vmem:[%s16663_s7 + $0x28] sm:$0xff]  }
0x1679   : > { %v13250_v21 = vld [vmem:[%s16663_s7 + $0xa8] sm:$0xff]  }
0x167b   : > { %3834 = vmatpush1.bf16.msra.mxu0 %v11108_v33  ;;  %3885 = vmatpush1.bf16.msra.mxu1 %v11110_v34  ;;  %v13255_v33 = vld [vmem:[%s16663_s7 + $0x78] sm:$0xff]  }
0x167c   : > { %3933 = vmatprep.subr.bf16.mxu0 %v11097_v37  ;;  %3984 = vmatprep.subr.bf16.mxu1 %v11099_v38  ;;  %v13256_v34 = vld [vmem:[%s16663_s7 + $0xf8] sm:$0xff]  }
0x167d   : > { %11121 = vmatmul.mubr.msk.bf16.gmra.mrb[104].mxu0 %vm471_vm0, %v14612_v40  ;;  %11123 = vmatmul.mubr.msk.bf16.gmra.mrb[104].mxu1 %vm471_vm0, %v14612_v40  ;;  %v13257_v37 = vld [vmem:[%s16663_s7 + $0x38] sm:$0xff]  }
0x167e   : > { %3863 = vmatprep.mubr.bf16.mxu0 %v13802_v29  ;;  %3914 = vmatprep.mubr.bf16.mxu1 %v13802_v29  ;;  %v13258_v38 = vld [vmem:[%s16663_s7 + $0xb8] sm:$0xff]  }
0x1685   : > { %11124 = vmatmul.mubr.msk.bf16.vlgmr.msra.gmra.mrb[108].mxu0 %vm471_vm0, %v14588_v15  ;;  %11126 = vmatmul.mubr.msk.bf16.vlgmr.msra.gmra.mrb[108].mxu1 %vm471_vm0, %v14588_v15 }
0x1686   : > { %3873 = vmatprep.mubr.bf16.mxu0 %v13802_v29  ;;  %3924 = vmatprep.mubr.bf16.mxu1 %v13802_v29 }
0x1687   : > { %3934 = vmatpush1.bf16.msra.mxu0 %v11096_v53  ;;  %3985 = vmatpush1.bf16.msra.mxu1 %v11098_v16  ;;  %v14794_v53 = vsub.s32 2, %v3484_v52  ;;  %v14799_v16 = vld [vmem:[%s16662_s6] sm:$0xff] }
0x1688   : > { %3935 = vmatprep.subr.bf16.mxu0 %v11113_v54  ;;  %3986 = vmatprep.subr.bf16.mxu1 %v11115_v56  ;;  %v14801_v54 = vsub.s32 1, %v3484_v52  ;;  %v14803_v56 = vsub.s32 3, %v3484_v52  ;;  %v3486_v57 = vrot.slane %v14799_v16, %v14792_v43 }
0x1689   : > { %v3494_v14 = vrot.slane %v14799_v16, %v14794_v53 }
0x168a   : > { %v3490_v18 = vrot.slane %v14799_v16, %v14801_v54  ;;  %v3498_v39 = vrot.slane %v14799_v16, %v14803_v56 }
0x168b   : > { %3936 = vmatpush1.bf16.msra.mxu0 %v11112_v44  ;;  %3987 = vmatpush1.bf16.msra.mxu1 %v11114_v45 }
0x168c   : > { %4035 = vmatprep.subr.bf16.mxu0 %v11101_v49  ;;  %4086 = vmatprep.subr.bf16.mxu1 %v11103_v25 }
0x168d   : > { %11125 = vmatmul.mubr.msk.bf16.gmra.mrb[112].mxu0 %vm471_vm0, %v14612_v40  ;;  %11127 = vmatmul.mubr.msk.bf16.gmra.mrb[112].mxu1 %vm471_vm0, %v14612_v40 }
0x168e   : > { %3965 = vmatprep.mubr.bf16.mxu0 %v13802_v29  ;;  %4016 = vmatprep.mubr.bf16.mxu1 %v13802_v29 }
0x1695   : > { %11128 = vmatmul.mubr.msk.bf16.vlgmr.msra.gmra.mrb[116].mxu0 %vm471_vm0, %v14588_v15  ;;  %11130 = vmatmul.mubr.msk.bf16.vlgmr.msra.gmra.mrb[116].mxu1 %vm471_vm0, %v14588_v15 }
0x1696   : > { %3975 = vmatprep.mubr.bf16.mxu0 %v13802_v29  ;;  %4026 = vmatprep.mubr.bf16.mxu1 %v13802_v29 }
0x1697   : > { %4036 = vmatpush1.bf16.msra.mxu0 %v11100_v24  ;;  %4087 = vmatpush1.bf16.msra.mxu1 %v11102_v30 }
0x1698   : > { %4037 = vmatprep.subr.bf16.mxu0 %v11117_v31  ;;  %4088 = vmatprep.subr.bf16.mxu1 %v11119_v35 }
0x169b   : > { %4038 = vmatpush1.bf16.msra.mxu0 %v11116_v59  ;;  %4089 = vmatpush1.bf16.msra.mxu1 %v11118_v2 }
0x169c   : > { %11919 = vmatprep.subr.bf16.mxu0 %v13227_v3  ;;  %11947 = vmatprep.subr.bf16.mxu1 %v13228_v22 }
0x169d   : > { %11129 = vmatmul.mubr.msk.bf16.gmra.mrb[120].mxu0 %vm471_vm0, %v14612_v40  ;;  %11131 = vmatmul.mubr.msk.bf16.gmra.mrb[120].mxu1 %vm471_vm0, %v14612_v40 }
0x169e   : > { %4067 = vmatprep.mubr.bf16.mxu0 %v13802_v29  ;;  %4118 = vmatprep.mubr.bf16.mxu1 %v13802_v29 }
0x16a5   : > { %11132 = vmatmul.mubr.msk.bf16.vlgmr.msra.gmra.mrb[124].mxu0 %vm471_vm0, %v14588_v15  ;;  %11134 = vmatmul.mubr.msk.bf16.vlgmr.msra.gmra.mrb[124].mxu1 %vm471_vm0, %v14588_v15  ;;  %v13247_v15 = vld [vmem:[%s16663_s7 + $0x68] sm:$0xff]  }
0x16a6   : > { %4077 = vmatprep.mubr.bf16.mxu0 %v13802_v29  ;;  %4128 = vmatprep.mubr.bf16.mxu1 %v13802_v29 }
0x16a7   : > { %11920 = vmatpush3.bf16.msra.mxu0 %v13229_v42  ;;  %11948 = vmatpush3.bf16.msra.mxu1 %v13230_v50 }
0x16a8   : > { %11921 = vmatprep.subr.bf16.mxu0 %v13231_v51  ;;  %11949 = vmatprep.subr.bf16.mxu1 %v13232_v55 }
0x16ab   : > { %11922 = vmatpush3.bf16.msra.mxu0 %v13233_v36  ;;  %11950 = vmatpush3.bf16.msra.mxu1 %v13234_v41 }
0x16ac   : > { %11923 = vmatprep.subr.bf16.mxu0 %v13235_v46  ;;  %11951 = vmatprep.subr.bf16.mxu1 %v13236_v58 }
0x16ad   : > { %11133 = vmatmul.mubr.msk.bf16.gmra.mrb[128].mxu0 %vm471_vm0, %v14612_v40  ;;  %11135 = vmatmul.mubr.msk.bf16.gmra.mrb[128].mxu1 %vm471_vm0, %v14612_v40  ;;  %v13259_v40 = vld [vmem:[%s16663_s7 + $0x140] sm:$0xff]  }
0x16af   : > { %11924 = vmatpush3.bf16.msra.mxu0 %v13237_v61  ;;  %11952 = vmatpush3.bf16.msra.mxu1 %v13238_v62 }
0x16b0   : > { %11925 = vmatprep.subr.bf16.mxu0 %v13239_v63  ;;  %11953 = vmatprep.subr.bf16.mxu1 %v13240_v4 }
0x16b3   : > { %11926 = vmatpush3.bf16.msra.mxu0 %v13241_v5  ;;  %11954 = vmatpush3.bf16.msra.mxu1 %v13242_v6 }
0x16b4   : > { %11927 = vmatprep.subr.bf16.mxu0 %v13243_v10  ;;  %11955 = vmatprep.subr.bf16.mxu1 %v13244_v11  ;;  %v13261_v10 = vld [vmem:[%s16663_s7 + $0x100] sm:$0xff]  }
0x16b5   : > { %v13262_v11 = vld [vmem:[%s16663_s7 + $0x180] sm:$0xff]  }
0x16b7   : > { %11928 = vmatpush3.bf16.msra.mxu0 %v13245_v12  ;;  %11956 = vmatpush3.bf16.msra.mxu1 %v13246_v13 }
0x16b8   : > { %11929 = vmatprep.subr.bf16.mxu0 %v13247_v15  ;;  %11957 = vmatprep.subr.bf16.mxu1 %v13248_v17 }
0x16bb   : > { %11930 = vmatpush3.bf16.msra.mxu0 %v13249_v20  ;;  %11958 = vmatpush3.bf16.msra.mxu1 %v13250_v21  ;;  %v13263_v20 = vld [vmem:[%s16663_s7 + $0x148] sm:$0xff]  }
0x16bc   : > { %11931 = vmatprep.subr.bf16.mxu0 %v13251_v23  ;;  %11959 = vmatprep.subr.bf16.mxu1 %v13252_v26  ;;  %v13264_v21 = vld [vmem:[%s16663_s7 + $0x1c8] sm:$0xff]   ;;  %v14825_v23 = vsub.s32 4, %v3484_v52  ;;  %v14827_v26 = vsub.s32 6, %v3484_v52 }
0x16bf   : > { %11932 = vmatpush3.bf16.msra.mxu0 %v13253_v27  ;;  %11960 = vmatpush3.bf16.msra.mxu1 %v13254_v28 }
0x16c0   : > { %11933 = vmatprep.subr.bf16.mxu0 %v13255_v33  ;;  %11961 = vmatprep.subr.bf16.mxu1 %v13256_v34 }
0x16c3   : > { %11934 = vmatpush3.bf16.msra.mxu0 %v13257_v37  ;;  %11962 = vmatpush3.bf16.msra.mxu1 %v13258_v38  ;;  %v14829_v37 = vsub.s32 5, %v3484_v52  ;;  %v14831_v38 = vsub.s32 7, %v3484_v52  ;;  %v14841_v52 = vrot.slane %v14799_v16, %v14825_v23 }
0x16c4   : > { %11975 = vmatprep.subr.bf16.mxu0 %v13259_v40  ;;  %12003 = vmatprep.subr.bf16.mxu1 %v13260_v47 }
0x1748   : > { %v3763_v44 = vpop.f32.mrb[100].mxu0  ;;  %v3814_v45 = vpop.f32.mrb[100].mxu1 }
0x1749   : > { %v3764_v49 = vadd.f32 %v3763_v44, %v3486_v57  ;;  %v3815_v25 = vadd.f32 %v3814_v45, %v3494_v14  ;;  %v3765_v60 = vpop.f32.mrb[101].mxu0  ;;  %v3816_v0 = vpop.f32.mrb[101].mxu1  ;;  %v14845_v45 = vrot.slane %v14799_v16, %v14827_v26 }
0x174a   : > { %v3766_v1 = vadd.f32 %v3765_v60, %v3490_v18  ;;  %v3817_v19 = vadd.f32 %v3816_v0, %v3498_v39  ;;  %v3767_v24 = vpop.f32.mrb[102].mxu0  ;;  %v3818_v30 = vpop.f32.mrb[102].mxu1  ;;  %v14849_v60 = vrot.slane %v14799_v16, %v14829_v37  ;;  %v14853_v0 = vrot.slane %v14799_v16, %v14831_v38  ;;  %v13270_v16 = vld [vmem:[%s16663_s7 + $0x190] sm:$0xff]  }
0x174b   : > { %v3768_v31 = vadd.f32 %v3767_v24, %v3486_v57  ;;  %v3819_v35 = vadd.f32 %v3818_v30, %v3494_v14  ;;  %v3769_v59 = vpop.f32.mrb[103].mxu0  ;;  %v3820_v2 = vpop.f32.mrb[103].mxu1  ;;  %v4137_v42 = vmax.f32 %v3764_v49, 0.0  ;;  %v4139_v50 = vmax.f32 %v3815_v25, 0.0 }
0x174c   : > { %v3770_v3 = vadd.f32 %v3769_v59, %v3490_v18  ;;  %v3821_v22 = vadd.f32 %v3820_v2, %v3498_v39  ;;  %v4138_v36 = vmax.f32 %v3766_v1, 0.0  ;;  %v4140_v41 = vmax.f32 %v3817_v19, 0.0  ;;  %v13267_v1 = vld [vmem:[%s16663_s7 + $0x150] sm:$0xff]  }
0x174d   : > { %v4153_v51 = vmax.f32 %v3768_v31, 0.0  ;;  %v4155_v55 = vmax.f32 %v3819_v35, 0.0  ;;  %v13268_v19 = vld [vmem:[%s16663_s7 + $0x1d0] sm:$0xff]  }
0x174e   : > { %v4154_v46 = vmax.f32 %v3770_v3, 0.0  ;;  %v4156_v58 = vmax.f32 %v3821_v22, 0.0  ;;  %v13269_v35 = vld [vmem:[%s16663_s7 + $0x110] sm:$0xff]  }
0x174f   : > { %v4185_v61 = vpack.c.bf16 %v4153_v51, %v4137_v42  ;;  %v4187_v62 = vpack.c.bf16 %v4155_v55, %v4139_v50  ;;  %v13271_v50 = vld [vmem:[%s16663_s7 + $0x158] sm:$0xff]  }
0x1750   : > { %v4186_v63 = vpack.c.bf16 %v4154_v46, %v4138_v36  ;;  %v4188_v4 = vpack.c.bf16 %v4156_v58, %v4140_v41  ;;  %v3773_v5 = vpop.f32.mrb[104].mxu0  ;;  %v3824_v6 = vpop.f32.mrb[104].mxu1  ;;  %v13272_v51 = vld [vmem:[%s16663_s7 + $0x1d8] sm:$0xff]  }
0x1751   : > { %v3774_v12 = vadd.f32 %v3773_v5, %v3486_v57  ;;  %v3825_v13 = vadd.f32 %v3824_v6, %v3494_v14  ;;  %v3775_v15 = vpop.f32.mrb[105].mxu0  ;;  %v3826_v17 = vpop.f32.mrb[105].mxu1  ;;  %v13273_v6 = vld [vmem:[%s16663_s7 + $0x118] sm:$0xff]  }
0x1752   : > { %v3776_v27 = vadd.f32 %v3775_v15, %v3490_v18  ;;  %v3827_v28 = vadd.f32 %v3826_v17, %v3498_v39  ;;  %v3777_v33 = vpop.f32.mrb[106].mxu0  ;;  %v3828_v34 = vpop.f32.mrb[106].mxu1  ;;  %5280 = vmatprep.mubr.bf16.mxu0 %v4186_v63  ;;  %5328 = vmatprep.mubr.bf16.mxu1 %v4188_v4  ;;  %v13265_v18 = vld [vmem:[%s16663_s7 + $0x108] sm:$0xff]   ;;  %v13275_v17 = vld [vmem:[%s16663_s7 + $0x160] sm:$0xff]  }
0x1753   : > { %v3778_v40 = vpop.f32.mrb[107].mxu0  ;;  %v3829_v47 = vpop.f32.mrb[107].mxu1  ;;  %5281 = vmatmul.mubr.bf16.vlgmr.msra.gmra.mrb[132].mxu0 %v4185_v61  ;;  %5329 = vmatmul.mubr.bf16.vlgmr.msra.gmra.mrb[132].mxu1 %v4187_v62  ;;  %v4169_v48 = vmax.f32 %v3774_v12, 0.0  ;;  %v13266_v39 = vld [vmem:[%s16663_s7 + $0x188] sm:$0xff]   ;;  %v4171_v44 = vmax.f32 %v3825_v13, 0.0 }
0x1754   : > { %v4170_v57 = vmax.f32 %v3776_v27, 0.0  ;;  %v4172_v14 = vmax.f32 %v3827_v28, 0.0  ;;  %11976 = vmatpush3.bf16.msra.mxu0 %v13261_v10  ;;  %12004 = vmatpush3.bf16.msra.mxu1 %v13262_v11  ;;  %v13274_v10 = vld [vmem:[%s16663_s7 + $0x198] sm:$0xff]  }
0x1755   : > { %11977 = vmatprep.subr.bf16.mxu0 %v13263_v20  ;;  %12005 = vmatprep.subr.bf16.mxu1 %v13264_v21  ;;  %v4201_v24 = vpack.c.bf16 %v4169_v48, %v4169_v48  ;;  %v4203_v59 = vpack.c.bf16 %v4171_v44, %v4171_v44  ;;  %v13276_v20 = vld [vmem:[%s16663_s7 + $0x1e0] sm:$0xff]  }
0x1756   : > { %v4202_v49 = vpack.c.bf16 %v4170_v57, %v4170_v57  ;;  %v4204_v25 = vpack.c.bf16 %v4172_v14, %v4172_v14 }
0x1758   : > { %11978 = vmatpush3.bf16.msra.mxu0 %v13265_v18  ;;  %12006 = vmatpush3.bf16.msra.mxu1 %v13266_v39  ;;  %v3865_v30 = vpop.f32.mrb[108].mxu0  ;;  %v3916_v31 = vpop.f32.mrb[108].mxu1  ;;  %v13277_v18 = vld [vmem:[%s16663_s7 + $0x120] sm:$0xff]  }
0x1759   : > { %v3866_v2 = vadd.f32 %v3865_v30, %v14841_v52  ;;  %v3917_v3 = vadd.f32 %v3916_v31, %v14845_v45  ;;  %5288 = vmatprep.mubr.bf16.mxu0 %v4202_v49  ;;  %5336 = vmatprep.mubr.bf16.mxu1 %v4204_v25  ;;  %v3867_v22 = vpop.f32.mrb[109].mxu0  ;;  %v3918_v42 = vpop.f32.mrb[109].mxu1  ;;  %v13278_v39 = vld [vmem:[%s16663_s7 + $0x1a0] sm:$0xff]   ;;  %v13279_v25 = vld [vmem:[%s16663_s7 + $0x168] sm:$0xff]  }
0x175a   : > { %v3868_v55 = vadd.f32 %v3867_v22, %v14849_v60  ;;  %v3919_v36 = vadd.f32 %v3918_v42, %v14853_v0  ;;  %v3869_v41 = vpop.f32.mrb[110].mxu0  ;;  %v3920_v46 = vpop.f32.mrb[110].mxu1  ;;  %11979 = vmatprep.subr.bf16.mxu0 %v13267_v1  ;;  %12007 = vmatprep.subr.bf16.mxu1 %v13268_v19  ;;  %v13280_v1 = vld [vmem:[%s16663_s7 + $0x1e8] sm:$0xff]   ;;  %v13283_v22 = vld [vmem:[%s16663_s7 + $0x170] sm:$0xff]  }
0x175b   : > { %v3870_v58 = vadd.f32 %v3869_v41, %v14841_v52  ;;  %v3921_v61 = vadd.f32 %v3920_v46, %v14845_v45  ;;  %v3871_v62 = vpop.f32.mrb[111].mxu0  ;;  %v3922_v63 = vpop.f32.mrb[111].mxu1  ;;  %5289 = vmatmul.mubr.bf16.gmra.mrb[136].mxu0 %v4201_v24  ;;  %5337 = vmatmul.mubr.bf16.gmra.mrb[136].mxu1 %v4203_v59  ;;  %v4141_v11 = vmax.f32 %v3866_v2, 0.0  ;;  %v4143_v12 = vmax.f32 %v3917_v3, 0.0  ;;  %v14916_v30 = vld [vmem:[%s16662_s6 + $0x8] sm:$0xff]  ;;  %v13284_v42 = vld [vmem:[%s16663_s7 + $0x1f0] sm:$0xff]  }
0x175c   : > { %v3872_v4 = vadd.f32 %v3871_v62, %v14849_v60  ;;  %v3923_v5 = vadd.f32 %v3922_v63, %v14853_v0  ;;  %11980 = vmatpush3.bf16.msra.mxu0 %v13269_v35  ;;  %12008 = vmatpush3.bf16.msra.mxu1 %v13270_v16  ;;  %v4142_v21 = vmax.f32 %v3868_v55, 0.0  ;;  %v4144_v27 = vmax.f32 %v3919_v36, 0.0  ;;  %v13281_v16 = vld [vmem:[%s16663_s7 + $0x128] sm:$0xff]  }
0x175d   : > { %v4157_v13 = vmax.f32 %v3870_v58, 0.0  ;;  %v4159_v15 = vmax.f32 %v3921_v61, 0.0  ;;  %11981 = vmatprep.subr.bf16.mxu0 %v13271_v50  ;;  %12009 = vmatprep.subr.bf16.mxu1 %v13272_v51  ;;  %v13282_v59 = vld [vmem:[%s16663_s7 + $0x1a8] sm:$0xff]   ;;  %v14926_v2 = vrot.slane %v14916_v30, %v14792_v43  ;;  %v14930_v3 = vrot.slane %v14916_v30, %v14794_v53  ;;  %v13285_v58 = vld [vmem:[%s16663_s7 + $0x130] sm:$0xff]  }
0x175e   : > { %v4158_v28 = vmax.f32 %v3872_v4, 0.0  ;;  %v4160_v33 = vmax.f32 %v3923_v5, 0.0  ;;  %v14940_v50 = vrot.slane %v14916_v30, %v14801_v54  ;;  %v14944_v51 = vrot.slane %v14916_v30, %v14803_v56  ;;  %v13286_v61 = vld [vmem:[%s16663_s7 + $0x1b0] sm:$0xff]   ;;  %v13288_v5 = vld [vmem:[%s16663_s7 + $0x1f8] sm:$0xff]  }
0x175f   : > { %v14893_v34 = vpack.c.bf16 %v4157_v13, %v4141_v11  ;;  %v14895_v40 = vpack.c.bf16 %v4159_v15, %v4143_v12 }
0x1760   : > { %v4190_v47 = vpack.c.bf16 %v4158_v28, %v4142_v21  ;;  %v4192_v48 = vpack.c.bf16 %v4160_v33, %v4144_v27  ;;  %11982 = vmatpush3.bf16.msra.mxu0 %v13273_v6  ;;  %12010 = vmatpush3.bf16.msra.mxu1 %v13274_v10  ;;  %v14897_v57 = vpop.f32.mrb[112].mxu0  ;;  %v14899_v14 = vpop.f32.mrb[112].mxu1 }
0x1761   : > { %v3877_v44 = vpop.f32.mrb[113].mxu0  ;;  %v3928_v49 = vpop.f32.mrb[113].mxu1  ;;  %11983 = vmatprep.subr.bf16.mxu0 %v13275_v17  ;;  %12011 = vmatprep.subr.bf16.mxu1 %v13276_v20 }
0x1762   : > { %v3879_v19 = vpop.f32.mrb[114].mxu0  ;;  %v3930_v24 = vpop.f32.mrb[114].mxu1  ;;  %5376 = vmatprep.mubr.bf16.mxu0 %v4190_v47  ;;  %5424 = vmatprep.mubr.bf16.mxu1 %v4192_v48  ;;  %v3878_v55 = vadd.f32 %v3877_v44, %v14849_v60  ;;  %v3929_v36 = vadd.f32 %v3928_v49, %v14853_v0  ;;  %v13287_v0 = vld [vmem:[%s16663_s7 + $0x178] sm:$0xff]  }
0x1763   : > { %v3880_v31 = vpop.f32.mrb[115].mxu0  ;;  %v3931_v35 = vpop.f32.mrb[115].mxu1  ;;  %v13289_v47 = vld [vmem:[%s16663_s7 + $0x138] sm:$0xff]  }
0x1764   : > { %11984 = vmatpush3.bf16.msra.mxu0 %v13277_v18  ;;  %12012 = vmatpush3.bf16.msra.mxu1 %v13278_v39  ;;  %v4174_v21 = vmax.f32 %v3878_v55, 0.0  ;;  %v4176_v27 = vmax.f32 %v3929_v36, 0.0  ;;  %v13290_v48 = vld [vmem:[%s16663_s7 + $0x1b8] sm:$0xff]  }
0x1765   : > { %11985 = vmatprep.subr.bf16.mxu0 %v13279_v25  ;;  %12013 = vmatprep.subr.bf16.mxu1 %v13280_v1  ;;  %v13291_v25 = vld [vmem:[%s16663_s7 + $0x240] sm:$0xff]  }
0x1766   : > { %v13292_v1 = vld [vmem:[%s16663_s7 + $0x2c0] sm:$0xff]  }
0x1768   : > { %11986 = vmatpush3.bf16.msra.mxu0 %v13281_v16  ;;  %12014 = vmatpush3.bf16.msra.mxu1 %v13282_v59  ;;  %v3967_v41 = vpop.f32.mrb[116].mxu0  ;;  %v4018_v46 = vpop.f32.mrb[116].mxu1 }
0x1769   : > { %v3968_v62 = vadd.f32 %v3967_v41, %v14926_v2  ;;  %v4019_v63 = vadd.f32 %v4018_v46, %v14930_v3  ;;  %v3969_v4 = vpop.f32.mrb[117].mxu0  ;;  %v4020_v60 = vpop.f32.mrb[117].mxu1  ;;  %11987 = vmatprep.subr.bf16.mxu0 %v13283_v22  ;;  %12015 = vmatprep.subr.bf16.mxu1 %v13284_v42  ;;  %v3876_v22 = vadd.f32 %v14897_v57, %v14841_v52  ;;  %v13293_v52 = vld [vmem:[%s16663_s7 + $0x200] sm:$0xff]  }
0x176a   : > { %v3970_v6 = vadd.f32 %v3969_v4, %v14940_v50  ;;  %v4021_v10 = vadd.f32 %v4020_v60, %v14944_v51  ;;  %v3971_v11 = vpop.f32.mrb[118].mxu0  ;;  %v4022_v12 = vpop.f32.mrb[118].mxu1  ;;  %v3927_v46 = vadd.f32 %v14899_v14, %v14845_v45  ;;  %v13294_v57 = vld [vmem:[%s16663_s7 + $0x280] sm:$0xff]   ;;  %v13295_v45 = vld [vmem:[%s16663_s7 + $0x248] sm:$0xff]  }
0x176b   : > { %v3972_v13 = vadd.f32 %v3971_v11, %v14926_v2  ;;  %v4023_v15 = vadd.f32 %v4022_v12, %v14930_v3  ;;  %v3973_v17 = vpop.f32.mrb[119].mxu0  ;;  %v4024_v20 = vpop.f32.mrb[119].mxu1  ;;  %v4145_v18 = vmax.f32 %v3968_v62, 0.0  ;;  %v4147_v39 = vmax.f32 %v4019_v63, 0.0  ;;  %v13296_v14 = vld [vmem:[%s16663_s7 + $0x2c8] sm:$0xff]  }
0x176c   : > { %v3974_v28 = vadd.f32 %v3973_v17, %v14940_v50  ;;  %v4025_v33 = vadd.f32 %v4024_v20, %v14944_v51  ;;  %11988 = vmatpush3.bf16.msra.mxu0 %v13285_v58  ;;  %12016 = vmatpush3.bf16.msra.mxu1 %v13286_v61  ;;  %v4146_v19 = vmax.f32 %v3970_v6, 0.0  ;;  %v4148_v24 = vmax.f32 %v4021_v10, 0.0  ;;  %v13297_v11 = vld [vmem:[%s16663_s7 + $0x208] sm:$0xff]   ;;  %v13299_v17 = vld [vmem:[%s16663_s7 + $0x250] sm:$0xff]  }
0x176d   : > { %v4161_v44 = vmax.f32 %v3972_v13, 0.0  ;;  %v4163_v49 = vmax.f32 %v4023_v15, 0.0  ;;  %11989 = vmatprep.subr.bf16.mxu0 %v13287_v0  ;;  %12017 = vmatprep.subr.bf16.mxu1 %v13288_v5  ;;  %v4206_v62 = vpack.c.bf16 %v4174_v21, %v4174_v21  ;;  %v4208_v63 = vpack.c.bf16 %v4176_v27, %v4176_v27  ;;  %v13298_v12 = vld [vmem:[%s16663_s7 + $0x288] sm:$0xff]   ;;  %v13300_v20 = vld [vmem:[%s16663_s7 + $0x2d0] sm:$0xff]  }
0x176e   : > { %v4162_v31 = vmax.f32 %v3974_v28, 0.0  ;;  %v4164_v35 = vmax.f32 %v4025_v33, 0.0  ;;  %v4173_v6 = vmax.f32 %v3876_v22, 0.0  ;;  %v4175_v10 = vmax.f32 %v3927_v46, 0.0 }
0x176f   : > { %v14980_v16 = vpack.c.bf16 %v4161_v44, %v4145_v18  ;;  %v14982_v59 = vpack.c.bf16 %v4163_v49, %v4147_v39  ;;  %v15030_v13 = vrot.slane %v14916_v30, %v14829_v37  ;;  %v15034_v15 = vrot.slane %v14916_v30, %v14831_v38  ;;  %v13301_v39 = vld [vmem:[%s16663_s7 + $0x210] sm:$0xff]  }
0x1770   : > { %v14986_v42 = vpack.c.bf16 %v4162_v31, %v4146_v19  ;;  %v14988_v55 = vpack.c.bf16 %v4164_v35, %v4148_v24  ;;  %11990 = vmatpush3.bf16.msra.mxu0 %v13289_v47  ;;  %12018 = vmatpush3.bf16.msra.mxu1 %v13290_v48  ;;  %v14990_v36 = vpop.f32.mrb[120].mxu0  ;;  %v14992_v41 = vpop.f32.mrb[120].mxu1  ;;  %v4205_v21 = vpack.c.bf16 %v4173_v6, %v4173_v6  ;;  %v13302_v44 = vld [vmem:[%s16663_s7 + $0x290] sm:$0xff]   ;;  %v13303_v24 = vld [vmem:[%s16663_s7 + $0x258] sm:$0xff]  }
0x1771   : > { %v14996_v58 = vpop.f32.mrb[121].mxu0  ;;  %v14998_v61 = vpop.f32.mrb[121].mxu1  ;;  %12031 = vmatprep.subr.bf16.mxu0 %v13291_v25  ;;  %12059 = vmatprep.subr.bf16.mxu1 %v13292_v1  ;;  %v4207_v33 = vpack.c.bf16 %v4175_v10, %v4175_v10  ;;  %v13304_v31 = vld [vmem:[%s16663_s7 + $0x2d8] sm:$0xff]  }
0x1772   : > { %v3981_v4 = vpop.f32.mrb[122].mxu0  ;;  %v4032_v60 = vpop.f32.mrb[122].mxu1 }
0x1773   : > { %5377 = vmatmul.mubr.bf16.vlgmr.msra.gmra.mrb[140].mxu0 %v14893_v34  ;;  %5425 = vmatmul.mubr.bf16.vlgmr.msra.gmra.mrb[140].mxu1 %v14895_v40  ;;  %v3982_v0 = vpop.f32.mrb[123].mxu0  ;;  %v4033_v5 = vpop.f32.mrb[123].mxu1  ;;  %v15022_v34 = vrot.slane %v14916_v30, %v14825_v23  ;;  %v15026_v40 = vrot.slane %v14916_v30, %v14827_v26 }
0x1774   : > { %5384 = vmatprep.mubr.bf16.mxu0 %v4206_v62  ;;  %5432 = vmatprep.mubr.bf16.mxu1 %v4208_v63  ;;  %v13306_v0 = vld [vmem:[%s16663_s7 + $0x298] sm:$0xff]  }
0x1775   : > { %12032 = vmatpush3.bf16.msra.mxu0 %v13293_v52  ;;  %12060 = vmatpush3.bf16.msra.mxu1 %v13294_v57 }
0x1776   : > { %12033 = vmatprep.subr.bf16.mxu0 %v13295_v45  ;;  %12061 = vmatprep.subr.bf16.mxu1 %v13296_v14  ;;  %v13305_v14 = vld [vmem:[%s16663_s7 + $0x218] sm:$0xff]  }
0x1778   : > { %v4069_v27 = vpop.f32.mrb[124].mxu0  ;;  %v4120_v28 = vpop.f32.mrb[124].mxu1 }
0x1779   : > { %12034 = vmatpush3.bf16.msra.mxu0 %v13297_v11  ;;  %12062 = vmatpush3.bf16.msra.mxu1 %v13298_v12  ;;  %v4070_v47 = vadd.f32 %v4069_v27, %v15022_v34  ;;  %v4121_v48 = vadd.f32 %v4120_v28, %v15026_v40  ;;  %v4071_v30 = vpop.f32.mrb[125].mxu0  ;;  %v4122_v18 = vpop.f32.mrb[125].mxu1  ;;  %v13308_v11 = vld [vmem:[%s16663_s7 + $0x2e0] sm:$0xff]  }
0x177a   : > { %v4072_v49 = vadd.f32 %v4071_v30, %v15030_v13  ;;  %v4123_v25 = vadd.f32 %v4122_v18, %v15034_v15  ;;  %v4073_v1 = vpop.f32.mrb[126].mxu0  ;;  %v4124_v19 = vpop.f32.mrb[126].mxu1  ;;  %12035 = vmatprep.subr.bf16.mxu0 %v13299_v17  ;;  %12063 = vmatprep.subr.bf16.mxu1 %v13300_v20  ;;  %v13310_v30 = vld [vmem:[%s16663_s7 + $0x2a0] sm:$0xff]  }
0x177b   : > { %v4074_v35 = vadd.f32 %v4073_v1, %v15022_v34  ;;  %v4125_v22 = vadd.f32 %v4124_v19, %v15026_v40  ;;  %5385 = vmatmul.mubr.bf16.gmra.mrb[144].mxu0 %v4205_v21  ;;  %5433 = vmatmul.mubr.bf16.gmra.mrb[144].mxu1 %v4207_v33  ;;  %v4075_v46 = vpop.f32.mrb[127].mxu0  ;;  %v4126_v52 = vpop.f32.mrb[127].mxu1  ;;  %v4149_v63 = vmax.f32 %v4070_v47, 0.0  ;;  %v4151_v4 = vmax.f32 %v4121_v48, 0.0  ;;  %v13309_v48 = vld [vmem:[%s16663_s7 + $0x220] sm:$0xff]   ;;  %v13313_v19 = vld [vmem:[%s16663_s7 + $0x228] sm:$0xff]  }
0x177c   : > { %v4076_v57 = vadd.f32 %v4075_v46, %v15030_v13  ;;  %v4127_v62 = vadd.f32 %v4126_v52, %v15034_v15  ;;  %5472 = vmatprep.mubr.bf16.mxu0 %v14986_v42  ;;  %5520 = vmatprep.mubr.bf16.mxu1 %v14988_v55  ;;  %v4150_v5 = vmax.f32 %v4072_v49, 0.0  ;;  %v4152_v6 = vmax.f32 %v4123_v25, 0.0  ;;  %v13307_v55 = vld [vmem:[%s16663_s7 + $0x260] sm:$0xff]   ;;  %v13312_v49 = vld [vmem:[%s16663_s7 + $0x2e8] sm:$0xff]   ;;  %v13318_v46 = vld [vmem:[%s16663_s7 + $0x2b0] sm:$0xff]  }
0x177d   : > { %v4165_v60 = vmax.f32 %v4074_v35, 0.0  ;;  %v4167_v45 = vmax.f32 %v4125_v22, 0.0  ;;  %12036 = vmatpush3.bf16.msra.mxu0 %v13301_v39  ;;  %12064 = vmatpush3.bf16.msra.mxu1 %v13302_v44  ;;  %v13311_v44 = vld [vmem:[%s16663_s7 + $0x268] sm:$0xff]   ;;  %v13316_v35 = vld [vmem:[%s16663_s7 + $0x2f0] sm:$0xff]   ;;  %v13319_v52 = vld [vmem:[%s16663_s7 + $0x278] sm:$0xff]  }
0x177e   : > { %v4166_v10 = vmax.f32 %v4076_v57, 0.0  ;;  %v4168_v42 = vmax.f32 %v4127_v62, 0.0  ;;  %12037 = vmatprep.subr.bf16.mxu0 %v13303_v24  ;;  %12065 = vmatprep.subr.bf16.mxu1 %v13304_v31  ;;  %v13314_v24 = vld [vmem:[%s16663_s7 + $0x2a8] sm:$0xff]   ;;  %v13315_v31 = vld [vmem:[%s16663_s7 + $0x270] sm:$0xff]   ;;  %v13320_v57 = vld [vmem:[%s16663_s7 + $0x2f8] sm:$0xff]   ;;  %v3980_v62 = vadd.f32 %v14996_v58, %v14940_v50 }
0x177f   : > { %v15076_v12 = vpack.c.bf16 %v4165_v60, %v4149_v63  ;;  %v15078_v17 = vpack.c.bf16 %v4167_v45, %v4151_v4  ;;  %v13317_v22 = vld [vmem:[%s16663_s7 + $0x230] sm:$0xff]   ;;  %v4031_v63 = vadd.f32 %v14998_v61, %v14944_v51  ;;  %v13321_v4 = vld [vmem:[%s16663_s7 + $0x238] sm:$0xff]   ;;  %v13323_v45 = vld [vmem:[%s16663_s7 + $0x340] sm:$0xff]   ;;  %v3978_v61 = vadd.f32 %v14990_v36, %v14926_v2 }
0x1780   : > { %v15080_v20 = vpack.c.bf16 %v4166_v10, %v4150_v5  ;;  %v15082_v21 = vpack.c.bf16 %v4168_v42, %v4152_v6  ;;  %v15084_v27 = vpop.f32.mrb[128].mxu0  ;;  %v15086_v28 = vpop.f32.mrb[128].mxu1  ;;  %v13322_v60 = vld [vmem:[%s16663_s7 + $0x2b8] sm:$0xff]   ;;  %v13324_v50 = vld [vmem:[%s16663_s7 + $0x3c0] sm:$0xff]   ;;  %v4178_v51 = vmax.f32 %v3980_v62, 0.0  ;;  %v13327_v42 = vld [vmem:[%s16663_s7 + $0x348] sm:$0xff]  }
0x1781   : > { %12038 = vmatpush3.bf16.msra.mxu0 %v13305_v14  ;;  %12066 = vmatpush3.bf16.msra.mxu1 %v13306_v0  ;;  %v15088_v33 = vpop.f32.mrb[129].mxu0  ;;  %v15090_v47 = vpop.f32.mrb[129].mxu1  ;;  %v4180_v58 = vmax.f32 %v4031_v63, 0.0  ;;  %v4029_v14 = vadd.f32 %v14992_v41, %v14930_v3  ;;  %v13325_v0 = vld [vmem:[%s16663_s7 + $0x300] sm:$0xff]   ;;  %v13328_v2 = vld [vmem:[%s16663_s7 + $0x3c8] sm:$0xff]   ;;  %v4177_v3 = vmax.f32 %v3978_v61, 0.0 }
0x1782   : > { %v4083_v18 = vpop.f32.mrb[130].mxu0  ;;  %v4134_v39 = vpop.f32.mrb[130].mxu1  ;;  %12039 = vmatprep.subr.bf16.mxu0 %v13307_v55  ;;  %12067 = vmatprep.subr.bf16.mxu1 %v13308_v11  ;;  %v13326_v5 = vld [vmem:[%s16663_s7 + $0x380] sm:$0xff]   ;;  %v4210_v6 = vpack.c.bf16 %v4178_v51, %v4178_v51  ;;  %v13329_v41 = vld [vmem:[%s16663_s7 + $0x308] sm:$0xff]   ;;  %v13350_v62 = vld [vmem:[%s16663_s7 + $0x3b0] sm:$0xff]  }
0x1783   : > { %v4084_v25 = vpop.f32.mrb[131].mxu0  ;;  %v4135_v1 = vpop.f32.mrb[131].mxu1  ;;  %v4212_v10 = vpack.c.bf16 %v4180_v58, %v4180_v58  ;;  %v4179_v36 = vmax.f32 %v4029_v14, 0.0  ;;  %v13330_v55 = vld [vmem:[%s16663_s7 + $0x388] sm:$0xff]   ;;  %v4209_v11 = vpack.c.bf16 %v4177_v3, %v4177_v3  ;;  %v13334_v18 = vld [vmem:[%s16663_s7 + $0x390] sm:$0xff]   ;;  %v13335_v39 = vld [vmem:[%s16663_s7 + $0x358] sm:$0xff]  }
0x1784   : > { %v13338_v25 = vld [vmem:[%s16663_s7 + $0x398] sm:$0xff]   ;;  %v13339_v1 = vld [vmem:[%s16663_s7 + $0x360] sm:$0xff]  }
0x1785   : > { %12040 = vmatpush3.bf16.msra.mxu0 %v13309_v48  ;;  %12068 = vmatpush3.bf16.msra.mxu1 %v13310_v30  ;;  %v4211_v48 = vpack.c.bf16 %v4179_v36, %v4179_v36  ;;  %v13333_v30 = vld [vmem:[%s16663_s7 + $0x310] sm:$0xff]   ;;  %v13351_v63 = vld [vmem:[%s16663_s7 + $0x378] sm:$0xff]  }
0x1786   : > { %12041 = vmatprep.subr.bf16.mxu0 %v13311_v44  ;;  %12069 = vmatprep.subr.bf16.mxu1 %v13312_v49  ;;  %v13336_v44 = vld [vmem:[%s16663_s7 + $0x3d8] sm:$0xff]  }
0x1787   : > { %v13337_v49 = vld [vmem:[%s16663_s7 + $0x318] sm:$0xff]  }
0x1788   : > { %v13354_v51 = vld [vmem:[%s16663_s7 + $0x3b8] sm:$0xff]  }
0x1789   : > { %12042 = vmatpush3.bf16.msra.mxu0 %v13313_v19  ;;  %12070 = vmatpush3.bf16.msra.mxu1 %v13314_v24  ;;  %v13342_v19 = vld [vmem:[%s16663_s7 + $0x3a0] sm:$0xff]   ;;  %v13343_v24 = vld [vmem:[%s16663_s7 + $0x368] sm:$0xff]  }
0x178a   : > { %12043 = vmatprep.subr.bf16.mxu0 %v13315_v31  ;;  %12071 = vmatprep.subr.bf16.mxu1 %v13316_v35  ;;  %v13344_v31 = vld [vmem:[%s16663_s7 + $0x3e8] sm:$0xff]  }
0x178b   : > { %v13345_v35 = vld [vmem:[%s16663_s7 + $0x328] sm:$0xff]  }
0x178d   : > { %12044 = vmatpush3.bf16.msra.mxu0 %v13317_v22  ;;  %12072 = vmatpush3.bf16.msra.mxu1 %v13318_v46  ;;  %v13346_v22 = vld [vmem:[%s16663_s7 + $0x3a8] sm:$0xff]   ;;  %v13347_v46 = vld [vmem:[%s16663_s7 + $0x370] sm:$0xff]  }
0x178e   : > { %12045 = vmatprep.subr.bf16.mxu0 %v13319_v52  ;;  %12073 = vmatprep.subr.bf16.mxu1 %v13320_v57  ;;  %v13348_v52 = vld [vmem:[%s16663_s7 + $0x3f0] sm:$0xff]  }
0x178f   : > { %v13349_v57 = vld [vmem:[%s16663_s7 + $0x330] sm:$0xff]  }
0x1791   : > { %12046 = vmatpush3.bf16.msra.mxu0 %v13321_v4  ;;  %12074 = vmatpush3.bf16.msra.mxu1 %v13322_v60  ;;  %v13352_v4 = vld [vmem:[%s16663_s7 + $0x3f8] sm:$0xff]   ;;  %v4082_v60 = vadd.f32 %v15088_v33, %v15030_v13  ;;  %v4080_v13 = vadd.f32 %v15084_v27, %v15022_v34  ;;  %v11136_v27 = vld [vmem:[%s16664_s8] ss:$0 sm:$0xff] }
0x1792   : > { %12087 = vmatprep.subr.bf16.mxu0 %v13323_v45  ;;  %12115 = vmatprep.subr.bf16.mxu1 %v13324_v50  ;;  %v4133_v45 = vadd.f32 %v15090_v47, %v15034_v15  ;;  %v13353_v50 = vld [vmem:[%s16663_s7 + $0x338] sm:$0xff]   ;;  %v4131_v15 = vadd.f32 %v15086_v28, %v15026_v40 }
0x1793   : > { %v4182_v58 = vmax.f32 %v4082_v60, 0.0  ;;  %v4181_v14 = vmax.f32 %v4080_v13, 0.0 }
0x1794   : > { %5473 = vmatmul.mubr.bf16.vlgmr.msra.gmra.mrb[148].mxu0 %v14980_v16  ;;  %5521 = vmatmul.mubr.bf16.vlgmr.msra.gmra.mrb[148].mxu1 %v14982_v59  ;;  %v13331_v16 = vld [vmem:[%s16663_s7 + $0x350] sm:$0xff]   ;;  %v4184_v61 = vmax.f32 %v4133_v45, 0.0 }
0x1795   : > { %5480 = vmatprep.mubr.bf16.mxu0 %v4210_v6  ;;  %5528 = vmatprep.mubr.bf16.mxu1 %v4212_v10  ;;  %v13332_v59 = vld [vmem:[%s16663_s7 + $0x3d0] sm:$0xff]   ;;  %v4214_v33 = vpack.c.bf16 %v4182_v58, %v4182_v58 }
0x1796   : > { %12088 = vmatpush3.bf16.msra.mxu0 %v13325_v0  ;;  %12116 = vmatpush3.bf16.msra.mxu1 %v13326_v5  ;;  %v4216_v47 = vpack.c.bf16 %v4184_v61, %v4184_v61  ;;  %v4183_v0 = vmax.f32 %v4131_v15, 0.0  ;;  %v4213_v5 = vpack.c.bf16 %v4181_v14, %v4181_v14 }
0x1797   : > { %12089 = vmatprep.subr.bf16.mxu0 %v13327_v42  ;;  %12117 = vmatprep.subr.bf16.mxu1 %v13328_v2 }
0x1798   : > { %v4215_v6 = vpack.c.bf16 %v4183_v0, %v4183_v0 }
0x179a   : > { %12090 = vmatpush3.bf16.msra.mxu0 %v13329_v41  ;;  %12118 = vmatpush3.bf16.msra.mxu1 %v13330_v55 }
0x179b   : > { %12091 = vmatprep.subr.bf16.mxu0 %v13331_v16  ;;  %12119 = vmatprep.subr.bf16.mxu1 %v13332_v59 }
0x179c   : > { %5481 = vmatmul.mubr.bf16.gmra.mrb[152].mxu0 %v4209_v11  ;;  %5529 = vmatmul.mubr.bf16.gmra.mrb[152].mxu1 %v4211_v48 }
0x179d   : > { %5568 = vmatprep.mubr.bf16.mxu0 %v15080_v20  ;;  %5616 = vmatprep.mubr.bf16.mxu1 %v15082_v21  ;;  %v13340_v20 = vld [vmem:[%s16663_s7 + $0x3e0] sm:$0xff]  }
0x179e   : > { %12092 = vmatpush3.bf16.msra.mxu0 %v13333_v30  ;;  %12120 = vmatpush3.bf16.msra.mxu1 %v13334_v18  ;;  %v13341_v21 = vld [vmem:[%s16663_s7 + $0x320] sm:$0xff]  }
0x179f   : > { %12093 = vmatprep.subr.bf16.mxu0 %v13335_v39  ;;  %12121 = vmatprep.subr.bf16.mxu1 %v13336_v44 }
0x17a2   : > { %12094 = vmatpush3.bf16.msra.mxu0 %v13337_v49  ;;  %12122 = vmatpush3.bf16.msra.mxu1 %v13338_v25 }
0x17a3   : > { %12095 = vmatprep.subr.bf16.mxu0 %v13339_v1  ;;  %12123 = vmatprep.subr.bf16.mxu1 %v13340_v20 }
0x17a6   : > { %12096 = vmatpush3.bf16.msra.mxu0 %v13341_v21  ;;  %12124 = vmatpush3.bf16.msra.mxu1 %v13342_v19 }
0x17a7   : > { %12097 = vmatprep.subr.bf16.mxu0 %v13343_v24  ;;  %12125 = vmatprep.subr.bf16.mxu1 %v13344_v31 }
0x17aa   : > { %12098 = vmatpush3.bf16.msra.mxu0 %v13345_v35  ;;  %12126 = vmatpush3.bf16.msra.mxu1 %v13346_v22 }
0x17ab   : > { %12099 = vmatprep.subr.bf16.mxu0 %v13347_v46  ;;  %12127 = vmatprep.subr.bf16.mxu1 %v13348_v52 }
0x17ae   : > { %12100 = vmatpush3.bf16.msra.mxu0 %v13349_v57  ;;  %12128 = vmatpush3.bf16.msra.mxu1 %v13350_v62 }
0x17af   : > { %12101 = vmatprep.subr.bf16.mxu0 %v13351_v63  ;;  %12129 = vmatprep.subr.bf16.mxu1 %v13352_v4 }
0x17b2   : > { %12102 = vmatpush3.bf16.msra.mxu0 %v13353_v50  ;;  %12130 = vmatpush3.bf16.msra.mxu1 %v13354_v51 }
0x17b3   : > { %12783 = vmatprep.subr.bf16.mxu1 %v13770_v7 }
0x17b5   : > { %5569 = vmatmul.mubr.bf16.vlgmr.msra.gmra.mrb[156].mxu0 %v15076_v12  ;;  %5617 = vmatmul.mubr.bf16.vlgmr.msra.gmra.mrb[156].mxu1 %v15078_v17 }
0x17b6   : > { %5576 = vmatprep.mubr.bf16.mxu0 %v4214_v33  ;;  %5624 = vmatprep.mubr.bf16.mxu1 %v4216_v47 }
0x17bd   : > { %5577 = vmatmul.mubr.bf16.gmra.mrb[160].mxu0 %v4213_v5  ;;  %5625 = vmatmul.mubr.bf16.gmra.mrb[160].mxu1 %v4215_v6 }
0x17be   : > { %12785 = vmatprep.mubr.msk.bf16.mxu1 %vm13771_vm1, %v13770_v7 }
0x1826   : > { %v11935_v34 = vpop.f32.mrb[132].mxu0  ;;  %v11963_v40 = vpop.f32.mrb[132].mxu1 }
0x1827   : > { %v11936_v12 = vpop.f32.mrb[133].mxu0  ;;  %v11964_v28 = vpop.f32.mrb[133].mxu1 }
0x1828   : > { %v11937_v17 = vadd.f32 %v11936_v12, %v11935_v34  ;;  %v11965_v10 = vadd.f32 %v11964_v28, %v11963_v40  ;;  %v11938_v42 = vpop.f32.mrb[134].mxu0  ;;  %v11966_v2 = vpop.f32.mrb[134].mxu1 }
0x1829   : > { %v11939_v3 = vpop.f32.mrb[135].mxu0  ;;  %v11967_v36 = vpop.f32.mrb[135].mxu1 }
0x182a   : > { %v5283_v41 = vadd.f32 %v11937_v17, %v11136_v27  ;;  %v11940_v55 = vadd.f32 %v11939_v3, %v11938_v42  ;;  %v11968_v16 = vadd.f32 %v11967_v36, %v11966_v2 }
0x182c   : > { %v5331_v59 = vadd.f32 %v11965_v10, %v5283_v41  ;;  %v5286_v11 = vadd.f32 %v11940_v55, %v11136_v27 }
0x182e   : > { %v5334_v48 = vadd.f32 %v11968_v16, %v5286_v11  ;;  %v11941_v30 = vpop.f32.mrb[136].mxu0  ;;  %v11969_v18 = vpop.f32.mrb[136].mxu1 }
0x182f   : > { %v11942_v39 = vpop.f32.mrb[137].mxu0  ;;  %v11970_v44 = vpop.f32.mrb[137].mxu1 }
0x1830   : > { %v11943_v49 = vadd.f32 %v11942_v39, %v11941_v30  ;;  %v11971_v25 = vadd.f32 %v11970_v44, %v11969_v18  ;;  %v11944_v1 = vpop.f32.mrb[138].mxu0  ;;  %v11972_v20 = vpop.f32.mrb[138].mxu1 }
0x1831   : > { %v11945_v21 = vpop.f32.mrb[139].mxu0  ;;  %v11973_v19 = vpop.f32.mrb[139].mxu1 }
0x1832   : > { %v5291_v24 = vadd.f32 %v11943_v49, %v11136_v27 }
0x1834   : > { %v5339_v31 = vadd.f32 %v11971_v25, %v5291_v24 }
0x1846   : > { %v11991_v35 = vpop.f32.mrb[140].mxu0  ;;  %v12019_v22 = vpop.f32.mrb[140].mxu1 }
0x1847   : > { %v11992_v46 = vpop.f32.mrb[141].mxu0  ;;  %v12020_v52 = vpop.f32.mrb[141].mxu1 }
0x1848   : > { %v11993_v57 = vadd.f32 %v11992_v46, %v11991_v35  ;;  %v12021_v62 = vadd.f32 %v12020_v52, %v12019_v22  ;;  %v11994_v63 = vpop.f32.mrb[142].mxu0  ;;  %v12022_v4 = vpop.f32.mrb[142].mxu1 }
0x1849   : > { %v11995_v60 = vpop.f32.mrb[143].mxu0  ;;  %v12023_v45 = vpop.f32.mrb[143].mxu1 }
0x184a   : > { %v5379_v50 = vadd.f32 %v11993_v57, %v5331_v59  ;;  %v11996_v51 = vadd.f32 %v11995_v60, %v11994_v63  ;;  %v12024_v58 = vadd.f32 %v12023_v45, %v12022_v4 }
0x184c   : > { %v5427_v61 = vadd.f32 %v12021_v62, %v5379_v50  ;;  %v5382_v13 = vadd.f32 %v11996_v51, %v5334_v48 }
0x184e   : > { %v5430_v15 = vadd.f32 %v12024_v58, %v5382_v13  ;;  %v11997_v33 = vpop.f32.mrb[144].mxu0  ;;  %v12025_v47 = vpop.f32.mrb[144].mxu1 }
0x184f   : > { %v11998_v14 = vpop.f32.mrb[145].mxu0  ;;  %v12026_v0 = vpop.f32.mrb[145].mxu1 }
0x1850   : > { %v11999_v5 = vadd.f32 %v11998_v14, %v11997_v33  ;;  %v12027_v6 = vadd.f32 %v12026_v0, %v12025_v47  ;;  %v12000_v34 = vpop.f32.mrb[146].mxu0  ;;  %v12028_v40 = vpop.f32.mrb[146].mxu1 }
0x1851   : > { %v12001_v27 = vpop.f32.mrb[147].mxu0  ;;  %v12029_v12 = vpop.f32.mrb[147].mxu1 }
0x1852   : > { %v5387_v28 = vadd.f32 %v11999_v5, %v5339_v31 }
0x1854   : > { %v5435_v17 = vadd.f32 %v12027_v6, %v5387_v28 }
0x1867   : > { %v12047_v10 = vpop.f32.mrb[148].mxu0  ;;  %v12075_v42 = vpop.f32.mrb[148].mxu1 }
0x1868   : > { %v12048_v2 = vpop.f32.mrb[149].mxu0  ;;  %v12076_v3 = vpop.f32.mrb[149].mxu1 }
0x1869   : > { %v12049_v36 = vadd.f32 %v12048_v2, %v12047_v10  ;;  %v12077_v41 = vadd.f32 %v12076_v3, %v12075_v42  ;;  %v12050_v55 = vpop.f32.mrb[150].mxu0  ;;  %v12078_v16 = vpop.f32.mrb[150].mxu1 }
0x186a   : > { %v12051_v59 = vpop.f32.mrb[151].mxu0  ;;  %v12079_v11 = vpop.f32.mrb[151].mxu1 }
0x186b   : > { %v5475_v48 = vadd.f32 %v12049_v36, %v5427_v61  ;;  %v12052_v30 = vadd.f32 %v12051_v59, %v12050_v55  ;;  %v12080_v18 = vadd.f32 %v12079_v11, %v12078_v16 }
0x186d   : > { %v5523_v39 = vadd.f32 %v12077_v41, %v5475_v48  ;;  %v5478_v44 = vadd.f32 %v12052_v30, %v5430_v15 }
0x186f   : > { %v5526_v49 = vadd.f32 %v12080_v18, %v5478_v44  ;;  %v12053_v25 = vpop.f32.mrb[152].mxu0  ;;  %v12081_v1 = vpop.f32.mrb[152].mxu1 }
0x1870   : > { %v12054_v20 = vpop.f32.mrb[153].mxu0  ;;  %v12082_v21 = vpop.f32.mrb[153].mxu1 }
0x1871   : > { %v12055_v19 = vadd.f32 %v12054_v20, %v12053_v25  ;;  %v12083_v24 = vadd.f32 %v12082_v21, %v12081_v1  ;;  %v12056_v31 = vpop.f32.mrb[154].mxu0  ;;  %v12084_v35 = vpop.f32.mrb[154].mxu1 }
0x1872   : > { %v12057_v22 = vpop.f32.mrb[155].mxu0  ;;  %v12085_v46 = vpop.f32.mrb[155].mxu1  ;;  %v13355_v35 = vld [vmem:[%s16735_s1 + $0x10] sm:$0xff]  }
0x1873   : > { %v5483_v52 = vadd.f32 %v12055_v19, %v5435_v17  ;;  %12775 = vmatprep.subr.bf16.mxu0 %v13355_v35  ;;  %v13356_v22 = vld [vmem:[%s16735_s1 + $0x18] sm:$0xff]   ;;  %s432_s1 = sand.u32 1, %s13760_s26  }
0x1874   : > { %12776 = vmatpush3.bf16.msra.mxu0 %v13355_v35 }
0x1875   : > { %v5531_v57 = vadd.f32 %v12083_v24, %v5483_v52  ;;  %12777 = vmatprep.subr.bf16.mxu0 %v13356_v22 }
0x1878   : > { %12778 = vmatpush3.bf16.msra.mxu0 %v13356_v22 }
0x1879   : > { %12789 = vmatprep.subr.bf16.mxu0 %v13770_v7 }
0x1888   : > { %v12103_v62 = vpop.f32.mrb[156].mxu0  ;;  %v12131_v63 = vpop.f32.mrb[156].mxu1 }
0x1889   : > { %v12104_v4 = vpop.f32.mrb[157].mxu0  ;;  %v12132_v60 = vpop.f32.mrb[157].mxu1 }
0x188a   : > { %v12105_v45 = vadd.f32 %v12104_v4, %v12103_v62  ;;  %v12133_v50 = vadd.f32 %v12132_v60, %v12131_v63  ;;  %v12106_v51 = vpop.f32.mrb[158].mxu0  ;;  %v12134_v58 = vpop.f32.mrb[158].mxu1 }
0x188b   : > { %v12107_v61 = vpop.f32.mrb[159].mxu0  ;;  %v12135_v13 = vpop.f32.mrb[159].mxu1 }
0x188c   : > { %v5571_v15 = vadd.f32 %v12105_v45, %v5523_v39  ;;  %v12108_v33 = vadd.f32 %v12107_v61, %v12106_v51  ;;  %v12136_v47 = vadd.f32 %v12135_v13, %v12134_v58  ;;  %v11265_v58 = vld [vmem:[%s16667_s11] ss:$0 sm:$0xff] }
0x188e   : > { %v5619_v14 = vadd.f32 %v12133_v50, %v5571_v15  ;;  %v5574_v0 = vadd.f32 %v12108_v33, %v5526_v49 }
0x1890   : > { %v5622_v5 = vadd.f32 %v12136_v47, %v5574_v0  ;;  %v12109_v6 = vpop.f32.mrb[160].mxu0  ;;  %v12137_v34 = vpop.f32.mrb[160].mxu1  ;;  %v5632_v40 = vadd.f32 %v5619_v14, %v14572_v8  ;;  %v11266_v47 = vld [vmem:[%s16668_s12] ss:$0 sm:$0xff] }
0x1891   : > { %v12110_v27 = vpop.f32.mrb[161].mxu0  ;;  %v12138_v12 = vpop.f32.mrb[161].mxu1 }
0x1892   : > { %v12111_v28 = vadd.f32 %v12110_v27, %v12109_v6  ;;  %v12139_v17 = vadd.f32 %v12138_v12, %v12137_v34  ;;  %v12112_v10 = vpop.f32.mrb[162].mxu0  ;;  %v12140_v42 = vpop.f32.mrb[162].mxu1  ;;  %v5637_v2 = vsel %vm471_vm0, %v5632_v40, 0.0  ;;  %v5633_v3 = vadd.f32 %v5622_v5, %v14574_v9 }
0x1893   : > { %v12113_v36 = vpop.f32.mrb[163].mxu0  ;;  %v12141_v41 = vpop.f32.mrb[163].mxu1  ;;  %5638 = vadd.xlane.f32.xlu0 %v5637_v2 }
0x1894   : > { %v5579_v55 = vadd.f32 %v12111_v28, %v5531_v57  ;;  %v5640_v16 = vsel %vm471_vm0, %v5633_v3, 0.0 }
0x1895   : > { %5641 = vadd.xlane.f32.xlu1 %v5640_v16 }
0x1896   : > { %v5627_v59 = vadd.f32 %v12139_v17, %v5579_v55  ;;  %v11272_v17 = vld [vmem:[%s16658_s2 + $0x1] ss:$0 sm:$0xff] }
0x1898   : > { %v5634_v8 = vadd.f32 %v5627_v59, %v14608_v32 }
0x189a   : > { %v5643_v11 = vsel %vm471_vm0, %v5634_v8, 0.0 }
0x189b   : > { %5644 = vadd.xlane.f32.xlu0 %v5643_v11 }
0x1920   : > { %v5639_v48 = vpop.xlane.xlu0 %5638 }
0x1921   : > { %v5646_v30 = vmul.f32 0.03125, %v5639_v48 }
0x1922   : > { %v5642_v18 = vpop.xlane.xlu1 %5641 }
0x1923   : > { %v5649_v39 = vsub.f32 %v5632_v40, %v5646_v30  ;;  %v5647_v44 = vmul.f32 0.03125, %v5642_v18 }
0x1925   : > { %v5650_v49 = vsub.f32 %v5633_v3, %v5647_v44  ;;  %v5652_v9 = vmul.f32 %v5649_v39, %v5649_v39 }
0x1927   : > { %v5655_v25 = vsel %vm471_vm0, %v5652_v9, 0.0  ;;  %v5653_v1 = vmul.f32 %v5650_v49, %v5650_v49 }
0x1928   : > { %5656 = vadd.xlane.f32.xlu1 %v5655_v25  ;;  %v5645_v20 = vpop.xlane.xlu0 %5644 }
0x1929   : > { %v5648_v21 = vmul.f32 0.03125, %v5645_v20  ;;  %v5658_v19 = vsel %vm471_vm0, %v5653_v1, 0.0 }
0x192a   : > { %5659 = vadd.xlane.f32.xlu0 %v5658_v19 }
0x192b   : > { %v5651_v32 = vsub.f32 %v5634_v8, %v5648_v21 }
0x192d   : > { %v5654_v24 = vmul.f32 %v5651_v32, %v5651_v32 }
0x192f   : > { %v5661_v31 = vsel %vm471_vm0, %v5654_v24, 0.0 }
0x1930   : > { %5662 = vadd.xlane.f32.xlu1 %v5661_v31 }
0x19b5   : > { %v5657_v46 = vpop.xlane.xlu1 %5656 }
0x19b6   : > { %v5664_v52 = vmul.f32 0.03125, %v5657_v46 }
0x19b7   : > { %v5660_v57 = vpop.xlane.xlu0 %5659 }
0x19b8   : > { %v5667_v62 = vadd.f32 1e-05, %v5664_v52  ;;  %v5665_v63 = vmul.f32 0.03125, %v5660_v57 }
0x19ba   : > { %13589 = vrsqrt.f32 %v5667_v62  ;;  %v5668_v4 = vadd.f32 1e-05, %v5665_v63 }
0x19bc   : > { %13591 = vrsqrt.f32 %v5668_v4 }
0x19bd   : > { %v5663_v60 = vpop.xlane.xlu1 %5662 }
0x19be   : > { %v5666_v45 = vmul.f32 0.03125, %v5663_v60 }
0x19c0   : > { %v5669_v50 = vadd.f32 1e-05, %v5666_v45 }
0x19c2   : > { %13593 = vrsqrt.f32 %v5669_v50 }
0x19c4   : > { %v13590_v51 = vpop.eup %13589 }
0x19c5   : > { %v5673_v61 = vmul.f32 %v13590_v51, %v5649_v39 }
0x19c6   : > { %v13592_v13 = vpop.eup %13591 }
0x19c7   : > { %v5674_v15 = vmul.f32 %v13592_v13, %v5650_v49  ;;  %v5682_v33 = vmul.f32 %v11265_v58, %v5673_v61 }
0x19c9   : > { %v5683_v14 = vmul.f32 %v11265_v58, %v5674_v15  ;;  %v15280_v0 = vadd.f32 %v11266_v47, %v5682_v33 }
0x19cb   : > { %v15282_v5 = vadd.f32 %v11266_v47, %v5683_v14 }
0x19cc   : > { %v13594_v6 = vpop.eup %13593 }
0x19cd   : > { %v5675_v34 = vmul.f32 %v13594_v6, %v5651_v32  ;;  %v5694_v40 = vpack.c.bf16 %v15282_v5, %v15280_v0 }
0x19cf   : > { %v5684_v27 = vmul.f32 %v11265_v58, %v5675_v34  ;;  %12779 = vmatprep.mubr.msk.bf16.mxu0 %vm471_vm0, %v5694_v40 }
0x19d1   : > { %v15287_v12 = vadd.f32 %v11266_v47, %v5684_v27 }
0x19d3   : > { %v5695_v28 = vpack.c.bf16 %v15287_v12, %v15287_v12 }
0x19d5   : > { %12780 = vmatmul.mubr.msk.bf16.vlgmr.msra.gmra.mrb[164].mxu0 %vm471_vm0, %v5695_v28 }
0x19d6   : > { %12791 = vmatprep.mubr.msk.bf16.mxu0 %vm13771_vm1, %v13770_v7 }
0x1aa8   : > { %v12781_v10 = vpop.f32.mrb[164].mxu0 }
0x1aa9   : > { %v5761_v42 = vpop.f32.mrb[165].mxu0  ;;  %v5770_v16 = vadd.f32 %v12781_v10, %v11272_v17 }
0x1aaa   : > { %v5762_v2 = vadd.f32 %v11272_v17, %v5761_v42  ;;  %v12782_v3 = vpop.f32.mrb[166].mxu0 }
0x1aab   : > { %v5764_v36 = vpop.f32.mrb[167].mxu0  ;;  %v15305_v8 = vpack.c.bf16 %v5770_v16, %v5770_v16 }
0x1aac   : > { %v15297_v41 = vpack.c.bf16 %v5762_v2, %v5762_v2  ;;  %v5765_v55 = vadd.f32 %v11272_v17, %v5764_v36 }
0x1aae   : > { %v15299_v59 = vpack.c.bf16 %v5765_v55, %v5765_v55  ;;  %5779 = vrot.lane.b32.xlu0 %v15297_v41, %s16737_s0 }
0x1ab0   : > { %5828 = vrot.lane.b32.xlu1 %v15299_v59, %s16737_s0 }
0x1ab4   : > { %5877 = vrot.lane.b32.xlu1 %v15305_v8, %s16737_s0  ;;  %s16747_s0 = smov 52  }
0x1b20   : > { %v5780_v11 = vpop.permute.xlu0 %5779 }
0x1b21   : > { %v5785_v48 = vsel %vm532_vm2, %v5780_v11, 0 }
0x1b22   : > { %v5829_v30 = vpop.permute.xlu1 %5828  ;;  %12784 = vmatpush3.bf16.xpose.msra.mxu1 %v5785_v48 }
0x1b23   : > { %v5834_v18 = vsel %vm532_vm2, %v5829_v30, 0  ;;  %12795 = vmatprep.subr.bf16.mxu1 %v13770_v7 }
0x1b24   : > { %12790 = vmatpush3.bf16.xpose.msra.mxu0 %v5834_v18 }
0x1b25   : > { %12801 = vmatprep.subr.bf16.mxu0 %v13770_v7 }
0x1b26   : > { %v5878_v39 = vpop.permute.xlu1 %5877 }
0x1b27   : > { %v5883_v44 = vsel %vm532_vm2, %v5878_v39, 0 }
0x1b29   : > { %12786 = vmatmul.mubr.msk.bf16.vlgmr.msra.gmra.mrb[164].mxu1 %vm532_vm2, %v15297_v41 }
0x1b2a   : > { %12796 = vmatpush3.bf16.xpose.msra.mxu1 %v5883_v44  ;;  %12797 = vmatprep.mubr.msk.bf16.mxu1 %vm13771_vm1, %v13770_v7 }
0x1b2b   : > { %12792 = vmatmul.mubr.msk.bf16.vlgmr.msra.gmra.mrb[168].mxu0 %vm532_vm2, %v15299_v59  ;;  %12807 = vmatprep.subr.bf16.mxu1 %v13770_v7 }
0x1b2c   : > { %12803 = vmatprep.mubr.msk.bf16.mxu0 %vm13771_vm1, %v13770_v7 }
0x1b31   : > { %12798 = vmatmul.mubr.msk.bf16.vlgmr.msra.gmra.mrb[168].mxu1 %vm532_vm2, %v15305_v8 }
0x1b32   : > { %12809 = vmatprep.mubr.msk.bf16.mxu1 %vm13771_vm1, %v13770_v7 }
0x1bfc   : > { %v5821_v49 = vpop.f32.mrb[164].mxu1 }
0x1bfd   : > { %v5925_v9 = vmul.f32 0.5, %v5821_v49  ;;  %v12787_v25 = vpop.f32.mrb[165].mxu1 }
0x1bfe   : > { %v5824_v1 = vpop.f32.mrb[166].mxu1  ;;  %v5870_v20 = vpop.f32.mrb[168].mxu0 }
0x1bff   : > { %v5926_v21 = vmul.f32 0.5, %v5870_v20  ;;  %v12788_v19 = vpop.f32.mrb[167].mxu1  ;;  %v12793_v32 = vpop.f32.mrb[169].mxu0  ;;  %v5928_v24 = vsel %vm680_vm3, %v5925_v9, -inf }
0x1c00   : > { %v5873_v31 = vpop.f32.mrb[170].mxu0  ;;  %5929 = vmax.xlane.f32.xlu0 %v5928_v24 }
0x1c01   : > { %v12794_v35 = vpop.f32.mrb[171].mxu0  ;;  %v5931_v22 = vsel %vm680_vm3, %v5926_v21, -inf }
0x1c02   : > { %5932 = vmax.xlane.f32.xlu1 %v5931_v22 }
0x1c04   : > { %v5919_v46 = vpop.f32.mrb[168].mxu1 }
0x1c05   : > { %v5927_v52 = vmul.f32 0.5, %v5919_v46  ;;  %v12799_v57 = vpop.f32.mrb[169].mxu1 }
0x1c06   : > { %v5922_v62 = vpop.f32.mrb[170].mxu1 }
0x1c07   : > { %v12800_v63 = vpop.f32.mrb[171].mxu1  ;;  %v5934_v4 = vsel %vm680_vm3, %v5927_v52, -inf }
0x1c08   : > { %5935 = vmax.xlane.f32.xlu0 %v5934_v4 }
0x1c13   : > { %6012 = vrot.lane.b32.xlu1 %v15299_v59, %s16738_s22 }
0x1c17   : > { %6060 = vrot.lane.b32.xlu1 %v15305_v8, %s16738_s22 }
0x1c1e   : > { %5964 = vrot.lane.b32.xlu0 %v15297_v41, %s16738_s22  ;;  %s16748_s22 = smov 80  }
0x1c8d   : > { %v5930_v60 = vpop.xlane.xlu0 %5929 }
0x1c8e   : > { %v5937_v45 = vsub.f32 %v5925_v9, %v5930_v60 }
0x1c8f   : > { %v5933_v50 = vpop.xlane.xlu1 %5932 }
0x1c90   : > { %v5940_v51 = vmul.f32 1.442695, %v5937_v45  ;;  %v5938_v58 = vsub.f32 %v5926_v21, %v5933_v50 }
0x1c92   : > { %13595 = vpow2.f32 %v5940_v51  ;;  %v5942_v61 = vmul.f32 1.442695, %v5938_v58 }
0x1c93   : > { %v6013_v13 = vpop.permute.xlu1 %6012 }
0x1c94   : > { %13597 = vpow2.f32 %v5942_v61  ;;  %v6018_v15 = vsel %vm722_vm4, %v6013_v13, 0 }
0x1c95   : > { %12808 = vmatpush3.bf16.msra.mxu1 %v6018_v15  ;;  %v5936_v33 = vpop.xlane.xlu0 %5935 }
0x1c96   : > { %12819 = vmatprep.subr.bf16.mxu1 %v13770_v7  ;;  %v5939_v28 = vsub.f32 %v5927_v52, %v5936_v33 }
0x1c97   : > { %v6061_v2 = vpop.permute.xlu1 %6060 }
0x1c98   : > { %v5944_v17 = vmul.f32 1.442695, %v5939_v28  ;;  %v6066_v39 = vsel %vm722_vm4, %v6061_v2, 0 }
0x1c99   : > { %v5965_v47 = vpop.permute.xlu0 %5964 }
0x1c9a   : > { %v5970_v14 = vsel %vm722_vm4, %v5965_v47, 0  ;;  %13599 = vpow2.f32 %v5944_v17 }
0x1c9b   : > { %12802 = vmatpush3.bf16.msra.mxu0 %v5970_v14 }
0x1c9c   : > { %v13596_v6 = vpop.eup %13595  ;;  %12813 = vmatprep.subr.bf16.mxu0 %v13770_v7 }
0x1c9d   : > { %v5946_v34 = vsel %vm680_vm3, %v13596_v6, 0.0 }
0x1c9e   : > { %v13598_v40 = vpop.eup %13597  ;;  %5947 = vadd.xlane.f32.xlu0 %v5946_v34 }
0x1c9f   : > { %v5949_v27 = vsel %vm680_vm3, %v13598_v40, 0.0 }
0x1ca0   : > { %5950 = vadd.xlane.f32.xlu1 %v5949_v27 }
0x1ca4   : > { %v13600_v10 = vpop.eup %13599 }
0x1ca5   : > { %v5952_v42 = vsel %vm680_vm3, %v13600_v10, 0.0 }
0x1cb1   : > { %6110 = vrot.lane.b32.xlu1 %v15297_v41, %s16739_s21 }
0x1cb4   : > { %6160 = vrot.lane.b32.xlu0 %v15299_v59, %s16739_s21 }
0x1cb5   : > { %6108 = vrot.lane.b32.xlu1 %v15297_v41, %s16740_s30 }
0x1cb9   : > { %6158 = vrot.lane.b32.xlu1 %v15299_v59, %s16740_s30 }
0x1cd3   : > { %5953 = vadd.xlane.f32.xlu0 %v5952_v42 }
0x1ce9   : > { %6210 = vrot.lane.b32.xlu0 %v15305_v8, %s16739_s21  ;;  %s16749_s21 = smov 112  }
0x1ced   : > { %6208 = vrot.lane.b32.xlu0 %v15305_v8, %s16740_s30  ;;  %s16750_s30 = smov 48  }
0x1d2b   : > { %v5948_v3 = vpop.xlane.xlu0 %5947 }
0x1d2c   : > { %13601 = vrcp.f32 %v5948_v3 }
0x1d2d   : > { %v5951_v36 = vpop.xlane.xlu1 %5950 }
0x1d2e   : > { %13603 = vrcp.f32 %v5951_v36 }
0x1d2f   : > { %v6161_v25 = vpop.permute.xlu0 %6160 }
0x1d30   : > { %v6166_v35 = vsel %vm532_vm2, %v6161_v25, 0 }
0x1d31   : > { %v6111_v18 = vpop.permute.xlu1 %6110 }
0x1d32   : > { %v6116_v49 = vsel %vm532_vm2, %v6111_v18, 0 }
0x1d35   : > { %v6109_v9 = vpop.permute.xlu1 %6108 }
0x1d36   : > { %v13602_v55 = vpop.eup %13601 }
0x1d37   : > { %v5958_v16 = vmul.f32 %v13602_v55, %v13596_v6 }
0x1d38   : > { %v13604_v11 = vpop.eup %13603 }
0x1d39   : > { %v5961_v48 = vpack.c.bf16 %v5958_v16, %v5958_v16  ;;  %v5959_v30 = vmul.f32 %v13604_v11, %v13598_v40  ;;  %v6159_v22 = vpop.permute.xlu1 %6158 }
0x1d3b   : > { %12804 = vmatmul.mubr.msk.bf16.vlgmr.msra.gmra.mrb[172].mxu0 %vm680_vm3, %v5961_v48  ;;  %v5962_v44 = vpack.c.bf16 %v5959_v30, %v5959_v30 }
0x1d3c   : > { %12814 = vmatpush3.bf16.msra.mxu0 %v6066_v39  ;;  %12815 = vmatprep.mubr.msk.bf16.mxu0 %vm13771_vm1, %v13770_v7 }
0x1d3d   : > { %12810 = vmatmul.mubr.msk.bf16.vlgmr.msra.gmra.mrb[172].mxu1 %vm680_vm3, %v5962_v44  ;;  %12825 = vmatprep.subr.bf16.mxu0 %v13770_v7 }
0x1d3e   : > { %12820 = vmatpush3.bf16.xpose.msra.mxu1 %v6116_v49  ;;  %12821 = vmatprep.mubr.msk.bf16.mxu1 %vm13771_vm1, %v13770_v7 }
0x1d3f   : > { %12831 = vmatprep.subr.bf16.mxu1 %v13770_v7 }
0x1d45   : > { %12822 = vmatmul.mubr.msk.bf16.vlgmr.msra.gmra.mrb[176].mxu1 %vm532_vm2, %v6109_v9 }
0x1d46   : > { %12833 = vmatprep.mubr.msk.bf16.mxu1 %vm13771_vm1, %v13770_v7 }
0x1d60   : > { %v5954_v1 = vpop.xlane.xlu0 %5953 }
0x1d61   : > { %13605 = vrcp.f32 %v5954_v1 }
0x1d64   : > { %v6211_v20 = vpop.permute.xlu0 %6210 }
0x1d65   : > { %v6216_v21 = vsel %vm532_vm2, %v6211_v20, 0 }
0x1d66   : > { %12832 = vmatpush3.bf16.xpose.msra.mxu1 %v6216_v21 }
0x1d67   : > { %12843 = vmatprep.subr.bf16.mxu1 %v13770_v7 }
0x1d68   : > { %v6209_v32 = vpop.permute.xlu0 %6208 }
0x1d6b   : > { %v13606_v19 = vpop.eup %13605 }
0x1d6c   : > { %v5960_v24 = vmul.f32 %v13606_v19, %v13600_v10 }
0x1d6d   : > { %12834 = vmatmul.mubr.msk.bf16.vlgmr.msra.gmra.mrb[180].mxu1 %vm532_vm2, %v6209_v32 }
0x1d6e   : > { %v5963_v31 = vpack.c.bf16 %v5960_v24, %v5960_v24  ;;  %12845 = vmatprep.mubr.msk.bf16.mxu1 %vm13771_vm1, %v13770_v7 }
0x1d70   : > { %12816 = vmatmul.mubr.msk.bf16.vlgmr.msra.gmra.mrb[176].mxu0 %vm680_vm3, %v5963_v31 }
0x1d71   : > { %12826 = vmatpush3.bf16.xpose.msra.mxu0 %v6166_v35  ;;  %12827 = vmatprep.mubr.msk.bf16.mxu0 %vm13771_vm1, %v13770_v7 }
0x1d72   : > { %12837 = vmatprep.subr.bf16.mxu0 %v13770_v7 }
0x1d78   : > { %12828 = vmatmul.mubr.msk.bf16.vlgmr.msra.gmra.mrb[180].mxu0 %vm532_vm2, %v6159_v22 }
0x1d79   : > { %12839 = vmatprep.mubr.msk.bf16.mxu0 %vm13771_vm1, %v13770_v7 }
0x1e0e   : > { %v15381_v46 = vpop.f32.mrb[172].mxu0 }
0x1e0f   : > { %v12805_v52 = vpop.f32.mrb[173].mxu0 }
0x1e10   : > { %v6009_v57 = vpop.f32.mrb[174].mxu0  ;;  %v15383_v62 = vpop.f32.mrb[172].mxu1 }
0x1e11   : > { %v12806_v63 = vpop.f32.mrb[175].mxu0  ;;  %v12811_v4 = vpop.f32.mrb[173].mxu1 }
0x1e12   : > { %v6057_v60 = vpop.f32.mrb[174].mxu1 }
0x1e13   : > { %v12812_v45 = vpop.f32.mrb[175].mxu1 }
0x1e18   : > { %v6152_v50 = vpop.f32.mrb[176].mxu1 }
0x1e19   : > { %v6258_v51 = vmul.f32 0.5, %v6152_v50  ;;  %v12823_v58 = vpop.f32.mrb[177].mxu1 }
0x1e1a   : > { %v6155_v61 = vpop.f32.mrb[178].mxu1 }
0x1e1b   : > { %v12824_v13 = vpop.f32.mrb[179].mxu1  ;;  %v6261_v15 = vsel %vm680_vm3, %v6258_v51, -inf }
0x1e1c   : > { %6262 = vmax.xlane.f32.xlu1 %v6261_v15 }
0x1e2d   : > { %6345 = vrot.lane.b32.xlu1 %v15299_v59, %s16741_s16 }
0x1e31   : > { %6393 = vrot.lane.b32.xlu1 %v15305_v8, %s16741_s16 }
0x1e40   : > { %v6252_v33 = vpop.f32.mrb[180].mxu1 }
0x1e41   : > { %v12835_v47 = vpop.f32.mrb[181].mxu1  ;;  %v6260_v3 = vmul.f32 0.5, %v6252_v33 }
0x1e42   : > { %v6255_v14 = vpop.f32.mrb[182].mxu1 }
0x1e43   : > { %v15390_v6 = vpop.f32.mrb[176].mxu0  ;;  %v12836_v34 = vpop.f32.mrb[183].mxu1  ;;  %v6267_v16 = vsel %vm680_vm3, %v6260_v3, -inf }
0x1e44   : > { %v12817_v40 = vpop.f32.mrb[177].mxu0 }
0x1e45   : > { %v6105_v27 = vpop.f32.mrb[178].mxu0 }
0x1e46   : > { %v12818_v28 = vpop.f32.mrb[179].mxu0 }
0x1e4b   : > { %v6202_v17 = vpop.f32.mrb[180].mxu0 }
0x1e4c   : > { %v6259_v10 = vmul.f32 0.5, %v6202_v17  ;;  %v12829_v42 = vpop.f32.mrb[181].mxu0 }
0x1e4d   : > { %v6205_v2 = vpop.f32.mrb[182].mxu0 }
0x1e4e   : > { %v12830_v36 = vpop.f32.mrb[183].mxu0  ;;  %v6264_v55 = vsel %vm680_vm3, %v6259_v10, -inf }
0x1e4f   : > { %6265 = vmax.xlane.f32.xlu0 %v6264_v55 }
0x1e53   : > { %6268 = vmax.xlane.f32.xlu0 %v6267_v16 }
0x1e69   : > { %6297 = vrot.lane.b32.xlu0 %v15297_v41, %s16741_s16  ;;  %s16751_s16 = smov 76  }
0x1ea9   : > { %v6263_v11 = vpop.xlane.xlu1 %6262 }
0x1eaa   : > { %v6270_v48 = vsub.f32 %v6258_v51, %v6263_v11 }
0x1eac   : > { %v6273_v30 = vmul.f32 1.442695, %v6270_v48 }
0x1ead   : > { %v6346_v18 = vpop.permute.xlu1 %6345 }
0x1eae   : > { %13607 = vpow2.f32 %v6273_v30  ;;  %v6351_v39 = vsel %vm722_vm4, %v6346_v18, 0 }
0x1eaf   : > { %12844 = vmatpush3.bf16.msra.mxu1 %v6351_v39 }
0x1eb0   : > { %12855 = vmatprep.subr.bf16.mxu1 %v13770_v7 }
0x1eb1   : > { %v6394_v57 = vpop.permute.xlu1 %6393 }
0x1eb2   : > { %v6399_v50 = vsel %vm722_vm4, %v6394_v57, 0 }
0x1eb8   : > { %v13608_v44 = vpop.eup %13607 }
0x1eb9   : > { %v6279_v49 = vsel %vm680_vm3, %v13608_v44, 0.0 }
0x1eba   : > { %6280 = vadd.xlane.f32.xlu1 %v6279_v49 }
0x1ecb   : > { %6493 = vrot.lane.b32.xlu1 %v15299_v59, %s16742_s15 }
0x1edc   : > { %v6266_v9 = vpop.xlane.xlu0 %6265 }
0x1edd   : > { %v6271_v25 = vsub.f32 %v6259_v10, %v6266_v9 }
0x1edf   : > { %v6275_v1 = vmul.f32 1.442695, %v6271_v25 }
0x1ee0   : > { %v6269_v20 = vpop.xlane.xlu0 %6268 }
0x1ee1   : > { %13609 = vpow2.f32 %v6275_v1  ;;  %v6272_v21 = vsub.f32 %v6260_v3, %v6269_v20 }
0x1ee3   : > { %v6277_v19 = vmul.f32 1.442695, %v6272_v21 }
0x1ee4   : > { %v6298_v32 = vpop.permute.xlu0 %6297 }
0x1ee5   : > { %13611 = vpow2.f32 %v6277_v19  ;;  %v6303_v24 = vsel %vm722_vm4, %v6298_v32, 0 }
0x1ee6   : > { %12838 = vmatpush3.bf16.msra.mxu0 %v6303_v24 }
0x1ee7   : > { %12849 = vmatprep.subr.bf16.mxu0 %v13770_v7 }
0x1eeb   : > { %v13610_v31 = vpop.eup %13609 }
0x1eec   : > { %v6282_v35 = vsel %vm680_vm3, %v13610_v31, 0.0 }
0x1eed   : > { %6283 = vadd.xlane.f32.xlu0 %v6282_v35 }
0x1eef   : > { %v13612_v22 = vpop.eup %13611 }
0x1ef0   : > { %v6285_v52 = vsel %vm680_vm3, %v13612_v22, 0.0 }
0x1ef1   : > { %6286 = vadd.xlane.f32.xlu1 %v6285_v52 }
0x1f02   : > { %6543 = vrot.lane.b32.xlu1 %v15305_v8, %s16742_s15 }
0x1f03   : > { %6443 = vrot.lane.b32.xlu0 %v15297_v41, %s16742_s15  ;;  %s16752_s15 = smov 108  }
0x1f06   : > { %6541 = vrot.lane.b32.xlu1 %v15305_v8, %s16743_s23 }
0x1f07   : > { %6441 = vrot.lane.b32.xlu0 %v15297_v41, %s16743_s23 }
0x1f0b   : > { %6491 = vrot.lane.b32.xlu0 %v15299_v59, %s16743_s23  ;;  %s16753_s23 = smov 44  }
0x1f47   : > { %v6281_v63 = vpop.xlane.xlu1 %6280 }
0x1f48   : > { %13613 = vrcp.f32 %v6281_v63 }
0x1f4b   : > { %v6494_v51 = vpop.permute.xlu1 %6493 }
0x1f4c   : > { %v6499_v28 = vsel %vm532_vm2, %v6494_v51, 0 }
0x1f52   : > { %v13614_v4 = vpop.eup %13613 }
0x1f53   : > { %v6291_v60 = vmul.f32 %v13614_v4, %v13608_v44 }
0x1f55   : > { %v6294_v45 = vpack.c.bf16 %v6291_v60, %v6291_v60 }
0x1f57   : > { %12840 = vmatmul.mubr.msk.bf16.vlgmr.msra.gmra.mrb[184].mxu0 %vm680_vm3, %v6294_v45 }
0x1f58   : > { %12850 = vmatpush3.bf16.msra.mxu0 %v6399_v50  ;;  %12851 = vmatprep.mubr.msk.bf16.mxu0 %vm13771_vm1, %v13770_v7 }
0x1f59   : > { %12861 = vmatprep.subr.bf16.mxu0 %v13770_v7 }
0x1f7a   : > { %v6284_v58 = vpop.xlane.xlu0 %6283 }
0x1f7b   : > { %13615 = vrcp.f32 %v6284_v58 }
0x1f7e   : > { %v6287_v61 = vpop.xlane.xlu1 %6286  ;;  %v6444_v33 = vpop.permute.xlu0 %6443 }
0x1f7f   : > { %13617 = vrcp.f32 %v6287_v61  ;;  %v6449_v34 = vsel %vm532_vm2, %v6444_v33, 0 }
0x1f82   : > { %v6544_v17 = vpop.permute.xlu1 %6543  ;;  %v6442_v10 = vpop.permute.xlu0 %6441 }
0x1f83   : > { %v6549_v42 = vsel %vm532_vm2, %v6544_v17, 0 }
0x1f85   : > { %v13616_v13 = vpop.eup %13615 }
0x1f86   : > { %v6292_v15 = vmul.f32 %v13616_v13, %v13610_v31  ;;  %v6492_v2 = vpop.permute.xlu0 %6491  ;;  %v6542_v3 = vpop.permute.xlu1 %6541 }
0x1f88   : > { %v6295_v47 = vpack.c.bf16 %v6292_v15, %v6292_v15 }
0x1f89   : > { %v13618_v14 = vpop.eup %13617 }
0x1f8a   : > { %12846 = vmatmul.mubr.msk.bf16.vlgmr.msra.gmra.mrb[184].mxu1 %vm680_vm3, %v6295_v47  ;;  %v6293_v40 = vmul.f32 %v13618_v14, %v13612_v22 }
0x1f8b   : > { %12856 = vmatpush3.bf16.xpose.msra.mxu1 %v6449_v34  ;;  %12857 = vmatprep.mubr.msk.bf16.mxu1 %vm13771_vm1, %v13770_v7 }
0x1f8c   : > { %v6296_v27 = vpack.c.bf16 %v6293_v40, %v6293_v40  ;;  %12867 = vmatprep.subr.bf16.mxu1 %v13770_v7 }
0x1f8e   : > { %12852 = vmatmul.mubr.msk.bf16.vlgmr.msra.gmra.mrb[188].mxu0 %vm680_vm3, %v6296_v27 }
0x1f8f   : > { %12862 = vmatpush3.bf16.xpose.msra.mxu0 %v6499_v28  ;;  %12863 = vmatprep.mubr.msk.bf16.mxu0 %vm13771_vm1, %v13770_v7 }
0x1f90   : > { %12873 = vmatprep.subr.bf16.mxu0 %v13770_v7 }
0x1f92   : > { %12858 = vmatmul.mubr.msk.bf16.vlgmr.msra.gmra.mrb[188].mxu1 %vm532_vm2, %v6442_v10 }
0x1f93   : > { %12868 = vmatpush3.bf16.xpose.msra.mxu1 %v6549_v42  ;;  %12869 = vmatprep.mubr.msk.bf16.mxu1 %vm13771_vm1, %v13770_v7 }
0x1f94   : > { %12879 = vmatprep.subr.bf16.mxu1 %v13770_v7 }
0x1f96   : > { %12864 = vmatmul.mubr.msk.bf16.vlgmr.msra.gmra.mrb[192].mxu0 %vm532_vm2, %v6492_v2 }
0x1f97   : > { %12875 = vmatprep.mubr.msk.bf16.mxu0 %vm13771_vm1, %v13770_v7 }
0x1f9a   : > { %12870 = vmatmul.mubr.msk.bf16.vlgmr.msra.gmra.mrb[192].mxu1 %vm532_vm2, %v6542_v3 }
0x1f9b   : > { %12881 = vmatprep.mubr.msk.bf16.mxu1 %vm13771_vm1, %v13770_v7 }
0x202a   : > { %v15441_v36 = vpop.f32.mrb[184].mxu0 }
0x202b   : > { %v12841_v55 = vpop.f32.mrb[185].mxu0 }
0x202c   : > { %v6342_v16 = vpop.f32.mrb[186].mxu0 }
0x202d   : > { %v12842_v11 = vpop.f32.mrb[187].mxu0 }
0x205d   : > { %v15443_v48 = vpop.f32.mrb[184].mxu1 }
0x205e   : > { %v13188_v30 = vpack.i.bf16 %v15443_v48, %v15441_v36  ;;  %v12847_v18 = vpop.f32.mrb[185].mxu1 }
0x205f   : > { %v6390_v39 = vpop.f32.mrb[186].mxu1 }
0x2060   : > { %v12848_v44 = vpop.f32.mrb[187].mxu1 }
0x2061   : > { %v15447_v49 = vpop.f32.mrb[188].mxu0 }
0x2062   : > { %v12853_v9 = vpop.f32.mrb[189].mxu0 }
0x2063   : > { %v6438_v25 = vpop.f32.mrb[190].mxu0 }
0x2064   : > { %v12854_v1 = vpop.f32.mrb[191].mxu0 }
0x2065   : > { %v6485_v20 = vpop.f32.mrb[188].mxu1 }
0x2066   : > { %v6591_v21 = vmul.f32 0.5, %v6485_v20  ;;  %v12859_v19 = vpop.f32.mrb[189].mxu1 }
0x2067   : > { %v6488_v32 = vpop.f32.mrb[190].mxu1 }
0x2068   : > { %v12860_v24 = vpop.f32.mrb[191].mxu1  ;;  %v6594_v31 = vsel %vm680_vm3, %v6591_v21, -inf }
0x2069   : > { %v6535_v35 = vpop.f32.mrb[192].mxu0  ;;  %6595 = vmax.xlane.f32.xlu0 %v6594_v31 }
0x206a   : > { %v6592_v22 = vmul.f32 0.5, %v6535_v35  ;;  %v12865_v52 = vpop.f32.mrb[193].mxu0 }
0x206b   : > { %v6538_v57 = vpop.f32.mrb[194].mxu0 }
0x206c   : > { %v12866_v63 = vpop.f32.mrb[195].mxu0  ;;  %v6597_v4 = vsel %vm680_vm3, %v6592_v22, -inf }
0x206d   : > { %6598 = vmax.xlane.f32.xlu1 %v6597_v4  ;;  %v6585_v60 = vpop.f32.mrb[192].mxu1 }
0x206e   : > { %v6593_v45 = vmul.f32 0.5, %v6585_v60  ;;  %v12871_v50 = vpop.f32.mrb[193].mxu1 }
0x206f   : > { %v6588_v51 = vpop.f32.mrb[194].mxu1 }
0x2070   : > { %v12872_v58 = vpop.f32.mrb[195].mxu1  ;;  %v6600_v61 = vsel %vm680_vm3, %v6593_v45, -inf }
0x2071   : > { %6601 = vmax.xlane.f32.xlu0 %v6600_v61 }
0x207e   : > { %6678 = vrot.lane.b32.xlu1 %v15299_v59, %s16744_s24 }
0x2082   : > { %6726 = vrot.lane.b32.xlu1 %v15305_v8, %s16744_s24 }
0x2087   : > { %6630 = vrot.lane.b32.xlu0 %v15297_v41, %s16744_s24  ;;  %s16754_s24 = smov 72  }
0x20f6   : > { %v6596_v13 = vpop.xlane.xlu0 %6595 }
0x20f7   : > { %v6603_v15 = vsub.f32 %v6591_v21, %v6596_v13 }
0x20f9   : > { %v6606_v33 = vmul.f32 1.442695, %v6603_v15 }
0x20fa   : > { %v6599_v47 = vpop.xlane.xlu1 %6598 }
0x20fb   : > { %13619 = vpow2.f32 %v6606_v33  ;;  %v6604_v14 = vsub.f32 %v6592_v22, %v6599_v47 }
0x20fd   : > { %v6608_v34 = vmul.f32 1.442695, %v6604_v14 }
0x20fe   : > { %v6679_v40 = vpop.permute.xlu1 %6678  ;;  %v6602_v27 = vpop.xlane.xlu0 %6601 }
0x20ff   : > { %13621 = vpow2.f32 %v6608_v34  ;;  %v6684_v28 = vsel %vm722_vm4, %v6679_v40, 0  ;;  %v6605_v16 = vsub.f32 %v6593_v45, %v6602_v27 }
0x2100   : > { %12880 = vmatpush3.bf16.msra.mxu1 %v6684_v28 }
0x2101   : > { %12891 = vmatprep.subr.bf16.mxu1 %v13770_v7  ;;  %v6610_v11 = vmul.f32 1.442695, %v6605_v16 }
0x2102   : > { %v6631_v17 = vpop.permute.xlu0 %6630  ;;  %v6727_v44 = vpop.permute.xlu1 %6726 }
0x2103   : > { %v6636_v10 = vsel %vm722_vm4, %v6631_v17, 0  ;;  %13623 = vpow2.f32 %v6610_v11  ;;  %v6732_v32 = vsel %vm722_vm4, %v6727_v44, 0 }
0x2104   : > { %12874 = vmatpush3.bf16.msra.mxu0 %v6636_v10 }
0x2105   : > { %v13620_v42 = vpop.eup %13619  ;;  %12885 = vmatprep.subr.bf16.mxu0 %v13770_v7 }
0x2106   : > { %v6612_v2 = vsel %vm680_vm3, %v13620_v42, 0.0 }
0x2107   : > { %6613 = vadd.xlane.f32.xlu0 %v6612_v2 }
0x2109   : > { %v13622_v3 = vpop.eup %13621 }
0x210a   : > { %v6615_v55 = vsel %vm680_vm3, %v13622_v3, 0.0 }
0x210b   : > { %6616 = vadd.xlane.f32.xlu1 %v6615_v55 }
0x210d   : > { %v13624_v18 = vpop.eup %13623 }
0x210e   : > { %v6618_v39 = vsel %vm680_vm3, %v13624_v18, 0.0 }
0x211c   : > { %6776 = vrot.lane.b32.xlu1 %v15297_v41, %s16745_s17 }
0x211d   : > { %6826 = vrot.lane.b32.xlu0 %v15299_v59, %s16745_s17 }
0x2120   : > { %6774 = vrot.lane.b32.xlu1 %v15297_v41, %s16746_s20 }
0x2124   : > { %6824 = vrot.lane.b32.xlu1 %v15299_v59, %s16746_s20 }
0x213c   : > { %6619 = vadd.xlane.f32.xlu0 %v6618_v39 }
0x2152   : > { %6876 = vrot.lane.b32.xlu0 %v15305_v8, %s16745_s17  ;;  %s16755_s17 = smov 104  }
0x2156   : > { %6874 = vrot.lane.b32.xlu0 %v15305_v8, %s16746_s20  ;;  %s16756_s20 = smov 40  }
0x2194   : > { %v6614_v9 = vpop.xlane.xlu0 %6613 }
0x2195   : > { %13625 = vrcp.f32 %v6614_v9 }
0x2198   : > { %v6617_v25 = vpop.xlane.xlu1 %6616  ;;  %v6827_v57 = vpop.permute.xlu0 %6826 }
0x2199   : > { %13627 = vrcp.f32 %v6617_v25  ;;  %v6832_v61 = vsel %vm532_vm2, %v6827_v57, 0 }
0x219c   : > { %v6777_v31 = vpop.permute.xlu1 %6776 }
0x219d   : > { %v6782_v22 = vsel %vm532_vm2, %v6777_v31, 0 }
0x219f   : > { %v13626_v1 = vpop.eup %13625 }
0x21a0   : > { %v6624_v20 = vmul.f32 %v13626_v1, %v13620_v42  ;;  %v6775_v52 = vpop.permute.xlu1 %6774 }
0x21a2   : > { %v6627_v21 = vpack.c.bf16 %v6624_v20, %v6624_v20 }
0x21a3   : > { %v13628_v19 = vpop.eup %13627 }
0x21a4   : > { %12876 = vmatmul.mubr.msk.bf16.vlgmr.msra.gmra.mrb[196].mxu0 %vm680_vm3, %v6627_v21  ;;  %v6625_v24 = vmul.f32 %v13628_v19, %v13622_v3  ;;  %v6825_v13 = vpop.permute.xlu1 %6824 }
0x21a5   : > { %12886 = vmatpush3.bf16.msra.mxu0 %v6732_v32  ;;  %12887 = vmatprep.mubr.msk.bf16.mxu0 %vm13771_vm1, %v13770_v7 }
0x21a6   : > { %v6628_v35 = vpack.c.bf16 %v6625_v24, %v6625_v24  ;;  %12897 = vmatprep.subr.bf16.mxu0 %v13770_v7 }
0x21a8   : > { %12882 = vmatmul.mubr.msk.bf16.vlgmr.msra.gmra.mrb[196].mxu1 %vm680_vm3, %v6628_v35 }
0x21a9   : > { %12892 = vmatpush3.bf16.xpose.msra.mxu1 %v6782_v22  ;;  %12893 = vmatprep.mubr.msk.bf16.mxu1 %vm13771_vm1, %v13770_v7 }
0x21aa   : > { %12903 = vmatprep.subr.bf16.mxu1 %v13770_v7 }
0x21b0   : > { %12894 = vmatmul.mubr.msk.bf16.vlgmr.msra.gmra.mrb[200].mxu1 %vm532_vm2, %v6775_v52 }
0x21b1   : > { %12905 = vmatprep.mubr.msk.bf16.mxu1 %vm13771_vm1, %v13770_v7 }
0x21c9   : > { %v6620_v63 = vpop.xlane.xlu0 %6619 }
0x21ca   : > { %13629 = vrcp.f32 %v6620_v63 }
0x21cd   : > { %v6877_v4 = vpop.permute.xlu0 %6876 }
0x21ce   : > { %v6882_v60 = vsel %vm532_vm2, %v6877_v4, 0 }
0x21cf   : > { %12904 = vmatpush3.bf16.xpose.msra.mxu1 %v6882_v60 }
0x21d0   : > { %12915 = vmatprep.subr.bf16.mxu1 %v13770_v7 }
0x21d1   : > { %v6875_v50 = vpop.permute.xlu0 %6874 }
0x21d4   : > { %v13630_v45 = vpop.eup %13629 }
0x21d5   : > { %v6626_v51 = vmul.f32 %v13630_v45, %v13624_v18 }
0x21d6   : > { %12906 = vmatmul.mubr.msk.bf16.vlgmr.msra.gmra.mrb[204].mxu1 %vm532_vm2, %v6875_v50 }
0x21d7   : > { %v6629_v58 = vpack.c.bf16 %v6626_v51, %v6626_v51  ;;  %12917 = vmatprep.mubr.msk.bf16.mxu1 %vm13771_vm1, %v13770_v7 }
0x21d9   : > { %12888 = vmatmul.mubr.msk.bf16.vlgmr.msra.gmra.mrb[200].mxu0 %vm680_vm3, %v6629_v58 }
0x21da   : > { %12898 = vmatpush3.bf16.xpose.msra.mxu0 %v6832_v61  ;;  %12899 = vmatprep.mubr.msk.bf16.mxu0 %vm13771_vm1, %v13770_v7 }
0x21db   : > { %12909 = vmatprep.subr.bf16.mxu0 %v13770_v7 }
0x21e1   : > { %12900 = vmatmul.mubr.msk.bf16.vlgmr.msra.gmra.mrb[204].mxu0 %vm532_vm2, %v6825_v13 }
0x21e2   : > { %12911 = vmatprep.mubr.msk.bf16.mxu0 %vm13771_vm1, %v13770_v7 }
0x2277   : > { %v15503_v15 = vpop.f32.mrb[196].mxu0 }
0x2278   : > { %v12877_v33 = vpop.f32.mrb[197].mxu0 }
0x2279   : > { %v6675_v47 = vpop.f32.mrb[198].mxu0 }
0x227a   : > { %v12878_v14 = vpop.f32.mrb[199].mxu0 }
0x227b   : > { %v15505_v34 = vpop.f32.mrb[196].mxu1 }
0x227c   : > { %v13193_v40 = vpack.i.bf16 %v15505_v34, %v15503_v15  ;;  %v12883_v27 = vpop.f32.mrb[197].mxu1 }
0x227d   : > { %v6723_v28 = vpop.f32.mrb[198].mxu1 }
0x227e   : > { %v12884_v17 = vpop.f32.mrb[199].mxu1 }
0x2283   : > { %v6818_v10 = vpop.f32.mrb[200].mxu1 }
0x2284   : > { %v6924_v42 = vmul.f32 0.5, %v6818_v10  ;;  %v12895_v2 = vpop.f32.mrb[201].mxu1 }
0x2285   : > { %v6821_v3 = vpop.f32.mrb[202].mxu1 }
0x2286   : > { %v12896_v55 = vpop.f32.mrb[203].mxu1  ;;  %v6927_v16 = vsel %vm680_vm3, %v6924_v42, -inf }
0x2287   : > { %6928 = vmax.xlane.f32.xlu1 %v6927_v16 }
0x2298   : > { %7011 = vrot.lane.b32.xlu1 %v15299_v59, %s16747_s0 }
0x229c   : > { %7059 = vrot.lane.b32.xlu1 %v15305_v8, %s16747_s0 }
0x22a9   : > { %v6918_v11 = vpop.f32.mrb[204].mxu1 }
0x22aa   : > { %v12907_v18 = vpop.f32.mrb[205].mxu1  ;;  %v6926_v31 = vmul.f32 0.5, %v6918_v11 }
0x22ab   : > { %v6921_v39 = vpop.f32.mrb[206].mxu1 }
0x22ac   : > { %v15514_v44 = vpop.f32.mrb[200].mxu0  ;;  %v12908_v9 = vpop.f32.mrb[207].mxu1  ;;  %v6933_v52 = vsel %vm680_vm3, %v6926_v31, -inf }
0x22ad   : > { %v12889_v25 = vpop.f32.mrb[201].mxu0 }
0x22ae   : > { %v6771_v1 = vpop.f32.mrb[202].mxu0 }
0x22af   : > { %v12890_v20 = vpop.f32.mrb[203].mxu0 }
0x22b4   : > { %v6868_v21 = vpop.f32.mrb[204].mxu0 }
0x22b5   : > { %v6925_v19 = vmul.f32 0.5, %v6868_v21  ;;  %v12901_v32 = vpop.f32.mrb[205].mxu0 }
0x22b6   : > { %v6871_v24 = vpop.f32.mrb[206].mxu0 }
0x22b7   : > { %v12902_v35 = vpop.f32.mrb[207].mxu0  ;;  %v6930_v22 = vsel %vm680_vm3, %v6925_v19, -inf }
0x22b8   : > { %6931 = vmax.xlane.f32.xlu0 %v6930_v22 }
0x22bc   : > { %6934 = vmax.xlane.f32.xlu0 %v6933_v52 }
0x22d2   : > { %6963 = vrot.lane.b32.xlu0 %v15297_v41, %s16747_s0  ;;  %s16757_s0 = smov 68  }
0x2314   : > { %v6929_v57 = vpop.xlane.xlu1 %6928 }
0x2315   : > { %v6936_v63 = vsub.f32 %v6924_v42, %v6929_v57 }
0x2317   : > { %v6939_v4 = vmul.f32 1.442695, %v6936_v63 }
0x2318   : > { %v7012_v60 = vpop.permute.xlu1 %7011 }
0x2319   : > { %13631 = vpow2.f32 %v6939_v4  ;;  %v7017_v45 = vsel %vm722_vm4, %v7012_v60, 0 }
0x231a   : > { %12916 = vmatpush3.bf16.msra.mxu1 %v7017_v45 }
0x231b   : > { %12927 = vmatprep.subr.bf16.mxu1 %v13770_v7 }
0x231c   : > { %v7060_v3 = vpop.permute.xlu1 %7059 }
0x231d   : > { %v7065_v39 = vsel %vm722_vm4, %v7060_v3, 0 }
0x2323   : > { %v13632_v50 = vpop.eup %13631 }
0x2324   : > { %v6945_v51 = vsel %vm680_vm3, %v13632_v50, 0.0 }
0x2325   : > { %6946 = vadd.xlane.f32.xlu1 %v6945_v51 }
0x2336   : > { %7159 = vrot.lane.b32.xlu1 %v15299_v59, %s16748_s22 }
0x2345   : > { %v6932_v58 = vpop.xlane.xlu0 %6931 }
0x2346   : > { %v6937_v61 = vsub.f32 %v6925_v19, %v6932_v58 }
0x2348   : > { %v6941_v13 = vmul.f32 1.442695, %v6937_v61 }
0x2349   : > { %v6935_v33 = vpop.xlane.xlu0 %6934 }
0x234a   : > { %13633 = vpow2.f32 %v6941_v13  ;;  %v6938_v47 = vsub.f32 %v6926_v31, %v6935_v33 }
0x234c   : > { %v6943_v14 = vmul.f32 1.442695, %v6938_v47 }
0x234d   : > { %v6964_v27 = vpop.permute.xlu0 %6963 }
0x234e   : > { %13635 = vpow2.f32 %v6943_v14  ;;  %v6969_v28 = vsel %vm722_vm4, %v6964_v27, 0 }
0x234f   : > { %12910 = vmatpush3.bf16.msra.mxu0 %v6969_v28 }
0x2350   : > { %12921 = vmatprep.subr.bf16.mxu0 %v13770_v7 }
0x2354   : > { %v13634_v17 = vpop.eup %13633 }
0x2355   : > { %v6948_v10 = vsel %vm680_vm3, %v13634_v17, 0.0 }
0x2356   : > { %6949 = vadd.xlane.f32.xlu0 %v6948_v10 }
0x2358   : > { %v13636_v42 = vpop.eup %13635 }
0x2359   : > { %v6951_v2 = vsel %vm680_vm3, %v13636_v42, 0.0 }
0x235a   : > { %6952 = vadd.xlane.f32.xlu1 %v6951_v2 }
0x236b   : > { %7209 = vrot.lane.b32.xlu1 %v15305_v8, %s16748_s22 }
0x236c   : > { %7109 = vrot.lane.b32.xlu0 %v15297_v41, %s16748_s22  ;;  %s16758_s22 = smov 100  }
0x236f   : > { %7207 = vrot.lane.b32.xlu1 %v15305_v8, %s16749_s21 }
0x2370   : > { %7107 = vrot.lane.b32.xlu0 %v15297_v41, %s16749_s21 }
0x2374   : > { %7157 = vrot.lane.b32.xlu0 %v15299_v59, %s16749_s21  ;;  %s16759_s21 = smov 36  }
0x23b2   : > { %v6947_v55 = vpop.xlane.xlu1 %6946 }
0x23b3   : > { %13637 = vrcp.f32 %v6947_v55 }
0x23b6   : > { %v7160_v9 = vpop.permute.xlu1 %7159 }
0x23b7   : > { %v7165_v52 = vsel %vm532_vm2, %v7160_v9, 0 }
0x23bd   : > { %v13638_v16 = vpop.eup %13637 }
0x23be   : > { %v6957_v11 = vmul.f32 %v13638_v16, %v13632_v50 }
0x23c0   : > { %v6960_v18 = vpack.c.bf16 %v6957_v11, %v6957_v11 }
0x23c2   : > { %12912 = vmatmul.mubr.msk.bf16.vlgmr.msra.gmra.mrb[208].mxu0 %vm680_vm3, %v6960_v18 }
0x23c3   : > { %12922 = vmatpush3.bf16.msra.mxu0 %v7065_v39  ;;  %12923 = vmatprep.mubr.msk.bf16.mxu0 %vm13771_vm1, %v13770_v7 }
0x23c4   : > { %12933 = vmatprep.subr.bf16.mxu0 %v13770_v7 }
0x23e3   : > { %v6950_v25 = vpop.xlane.xlu0 %6949 }
0x23e4   : > { %13639 = vrcp.f32 %v6950_v25 }
0x23e7   : > { %v6953_v1 = vpop.xlane.xlu1 %6952  ;;  %v7110_v19 = vpop.permute.xlu0 %7109 }
0x23e8   : > { %13641 = vrcp.f32 %v6953_v1  ;;  %v7115_v35 = vsel %vm532_vm2, %v7110_v19, 0 }
0x23eb   : > { %v7210_v57 = vpop.permute.xlu1 %7209  ;;  %v7108_v63 = vpop.permute.xlu0 %7107 }
0x23ec   : > { %v7215_v4 = vsel %vm532_vm2, %v7210_v57, 0 }
0x23ee   : > { %v13640_v20 = vpop.eup %13639 }
0x23ef   : > { %v6958_v21 = vmul.f32 %v13640_v20, %v13634_v17  ;;  %v7158_v60 = vpop.permute.xlu0 %7157  ;;  %v7208_v45 = vpop.permute.xlu1 %7207 }
0x23f1   : > { %v6961_v32 = vpack.c.bf16 %v6958_v21, %v6958_v21 }
0x23f2   : > { %v13642_v24 = vpop.eup %13641 }
0x23f3   : > { %v6959_v31 = vmul.f32 %v13642_v24, %v13636_v42  ;;  %12918 = vmatmul.mubr.msk.bf16.vlgmr.msra.gmra.mrb[208].mxu1 %vm680_vm3, %v6961_v32 }
0x23f4   : > { %12928 = vmatpush3.bf16.xpose.msra.mxu1 %v7115_v35  ;;  %12929 = vmatprep.mubr.msk.bf16.mxu1 %vm13771_vm1, %v13770_v7 }
0x23f5   : > { %v6962_v22 = vpack.c.bf16 %v6959_v31, %v6959_v31  ;;  %12939 = vmatprep.subr.bf16.mxu1 %v13770_v7 }
0x23f7   : > { %12924 = vmatmul.mubr.msk.bf16.vlgmr.msra.gmra.mrb[212].mxu0 %vm680_vm3, %v6962_v22 }
0x23f8   : > { %12934 = vmatpush3.bf16.xpose.msra.mxu0 %v7165_v52  ;;  %12935 = vmatprep.mubr.msk.bf16.mxu0 %vm13771_vm1, %v13770_v7 }
0x23f9   : > { %12945 = vmatprep.subr.bf16.mxu0 %v13770_v7 }
0x23fb   : > { %12930 = vmatmul.mubr.msk.bf16.vlgmr.msra.gmra.mrb[212].mxu1 %vm532_vm2, %v7108_v63 }
0x23fc   : > { %12940 = vmatpush3.bf16.xpose.msra.mxu1 %v7215_v4  ;;  %12941 = vmatprep.mubr.msk.bf16.mxu1 %vm13771_vm1, %v13770_v7 }
0x23fd   : > { %12951 = vmatprep.subr.bf16.mxu1 %v13770_v7 }
0x23ff   : > { %12936 = vmatmul.mubr.msk.bf16.vlgmr.msra.gmra.mrb[216].mxu0 %vm532_vm2, %v7158_v60 }
0x2400   : > { %12947 = vmatprep.mubr.msk.bf16.mxu0 %vm13771_vm1, %v13770_v7 }
0x2403   : > { %12942 = vmatmul.mubr.msk.bf16.vlgmr.msra.gmra.mrb[216].mxu1 %vm532_vm2, %v7208_v45 }
0x2404   : > { %12953 = vmatprep.mubr.msk.bf16.mxu1 %vm13771_vm1, %v13770_v7 }
0x2495   : > { %v15565_v50 = vpop.f32.mrb[208].mxu0 }
0x2496   : > { %v12913_v51 = vpop.f32.mrb[209].mxu0 }
0x2497   : > { %v7008_v58 = vpop.f32.mrb[210].mxu0 }
0x2498   : > { %v12914_v61 = vpop.f32.mrb[211].mxu0 }
0x24c6   : > { %v15567_v13 = vpop.f32.mrb[208].mxu1 }
0x24c7   : > { %v13198_v33 = vpack.i.bf16 %v15567_v13, %v15565_v50  ;;  %v12919_v47 = vpop.f32.mrb[209].mxu1 }
0x24c8   : > { %v7056_v14 = vpop.f32.mrb[210].mxu1 }
0x24c9   : > { %v12920_v27 = vpop.f32.mrb[211].mxu1 }
0x24ca   : > { %v15571_v28 = vpop.f32.mrb[212].mxu0 }
0x24cb   : > { %v12925_v17 = vpop.f32.mrb[213].mxu0 }
0x24cc   : > { %v7104_v10 = vpop.f32.mrb[214].mxu0 }
0x24cd   : > { %v12926_v42 = vpop.f32.mrb[215].mxu0 }
0x24ce   : > { %v7151_v2 = vpop.f32.mrb[212].mxu1 }
0x24cf   : > { %v7257_v3 = vmul.f32 0.5, %v7151_v2  ;;  %v12931_v55 = vpop.f32.mrb[213].mxu1 }
0x24d0   : > { %v7154_v16 = vpop.f32.mrb[214].mxu1 }
0x24d1   : > { %v12932_v11 = vpop.f32.mrb[215].mxu1  ;;  %v7260_v18 = vsel %vm680_vm3, %v7257_v3, -inf }
0x24d2   : > { %v7201_v39 = vpop.f32.mrb[216].mxu0  ;;  %7261 = vmax.xlane.f32.xlu0 %v7260_v18 }
0x24d3   : > { %v7258_v9 = vmul.f32 0.5, %v7201_v39  ;;  %v12937_v25 = vpop.f32.mrb[217].mxu0 }
0x24d4   : > { %v7204_v1 = vpop.f32.mrb[218].mxu0 }
0x24d5   : > { %v12938_v20 = vpop.f32.mrb[219].mxu0  ;;  %v7263_v21 = vsel %vm680_vm3, %v7258_v9, -inf }
0x24d6   : > { %7264 = vmax.xlane.f32.xlu1 %v7263_v21  ;;  %v7251_v19 = vpop.f32.mrb[216].mxu1 }
0x24d7   : > { %v7259_v32 = vmul.f32 0.5, %v7251_v19  ;;  %v12943_v24 = vpop.f32.mrb[217].mxu1 }
0x24d8   : > { %v7254_v31 = vpop.f32.mrb[218].mxu1 }
0x24d9   : > { %v12944_v35 = vpop.f32.mrb[219].mxu1  ;;  %v7266_v22 = vsel %vm680_vm3, %v7259_v32, -inf }
0x24da   : > { %7267 = vmax.xlane.f32.xlu0 %v7266_v22 }
0x24e7   : > { %7344 = vrot.lane.b32.xlu1 %v15299_v59, %s16750_s30 }
0x24eb   : > { %7392 = vrot.lane.b32.xlu1 %v15305_v8, %s16750_s30 }
0x24f0   : > { %7296 = vrot.lane.b32.xlu0 %v15297_v41, %s16750_s30  ;;  %s16760_s30 = smov 4  }
0x255f   : > { %v7262_v52 = vpop.xlane.xlu0 %7261 }
0x2560   : > { %v7269_v57 = vsub.f32 %v7257_v3, %v7262_v52 }
0x2562   : > { %v7272_v63 = vmul.f32 1.442695, %v7269_v57 }
0x2563   : > { %v7265_v4 = vpop.xlane.xlu1 %7264 }
0x2564   : > { %13643 = vpow2.f32 %v7272_v63  ;;  %v7270_v60 = vsub.f32 %v7258_v9, %v7265_v4 }
0x2566   : > { %v7274_v45 = vmul.f32 1.442695, %v7270_v60 }
0x2567   : > { %v7345_v51 = vpop.permute.xlu1 %7344  ;;  %v7268_v58 = vpop.xlane.xlu0 %7267 }
0x2568   : > { %13645 = vpow2.f32 %v7274_v45  ;;  %v7350_v61 = vsel %vm722_vm4, %v7345_v51, 0  ;;  %v7271_v2 = vsub.f32 %v7259_v32, %v7268_v58 }
0x2569   : > { %12952 = vmatpush3.bf16.msra.mxu1 %v7350_v61 }
0x256a   : > { %12963 = vmatprep.subr.bf16.mxu1 %v13770_v7  ;;  %v7276_v3 = vmul.f32 1.442695, %v7271_v2 }
0x256b   : > { %v7297_v47 = vpop.permute.xlu0 %7296  ;;  %v7393_v11 = vpop.permute.xlu1 %7392 }
0x256c   : > { %v7302_v14 = vsel %vm722_vm4, %v7297_v47, 0  ;;  %13647 = vpow2.f32 %v7276_v3  ;;  %v7398_v21 = vsel %vm722_vm4, %v7393_v11, 0 }
0x256d   : > { %12946 = vmatpush3.bf16.msra.mxu0 %v7302_v14 }
0x256e   : > { %v13644_v27 = vpop.eup %13643  ;;  %12957 = vmatprep.subr.bf16.mxu0 %v13770_v7 }
0x256f   : > { %v7278_v17 = vsel %vm680_vm3, %v13644_v27, 0.0 }
0x2570   : > { %7279 = vadd.xlane.f32.xlu0 %v7278_v17 }
0x2572   : > { %v13646_v10 = vpop.eup %13645 }
0x2573   : > { %v7281_v42 = vsel %vm680_vm3, %v13646_v10, 0.0 }
0x2574   : > { %7282 = vadd.xlane.f32.xlu1 %v7281_v42 }
0x2576   : > { %v13648_v55 = vpop.eup %13647 }
0x2577   : > { %v7284_v16 = vsel %vm680_vm3, %v13648_v55, 0.0 }
0x2585   : > { %7442 = vrot.lane.b32.xlu1 %v15297_v41, %s16751_s16 }
0x2586   : > { %7492 = vrot.lane.b32.xlu0 %v15299_v59, %s16751_s16 }
0x2589   : > { %7440 = vrot.lane.b32.xlu1 %v15297_v41, %s16752_s15 }
0x258d   : > { %7490 = vrot.lane.b32.xlu1 %v15299_v59, %s16752_s15 }
0x25a5   : > { %7285 = vadd.xlane.f32.xlu0 %v7284_v16 }
0x25bb   : > { %7542 = vrot.lane.b32.xlu0 %v15305_v8, %s16751_s16  ;;  %s16761_s16 = smov 8  }
0x25bf   : > { %7540 = vrot.lane.b32.xlu0 %v15305_v8, %s16752_s15  ;;  %s16762_s15 = smov 12  }
0x25fd   : > { %v7280_v18 = vpop.xlane.xlu0 %7279 }
0x25fe   : > { %13649 = vrcp.f32 %v7280_v18 }
0x2601   : > { %v7283_v39 = vpop.xlane.xlu1 %7282  ;;  %v7493_v22 = vpop.permute.xlu0 %7492 }
0x2602   : > { %13651 = vrcp.f32 %v7283_v39  ;;  %v7498_v58 = vsel %vm532_vm2, %v7493_v22, 0 }
0x2605   : > { %v7443_v32 = vpop.permute.xlu1 %7442 }
0x2606   : > { %v7448_v31 = vsel %vm532_vm2, %v7443_v32, 0 }
0x2608   : > { %v13650_v9 = vpop.eup %13649 }
0x2609   : > { %v7290_v25 = vmul.f32 %v13650_v9, %v13644_v27  ;;  %v7441_v35 = vpop.permute.xlu1 %7440 }
0x260b   : > { %v7293_v1 = vpack.c.bf16 %v7290_v25, %v7290_v25 }
0x260c   : > { %v13652_v20 = vpop.eup %13651 }
0x260d   : > { %v7291_v19 = vmul.f32 %v13652_v20, %v13646_v10  ;;  %12948 = vmatmul.mubr.msk.bf16.vlgmr.msra.gmra.mrb[220].mxu0 %vm680_vm3, %v7293_v1  ;;  %v7491_v61 = vpop.permute.xlu1 %7490 }
0x260e   : > { %12958 = vmatpush3.bf16.msra.mxu0 %v7398_v21  ;;  %12959 = vmatprep.mubr.msk.bf16.mxu0 %vm13771_vm1, %v13770_v7 }
0x260f   : > { %v7294_v24 = vpack.c.bf16 %v7291_v19, %v7291_v19  ;;  %12969 = vmatprep.subr.bf16.mxu0 %v13770_v7 }
0x2611   : > { %12954 = vmatmul.mubr.msk.bf16.vlgmr.msra.gmra.mrb[220].mxu1 %vm680_vm3, %v7294_v24 }
0x2612   : > { %12964 = vmatpush3.bf16.xpose.msra.mxu1 %v7448_v31  ;;  %12965 = vmatprep.mubr.msk.bf16.mxu1 %vm13771_vm1, %v13770_v7 }
0x2613   : > { %12975 = vmatprep.subr.bf16.mxu1 %v13770_v7 }
0x2619   : > { %12966 = vmatmul.mubr.msk.bf16.vlgmr.msra.gmra.mrb[224].mxu1 %vm532_vm2, %v7441_v35 }
0x261a   : > { %12977 = vmatprep.mubr.msk.bf16.mxu1 %vm13771_vm1, %v13770_v7 }
0x2632   : > { %v7286_v52 = vpop.xlane.xlu0 %7285 }
0x2633   : > { %13653 = vrcp.f32 %v7286_v52 }
0x2636   : > { %v7543_v57 = vpop.permute.xlu0 %7542 }
0x2637   : > { %v7548_v63 = vsel %vm532_vm2, %v7543_v57, 0 }
0x2638   : > { %12976 = vmatpush3.bf16.xpose.msra.mxu1 %v7548_v63 }
0x2639   : > { %12987 = vmatprep.subr.bf16.mxu1 %v13770_v7 }
0x263a   : > { %v7541_v45 = vpop.permute.xlu0 %7540 }
0x263d   : > { %v13654_v4 = vpop.eup %13653 }
0x263e   : > { %v7292_v60 = vmul.f32 %v13654_v4, %v13648_v55 }
0x263f   : > { %12978 = vmatmul.mubr.msk.bf16.vlgmr.msra.gmra.mrb[228].mxu1 %vm532_vm2, %v7541_v45 }
0x2640   : > { %v7295_v51 = vpack.c.bf16 %v7292_v60, %v7292_v60  ;;  %12989 = vmatprep.mubr.msk.bf16.mxu1 %vm13771_vm1, %v13770_v7 }
0x2642   : > { %12960 = vmatmul.mubr.msk.bf16.vlgmr.msra.gmra.mrb[224].mxu0 %vm680_vm3, %v7295_v51 }
0x2643   : > { %12970 = vmatpush3.bf16.xpose.msra.mxu0 %v7498_v58  ;;  %12971 = vmatprep.mubr.msk.bf16.mxu0 %vm13771_vm1, %v13770_v7 }
0x2644   : > { %12981 = vmatprep.subr.bf16.mxu0 %v13770_v7 }
0x264a   : > { %12972 = vmatmul.mubr.msk.bf16.vlgmr.msra.gmra.mrb[228].mxu0 %vm532_vm2, %v7491_v61 }
0x264b   : > { %12983 = vmatprep.mubr.msk.bf16.mxu0 %vm13771_vm1, %v13770_v7 }
0x26e0   : > { %v15627_v47 = vpop.f32.mrb[220].mxu0 }
0x26e1   : > { %v12949_v14 = vpop.f32.mrb[221].mxu0 }
0x26e2   : > { %v7341_v27 = vpop.f32.mrb[222].mxu0 }
0x26e3   : > { %v12950_v17 = vpop.f32.mrb[223].mxu0 }
0x26e4   : > { %v15629_v10 = vpop.f32.mrb[220].mxu1 }
0x26e5   : > { %v13203_v42 = vpack.i.bf16 %v15629_v10, %v15627_v47  ;;  %v12955_v2 = vpop.f32.mrb[221].mxu1 }
0x26e6   : > { %v7389_v3 = vpop.f32.mrb[222].mxu1 }
0x26e7   : > { %v12956_v55 = vpop.f32.mrb[223].mxu1 }
0x26ec   : > { %v7484_v16 = vpop.f32.mrb[224].mxu1 }
0x26ed   : > { %v7590_v11 = vmul.f32 0.5, %v7484_v16  ;;  %v12967_v18 = vpop.f32.mrb[225].mxu1 }
0x26ee   : > { %v7487_v39 = vpop.f32.mrb[226].mxu1 }
0x26ef   : > { %v12968_v9 = vpop.f32.mrb[227].mxu1  ;;  %v7593_v25 = vsel %vm680_vm3, %v7590_v11, -inf }
0x26f0   : > { %7594 = vmax.xlane.f32.xlu1 %v7593_v25 }
0x2701   : > { %7677 = vrot.lane.b32.xlu1 %v15299_v59, %s16753_s23 }
0x2705   : > { %7725 = vrot.lane.b32.xlu1 %v15305_v8, %s16753_s23 }
0x2712   : > { %v7584_v1 = vpop.f32.mrb[228].mxu1 }
0x2713   : > { %v12979_v20 = vpop.f32.mrb[229].mxu1  ;;  %v7592_v4 = vmul.f32 0.5, %v7584_v1 }
0x2714   : > { %v7587_v21 = vpop.f32.mrb[230].mxu1 }
0x2715   : > { %v15638_v19 = vpop.f32.mrb[224].mxu0  ;;  %v12980_v32 = vpop.f32.mrb[231].mxu1  ;;  %v7599_v51 = vsel %vm680_vm3, %v7592_v4, -inf }
0x2716   : > { %v12961_v24 = vpop.f32.mrb[225].mxu0 }
0x2717   : > { %v7437_v31 = vpop.f32.mrb[226].mxu0 }
0x2718   : > { %v12962_v35 = vpop.f32.mrb[227].mxu0 }
0x271d   : > { %v7534_v22 = vpop.f32.mrb[228].mxu0 }
0x271e   : > { %v7591_v52 = vmul.f32 0.5, %v7534_v22  ;;  %v12973_v57 = vpop.f32.mrb[229].mxu0 }
0x271f   : > { %v7537_v63 = vpop.f32.mrb[230].mxu0 }
0x2720   : > { %v12974_v60 = vpop.f32.mrb[231].mxu0  ;;  %v7596_v45 = vsel %vm680_vm3, %v7591_v52, -inf }
0x2721   : > { %7597 = vmax.xlane.f32.xlu0 %v7596_v45 }
0x2725   : > { %7600 = vmax.xlane.f32.xlu0 %v7599_v51 }
0x273b   : > { %7629 = vrot.lane.b32.xlu0 %v15297_v41, %s16753_s23  ;;  %s16763_s23 = smov 16  }
0x277d   : > { %v7595_v58 = vpop.xlane.xlu1 %7594 }
0x277e   : > { %v7602_v61 = vsub.f32 %v7590_v11, %v7595_v58 }
0x2780   : > { %v7605_v14 = vmul.f32 1.442695, %v7602_v61 }
0x2781   : > { %v7678_v27 = vpop.permute.xlu1 %7677 }
0x2782   : > { %13655 = vpow2.f32 %v7605_v14  ;;  %v7683_v17 = vsel %vm722_vm4, %v7678_v27, 0 }
0x2783   : > { %12988 = vmatpush3.bf16.msra.mxu1 %v7683_v17 }
0x2784   : > { %12999 = vmatprep.subr.bf16.mxu1 %v13770_v7 }
0x2785   : > { %v7726_v31 = vpop.permute.xlu1 %7725 }
0x2786   : > { %v7731_v63 = vsel %vm722_vm4, %v7726_v31, 0 }
0x278c   : > { %v13656_v2 = vpop.eup %13655 }
0x278d   : > { %v7611_v3 = vsel %vm680_vm3, %v13656_v2, 0.0 }
0x278e   : > { %7612 = vadd.xlane.f32.xlu1 %v7611_v3 }
0x279f   : > { %7825 = vrot.lane.b32.xlu1 %v15299_v59, %s16754_s24 }
0x27ae   : > { %v7598_v55 = vpop.xlane.xlu0 %7597 }
0x27af   : > { %v7603_v16 = vsub.f32 %v7591_v52, %v7598_v55 }
0x27b1   : > { %v7607_v18 = vmul.f32 1.442695, %v7603_v16 }
0x27b2   : > { %v7601_v39 = vpop.xlane.xlu0 %7600 }
0x27b3   : > { %13657 = vpow2.f32 %v7607_v18  ;;  %v7604_v11 = vsub.f32 %v7592_v4, %v7601_v39 }
0x27b5   : > { %v7609_v9 = vmul.f32 1.442695, %v7604_v11 }
0x27b6   : > { %v7630_v25 = vpop.permute.xlu0 %7629 }
0x27b7   : > { %13659 = vpow2.f32 %v7609_v9  ;;  %v7635_v1 = vsel %vm722_vm4, %v7630_v25, 0 }
0x27b8   : > { %12982 = vmatpush3.bf16.msra.mxu0 %v7635_v1 }
0x27b9   : > { %12993 = vmatprep.subr.bf16.mxu0 %v13770_v7 }
0x27bd   : > { %v13658_v20 = vpop.eup %13657 }
0x27be   : > { %v7614_v21 = vsel %vm680_vm3, %v13658_v20, 0.0 }
0x27bf   : > { %7615 = vadd.xlane.f32.xlu0 %v7614_v21 }
0x27c1   : > { %v13660_v32 = vpop.eup %13659 }
0x27c2   : > { %v7617_v24 = vsel %vm680_vm3, %v13660_v32, 0.0 }
0x27c3   : > { %7618 = vadd.xlane.f32.xlu1 %v7617_v24 }
0x27d4   : > { %7875 = vrot.lane.b32.xlu1 %v15305_v8, %s16754_s24 }
0x27d5   : > { %7775 = vrot.lane.b32.xlu0 %v15297_v41, %s16754_s24  ;;  %s16764_s24 = smov 20  }
0x27d8   : > { %7873 = vrot.lane.b32.xlu1 %v15305_v8, %s16755_s17 }
0x27d9   : > { %7773 = vrot.lane.b32.xlu0 %v15297_v41, %s16755_s17 }
0x27dd   : > { %7823 = vrot.lane.b32.xlu0 %v15299_v59, %s16755_s17  ;;  %s16765_s17 = smov 24  }
0x281b   : > { %v7613_v35 = vpop.xlane.xlu1 %7612 }
0x281c   : > { %13661 = vrcp.f32 %v7613_v35 }
0x281f   : > { %v7826_v4 = vpop.permute.xlu1 %7825 }
0x2820   : > { %v7831_v55 = vsel %vm532_vm2, %v7826_v4, 0 }
0x2826   : > { %v13662_v22 = vpop.eup %13661 }
0x2827   : > { %v7623_v52 = vmul.f32 %v13662_v22, %v13656_v2 }
0x2829   : > { %v7626_v57 = vpack.c.bf16 %v7623_v52, %v7623_v52 }
0x282b   : > { %12984 = vmatmul.mubr.msk.bf16.vlgmr.msra.gmra.mrb[232].mxu0 %vm680_vm3, %v7626_v57 }
0x282c   : > { %12994 = vmatpush3.bf16.msra.mxu0 %v7731_v63  ;;  %12995 = vmatprep.mubr.msk.bf16.mxu0 %vm13771_vm1, %v13770_v7 }
0x282d   : > { %13005 = vmatprep.subr.bf16.mxu0 %v13770_v7 }
0x284c   : > { %v7616_v60 = vpop.xlane.xlu0 %7615 }
0x284d   : > { %13663 = vrcp.f32 %v7616_v60 }
0x2850   : > { %v7619_v45 = vpop.xlane.xlu1 %7618  ;;  %v7776_v61 = vpop.permute.xlu0 %7775 }
0x2851   : > { %13665 = vrcp.f32 %v7619_v45  ;;  %v7781_v2 = vsel %vm532_vm2, %v7776_v61, 0 }
0x2854   : > { %v7876_v16 = vpop.permute.xlu1 %7875  ;;  %v7774_v18 = vpop.permute.xlu0 %7773 }
0x2855   : > { %v7881_v39 = vsel %vm532_vm2, %v7876_v16, 0 }
0x2857   : > { %v13664_v51 = vpop.eup %13663 }
0x2858   : > { %v7624_v58 = vmul.f32 %v13664_v51, %v13658_v20  ;;  %v7824_v11 = vpop.permute.xlu0 %7823  ;;  %v7874_v9 = vpop.permute.xlu1 %7873 }
0x285a   : > { %v7627_v14 = vpack.c.bf16 %v7624_v58, %v7624_v58 }
0x285b   : > { %v13666_v27 = vpop.eup %13665 }
0x285c   : > { %v7625_v17 = vmul.f32 %v13666_v27, %v13660_v32  ;;  %12990 = vmatmul.mubr.msk.bf16.vlgmr.msra.gmra.mrb[232].mxu1 %vm680_vm3, %v7627_v14 }
0x285d   : > { %13000 = vmatpush3.bf16.xpose.msra.mxu1 %v7781_v2  ;;  %13001 = vmatprep.mubr.msk.bf16.mxu1 %vm13771_vm1, %v13770_v7 }
0x285e   : > { %v7628_v3 = vpack.c.bf16 %v7625_v17, %v7625_v17  ;;  %13011 = vmatprep.subr.bf16.mxu1 %v13770_v7 }
0x2860   : > { %12996 = vmatmul.mubr.msk.bf16.vlgmr.msra.gmra.mrb[236].mxu0 %vm680_vm3, %v7628_v3 }
0x2861   : > { %13006 = vmatpush3.bf16.xpose.msra.mxu0 %v7831_v55  ;;  %13007 = vmatprep.mubr.msk.bf16.mxu0 %vm13771_vm1, %v13770_v7 }
0x2862   : > { %13017 = vmatprep.subr.bf16.mxu0 %v13770_v7 }
0x2864   : > { %13002 = vmatmul.mubr.msk.bf16.vlgmr.msra.gmra.mrb[236].mxu1 %vm532_vm2, %v7774_v18 }
0x2865   : > { %13012 = vmatpush3.bf16.xpose.msra.mxu1 %v7881_v39  ;;  %13013 = vmatprep.mubr.msk.bf16.mxu1 %vm13771_vm1, %v13770_v7 }
0x2866   : > { %13023 = vmatprep.subr.bf16.mxu1 %v13770_v7 }
0x2868   : > { %13008 = vmatmul.mubr.msk.bf16.vlgmr.msra.gmra.mrb[240].mxu0 %vm532_vm2, %v7824_v11 }
0x2869   : > { %13019 = vmatprep.mubr.msk.bf16.mxu0 %vm13771_vm1, %v13770_v7 }
0x286c   : > { %13014 = vmatmul.mubr.msk.bf16.vlgmr.msra.gmra.mrb[240].mxu1 %vm532_vm2, %v7874_v9 }
0x286d   : > { %13025 = vmatprep.mubr.msk.bf16.mxu1 %vm13771_vm1, %v13770_v7 }
0x28fe   : > { %v15689_v25 = vpop.f32.mrb[232].mxu0 }
0x28ff   : > { %v12985_v1 = vpop.f32.mrb[233].mxu0 }
0x2900   : > { %v7674_v20 = vpop.f32.mrb[234].mxu0 }
0x2901   : > { %v12986_v21 = vpop.f32.mrb[235].mxu0 }
0x292f   : > { %v15691_v32 = vpop.f32.mrb[232].mxu1 }
0x2930   : > { %v13208_v24 = vpack.i.bf16 %v15691_v32, %v15689_v25  ;;  %v12991_v31 = vpop.f32.mrb[233].mxu1 }
0x2931   : > { %v7722_v35 = vpop.f32.mrb[234].mxu1 }
0x2932   : > { %v12992_v22 = vpop.f32.mrb[235].mxu1 }
0x2933   : > { %v15695_v52 = vpop.f32.mrb[236].mxu0 }
0x2934   : > { %v12997_v57 = vpop.f32.mrb[237].mxu0 }
0x2935   : > { %v7770_v63 = vpop.f32.mrb[238].mxu0 }
0x2936   : > { %v12998_v4 = vpop.f32.mrb[239].mxu0 }
0x2937   : > { %v7817_v60 = vpop.f32.mrb[236].mxu1 }
0x2938   : > { %v7923_v45 = vmul.f32 0.5, %v7817_v60  ;;  %v13003_v51 = vpop.f32.mrb[237].mxu1 }
0x2939   : > { %v7820_v58 = vpop.f32.mrb[238].mxu1 }
0x293a   : > { %v13004_v61 = vpop.f32.mrb[239].mxu1  ;;  %v7926_v14 = vsel %vm680_vm3, %v7923_v45, -inf }
0x293b   : > { %v7867_v27 = vpop.f32.mrb[240].mxu0  ;;  %7927 = vmax.xlane.f32.xlu0 %v7926_v14 }
0x293c   : > { %v7924_v17 = vmul.f32 0.5, %v7867_v27  ;;  %v13009_v2 = vpop.f32.mrb[241].mxu0 }
0x293d   : > { %v7870_v3 = vpop.f32.mrb[242].mxu0 }
0x293e   : > { %v13010_v55 = vpop.f32.mrb[243].mxu0  ;;  %v7929_v16 = vsel %vm680_vm3, %v7924_v17, -inf }
0x293f   : > { %7930 = vmax.xlane.f32.xlu1 %v7929_v16  ;;  %v7917_v18 = vpop.f32.mrb[240].mxu1 }
0x2940   : > { %v7925_v39 = vmul.f32 0.5, %v7917_v18  ;;  %v13015_v11 = vpop.f32.mrb[241].mxu1 }
0x2941   : > { %v7920_v9 = vpop.f32.mrb[242].mxu1 }
0x2942   : > { %v13016_v1 = vpop.f32.mrb[243].mxu1  ;;  %v7932_v20 = vsel %vm680_vm3, %v7925_v39, -inf }
0x2943   : > { %7933 = vmax.xlane.f32.xlu0 %v7932_v20 }
0x2950   : > { %8010 = vrot.lane.b32.xlu1 %v15299_v59, %s16756_s20 }
0x2954   : > { %8058 = vrot.lane.b32.xlu1 %v15305_v8, %s16756_s20 }
0x2959   : > { %7962 = vrot.lane.b32.xlu0 %v15297_v41, %s16756_s20  ;;  %s11814_s20 = smul.u32 384, %s13896_s29 }
0x29c8   : > { %v7928_v21 = vpop.xlane.xlu0 %7927 }
0x29c9   : > { %v7935_v31 = vsub.f32 %v7923_v45, %v7928_v21 }
0x29cb   : > { %v7938_v35 = vmul.f32 1.442695, %v7935_v31 }
0x29cc   : > { %v7931_v22 = vpop.xlane.xlu1 %7930 }
0x29cd   : > { %13667 = vpow2.f32 %v7938_v35  ;;  %v7936_v57 = vsub.f32 %v7924_v17, %v7931_v22 }
0x29cf   : > { %v7940_v63 = vmul.f32 1.442695, %v7936_v57 }
0x29d0   : > { %v8011_v4 = vpop.permute.xlu1 %8010  ;;  %v7934_v60 = vpop.xlane.xlu0 %7933 }
0x29d1   : > { %13669 = vpow2.f32 %v7940_v63  ;;  %v8016_v51 = vsel %vm722_vm4, %v8011_v4, 0  ;;  %v7937_v2 = vsub.f32 %v7925_v39, %v7934_v60 }
0x29d2   : > { %13024 = vmatpush3.bf16.msra.mxu1 %v8016_v51 }
0x29d3   : > { %13035 = vmatprep.subr.bf16.mxu1 %v13770_v7  ;;  %v7942_v3 = vmul.f32 1.442695, %v7937_v2 }
0x29d4   : > { %v7963_v58 = vpop.permute.xlu0 %7962  ;;  %v8059_v18 = vpop.permute.xlu1 %8058 }
0x29d5   : > { %v7968_v61 = vsel %vm722_vm4, %v7963_v58, 0  ;;  %13671 = vpow2.f32 %v7942_v3  ;;  %v8064_v31 = vsel %vm722_vm4, %v8059_v18, 0 }
0x29d6   : > { %13018 = vmatpush3.bf16.msra.mxu0 %v7968_v61 }
0x29d7   : > { %v13668_v14 = vpop.eup %13667  ;;  %13029 = vmatprep.subr.bf16.mxu0 %v13770_v7 }
0x29d8   : > { %v7944_v45 = vsel %vm680_vm3, %v13668_v14, 0.0 }
0x29d9   : > { %7945 = vadd.xlane.f32.xlu0 %v7944_v45 }
0x29db   : > { %v13670_v27 = vpop.eup %13669 }
0x29dc   : > { %v7947_v17 = vsel %vm680_vm3, %v13670_v27, 0.0 }
0x29dd   : > { %7948 = vadd.xlane.f32.xlu1 %v7947_v17 }
0x29df   : > { %v13672_v55 = vpop.eup %13671 }
0x29e0   : > { %v7950_v16 = vsel %vm680_vm3, %v13672_v55, 0.0 }
0x29ee   : > { %8108 = vrot.lane.b32.xlu1 %v15297_v41, %s16757_s0 }
0x29ef   : > { %8158 = vrot.lane.b32.xlu0 %v15299_v59, %s16757_s0 }
0x29f2   : > { %8106 = vrot.lane.b32.xlu1 %v15297_v41, %s16758_s22 }
0x29f6   : > { %8156 = vrot.lane.b32.xlu1 %v15299_v59, %s16758_s22 }
0x2a0e   : > { %7951 = vadd.xlane.f32.xlu0 %v7950_v16 }
0x2a24   : > { %8208 = vrot.lane.b32.xlu0 %v15305_v8, %s16757_s0 }
0x2a28   : > { %8206 = vrot.lane.b32.xlu0 %v15305_v8, %s16758_s22 }
0x2a66   : > { %v7946_v11 = vpop.xlane.xlu0 %7945 }
0x2a67   : > { %13673 = vrcp.f32 %v7946_v11 }
0x2a6a   : > { %v7949_v9 = vpop.xlane.xlu1 %7948  ;;  %v8159_v60 = vpop.permute.xlu0 %8158 }
0x2a6b   : > { %13675 = vrcp.f32 %v7949_v9  ;;  %v8164_v2 = vsel %vm532_vm2, %v8159_v60, 0 }
0x2a6e   : > { %v8109_v22 = vpop.permute.xlu1 %8108 }
0x2a6f   : > { %v8114_v63 = vsel %vm532_vm2, %v8109_v22, 0 }
0x2a71   : > { %v13674_v1 = vpop.eup %13673 }
0x2a72   : > { %v7956_v20 = vmul.f32 %v13674_v1, %v13668_v14  ;;  %v8107_v4 = vpop.permute.xlu1 %8106 }
0x2a74   : > { %v7959_v39 = vpack.c.bf16 %v7956_v20, %v7956_v20 }
0x2a75   : > { %v13676_v21 = vpop.eup %13675 }
0x2a76   : > { %v7957_v35 = vmul.f32 %v13676_v21, %v13670_v27  ;;  %13020 = vmatmul.mubr.msk.bf16.vlgmr.msra.gmra.mrb[244].mxu0 %vm680_vm3, %v7959_v39  ;;  %v8157_v3 = vpop.permute.xlu1 %8156 }
0x2a77   : > { %13030 = vmatpush3.bf16.msra.mxu0 %v8064_v31  ;;  %13031 = vmatprep.mubr.msk.bf16.mxu0 %vm13771_vm1, %v13770_v7 }
0x2a78   : > { %v7960_v57 = vpack.c.bf16 %v7957_v35, %v7957_v35  ;;  %13041 = vmatprep.subr.bf16.mxu0 %v13770_v7 }
0x2a7a   : > { %13026 = vmatmul.mubr.msk.bf16.vlgmr.msra.gmra.mrb[244].mxu1 %vm680_vm3, %v7960_v57 }
0x2a7b   : > { %13036 = vmatpush3.bf16.xpose.msra.mxu1 %v8114_v63  ;;  %13037 = vmatprep.mubr.msk.bf16.mxu1 %vm13771_vm1, %v13770_v7 }
0x2a7c   : > { %13047 = vmatprep.subr.bf16.mxu1 %v13770_v7 }
0x2a82   : > { %13038 = vmatmul.mubr.msk.bf16.vlgmr.msra.gmra.mrb[248].mxu1 %vm532_vm2, %v8107_v4 }
0x2a83   : > { %13049 = vmatprep.mubr.msk.bf16.mxu1 %vm13771_vm1, %v13770_v7 }
0x2a9b   : > { %v7952_v51 = vpop.xlane.xlu0 %7951 }
0x2a9c   : > { %13677 = vrcp.f32 %v7952_v51 }
0x2a9f   : > { %v8209_v58 = vpop.permute.xlu0 %8208 }
0x2aa0   : > { %v8214_v61 = vsel %vm532_vm2, %v8209_v58, 0 }
0x2aa1   : > { %13048 = vmatpush3.bf16.xpose.msra.mxu1 %v8214_v61 }
0x2aa2   : > { %13059 = vmatprep.subr.bf16.mxu1 %v13770_v7 }
0x2aa3   : > { %v8207_v27 = vpop.permute.xlu0 %8206 }
0x2aa6   : > { %v13678_v14 = vpop.eup %13677 }
0x2aa7   : > { %v7958_v45 = vmul.f32 %v13678_v14, %v13672_v55 }
0x2aa8   : > { %13050 = vmatmul.mubr.msk.bf16.vlgmr.msra.gmra.mrb[252].mxu1 %vm532_vm2, %v8207_v27 }
0x2aa9   : > { %v7961_v17 = vpack.c.bf16 %v7958_v45, %v7958_v45  ;;  %13061 = vmatprep.mubr.msk.bf16.mxu1 %vm13771_vm1, %v13770_v7 }
0x2aab   : > { %13032 = vmatmul.mubr.msk.bf16.vlgmr.msra.gmra.mrb[248].mxu0 %vm680_vm3, %v7961_v17 }
0x2aac   : > { %13042 = vmatpush3.bf16.xpose.msra.mxu0 %v8164_v2  ;;  %13043 = vmatprep.mubr.msk.bf16.mxu0 %vm13771_vm1, %v13770_v7 }
0x2aad   : > { %13053 = vmatprep.subr.bf16.mxu0 %v13770_v7 }
0x2ab3   : > { %13044 = vmatmul.mubr.msk.bf16.vlgmr.msra.gmra.mrb[252].mxu0 %vm532_vm2, %v8157_v3 }
0x2ab4   : > { %13055 = vmatprep.mubr.msk.bf16.mxu0 %vm13771_vm1, %v13770_v7 }
0x2b49   : > { %v15751_v55 = vpop.f32.mrb[244].mxu0 }
0x2b4a   : > { %v13021_v16 = vpop.f32.mrb[245].mxu0 }
0x2b4b   : > { %v8007_v18 = vpop.f32.mrb[246].mxu0 }
0x2b4c   : > { %v13022_v11 = vpop.f32.mrb[247].mxu0 }
0x2b4d   : > { %v15753_v9 = vpop.f32.mrb[244].mxu1 }
0x2b4e   : > { %v13213_v1 = vpack.i.bf16 %v15753_v9, %v15751_v55  ;;  %v13027_v20 = vpop.f32.mrb[245].mxu1 }
0x2b4f   : > { %v8055_v39 = vpop.f32.mrb[246].mxu1 }
0x2b50   : > { %v13028_v21 = vpop.f32.mrb[247].mxu1 }
0x2b55   : > { %v8150_v31 = vpop.f32.mrb[248].mxu1 }
0x2b56   : > { %v8256_v35 = vmul.f32 0.5, %v8150_v31  ;;  %v13039_v22 = vpop.f32.mrb[249].mxu1 }
0x2b57   : > { %v8153_v57 = vpop.f32.mrb[250].mxu1 }
0x2b58   : > { %v13040_v63 = vpop.f32.mrb[251].mxu1  ;;  %v8259_v4 = vsel %vm680_vm3, %v8256_v35, -inf }
0x2b59   : > { %8260 = vmax.xlane.f32.xlu1 %v8259_v4 }
0x2b7b   : > { %v8250_v60 = vpop.f32.mrb[252].mxu1 }
0x2b7c   : > { %v13051_v51 = vpop.f32.mrb[253].mxu1  ;;  %v8258_v11 = vmul.f32 0.5, %v8250_v60 }
0x2b7d   : > { %v8253_v58 = vpop.f32.mrb[254].mxu1 }
0x2b7e   : > { %v8100_v61 = vpop.f32.mrb[248].mxu0  ;;  %v13052_v14 = vpop.f32.mrb[255].mxu1  ;;  %v8265_v21 = vsel %vm680_vm3, %v8258_v11, -inf }
0x2b7f   : > { %v13033_v45 = vpop.f32.mrb[249].mxu0 }
0x2b80   : > { %v8103_v27 = vpop.f32.mrb[250].mxu0 }
0x2b81   : > { %v13034_v17 = vpop.f32.mrb[251].mxu0 }
0x2b86   : > { %v8200_v2 = vpop.f32.mrb[252].mxu0 }
0x2b87   : > { %v8257_v3 = vmul.f32 0.5, %v8200_v2  ;;  %v13045_v16 = vpop.f32.mrb[253].mxu0 }
0x2b88   : > { %v8203_v18 = vpop.f32.mrb[254].mxu0 }
0x2b89   : > { %v13046_v20 = vpop.f32.mrb[255].mxu0  ;;  %v8262_v39 = vsel %vm680_vm3, %v8257_v3, -inf }
0x2b8a   : > { %8263 = vmax.xlane.f32.xlu0 %v8262_v39 }
0x2b8e   : > { %8266 = vmax.xlane.f32.xlu0 %v8265_v21 }
0x2be6   : > { %v8261_v31 = vpop.xlane.xlu1 %8260 }
0x2be7   : > { %v8268_v22 = vsub.f32 %v8256_v35, %v8261_v31 }
0x2be9   : > { %v8271_v57 = vmul.f32 1.442695, %v8268_v22 }
0x2beb   : > { %13679 = vpow2.f32 %v8271_v57 }
0x2bf5   : > { %v13680_v63 = vpop.eup %13679 }
0x2bf6   : > { %v8277_v4 = vsel %vm680_vm3, %v13680_v63, 0.0 }
0x2bf7   : > { %8278 = vadd.xlane.f32.xlu1 %v8277_v4 }
0x2c08   : > { %8343 = vrot.lane.b32.xlu1 %v15299_v59, %s16759_s21 }
0x2c17   : > { %v8264_v51 = vpop.xlane.xlu0 %8263 }
0x2c18   : > { %v8269_v60 = vsub.f32 %v8257_v3, %v8264_v51 }
0x2c1a   : > { %v8273_v58 = vmul.f32 1.442695, %v8269_v60 }
0x2c1b   : > { %v8267_v14 = vpop.xlane.xlu0 %8266 }
0x2c1c   : > { %13681 = vpow2.f32 %v8273_v58  ;;  %v8270_v45 = vsub.f32 %v8258_v11, %v8267_v14 }
0x2c1e   : > { %v8275_v27 = vmul.f32 1.442695, %v8270_v45 }
0x2c20   : > { %13683 = vpow2.f32 %v8275_v27 }
0x2c26   : > { %v13682_v17 = vpop.eup %13681 }
0x2c27   : > { %v8280_v35 = vsel %vm680_vm3, %v13682_v17, 0.0 }
0x2c28   : > { %8281 = vadd.xlane.f32.xlu0 %v8280_v35 }
0x2c2a   : > { %v13684_v2 = vpop.eup %13683 }
0x2c2b   : > { %v8283_v16 = vsel %vm680_vm3, %v13684_v2, 0.0 }
0x2c2c   : > { %8284 = vadd.xlane.f32.xlu1 %v8283_v16 }
0x2c3d   : > { %8391 = vrot.lane.b32.xlu1 %v15305_v8, %s16759_s21 }
0x2c3e   : > { %8295 = vrot.lane.b32.xlu0 %v15297_v41, %s16759_s21 }
0x2c41   : > { %8446 = vrot.lane.b32.xlu1 %v15447_v49, %s16760_s30 }
0x2c42   : > { %13189 = vrot.lane.b32.xlu0 %v13188_v30, %s16760_s30  ;;  %s16766_s30 = smov 28  }
0x2c45   : > { %8458 = vrot.lane.b32.xlu1 %v15514_v44, %s16761_s16 }
0x2c46   : > { %13194 = vrot.lane.b32.xlu0 %v13193_v40, %s16761_s16 }
0x2c49   : > { %8470 = vrot.lane.b32.xlu1 %v15571_v28, %s16762_s15 }
0x2c4a   : > { %13199 = vrot.lane.b32.xlu0 %v13198_v33, %s16762_s15  ;;  %s13079_s15 = smul.u32 24, %s432_s1 }
0x2c4d   : > { %8482 = vrot.lane.b32.xlu1 %v15638_v19, %s16763_s23  ;;  %v13357_v19 = vld [vmem:[%s16659_s3 + $0x10] sm:$0xff]  }
0x2c4e   : > { %13204 = vrot.lane.b32.xlu0 %v13203_v42, %s16763_s23  ;;  %s13803_s23 = smov [#allocation2]  }
0x2c51   : > { %8494 = vrot.lane.b32.xlu1 %v15695_v52, %s16764_s24 }
0x2c52   : > { %13209 = vrot.lane.b32.xlu0 %v13208_v24, %s16764_s24  ;;  %s13710_s24 = sshll.u32 %s13803_s23, 4  ;;  %s13711_s24 = int_to_ptr.vmem [resolvable:$false] %s13710_s24 }
0x2c55   : > { %8506 = vrot.lane.b32.xlu1 %v8100_v61, %s16765_s17 }
0x2c56   : > { %13214 = vrot.lane.b32.xlu0 %v13213_v1, %s16765_s17  ;;  %s434_s17 = scalar_lea.vmem [#allocation2], %s13079_s15  ;;  %s16614_s15 = scalar_lea.sflag [#allocation3], %s432_s1 }
0x2c57   : > { %s10961_s0 = sshll.u32 %s434_s17, 4  ;;  %s16611_s0 = int_to_ptr.vmem [resolvable:$true] %s10961_s0 }
0x2c58   : > { %s13706_s29 = scalar_lea.vmem %s16611_s0, 384  ;;  %p13713_p0 = scmp.lt.s32.totalorder %s16611_s0, %s13711_s24 }
0x2c59   : > { %p13707_p11 = scmp.ne.s32.totalorder %s16611_s0, %s13706_s29 }
0x2c5b   : > { %p13708_p12 = pnand %p13707_p11, %p13913_p5 }
0x2c5d   : > { %p13709_p13 = pneg %p13708_p12 }
0x2c84   : > { %v8279_v41 = vpop.xlane.xlu1 %8278 }
0x2c85   : > { %13685 = vrcp.f32 %v8279_v41 }
0x2c88   : > { %v8344_v59 = vpop.permute.xlu1 %8343 }
0x2c89   : > { %v8349_v8 = vsel %vm722_vm4, %v8344_v59, 0 }
0x2c8a   : > { %13060 = vmatpush3.bf16.msra.mxu1 %v8349_v8 }
0x2c8b   : > { %13071 = vmatprep.subr.bf16.mxu1 %v13357_v19 }
0x2c8f   : > { %v13686_v36 = vpop.eup %13685 }
0x2c90   : > { %v8289_v30 = vmul.f32 %v13686_v36, %v13680_v63 }
0x2c92   : > { %v8292_v40 = vpack.c.bf16 %v8289_v30, %v8289_v30 }
0x2cb5   : > { %v8282_v48 = vpop.xlane.xlu0 %8281 }
0x2cb6   : > { %13687 = vrcp.f32 %v8282_v48 }
0x2cb9   : > { %v8285_v49 = vpop.xlane.xlu1 %8284  ;;  %v8296_v15 = vpop.permute.xlu0 %8295 }
0x2cba   : > { %13689 = vrcp.f32 %v8285_v49  ;;  %v8301_v34 = vsel %vm722_vm4, %v8296_v15, 0 }
0x2cbb   : > { %13054 = vmatpush3.bf16.msra.mxu0 %v8301_v34 }
0x2cbc   : > { %13065 = vmatprep.subr.bf16.mxu0 %v13770_v7 }
0x2cbd   : > { %v8392_v44 = vpop.permute.xlu1 %8391  ;;  %v13190_v21 = vpop.permute.xlu0 %13189 }
0x2cbe   : > { %v8397_v50 = vsel %vm722_vm4, %v8392_v44, 0  ;;  %13056 = vmatmul.mubr.msk.bf16.vlgmr.msra.gmra.mrb[0].mxu0 %vm680_vm3, %v8292_v40  ;;  %v13192_v14 = vunpack.i.h.bf16 %v13190_v21  ;;  %v13191_v45 = vunpack.i.l.bf16 %v13190_v21 }
0x2cbf   : > { %13066 = vmatpush3.bf16.msra.mxu0 %v8397_v50  ;;  %13067 = vmatprep.mubr.msk.bf16.mxu0 %vm13771_vm1, %v13770_v7  ;;  %v13358_v7 = vld [vmem:[%s16659_s3 + $0x18] sm:$0xff]  }
0x2cc0   : > { %v13688_v13 = vpop.eup %13687  ;;  %v8524_v8 = vsel %vm532_vm2, %v15383_v62, %v13192_v14  ;;  %v8523_v36 = vsel %vm532_vm2, %v15381_v46, %v13191_v45 }
0x2cc1   : > { %v8290_v33 = vmul.f32 %v13688_v13, %v13682_v17  ;;  %v8447_v31 = vpop.permute.xlu1 %8446  ;;  %v13195_v22 = vpop.permute.xlu0 %13194 }
0x2cc2   : > { %v13197_v17 = vunpack.i.h.bf16 %v13195_v22  ;;  %v13196_v35 = vunpack.i.l.bf16 %v13195_v22  ;;  %v8525_v49 = vsel %vm532_vm2, %v15390_v6, %v8447_v31 }
0x2cc3   : > { %v8293_v28 = vpack.c.bf16 %v8290_v33, %v8290_v33 }
0x2cc4   : > { %v13690_v47 = vpop.eup %13689  ;;  %v8526_v15 = vsel %vm680_vm3, %v8523_v36, %v13196_v35  ;;  %v8527_v34 = vsel %vm680_vm3, %v8524_v8, %v13197_v17 }
0x2cc5   : > { %v8291_v10 = vmul.f32 %v13690_v47, %v13684_v2  ;;  %13062 = vmatmul.mubr.msk.bf16.vlgmr.msra.gmra.mrb[0].mxu1 %vm680_vm3, %v8293_v28  ;;  %v8459_v57 = vpop.permute.xlu1 %8458  ;;  %v13200_v63 = vpop.permute.xlu0 %13199 }
0x2cc6   : > { %13072 = vmatpush3.bf16.msra.mxu1 %v13357_v19  ;;  %v13201_v2 = vunpack.i.l.bf16 %v13200_v63  ;;  %v13202_v16 = vunpack.i.h.bf16 %v13200_v63  ;;  %v8528_v44 = vsel %vm680_vm3, %v8525_v49, %v8459_v57 }
0x2cc7   : > { %v8294_v42 = vpack.c.bf16 %v8291_v10, %v8291_v10  ;;  %13073 = vmatprep.subr.bf16.mxu1 %v13358_v7 }
0x2cc8   : > { %v8529_v50 = vsel %vm3283_vm5, %v8526_v15, %v13201_v2  ;;  %v8530_v28 = vsel %vm3283_vm5, %v8527_v34, %v13202_v16 }
0x2cc9   : > { %13068 = vmatmul.mubr.msk.bf16.vlgmr.msra.gmra.mrb[4].mxu0 %vm680_vm3, %v8294_v42  ;;  %v8471_v4 = vpop.permute.xlu1 %8470  ;;  %v13205_v51 = vpop.permute.xlu0 %13204 }
0x2cca   : > { %9007 = vmatprep.mubr.bf16.mxu0 %v13802_v29  ;;  %13074 = vmatpush3.bf16.msra.mxu1 %v13358_v7  ;;  %v13206_v41 = vunpack.i.l.bf16 %v13205_v51  ;;  %v13207_v48 = vunpack.i.h.bf16 %v13205_v51  ;;  %v8531_v46 = vsel %vm3283_vm5, %v8528_v44, %v8471_v4  ;;  %v11347_v44 = vld [vmem:[%s16661_s5 + $0x140] sm:$0xff] }
0x2ccc   : > { %v8532_v47 = vsel %vm3287_vm6, %v8529_v50, %v13206_v41  ;;  %v8533_v6 = vsel %vm3287_vm6, %v8530_v28, %v13207_v48  ;;  %v11340_v50 = vld [vmem:[%s16661_s5 + $0x108] sm:$0xff] }
0x2ccd   : > { %v8483_v60 = vpop.permute.xlu1 %8482  ;;  %v13210_v58 = vpop.permute.xlu0 %13209 }
0x2cce   : > { %v13211_v30 = vunpack.i.l.bf16 %v13210_v58  ;;  %v13212_v40 = vunpack.i.h.bf16 %v13210_v58  ;;  %v8534_v10 = vsel %vm3287_vm6, %v8531_v46, %v8483_v60 }
0x2cd0   : > { %v8535_v42 = vsel %vm3291_vm7, %v8532_v47, %v13211_v30  ;;  %v8536_v7 = vsel %vm3291_vm7, %v8533_v6, %v13212_v40  ;;  %v11339_v40 = vld [vmem:[%s16661_s5 + $0x100] sm:$0xff] }
0x2cd1   : > { %v8495_v27 = vpop.permute.xlu1 %8494  ;;  %v13215_v59 = vpop.permute.xlu0 %13214  ;;  %v11355_v47 = vld [vmem:[%s16661_s5 + $0x180] sm:$0xff] }
0x2cd2   : > { %v13217_v13 = vunpack.i.h.bf16 %v13215_v59  ;;  %v13216_v33 = vunpack.i.l.bf16 %v13215_v59  ;;  %v11363_v6 = vld [vmem:[%s16661_s5 + $0x1c0] sm:$0xff] }
0x2cd5   : > { %v8507_v62 = vpop.permute.xlu1 %8506 }
0x2d91   : > { %v8337_v25 = vpop.f32.mrb[0].mxu0 }
0x2d92   : > { %v13057_v32 = vpop.f32.mrb[1].mxu0 }
0x2d93   : > { %v8340_v24 = vpop.f32.mrb[2].mxu0 }
0x2d94   : > { %v13058_v52 = vpop.f32.mrb[3].mxu0 }
0x2d95   : > { %v8538_v52 = vsel %vm3295_vm8, %v8535_v42, %v13216_v33  ;;  %v11348_v33 = vld [vmem:[%s16661_s5 + $0x148] sm:$0xff]  ;;  %v11390_v42 = vcombine.high %v11355_v47, %v11363_v6 }
0x2d96   : > { %v11375_v28 = vcombine.low %v11340_v50, %v11348_v33  ;;  %v11376_v46 = vcombine.high %v11340_v50, %v11348_v33 }
0x2d98   : > { %v8385_v55 = vpop.f32.mrb[0].mxu1  ;;  %9026 = vmatprep.subr.bf16.mxu1 %v11376_v46 }
0x2d99   : > { %v13218_v9 = vpack.i.bf16 %v8385_v55, %v8337_v25  ;;  %v13063_v1 = vpop.f32.mrb[1].mxu1  ;;  %v8537_v25 = vsel %vm3291_vm7, %v8534_v10, %v8495_v27  ;;  %v8539_v55 = vsel %vm3295_vm8, %v8536_v7, %v13217_v13  ;;  %v11374_v13 = vcombine.high %v11339_v40, %v11347_v44  ;;  %v11356_v10 = vld [vmem:[%s16661_s5 + $0x188] sm:$0xff] }
0x2d9a   : > { %v8388_v61 = vpop.f32.mrb[2].mxu1  ;;  %v11389_v7 = vcombine.low %v11355_v47, %v11363_v6  ;;  %v11359_v47 = vld [vmem:[%s16661_s5 + $0x1a0] sm:$0xff] }
0x2d9b   : > { %13219 = vrot.lane.b32.xlu0 %v13218_v9, %s16766_s30  ;;  %v13064_v3 = vpop.f32.mrb[3].mxu1  ;;  %v8540_v9 = vsel %vm3295_vm8, %v8537_v25, %v8507_v62  ;;  %v11373_v62 = vcombine.low %v11339_v40, %v11347_v44  ;;  %8975 = vmatprep.subr.bf16.mxu0 %v11374_v13  ;;  %v11344_v40 = vld [vmem:[%s16661_s5 + $0x128] sm:$0xff]  ;;  %v11367_v6 = vld [vmem:[%s16661_s5 + $0x1e0] sm:$0xff] }
0x2d9c   : > { %v8433_v18 = vpop.f32.mrb[4].mxu0  ;;  %v11352_v44 = vld [vmem:[%s16661_s5 + $0x168] sm:$0xff] }
0x2d9d   : > { %8518 = vrot.lane.b32.xlu1 %v8433_v18, %s16766_s30  ;;  %v13069_v11 = vpop.f32.mrb[5].mxu0  ;;  %8976 = vmatpush1.bf16.msra.mxu0 %v11373_v62  ;;  %s16609_s30 = scalar_lea.hbm %s16669_s13, %s11814_s20  ;;  %s13712_s20 = scalar_lea.vmem %s13711_s24, 768 }
0x2d9e   : > { %v8436_v20 = vpop.f32.mrb[6].mxu0  ;;  %8977 = vmatprep.subr.bf16.mxu0 %v11390_v42  ;;  %v11368_v42 = vld [vmem:[%s16661_s5 + $0x1e8] sm:$0xff]  ;;  %p13714_p1 = scmp.lt.s32.totalorder %s13712_s20, %s13706_s29 }
0x2d9f   : > { %v13070_v39 = vpop.f32.mrb[7].mxu0 }
0x2da0   : > { %v11330_v39 = vld [vmem:[%s16660_s4 + $0x1] ss:$0 sm:$0xff]  ;;  %p13715_p2 = por %p13714_p1, %p13713_p0 }
0x2da1   : > { %8978 = vmatpush1.bf16.msra.mxu0 %v11389_v7  ;;  %v11383_v7 = vcombine.low %v11344_v40, %v11352_v44 }
0x2da2   : > { %p13716_p3 = pnand %p13715_p2, %p13709_p13 }
0x2e0d   : > { %v13220_v19 = vpop.permute.xlu0 %13219 }
0x2e0e   : > { %v13222_v32 = vunpack.i.h.bf16 %v13220_v19  ;;  %v13221_v24 = vunpack.i.l.bf16 %v13220_v19  ;;  %v11364_v19 = vld [vmem:[%s16661_s5 + $0x1c8] sm:$0xff] }
0x2e0f   : > { %v8519_v1 = vpop.permute.xlu1 %8518  ;;  %v11391_v25 = vcombine.low %v11356_v10, %v11364_v19 }
0x2e10   : > { %v8542_v61 = vsel %vm3299_vm9, %v8539_v55, %v13222_v32  ;;  %v8541_v3 = vsel %vm3299_vm9, %v8538_v52, %v13221_v24  ;;  %v8543_v18 = vsel %vm3299_vm9, %v8540_v9, %v8519_v1  ;;  %v11392_v32 = vcombine.high %v11356_v10, %v11364_v19  ;;  %v11341_v24 = vld [vmem:[%s16661_s5 + $0x110] sm:$0xff]  ;;  %v11342_v55 = vld [vmem:[%s16661_s5 + $0x118] sm:$0xff]  ;;  %v11360_v10 = vld [vmem:[%s16661_s5 + $0x1a8] sm:$0xff] }
0x2e11   : > { %v8544_v11 = vpack.c.bf16 %v8542_v61, %v8541_v3  ;;  %v8545_v20 = vpack.c.bf16 %v8543_v18, %v8543_v18  ;;  %v11349_v52 = vld [vmem:[%s16661_s5 + $0x150] sm:$0xff]  ;;  %v11350_v1 = vld [vmem:[%s16661_s5 + $0x158] sm:$0xff] }
0x2e12   : > { %v11378_v9 = vcombine.high %v11341_v24, %v11349_v52  ;;  %v11377_v61 = vcombine.low %v11341_v24, %v11349_v52  ;;  %v11379_v3 = vcombine.low %v11342_v55, %v11350_v1  ;;  %v11380_v18 = vcombine.high %v11342_v55, %v11350_v1  ;;  %v11345_v24 = vld [vmem:[%s16661_s5 + $0x130] sm:$0xff]  ;;  %v11346_v55 = vld [vmem:[%s16661_s5 + $0x138] sm:$0xff] }
0x2e13   : > { %13075 = vmatprep.mubr.msk.bf16.mxu1 %vm471_vm0, %v8544_v11  ;;  %v11353_v52 = vld [vmem:[%s16661_s5 + $0x170] sm:$0xff]  ;;  %v11397_v1 = vcombine.low %v11359_v47, %v11367_v6 }
0x2e14   : > { %13076 = vmatmul.mubr.msk.bf16.vlgmr.msra.gmra.mrb[4].mxu1 %vm471_vm0, %v8545_v20  ;;  %9077 = vmatprep.subr.bf16.mxu0 %v11378_v9  ;;  %v11354_v9 = vld [vmem:[%s16661_s5 + $0x178] sm:$0xff] }
0x2e15   : > { %9058 = vmatprep.mubr.bf16.mxu1 %v13802_v29  ;;  %9027 = vmatpush1.bf16.msra.mxu1 %v11375_v28  ;;  %v11384_v28 = vcombine.high %v11344_v40, %v11352_v44  ;;  %v13379_v40 = vld [vmem:[%s16663_s7 + $0x468] sm:$0xff]  }
0x2e16   : > { %9028 = vmatprep.subr.bf16.mxu1 %v11392_v32  ;;  %v11400_v32 = vcombine.high %v11360_v10, %v11368_v42  ;;  %v13380_v44 = vld [vmem:[%s16663_s7 + $0x4e8] sm:$0xff]  }
0x2e19   : > { %9029 = vmatpush1.bf16.msra.mxu1 %v11391_v25  ;;  %v11398_v25 = vcombine.high %v11359_v47, %v11367_v6  ;;  %v13386_v47 = vld [vmem:[%s16663_s7 + $0x4b0] sm:$0xff]   ;;  %v13387_v6 = vld [vmem:[%s16663_s7 + $0x478] sm:$0xff]  }
0x2e1a   : > { %9128 = vmatprep.subr.bf16.mxu1 %v11380_v18  ;;  %v11388_v18 = vcombine.high %v11346_v55, %v11354_v9 }
0x2ee7   : > { %v13077_v21 = vpop.f32.mrb[4].mxu1 }
0x2ee8   : > { %v8611_v31 = vpop.f32.mrb[5].mxu1  ;;  %v8620_v22 = vadd.f32 %v13077_v21, %v11330_v39 }
0x2ee9   : > { %v8612_v57 = vadd.f32 %v11330_v39, %v8611_v31  ;;  %v13078_v63 = vpop.f32.mrb[6].mxu1 }
0x2eea   : > { %v8614_v4 = vpop.f32.mrb[7].mxu1  ;;  %v8627_v58 = vadd.f32 %v8620_v22, %v15287_v12 }
0x2eeb   : > { %v8625_v51 = vadd.f32 %v8612_v57, %v15280_v0  ;;  %v8615_v60 = vadd.f32 %v11330_v39, %v8614_v4 }
0x2eec   : > { %v8638_v17 = vsel %vm471_vm0, %v8627_v58, 0.0 }
0x2eed   : > { %v8626_v14 = vadd.f32 %v8615_v60, %v15282_v5  ;;  %v8632_v45 = vsel %vm471_vm0, %v8625_v51, 0.0  ;;  %v11337_v60 = vld [vmem:[%s16665_s9 + $0x1] ss:$0 sm:$0xff] }
0x2eee   : > { %8633 = vadd.xlane.f32.xlu0 %v8632_v45 }
0x2eef   : > { %v8635_v27 = vsel %vm471_vm0, %v8626_v14, 0.0 }
0x2ef0   : > { %8636 = vadd.xlane.f32.xlu1 %v8635_v27 }
0x2ef2   : > { %8639 = vadd.xlane.f32.xlu0 %v8638_v17 }
0x2f7b   : > { %v8634_v35 = vpop.xlane.xlu0 %8633 }
0x2f7c   : > { %v8641_v2 = vmul.f32 0.03125, %v8634_v35  ;;  %v11338_v35 = vld [vmem:[%s16666_s10 + $0x1] ss:$0 sm:$0xff] }
0x2f7d   : > { %v8637_v16 = vpop.xlane.xlu1 %8636 }
0x2f7e   : > { %v15858_v41 = vsub.f32 %v8625_v51, %v8641_v2  ;;  %v8642_v0 = vmul.f32 0.03125, %v8637_v16 }
0x2f7f   : > { %v8640_v59 = vpop.xlane.xlu0 %8639 }
0x2f80   : > { %v15860_v8 = vsub.f32 %v8626_v14, %v8642_v0  ;;  %v8643_v12 = vmul.f32 0.03125, %v8640_v59  ;;  %v8647_v5 = vmul.f32 %v15858_v41, %v15858_v41  ;;  %v11357_v0 = vld [vmem:[%s16661_s5 + $0x190] sm:$0xff] }
0x2f82   : > { %v15864_v36 = vsub.f32 %v8627_v58, %v8643_v12  ;;  %v8650_v48 = vsel %vm471_vm0, %v8647_v5, 0.0  ;;  %v8648_v30 = vmul.f32 %v15860_v8, %v15860_v8  ;;  %v11366_v5 = vld [vmem:[%s16661_s5 + $0x1d8] sm:$0xff] }
0x2f83   : > { %8651 = vadd.xlane.f32.xlu0 %v8650_v48 }
0x2f84   : > { %v8653_v49 = vsel %vm471_vm0, %v8648_v30, 0.0  ;;  %v8649_v15 = vmul.f32 %v15864_v36, %v15864_v36 }
0x2f85   : > { %8654 = vadd.xlane.f32.xlu1 %v8653_v49 }
0x2f86   : > { %v8656_v34 = vsel %vm471_vm0, %v8649_v15, 0.0  ;;  %v11343_v15 = vld [vmem:[%s16661_s5 + $0x120] sm:$0xff] }
0x2f87   : > { %8657 = vadd.xlane.f32.xlu0 %v8656_v34  ;;  %v11351_v34 = vld [vmem:[%s16661_s5 + $0x160] sm:$0xff] }
0x2f88   : > { %v11382_v62 = vcombine.high %v11343_v15, %v11351_v34  ;;  %v11381_v19 = vcombine.low %v11343_v15, %v11351_v34  ;;  %v13377_v15 = vld [vmem:[%s16663_s7 + $0x420] sm:$0xff]  }
0x2f89   : > { %v13378_v34 = vld [vmem:[%s16663_s7 + $0x4a0] sm:$0xff]  }
0x3010   : > { %v8652_v11 = vpop.xlane.xlu0 %8651 }
0x3011   : > { %v8659_v20 = vmul.f32 0.03125, %v8652_v11  ;;  %v11361_v11 = vld [vmem:[%s16661_s5 + $0x1b0] sm:$0xff] }
0x3012   : > { %v8655_v39 = vpop.xlane.xlu1 %8654 }
0x3013   : > { %v8662_v21 = vadd.f32 1e-05, %v8659_v20  ;;  %v8660_v31 = vmul.f32 0.03125, %v8655_v39  ;;  %v11369_v20 = vld [vmem:[%s16661_s5 + $0x1f0] sm:$0xff]  ;;  %v11362_v39 = vld [vmem:[%s16661_s5 + $0x1b8] sm:$0xff] }
0x3014   : > { %v8658_v22 = vpop.xlane.xlu0 %8657 }
0x3015   : > { %13691 = vrsqrt.f32 %v8662_v21  ;;  %v8663_v57 = vadd.f32 1e-05, %v8660_v31  ;;  %v8661_v63 = vmul.f32 0.03125, %v8658_v22  ;;  %v11370_v21 = vld [vmem:[%s16661_s5 + $0x1f8] sm:$0xff]  ;;  %v11385_v31 = vcombine.low %v11345_v24, %v11353_v52 }
0x3016   : > { %v11387_v22 = vcombine.low %v11346_v55, %v11354_v9 }
0x3017   : > { %13693 = vrsqrt.f32 %v8663_v57  ;;  %v8664_v4 = vadd.f32 1e-05, %v8661_v63  ;;  %v11402_v57 = vcombine.high %v11361_v11, %v11369_v20  ;;  %v11404_v63 = vcombine.high %v11362_v39, %v11370_v21 }
0x3019   : > { %13695 = vrsqrt.f32 %v8664_v4  ;;  %v11401_v4 = vcombine.low %v11361_v11, %v11369_v20 }
0x301f   : > { %v13692_v51 = vpop.eup %13691 }
0x3020   : > { %v8668_v58 = vmul.f32 %v13692_v51, %v15858_v41  ;;  %v11365_v41 = vld [vmem:[%s16661_s5 + $0x1d0] sm:$0xff]  ;;  %v11403_v51 = vcombine.low %v11362_v39, %v11370_v21 }
0x3021   : > { %v13694_v14 = vpop.eup %13693  ;;  %v11394_v30 = vcombine.high %v11357_v0, %v11365_v41  ;;  %v11393_v13 = vcombine.low %v11357_v0, %v11365_v41  ;;  %v13369_v0 = vld [vmem:[%s16663_s7 + $0x410] sm:$0xff]  }
0x3022   : > { %v8677_v45 = vmul.f32 %v11337_v60, %v8668_v58  ;;  %v8669_v27 = vmul.f32 %v13694_v14, %v15860_v8  ;;  %v11358_v8 = vld [vmem:[%s16661_s5 + $0x198] sm:$0xff]  ;;  %v13360_v58 = vld [vmem:[%s16663_s7 + $0x4c0] sm:$0xff]   ;;  %v13370_v41 = vld [vmem:[%s16663_s7 + $0x490] sm:$0xff]  }
0x3023   : > { %v13696_v17 = vpop.eup %13695  ;;  %v11396_v49 = vcombine.high %v11358_v8, %v11366_v5  ;;  %v11395_v33 = vcombine.low %v11358_v8, %v11366_v5  ;;  %v13361_v14 = vld [vmem:[%s16663_s7 + $0x400] sm:$0xff]   ;;  %v13371_v8 = vld [vmem:[%s16663_s7 + $0x458] sm:$0xff]  }
0x3024   : > { %v8678_v2 = vmul.f32 %v11337_v60, %v8669_v27  ;;  %v8670_v16 = vmul.f32 %v13696_v17, %v15864_v36  ;;  %v15921_v59 = vadd.f32 %v11338_v35, %v8677_v45  ;;  %v13362_v45 = vld [vmem:[%s16663_s7 + $0x480] sm:$0xff]   ;;  %v13363_v27 = vld [vmem:[%s16663_s7 + $0x448] sm:$0xff]   ;;  %v13372_v5 = vld [vmem:[%s16663_s7 + $0x4d8] sm:$0xff]  }
0x3025   : > { %v13364_v17 = vld [vmem:[%s16663_s7 + $0x4c8] sm:$0xff]  }
0x3026   : > { %v15923_v12 = vadd.f32 %v11338_v35, %v8678_v2  ;;  %v8679_v48 = vmul.f32 %v11337_v60, %v8670_v16  ;;  %v13359_v60 = vld [vmem:[%s16663_s7 + $0x440] sm:$0xff]   ;;  %v13366_v2 = vld [vmem:[%s16663_s7 + $0x488] sm:$0xff]   ;;  %v13367_v16 = vld [vmem:[%s16663_s7 + $0x450] sm:$0xff]  }
0x3028   : > { %v15936_v36 = vpack.c.bf16 %v15923_v12, %v15921_v59  ;;  %v15956_v50 = vadd.f32 %v11338_v35, %v8679_v48  ;;  %v13365_v35 = vld [vmem:[%s16663_s7 + $0x408] sm:$0xff]   ;;  %v13374_v48 = vld [vmem:[%s16663_s7 + $0x498] sm:$0xff]  }
0x302a   : > { %11405 = vmatmul.mubr.msk.bf16.vlgmr.msra.gmra.mrb[8].mxu0 %vm471_vm0, %v15936_v36  ;;  %11407 = vmatmul.mubr.msk.bf16.vlgmr.msra.gmra.mrb[8].mxu1 %vm471_vm0, %v15936_v36  ;;  %v15960_v46 = vpack.c.bf16 %v15956_v50, %v15956_v50 }
0x302b   : > { %9017 = vmatprep.mubr.bf16.mxu0 %v13802_v29  ;;  %9068 = vmatprep.mubr.bf16.mxu1 %v13802_v29 }
0x302c   : > { %9078 = vmatpush1.bf16.msra.mxu0 %v11377_v61  ;;  %9129 = vmatpush1.bf16.msra.mxu1 %v11379_v3  ;;  %v11399_v61 = vcombine.low %v11360_v10, %v11368_v42  ;;  %v11386_v3 = vcombine.high %v11345_v24, %v11353_v52  ;;  %v13388_v10 = vld [vmem:[%s16663_s7 + $0x4f8] sm:$0xff]  }
0x302d   : > { %9079 = vmatprep.subr.bf16.mxu0 %v11394_v30  ;;  %9130 = vmatprep.subr.bf16.mxu1 %v11396_v49  ;;  %v13375_v30 = vld [vmem:[%s16663_s7 + $0x460] sm:$0xff]   ;;  %v13389_v42 = vld [vmem:[%s16663_s7 + $0x438] sm:$0xff]  }
0x302e   : > { %v13376_v49 = vld [vmem:[%s16663_s7 + $0x4e0] sm:$0xff]  }
0x3030   : > { %9080 = vmatpush1.bf16.msra.mxu0 %v11393_v13  ;;  %9131 = vmatpush1.bf16.msra.mxu1 %v11395_v33  ;;  %v13381_v13 = vld [vmem:[%s16663_s7 + $0x428] sm:$0xff]  }
0x3031   : > { %9179 = vmatprep.subr.bf16.mxu0 %v11382_v62  ;;  %9230 = vmatprep.subr.bf16.mxu1 %v11384_v28  ;;  %v13382_v33 = vld [vmem:[%s16663_s7 + $0x4a8] sm:$0xff]   ;;  %v13383_v62 = vld [vmem:[%s16663_s7 + $0x470] sm:$0xff]  }
0x3032   : > { %11406 = vmatmul.mubr.msk.bf16.gmra.mrb[12].mxu0 %vm471_vm0, %v15960_v46  ;;  %11408 = vmatmul.mubr.msk.bf16.gmra.mrb[12].mxu1 %vm471_vm0, %v15960_v46  ;;  %v13384_v28 = vld [vmem:[%s16663_s7 + $0x4f0] sm:$0xff]  }
0x3033   : > { %9109 = vmatprep.mubr.bf16.mxu0 %v13802_v29  ;;  %9160 = vmatprep.mubr.bf16.mxu1 %v13802_v29 }
0x303a   : > { %11409 = vmatmul.mubr.msk.bf16.vlgmr.msra.gmra.mrb[16].mxu0 %vm471_vm0, %v15936_v36  ;;  %11411 = vmatmul.mubr.msk.bf16.vlgmr.msra.gmra.mrb[16].mxu1 %vm471_vm0, %v15936_v36 }
0x303b   : > { %9119 = vmatprep.mubr.bf16.mxu0 %v13802_v29  ;;  %9170 = vmatprep.mubr.bf16.mxu1 %v13802_v29 }
0x303c   : > { %9180 = vmatpush1.bf16.msra.mxu0 %v11381_v19  ;;  %9231 = vmatpush1.bf16.msra.mxu1 %v11383_v7  ;;  %v13390_v19 = vld [vmem:[%s16663_s7 + $0x4b8] sm:$0xff]   ;;  %v13391_v7 = vld [vmem:[%s16663_s7 + $0x540] sm:$0xff]  }
0x303d   : > { %9181 = vmatprep.subr.bf16.mxu0 %v11398_v25  ;;  %9232 = vmatprep.subr.bf16.mxu1 %v11400_v32  ;;  %v13392_v25 = vld [vmem:[%s16663_s7 + $0x5c0] sm:$0xff]   ;;  %v16143_v32 = vld [vmem:[%s16662_s6 + $0x10] sm:$0xff] }
0x303e   : > { %v8732_v24 = vrot.slane %v16143_v32, %v14792_v43  ;;  %v8740_v52 = vrot.slane %v16143_v32, %v14794_v53  ;;  %v8736_v55 = vrot.slane %v16143_v32, %v14801_v54  ;;  %v8744_v9 = vrot.slane %v16143_v32, %v14803_v56 }
0x3040   : > { %9182 = vmatpush1.bf16.msra.mxu0 %v11397_v1  ;;  %9233 = vmatpush1.bf16.msra.mxu1 %v11399_v61 }
0x3041   : > { %9281 = vmatprep.subr.bf16.mxu0 %v11386_v3  ;;  %9332 = vmatprep.subr.bf16.mxu1 %v11388_v18 }
0x3042   : > { %11410 = vmatmul.mubr.msk.bf16.gmra.mrb[20].mxu0 %vm471_vm0, %v15960_v46  ;;  %11412 = vmatmul.mubr.msk.bf16.gmra.mrb[20].mxu1 %vm471_vm0, %v15960_v46 }
0x3043   : > { %9211 = vmatprep.mubr.bf16.mxu0 %v13802_v29  ;;  %9262 = vmatprep.mubr.bf16.mxu1 %v13802_v29 }
0x304a   : > { %11413 = vmatmul.mubr.msk.bf16.vlgmr.msra.gmra.mrb[24].mxu0 %vm471_vm0, %v15936_v36  ;;  %11415 = vmatmul.mubr.msk.bf16.vlgmr.msra.gmra.mrb[24].mxu1 %vm471_vm0, %v15936_v36 }
0x304b   : > { %9221 = vmatprep.mubr.bf16.mxu0 %v13802_v29  ;;  %9272 = vmatprep.mubr.bf16.mxu1 %v13802_v29 }
0x304c   : > { %9282 = vmatpush1.bf16.msra.mxu0 %v11385_v31  ;;  %9333 = vmatpush1.bf16.msra.mxu1 %v11387_v22 }
0x304d   : > { %9283 = vmatprep.subr.bf16.mxu0 %v11402_v57  ;;  %9334 = vmatprep.subr.bf16.mxu1 %v11404_v63 }
0x3050   : > { %9284 = vmatpush1.bf16.msra.mxu0 %v11401_v4  ;;  %9335 = vmatpush1.bf16.msra.mxu1 %v11403_v51 }
0x3051   : > { %12247 = vmatprep.subr.bf16.mxu0 %v13359_v60  ;;  %12275 = vmatprep.subr.bf16.mxu1 %v13360_v58 }
0x3052   : > { %11414 = vmatmul.mubr.msk.bf16.gmra.mrb[28].mxu0 %vm471_vm0, %v15960_v46  ;;  %11416 = vmatmul.mubr.msk.bf16.gmra.mrb[28].mxu1 %vm471_vm0, %v15960_v46 }
0x3053   : > { %9313 = vmatprep.mubr.bf16.mxu0 %v13802_v29  ;;  %9364 = vmatprep.mubr.bf16.mxu1 %v13802_v29 }
0x305a   : > { %11417 = vmatmul.mubr.msk.bf16.vlgmr.msra.gmra.mrb[32].mxu0 %vm471_vm0, %v15936_v36  ;;  %11419 = vmatmul.mubr.msk.bf16.vlgmr.msra.gmra.mrb[32].mxu1 %vm471_vm0, %v15936_v36  ;;  %v13373_v36 = vld [vmem:[%s16663_s7 + $0x418] sm:$0xff]  }
0x305b   : > { %9323 = vmatprep.mubr.bf16.mxu0 %v13802_v29  ;;  %9374 = vmatprep.mubr.bf16.mxu1 %v13802_v29  ;;  %v13368_v29 = vld [vmem:[%s16663_s7 + $0x4d0] sm:$0xff]  }
0x305c   : > { %12248 = vmatpush3.bf16.msra.mxu0 %v13361_v14  ;;  %12276 = vmatpush3.bf16.msra.mxu1 %v13362_v45 }
0x305d   : > { %12249 = vmatprep.subr.bf16.mxu0 %v13363_v27  ;;  %12277 = vmatprep.subr.bf16.mxu1 %v13364_v17 }
0x3060   : > { %12250 = vmatpush3.bf16.msra.mxu0 %v13365_v35  ;;  %12278 = vmatpush3.bf16.msra.mxu1 %v13366_v2 }
0x3061   : > { %12251 = vmatprep.subr.bf16.mxu0 %v13367_v16  ;;  %12279 = vmatprep.subr.bf16.mxu1 %v13368_v29 }
0x3062   : > { %11418 = vmatmul.mubr.msk.bf16.gmra.mrb[36].mxu0 %vm471_vm0, %v15960_v46  ;;  %11420 = vmatmul.mubr.msk.bf16.gmra.mrb[36].mxu1 %vm471_vm0, %v15960_v46  ;;  %v13385_v46 = vld [vmem:[%s16663_s7 + $0x430] sm:$0xff]  }
0x3064   : > { %12252 = vmatpush3.bf16.msra.mxu0 %v13369_v0  ;;  %12280 = vmatpush3.bf16.msra.mxu1 %v13370_v41 }
0x3065   : > { %12253 = vmatprep.subr.bf16.mxu0 %v13371_v8  ;;  %12281 = vmatprep.subr.bf16.mxu1 %v13372_v5 }
0x3068   : > { %12254 = vmatpush3.bf16.msra.mxu0 %v13373_v36  ;;  %12282 = vmatpush3.bf16.msra.mxu1 %v13374_v48 }
0x3069   : > { %12255 = vmatprep.subr.bf16.mxu0 %v13375_v30  ;;  %12283 = vmatprep.subr.bf16.mxu1 %v13376_v49  ;;  %v13393_v30 = vld [vmem:[%s16663_s7 + $0x500] sm:$0xff]  }
0x306a   : > { %v13394_v49 = vld [vmem:[%s16663_s7 + $0x580] sm:$0xff]  }
0x306c   : > { %12256 = vmatpush3.bf16.msra.mxu0 %v13377_v15  ;;  %12284 = vmatpush3.bf16.msra.mxu1 %v13378_v34 }
0x306d   : > { %12257 = vmatprep.subr.bf16.mxu0 %v13379_v40  ;;  %12285 = vmatprep.subr.bf16.mxu1 %v13380_v44 }
0x3070   : > { %12258 = vmatpush3.bf16.msra.mxu0 %v13381_v13  ;;  %12286 = vmatpush3.bf16.msra.mxu1 %v13382_v33  ;;  %v13395_v13 = vld [vmem:[%s16663_s7 + $0x548] sm:$0xff]  }
0x3071   : > { %12259 = vmatprep.subr.bf16.mxu0 %v13383_v62  ;;  %12287 = vmatprep.subr.bf16.mxu1 %v13384_v28  ;;  %v13396_v33 = vld [vmem:[%s16663_s7 + $0x5c8] sm:$0xff]  }
0x3074   : > { %12260 = vmatpush3.bf16.msra.mxu0 %v13385_v46  ;;  %12288 = vmatpush3.bf16.msra.mxu1 %v13386_v47 }
0x3075   : > { %12261 = vmatprep.subr.bf16.mxu0 %v13387_v6  ;;  %12289 = vmatprep.subr.bf16.mxu1 %v13388_v10 }
0x3078   : > { %12262 = vmatpush3.bf16.msra.mxu0 %v13389_v42  ;;  %12290 = vmatpush3.bf16.msra.mxu1 %v13390_v19 }
0x3079   : > { %12303 = vmatprep.subr.bf16.mxu0 %v13391_v7  ;;  %12331 = vmatprep.subr.bf16.mxu1 %v13392_v25  ;;  %v13397_v25 = vld [vmem:[%s16663_s7 + $0x508] sm:$0xff]  }
0x30fd   : > { %v9009_v1 = vpop.f32.mrb[8].mxu0  ;;  %v9060_v61 = vpop.f32.mrb[8].mxu1 }
0x30fe   : > { %v9010_v3 = vadd.f32 %v9009_v1, %v8732_v24  ;;  %v9061_v18 = vadd.f32 %v9060_v61, %v8740_v52  ;;  %v9011_v11 = vpop.f32.mrb[9].mxu0  ;;  %v9062_v20 = vpop.f32.mrb[9].mxu1 }
0x30ff   : > { %v9012_v39 = vadd.f32 %v9011_v11, %v8736_v55  ;;  %v9063_v21 = vadd.f32 %v9062_v20, %v8744_v9  ;;  %v9013_v31 = vpop.f32.mrb[10].mxu0  ;;  %v9064_v22 = vpop.f32.mrb[10].mxu1  ;;  %v13399_v11 = vld [vmem:[%s16663_s7 + $0x550] sm:$0xff]  }
0x3100   : > { %v9014_v57 = vadd.f32 %v9013_v31, %v8732_v24  ;;  %v9065_v63 = vadd.f32 %v9064_v22, %v8740_v52  ;;  %v9015_v4 = vpop.f32.mrb[11].mxu0  ;;  %v9066_v51 = vpop.f32.mrb[11].mxu1  ;;  %v9383_v14 = vmax.f32 %v9010_v3, 0.0  ;;  %v9385_v45 = vmax.f32 %v9061_v18, 0.0  ;;  %v13400_v20 = vld [vmem:[%s16663_s7 + $0x5d0] sm:$0xff]  }
0x3101   : > { %v9016_v60 = vadd.f32 %v9015_v4, %v8736_v55  ;;  %v9067_v58 = vadd.f32 %v9066_v51, %v8744_v9  ;;  %v9384_v35 = vmax.f32 %v9012_v39, 0.0  ;;  %v9386_v2 = vmax.f32 %v9063_v21, 0.0  ;;  %v13401_v22 = vld [vmem:[%s16663_s7 + $0x510] sm:$0xff]  }
0x3102   : > { %v9399_v27 = vmax.f32 %v9014_v57, 0.0  ;;  %v9401_v17 = vmax.f32 %v9065_v63, 0.0  ;;  %v16181_v3 = vrot.slane %v16143_v32, %v14829_v37  ;;  %v16185_v18 = vrot.slane %v16143_v32, %v14831_v38 }
0x3103   : > { %v9400_v16 = vmax.f32 %v9016_v60, 0.0  ;;  %v9402_v29 = vmax.f32 %v9067_v58, 0.0  ;;  %v13403_v58 = vld [vmem:[%s16663_s7 + $0x558] sm:$0xff]  }
0x3104   : > { %v9431_v0 = vpack.c.bf16 %v9399_v27, %v9383_v14  ;;  %v9433_v41 = vpack.c.bf16 %v9401_v17, %v9385_v45  ;;  %v13404_v14 = vld [vmem:[%s16663_s7 + $0x5d8] sm:$0xff]  }
0x3105   : > { %v9432_v8 = vpack.c.bf16 %v9400_v16, %v9384_v35  ;;  %v9434_v5 = vpack.c.bf16 %v9402_v29, %v9386_v2  ;;  %v9019_v36 = vpop.f32.mrb[12].mxu0  ;;  %v9070_v48 = vpop.f32.mrb[12].mxu1 }
0x3106   : > { %v9020_v15 = vadd.f32 %v9019_v36, %v8732_v24  ;;  %v9071_v34 = vadd.f32 %v9070_v48, %v8740_v52  ;;  %v9021_v40 = vpop.f32.mrb[13].mxu0  ;;  %v9072_v44 = vpop.f32.mrb[13].mxu1  ;;  %v13398_v24 = vld [vmem:[%s16663_s7 + $0x588] sm:$0xff]   ;;  %v13406_v36 = vld [vmem:[%s16663_s7 + $0x598] sm:$0xff]  }
0x3107   : > { %v9022_v62 = vadd.f32 %v9021_v40, %v8736_v55  ;;  %v9073_v28 = vadd.f32 %v9072_v44, %v8744_v9  ;;  %v9023_v46 = vpop.f32.mrb[14].mxu0  ;;  %v9074_v47 = vpop.f32.mrb[14].mxu1  ;;  %10528 = vmatprep.mubr.bf16.mxu0 %v9432_v8  ;;  %10576 = vmatprep.mubr.bf16.mxu1 %v9434_v5  ;;  %v16173_v55 = vrot.slane %v16143_v32, %v14825_v23  ;;  %v13405_v5 = vld [vmem:[%s16663_s7 + $0x518] sm:$0xff]   ;;  %v13408_v40 = vld [vmem:[%s16663_s7 + $0x5e0] sm:$0xff]  }
0x3108   : > { %v9024_v6 = vpop.f32.mrb[15].mxu0  ;;  %v9075_v10 = vpop.f32.mrb[15].mxu1  ;;  %10529 = vmatmul.mubr.bf16.vlgmr.msra.gmra.mrb[40].mxu0 %v9431_v0  ;;  %10577 = vmatmul.mubr.bf16.vlgmr.msra.gmra.mrb[40].mxu1 %v9433_v41  ;;  %v9415_v42 = vmax.f32 %v9020_v15, 0.0  ;;  %v9417_v52 = vmax.f32 %v9071_v34, 0.0  ;;  %v16177_v9 = vrot.slane %v16143_v32, %v14827_v26  ;;  %v13402_v32 = vld [vmem:[%s16663_s7 + $0x590] sm:$0xff]   ;;  %v13407_v34 = vld [vmem:[%s16663_s7 + $0x560] sm:$0xff]  }
0x3109   : > { %v9416_v19 = vmax.f32 %v9022_v62, 0.0  ;;  %v9418_v7 = vmax.f32 %v9073_v28, 0.0  ;;  %12304 = vmatpush3.bf16.msra.mxu0 %v13393_v30  ;;  %12332 = vmatpush3.bf16.msra.mxu1 %v13394_v49 }
0x310a   : > { %12305 = vmatprep.subr.bf16.mxu0 %v13395_v13  ;;  %12333 = vmatprep.subr.bf16.mxu1 %v13396_v33  ;;  %v9447_v39 = vpack.c.bf16 %v9415_v42, %v9415_v42  ;;  %v9449_v57 = vpack.c.bf16 %v9417_v52, %v9417_v52  ;;  %v13411_v52 = vld [vmem:[%s16663_s7 + $0x568] sm:$0xff]  }
0x310b   : > { %v9448_v1 = vpack.c.bf16 %v9416_v19, %v9416_v19  ;;  %v9450_v61 = vpack.c.bf16 %v9418_v7, %v9418_v7  ;;  %v13409_v19 = vld [vmem:[%s16663_s7 + $0x520] sm:$0xff]  }
0x310c   : > { %v13410_v7 = vld [vmem:[%s16663_s7 + $0x5a0] sm:$0xff]  }
0x310d   : > { %12306 = vmatpush3.bf16.msra.mxu0 %v13397_v25  ;;  %12334 = vmatpush3.bf16.msra.mxu1 %v13398_v24  ;;  %v9111_v21 = vpop.f32.mrb[16].mxu0  ;;  %v9162_v31 = vpop.f32.mrb[16].mxu1 }
0x310e   : > { %v9112_v63 = vadd.f32 %v9111_v21, %v16173_v55  ;;  %v9163_v4 = vadd.f32 %v9162_v31, %v16177_v9  ;;  %10536 = vmatprep.mubr.bf16.mxu0 %v9448_v1  ;;  %10584 = vmatprep.mubr.bf16.mxu1 %v9450_v61  ;;  %v9113_v51 = vpop.f32.mrb[17].mxu0  ;;  %v9164_v60 = vpop.f32.mrb[17].mxu1  ;;  %v13412_v1 = vld [vmem:[%s16663_s7 + $0x5e8] sm:$0xff]  }
0x310f   : > { %v9114_v45 = vadd.f32 %v9113_v51, %v16181_v3  ;;  %v9165_v27 = vadd.f32 %v9164_v60, %v16185_v18  ;;  %v9115_v17 = vpop.f32.mrb[18].mxu0  ;;  %v9166_v35 = vpop.f32.mrb[18].mxu1  ;;  %12307 = vmatprep.subr.bf16.mxu0 %v13399_v11  ;;  %12335 = vmatprep.subr.bf16.mxu1 %v13400_v20  ;;  %v16248_v20 = vld [vmem:[%s16662_s6 + $0x18] sm:$0xff]  ;;  %v13413_v31 = vld [vmem:[%s16663_s7 + $0x528] sm:$0xff]  }
0x3110   : > { %v9116_v2 = vadd.f32 %v9115_v17, %v16173_v55  ;;  %v9167_v16 = vadd.f32 %v9166_v35, %v16177_v9  ;;  %v9117_v29 = vpop.f32.mrb[19].mxu0  ;;  %v9168_v0 = vpop.f32.mrb[19].mxu1  ;;  %10537 = vmatmul.mubr.bf16.gmra.mrb[44].mxu0 %v9447_v39  ;;  %10585 = vmatmul.mubr.bf16.gmra.mrb[44].mxu1 %v9449_v57  ;;  %v9387_v48 = vmax.f32 %v9112_v63, 0.0  ;;  %v9389_v30 = vmax.f32 %v9163_v4, 0.0  ;;  %v13415_v63 = vld [vmem:[%s16663_s7 + $0x570] sm:$0xff]   ;;  %v13420_v35 = vld [vmem:[%s16663_s7 + $0x5f8] sm:$0xff]  }
0x3111   : > { %v9118_v41 = vadd.f32 %v9117_v29, %v16181_v3  ;;  %v9169_v8 = vadd.f32 %v9168_v0, %v16185_v18  ;;  %12308 = vmatpush3.bf16.msra.mxu0 %v13401_v22  ;;  %12336 = vmatpush3.bf16.msra.mxu1 %v13402_v32  ;;  %v9388_v44 = vmax.f32 %v9114_v45, 0.0  ;;  %v9390_v13 = vmax.f32 %v9165_v27, 0.0  ;;  %v13414_v22 = vld [vmem:[%s16663_s7 + $0x5a8] sm:$0xff]   ;;  %v13416_v4 = vld [vmem:[%s16663_s7 + $0x5f0] sm:$0xff]  }
0x3112   : > { %v9403_v49 = vmax.f32 %v9116_v2, 0.0  ;;  %v9405_v15 = vmax.f32 %v9167_v16, 0.0  ;;  %12309 = vmatprep.subr.bf16.mxu0 %v13403_v58  ;;  %12337 = vmatprep.subr.bf16.mxu1 %v13404_v14  ;;  %v16258_v32 = vrot.slane %v16248_v20, %v14792_v43  ;;  %v16262_v57 = vrot.slane %v16248_v20, %v14794_v53  ;;  %v13417_v45 = vld [vmem:[%s16663_s7 + $0x530] sm:$0xff]  }
0x3113   : > { %v9404_v33 = vmax.f32 %v9118_v41, 0.0  ;;  %v9406_v62 = vmax.f32 %v9169_v8, 0.0  ;;  %v16272_v51 = vrot.slane %v16248_v20, %v14801_v54  ;;  %v16276_v43 = vrot.slane %v16248_v20, %v14803_v56  ;;  %v13418_v54 = vld [vmem:[%s16663_s7 + $0x5b0] sm:$0xff]  }
0x3114   : > { %v16225_v28 = vpack.c.bf16 %v9403_v49, %v9387_v48  ;;  %v16227_v46 = vpack.c.bf16 %v9405_v15, %v9389_v30 }
0x3115   : > { %v9436_v47 = vpack.c.bf16 %v9404_v33, %v9388_v44  ;;  %v9438_v6 = vpack.c.bf16 %v9406_v62, %v9390_v13  ;;  %12310 = vmatpush3.bf16.msra.mxu0 %v13405_v5  ;;  %12338 = vmatpush3.bf16.msra.mxu1 %v13406_v36  ;;  %v16229_v10 = vpop.f32.mrb[20].mxu0  ;;  %v16231_v42 = vpop.f32.mrb[20].mxu1 }
0x3116   : > { %v9123_v25 = vpop.f32.mrb[21].mxu0  ;;  %v9174_v24 = vpop.f32.mrb[21].mxu1  ;;  %12311 = vmatprep.subr.bf16.mxu0 %v13407_v34  ;;  %12339 = vmatprep.subr.bf16.mxu1 %v13408_v40  ;;  %v13421_v34 = vld [vmem:[%s16663_s7 + $0x538] sm:$0xff]  }
0x3117   : > { %v9125_v61 = vpop.f32.mrb[22].mxu0  ;;  %v9176_v11 = vpop.f32.mrb[22].mxu1  ;;  %10624 = vmatprep.mubr.bf16.mxu0 %v9436_v47  ;;  %10672 = vmatprep.mubr.bf16.mxu1 %v9438_v6  ;;  %v9124_v60 = vadd.f32 %v9123_v25, %v16181_v3  ;;  %v9175_v53 = vadd.f32 %v9174_v24, %v16185_v18  ;;  %v13419_v18 = vld [vmem:[%s16663_s7 + $0x578] sm:$0xff]   ;;  %v13423_v47 = vld [vmem:[%s16663_s7 + $0x640] sm:$0xff]  }
0x3118   : > { %v9126_v39 = vpop.f32.mrb[23].mxu0  ;;  %v9177_v21 = vpop.f32.mrb[23].mxu1  ;;  %v13422_v40 = vld [vmem:[%s16663_s7 + $0x5b8] sm:$0xff]   ;;  %v13424_v6 = vld [vmem:[%s16663_s7 + $0x6c0] sm:$0xff]   ;;  %v9122_v61 = vadd.f32 %v16229_v10, %v16173_v55 }
0x3119   : > { %12312 = vmatpush3.bf16.msra.mxu0 %v13409_v19  ;;  %12340 = vmatpush3.bf16.msra.mxu1 %v13410_v7  ;;  %v9420_v48 = vmax.f32 %v9124_v60, 0.0  ;;  %v9422_v30 = vmax.f32 %v9175_v53, 0.0  ;;  %v13425_v55 = vld [vmem:[%s16663_s7 + $0x600] sm:$0xff]  }
0x311a   : > { %12313 = vmatprep.subr.bf16.mxu0 %v13411_v52  ;;  %12341 = vmatprep.subr.bf16.mxu1 %v13412_v1  ;;  %v13426_v10 = vld [vmem:[%s16663_s7 + $0x680] sm:$0xff]  }
0x311b   : > { %v9452_v60 = vpack.c.bf16 %v9420_v48, %v9420_v48  ;;  %v9454_v53 = vpack.c.bf16 %v9422_v30, %v9422_v30 }
0x311d   : > { %12314 = vmatpush3.bf16.msra.mxu0 %v13413_v31  ;;  %12342 = vmatpush3.bf16.msra.mxu1 %v13414_v22  ;;  %v9213_v58 = vpop.f32.mrb[24].mxu0  ;;  %v9264_v14 = vpop.f32.mrb[24].mxu1  ;;  %v9173_v22 = vadd.f32 %v16231_v42, %v16177_v9  ;;  %v13427_v9 = vld [vmem:[%s16663_s7 + $0x648] sm:$0xff]  }
0x311e   : > { %v9214_v27 = vadd.f32 %v9213_v58, %v16258_v32  ;;  %v9265_v56 = vadd.f32 %v9264_v14, %v16262_v57  ;;  %v9215_v17 = vpop.f32.mrb[25].mxu0  ;;  %v9266_v3 = vpop.f32.mrb[25].mxu1  ;;  %12315 = vmatprep.subr.bf16.mxu0 %v13415_v63  ;;  %12343 = vmatprep.subr.bf16.mxu1 %v13416_v4  ;;  %v13428_v42 = vld [vmem:[%s16663_s7 + $0x6c8] sm:$0xff]  }
0x311f   : > { %v9216_v2 = vadd.f32 %v9215_v17, %v16272_v51  ;;  %v9267_v16 = vadd.f32 %v9266_v3, %v16276_v43  ;;  %v9217_v29 = vpop.f32.mrb[26].mxu0  ;;  %v9268_v0 = vpop.f32.mrb[26].mxu1  ;;  %v13429_v17 = vld [vmem:[%s16663_s7 + $0x608] sm:$0xff]  }
0x3120   : > { %v9218_v41 = vadd.f32 %v9217_v29, %v16258_v32  ;;  %v9269_v8 = vadd.f32 %v9268_v0, %v16262_v57  ;;  %v9219_v5 = vpop.f32.mrb[27].mxu0  ;;  %v9270_v36 = vpop.f32.mrb[27].mxu1  ;;  %v9391_v44 = vmax.f32 %v9214_v27, 0.0  ;;  %v9393_v13 = vmax.f32 %v9265_v56, 0.0  ;;  %v13430_v3 = vld [vmem:[%s16663_s7 + $0x688] sm:$0xff]  }
0x3121   : > { %v9220_v49 = vadd.f32 %v9219_v5, %v16272_v51  ;;  %v9271_v15 = vadd.f32 %v9270_v36, %v16276_v43  ;;  %12316 = vmatpush3.bf16.msra.mxu0 %v13417_v45  ;;  %12344 = vmatpush3.bf16.msra.mxu1 %v13418_v54  ;;  %v9392_v19 = vmax.f32 %v9216_v2, 0.0  ;;  %v9394_v7 = vmax.f32 %v9267_v16, 0.0  ;;  %v13431_v2 = vld [vmem:[%s16663_s7 + $0x650] sm:$0xff]  }
0x3122   : > { %v9407_v33 = vmax.f32 %v9218_v41, 0.0  ;;  %v9409_v62 = vmax.f32 %v9269_v8, 0.0  ;;  %12317 = vmatprep.subr.bf16.mxu0 %v13419_v18  ;;  %12345 = vmatprep.subr.bf16.mxu1 %v13420_v35  ;;  %v9419_v27 = vmax.f32 %v9122_v61, 0.0  ;;  %v9421_v56 = vmax.f32 %v9173_v22, 0.0  ;;  %v13433_v8 = vld [vmem:[%s16663_s7 + $0x610] sm:$0xff]   ;;  %v13438_v61 = vld [vmem:[%s16663_s7 + $0x698] sm:$0xff]  }
0x3123   : > { %v9408_v25 = vmax.f32 %v9220_v49, 0.0  ;;  %v9410_v24 = vmax.f32 %v9271_v15, 0.0  ;;  %v16362_v18 = vrot.slane %v16248_v20, %v14829_v37  ;;  %v16366_v35 = vrot.slane %v16248_v20, %v14831_v38  ;;  %v13434_v5 = vld [vmem:[%s16663_s7 + $0x690] sm:$0xff]   ;;  %v13435_v15 = vld [vmem:[%s16663_s7 + $0x658] sm:$0xff]  }
0x3124   : > { %v16312_v52 = vpack.c.bf16 %v9407_v33, %v9391_v44  ;;  %v16314_v1 = vpack.c.bf16 %v9409_v62, %v9393_v13  ;;  %v9453_v0 = vpack.c.bf16 %v9421_v56, %v9421_v56  ;;  %v13441_v56 = vld [vmem:[%s16663_s7 + $0x620] sm:$0xff]  }
0x3125   : > { %v16318_v11 = vpack.c.bf16 %v9408_v25, %v9392_v19  ;;  %v16320_v39 = vpack.c.bf16 %v9410_v24, %v9394_v7  ;;  %12318 = vmatpush3.bf16.msra.mxu0 %v13421_v34  ;;  %12346 = vmatpush3.bf16.msra.mxu1 %v13422_v40  ;;  %v16322_v21 = vpop.f32.mrb[28].mxu0  ;;  %v16324_v31 = vpop.f32.mrb[28].mxu1  ;;  %v13436_v34 = vld [vmem:[%s16663_s7 + $0x6d8] sm:$0xff]  }
0x3126   : > { %v16328_v63 = vpop.f32.mrb[29].mxu0  ;;  %v16330_v4 = vpop.f32.mrb[29].mxu1  ;;  %12359 = vmatprep.subr.bf16.mxu0 %v13423_v47  ;;  %12387 = vmatprep.subr.bf16.mxu1 %v13424_v6  ;;  %v13437_v24 = vld [vmem:[%s16663_s7 + $0x618] sm:$0xff]  }
0x3127   : > { %v9227_v58 = vpop.f32.mrb[30].mxu0  ;;  %v9278_v14 = vpop.f32.mrb[30].mxu1 }
0x3128   : > { %10625 = vmatmul.mubr.bf16.vlgmr.msra.gmra.mrb[48].mxu0 %v16225_v28  ;;  %10673 = vmatmul.mubr.bf16.vlgmr.msra.gmra.mrb[48].mxu1 %v16227_v46  ;;  %v9228_v45 = vpop.f32.mrb[31].mxu0  ;;  %v9279_v54 = vpop.f32.mrb[31].mxu1  ;;  %v16354_v28 = vrot.slane %v16248_v20, %v14825_v23  ;;  %v16358_v46 = vrot.slane %v16248_v20, %v14827_v26  ;;  %v13432_v23 = vld [vmem:[%s16663_s7 + $0x6d0] sm:$0xff]   ;;  %v9451_v26 = vpack.c.bf16 %v9419_v27, %v9419_v27 }
0x3129   : > { %10632 = vmatprep.mubr.bf16.mxu0 %v9452_v60  ;;  %10680 = vmatprep.mubr.bf16.mxu1 %v9454_v53  ;;  %v13440_v60 = vld [vmem:[%s16663_s7 + $0x6e0] sm:$0xff]  }
0x312a   : > { %12360 = vmatpush3.bf16.msra.mxu0 %v13425_v55  ;;  %12388 = vmatpush3.bf16.msra.mxu1 %v13426_v10 }
0x312b   : > { %12361 = vmatprep.subr.bf16.mxu0 %v13427_v9  ;;  %12389 = vmatprep.subr.bf16.mxu1 %v13428_v42 }
0x312d   : > { %v9315_v16 = vpop.f32.mrb[32].mxu0  ;;  %v9366_v29 = vpop.f32.mrb[32].mxu1 }
0x312e   : > { %12362 = vmatpush3.bf16.msra.mxu0 %v13429_v17  ;;  %12390 = vmatpush3.bf16.msra.mxu1 %v13430_v3  ;;  %v9316_v37 = vadd.f32 %v9315_v16, %v16354_v28  ;;  %v9367_v41 = vadd.f32 %v9366_v29, %v16358_v46  ;;  %v9317_v38 = vpop.f32.mrb[33].mxu0  ;;  %v9368_v20 = vpop.f32.mrb[33].mxu1  ;;  %v13442_v17 = vld [vmem:[%s16663_s7 + $0x6a0] sm:$0xff]  }
0x312f   : > { %v9318_v36 = vadd.f32 %v9317_v38, %v16362_v18  ;;  %v9369_v48 = vadd.f32 %v9368_v20, %v16366_v35  ;;  %v9319_v30 = vpop.f32.mrb[34].mxu0  ;;  %v9370_v49 = vpop.f32.mrb[34].mxu1  ;;  %12363 = vmatprep.subr.bf16.mxu0 %v13431_v2  ;;  %12391 = vmatprep.subr.bf16.mxu1 %v13432_v23  ;;  %v13443_v23 = vld [vmem:[%s16663_s7 + $0x668] sm:$0xff]   ;;  %v13448_v38 = vld [vmem:[%s16663_s7 + $0x6f0] sm:$0xff]  }
0x3130   : > { %v9320_v40 = vadd.f32 %v9319_v30, %v16354_v28  ;;  %v9371_v44 = vadd.f32 %v9370_v49, %v16358_v46  ;;  %10633 = vmatmul.mubr.bf16.gmra.mrb[52].mxu0 %v9451_v26  ;;  %10681 = vmatmul.mubr.bf16.gmra.mrb[52].mxu1 %v9453_v0  ;;  %v9321_v13 = vpop.f32.mrb[35].mxu0  ;;  %v9372_v33 = vpop.f32.mrb[35].mxu1  ;;  %v9395_v6 = vmax.f32 %v9316_v37, 0.0  ;;  %v9397_v19 = vmax.f32 %v9367_v41, 0.0  ;;  %v13444_v26 = vld [vmem:[%s16663_s7 + $0x6e8] sm:$0xff]   ;;  %v13447_v41 = vld [vmem:[%s16663_s7 + $0x670] sm:$0xff]  }
0x3131   : > { %v9322_v62 = vadd.f32 %v9321_v13, %v16362_v18  ;;  %v9373_v47 = vadd.f32 %v9372_v33, %v16366_v35  ;;  %10720 = vmatprep.mubr.bf16.mxu0 %v16318_v11  ;;  %10768 = vmatprep.mubr.bf16.mxu1 %v16320_v39  ;;  %v9396_v22 = vmax.f32 %v9318_v36, 0.0  ;;  %v9398_v55 = vmax.f32 %v9369_v48, 0.0  ;;  %v13439_v39 = vld [vmem:[%s16663_s7 + $0x660] sm:$0xff]   ;;  %v13445_v0 = vld [vmem:[%s16663_s7 + $0x628] sm:$0xff]   ;;  %v13449_v20 = vld [vmem:[%s16663_s7 + $0x630] sm:$0xff]  }
0x3132   : > { %v9411_v7 = vmax.f32 %v9320_v40, 0.0  ;;  %v9413_v25 = vmax.f32 %v9371_v44, 0.0  ;;  %12364 = vmatpush3.bf16.msra.mxu0 %v13433_v8  ;;  %12392 = vmatpush3.bf16.msra.mxu1 %v13434_v5  ;;  %v13446_v37 = vld [vmem:[%s16663_s7 + $0x6a8] sm:$0xff]   ;;  %v13450_v8 = vld [vmem:[%s16663_s7 + $0x6b0] sm:$0xff]   ;;  %v13451_v5 = vld [vmem:[%s16663_s7 + $0x678] sm:$0xff]   ;;  %v9226_v48 = vadd.f32 %v16328_v63, %v16272_v51  ;;  %v9277_v30 = vadd.f32 %v16330_v4, %v16276_v43 }
0x3133   : > { %v9412_v10 = vmax.f32 %v9322_v62, 0.0  ;;  %v9414_v11 = vmax.f32 %v9373_v47, 0.0  ;;  %12365 = vmatprep.subr.bf16.mxu0 %v13435_v15  ;;  %12393 = vmatprep.subr.bf16.mxu1 %v13436_v34  ;;  %v13452_v36 = vld [vmem:[%s16663_s7 + $0x6f8] sm:$0xff]   ;;  %v13455_v34 = vld [vmem:[%s16663_s7 + $0x740] sm:$0xff]   ;;  %v9224_v4 = vadd.f32 %v16322_v21, %v16258_v32  ;;  %v9275_v40 = vadd.f32 %v16324_v31, %v16262_v57  ;;  %v13459_v47 = vld [vmem:[%s16663_s7 + $0x748] sm:$0xff]  }
0x3134   : > { %v16408_v53 = vpack.c.bf16 %v9411_v7, %v9395_v6  ;;  %v16410_v58 = vpack.c.bf16 %v9413_v25, %v9397_v19  ;;  %v13453_v49 = vld [vmem:[%s16663_s7 + $0x638] sm:$0xff]   ;;  %v13456_v51 = vld [vmem:[%s16663_s7 + $0x7c0] sm:$0xff]   ;;  %v9424_v43 = vmax.f32 %v9226_v48, 0.0  ;;  %v9426_v63 = vmax.f32 %v9277_v30, 0.0  ;;  %v13460_v32 = vld [vmem:[%s16663_s7 + $0x7c8] sm:$0xff]  }
0x3135   : > { %v16412_v14 = vpack.c.bf16 %v9412_v10, %v9396_v22  ;;  %v16414_v9 = vpack.c.bf16 %v9414_v11, %v9398_v55  ;;  %v16416_v42 = vpop.f32.mrb[36].mxu0  ;;  %v16418_v45 = vpop.f32.mrb[36].mxu1  ;;  %v13454_v15 = vld [vmem:[%s16663_s7 + $0x6b8] sm:$0xff]   ;;  %v13457_v44 = vld [vmem:[%s16663_s7 + $0x700] sm:$0xff]   ;;  %v9423_v57 = vmax.f32 %v9224_v4, 0.0  ;;  %v9425_v21 = vmax.f32 %v9275_v40, 0.0 }
0x3136   : > { %12366 = vmatpush3.bf16.msra.mxu0 %v13437_v24  ;;  %12394 = vmatpush3.bf16.msra.mxu1 %v13438_v61  ;;  %v16420_v54 = vpop.f32.mrb[37].mxu0  ;;  %v16422_v27 = vpop.f32.mrb[37].mxu1  ;;  %v13458_v13 = vld [vmem:[%s16663_s7 + $0x780] sm:$0xff]   ;;  %v9456_v33 = vpack.c.bf16 %v9424_v43, %v9424_v43  ;;  %v9458_v62 = vpack.c.bf16 %v9426_v63, %v9426_v63  ;;  %v13461_v31 = vld [vmem:[%s16663_s7 + $0x708] sm:$0xff]   ;;  %v13465_v25 = vld [vmem:[%s16663_s7 + $0x710] sm:$0xff]  }
0x3137   : > { %v9329_v3 = vpop.f32.mrb[38].mxu0  ;;  %v9380_v2 = vpop.f32.mrb[38].mxu1  ;;  %12367 = vmatprep.subr.bf16.mxu0 %v13439_v39  ;;  %12395 = vmatprep.subr.bf16.mxu1 %v13440_v60  ;;  %v13462_v6 = vld [vmem:[%s16663_s7 + $0x788] sm:$0xff]   ;;  %v9455_v19 = vpack.c.bf16 %v9423_v57, %v9423_v57  ;;  %v9457_v7 = vpack.c.bf16 %v9425_v21, %v9425_v21  ;;  %v13466_v24 = vld [vmem:[%s16663_s7 + $0x790] sm:$0xff]   ;;  %v13467_v61 = vld [vmem:[%s16663_s7 + $0x758] sm:$0xff]  }
0x3138   : > { %v9330_v16 = vpop.f32.mrb[39].mxu0  ;;  %v9381_v29 = vpop.f32.mrb[39].mxu1  ;;  %v13468_v22 = vld [vmem:[%s16663_s7 + $0x7d8] sm:$0xff]   ;;  %v13471_v11 = vld [vmem:[%s16663_s7 + $0x760] sm:$0xff]   ;;  %v13478_v3 = vld [vmem:[%s16663_s7 + $0x7a8] sm:$0xff]  }
0x3139   : > { %v13469_v55 = vld [vmem:[%s16663_s7 + $0x718] sm:$0xff]   ;;  %v13472_v39 = vld [vmem:[%s16663_s7 + $0x7e0] sm:$0xff]   ;;  %v13479_v2 = vld [vmem:[%s16663_s7 + $0x770] sm:$0xff]  }
0x313a   : > { %12368 = vmatpush3.bf16.msra.mxu0 %v13441_v56  ;;  %12396 = vmatpush3.bf16.msra.mxu1 %v13442_v17  ;;  %v13470_v10 = vld [vmem:[%s16663_s7 + $0x798] sm:$0xff]   ;;  %v13473_v60 = vld [vmem:[%s16663_s7 + $0x720] sm:$0xff]   ;;  %v13476_v56 = vld [vmem:[%s16663_s7 + $0x7e8] sm:$0xff]  }
0x313b   : > { %12369 = vmatprep.subr.bf16.mxu0 %v13443_v23  ;;  %12397 = vmatprep.subr.bf16.mxu1 %v13444_v26  ;;  %v13477_v17 = vld [vmem:[%s16663_s7 + $0x728] sm:$0xff]   ;;  %v13480_v23 = vld [vmem:[%s16663_s7 + $0x7f0] sm:$0xff]   ;;  %v13483_v29 = vld [vmem:[%s16663_s7 + $0x778] sm:$0xff]  }
0x313c   : > { %v13481_v26 = vld [vmem:[%s16663_s7 + $0x730] sm:$0xff]  }
0x313d   : > { %v13482_v16 = vld [vmem:[%s16663_s7 + $0x7b0] sm:$0xff]  }
0x313e   : > { %12370 = vmatpush3.bf16.msra.mxu0 %v13445_v0  ;;  %12398 = vmatpush3.bf16.msra.mxu1 %v13446_v37  ;;  %v13484_v0 = vld [vmem:[%s16663_s7 + $0x7f8] sm:$0xff]   ;;  %v9328_v37 = vadd.f32 %v16420_v54, %v16362_v18  ;;  %v9326_v18 = vadd.f32 %v16416_v42, %v16354_v28  ;;  %v11678_v28 = vld [vmem:[%s16664_s8 + $0x1] ss:$0 sm:$0xff] }
0x313f   : > { %12371 = vmatprep.subr.bf16.mxu0 %v13447_v41  ;;  %12399 = vmatprep.subr.bf16.mxu1 %v13448_v38  ;;  %v9379_v41 = vadd.f32 %v16422_v27, %v16366_v35  ;;  %v13485_v38 = vld [vmem:[%s16663_s7 + $0x738] sm:$0xff]   ;;  %v9377_v35 = vadd.f32 %v16418_v45, %v16358_v46 }
0x3141   : > { %v9429_v48 = vmax.f32 %v9377_v35, 0.0 }
0x3142   : > { %12372 = vmatpush3.bf16.msra.mxu0 %v13449_v20  ;;  %12400 = vmatpush3.bf16.msra.mxu1 %v13450_v8  ;;  %v13486_v20 = vld [vmem:[%s16663_s7 + $0x7b8] sm:$0xff]   ;;  %v9428_v8 = vmax.f32 %v9328_v37, 0.0 }
0x3143   : > { %12373 = vmatprep.subr.bf16.mxu0 %v13451_v5  ;;  %12401 = vmatprep.subr.bf16.mxu1 %v13452_v36  ;;  %v9430_v5 = vmax.f32 %v9379_v41, 0.0  ;;  %v9427_v36 = vmax.f32 %v9326_v18, 0.0 }
0x3144   : > { %v9460_v54 = vpack.c.bf16 %v9428_v8, %v9428_v8 }
0x3145   : > { %v9462_v27 = vpack.c.bf16 %v9430_v5, %v9430_v5  ;;  %v9459_v30 = vpack.c.bf16 %v9427_v36, %v9427_v36 }
0x3146   : > { %12374 = vmatpush3.bf16.msra.mxu0 %v13453_v49  ;;  %12402 = vmatpush3.bf16.msra.mxu1 %v13454_v15  ;;  %v9461_v49 = vpack.c.bf16 %v9429_v48, %v9429_v48 }
0x3147   : > { %12415 = vmatprep.subr.bf16.mxu0 %v13455_v34  ;;  %12443 = vmatprep.subr.bf16.mxu1 %v13456_v51 }
0x3149   : > { %10721 = vmatmul.mubr.bf16.vlgmr.msra.gmra.mrb[56].mxu0 %v16312_v52  ;;  %10769 = vmatmul.mubr.bf16.vlgmr.msra.gmra.mrb[56].mxu1 %v16314_v1  ;;  %v13463_v52 = vld [vmem:[%s16663_s7 + $0x750] sm:$0xff]  }
0x314a   : > { %10728 = vmatprep.mubr.bf16.mxu0 %v9456_v33  ;;  %10776 = vmatprep.mubr.bf16.mxu1 %v9458_v62  ;;  %v13464_v1 = vld [vmem:[%s16663_s7 + $0x7d0] sm:$0xff]  }
0x314b   : > { %12416 = vmatpush3.bf16.msra.mxu0 %v13457_v44  ;;  %12444 = vmatpush3.bf16.msra.mxu1 %v13458_v13 }
0x314c   : > { %12417 = vmatprep.subr.bf16.mxu0 %v13459_v47  ;;  %12445 = vmatprep.subr.bf16.mxu1 %v13460_v32 }
0x314f   : > { %12418 = vmatpush3.bf16.msra.mxu0 %v13461_v31  ;;  %12446 = vmatpush3.bf16.msra.mxu1 %v13462_v6 }
0x3150   : > { %12419 = vmatprep.subr.bf16.mxu0 %v13463_v52  ;;  %12447 = vmatprep.subr.bf16.mxu1 %v13464_v1 }
0x3151   : > { %10729 = vmatmul.mubr.bf16.gmra.mrb[60].mxu0 %v9455_v19  ;;  %10777 = vmatmul.mubr.bf16.gmra.mrb[60].mxu1 %v9457_v7 }
0x3152   : > { %10816 = vmatprep.mubr.bf16.mxu0 %v16412_v14  ;;  %10864 = vmatprep.mubr.bf16.mxu1 %v16414_v9  ;;  %v13474_v14 = vld [vmem:[%s16663_s7 + $0x7a0] sm:$0xff]   ;;  %v13475_v9 = vld [vmem:[%s16663_s7 + $0x768] sm:$0xff]  }
0x3153   : > { %12420 = vmatpush3.bf16.msra.mxu0 %v13465_v25  ;;  %12448 = vmatpush3.bf16.msra.mxu1 %v13466_v24 }
0x3154   : > { %12421 = vmatprep.subr.bf16.mxu0 %v13467_v61  ;;  %12449 = vmatprep.subr.bf16.mxu1 %v13468_v22 }
0x3157   : > { %12422 = vmatpush3.bf16.msra.mxu0 %v13469_v55  ;;  %12450 = vmatpush3.bf16.msra.mxu1 %v13470_v10 }
0x3158   : > { %12423 = vmatprep.subr.bf16.mxu0 %v13471_v11  ;;  %12451 = vmatprep.subr.bf16.mxu1 %v13472_v39 }
0x315b   : > { %12424 = vmatpush3.bf16.msra.mxu0 %v13473_v60  ;;  %12452 = vmatpush3.bf16.msra.mxu1 %v13474_v14 }
0x315c   : > { %12425 = vmatprep.subr.bf16.mxu0 %v13475_v9  ;;  %12453 = vmatprep.subr.bf16.mxu1 %v13476_v56 }
0x315f   : > { %12426 = vmatpush3.bf16.msra.mxu0 %v13477_v17  ;;  %12454 = vmatpush3.bf16.msra.mxu1 %v13478_v3 }
0x3160   : > { %12427 = vmatprep.subr.bf16.mxu0 %v13479_v2  ;;  %12455 = vmatprep.subr.bf16.mxu1 %v13480_v23 }
0x3163   : > { %12428 = vmatpush3.bf16.msra.mxu0 %v13481_v26  ;;  %12456 = vmatpush3.bf16.msra.mxu1 %v13482_v16 }
0x3164   : > { %12429 = vmatprep.subr.bf16.mxu0 %v13483_v29  ;;  %12457 = vmatprep.subr.bf16.mxu1 %v13484_v0 }
0x3167   : > { %12430 = vmatpush3.bf16.msra.mxu0 %v13485_v38  ;;  %12458 = vmatpush3.bf16.msra.mxu1 %v13486_v20 }
0x316a   : > { %10817 = vmatmul.mubr.bf16.vlgmr.msra.gmra.mrb[64].mxu0 %v16408_v53  ;;  %10865 = vmatmul.mubr.bf16.vlgmr.msra.gmra.mrb[64].mxu1 %v16410_v58 }
0x316b   : > { %10824 = vmatprep.mubr.bf16.mxu0 %v9460_v54  ;;  %10872 = vmatprep.mubr.bf16.mxu1 %v9462_v27 }
0x3172   : > { %10825 = vmatmul.mubr.bf16.gmra.mrb[68].mxu0 %v9459_v30  ;;  %10873 = vmatmul.mubr.bf16.gmra.mrb[68].mxu1 %v9461_v49 }
0x31db   : > { %v12263_v15 = vpop.f32.mrb[40].mxu0  ;;  %v12291_v34 = vpop.f32.mrb[40].mxu1 }
0x31dc   : > { %v12264_v46 = vpop.f32.mrb[41].mxu0  ;;  %v12292_v42 = vpop.f32.mrb[41].mxu1 }
0x31dd   : > { %v12265_v45 = vadd.f32 %v12264_v46, %v12263_v15  ;;  %v12293_v53 = vadd.f32 %v12292_v42, %v12291_v34  ;;  %v12266_v51 = vpop.f32.mrb[42].mxu0  ;;  %v12294_v58 = vpop.f32.mrb[42].mxu1 }
0x31de   : > { %v12267_v43 = vpop.f32.mrb[43].mxu0  ;;  %v12295_v63 = vpop.f32.mrb[43].mxu1 }
0x31df   : > { %v10531_v4 = vadd.f32 %v12265_v45, %v11678_v28  ;;  %v12268_v40 = vadd.f32 %v12267_v43, %v12266_v51  ;;  %v12296_v44 = vadd.f32 %v12295_v63, %v12294_v58 }
0x31e1   : > { %v10579_v13 = vadd.f32 %v12293_v53, %v10531_v4  ;;  %v10534_v33 = vadd.f32 %v12268_v40, %v11678_v28 }
0x31e3   : > { %v10582_v62 = vadd.f32 %v12296_v44, %v10534_v33  ;;  %v12269_v47 = vpop.f32.mrb[44].mxu0  ;;  %v12297_v32 = vpop.f32.mrb[44].mxu1 }
0x31e4   : > { %v12270_v57 = vpop.f32.mrb[45].mxu0  ;;  %v12298_v21 = vpop.f32.mrb[45].mxu1 }
0x31e5   : > { %v12271_v31 = vadd.f32 %v12270_v57, %v12269_v47  ;;  %v12299_v6 = vadd.f32 %v12298_v21, %v12297_v32  ;;  %v12272_v52 = vpop.f32.mrb[46].mxu0  ;;  %v12300_v1 = vpop.f32.mrb[46].mxu1 }
0x31e6   : > { %v12273_v19 = vpop.f32.mrb[47].mxu0  ;;  %v12301_v7 = vpop.f32.mrb[47].mxu1 }
0x31e7   : > { %v10539_v25 = vadd.f32 %v12271_v31, %v11678_v28 }
0x31e9   : > { %v10587_v24 = vadd.f32 %v12299_v6, %v10539_v25 }
0x31fb   : > { %v12319_v61 = vpop.f32.mrb[48].mxu0  ;;  %v12347_v22 = vpop.f32.mrb[48].mxu1 }
0x31fc   : > { %v12320_v55 = vpop.f32.mrb[49].mxu0  ;;  %v12348_v10 = vpop.f32.mrb[49].mxu1 }
0x31fd   : > { %v12321_v11 = vadd.f32 %v12320_v55, %v12319_v61  ;;  %v12349_v39 = vadd.f32 %v12348_v10, %v12347_v22  ;;  %v12322_v60 = vpop.f32.mrb[50].mxu0  ;;  %v12350_v14 = vpop.f32.mrb[50].mxu1 }
0x31fe   : > { %v12323_v9 = vpop.f32.mrb[51].mxu0  ;;  %v12351_v56 = vpop.f32.mrb[51].mxu1 }
0x31ff   : > { %v10627_v17 = vadd.f32 %v12321_v11, %v10579_v13  ;;  %v12324_v3 = vadd.f32 %v12323_v9, %v12322_v60  ;;  %v12352_v2 = vadd.f32 %v12351_v56, %v12350_v14 }
0x3201   : > { %v10675_v23 = vadd.f32 %v12349_v39, %v10627_v17  ;;  %v10630_v26 = vadd.f32 %v12324_v3, %v10582_v62 }
0x3203   : > { %v10678_v16 = vadd.f32 %v12352_v2, %v10630_v26  ;;  %v12325_v29 = vpop.f32.mrb[52].mxu0  ;;  %v12353_v0 = vpop.f32.mrb[52].mxu1 }
0x3204   : > { %v12326_v37 = vpop.f32.mrb[53].mxu0  ;;  %v12354_v41 = vpop.f32.mrb[53].mxu1 }
0x3205   : > { %v12327_v38 = vadd.f32 %v12326_v37, %v12325_v29  ;;  %v12355_v20 = vadd.f32 %v12354_v41, %v12353_v0  ;;  %v12328_v8 = vpop.f32.mrb[54].mxu0  ;;  %v12356_v5 = vpop.f32.mrb[54].mxu1 }
0x3206   : > { %v12329_v18 = vpop.f32.mrb[55].mxu0  ;;  %v12357_v35 = vpop.f32.mrb[55].mxu1 }
0x3207   : > { %v10635_v54 = vadd.f32 %v12327_v38, %v10587_v24 }
0x3209   : > { %v10683_v27 = vadd.f32 %v12355_v20, %v10635_v54 }
0x321c   : > { %v12375_v36 = vpop.f32.mrb[56].mxu0  ;;  %v12403_v48 = vpop.f32.mrb[56].mxu1 }
0x321d   : > { %v12376_v30 = vpop.f32.mrb[57].mxu0  ;;  %v12404_v49 = vpop.f32.mrb[57].mxu1 }
0x321e   : > { %v12377_v15 = vadd.f32 %v12376_v30, %v12375_v36  ;;  %v12405_v34 = vadd.f32 %v12404_v49, %v12403_v48  ;;  %v12378_v28 = vpop.f32.mrb[58].mxu0  ;;  %v12406_v46 = vpop.f32.mrb[58].mxu1 }
0x321f   : > { %v12379_v42 = vpop.f32.mrb[59].mxu0  ;;  %v12407_v45 = vpop.f32.mrb[59].mxu1 }
0x3220   : > { %v10723_v53 = vadd.f32 %v12377_v15, %v10675_v23  ;;  %v12380_v51 = vadd.f32 %v12379_v42, %v12378_v28  ;;  %v12408_v58 = vadd.f32 %v12407_v45, %v12406_v46 }
0x3222   : > { %v10771_v43 = vadd.f32 %v12405_v34, %v10723_v53  ;;  %v10726_v63 = vadd.f32 %v12380_v51, %v10678_v16 }
0x3224   : > { %v10774_v4 = vadd.f32 %v12408_v58, %v10726_v63  ;;  %v12381_v40 = vpop.f32.mrb[60].mxu0  ;;  %v12409_v44 = vpop.f32.mrb[60].mxu1 }
0x3225   : > { %v12382_v13 = vpop.f32.mrb[61].mxu0  ;;  %v12410_v33 = vpop.f32.mrb[61].mxu1 }
0x3226   : > { %v12383_v62 = vadd.f32 %v12382_v13, %v12381_v40  ;;  %v12411_v47 = vadd.f32 %v12410_v33, %v12409_v44  ;;  %v12384_v32 = vpop.f32.mrb[62].mxu0  ;;  %v12412_v57 = vpop.f32.mrb[62].mxu1 }
0x3227   : > { %v12385_v21 = vpop.f32.mrb[63].mxu0  ;;  %v12413_v31 = vpop.f32.mrb[63].mxu1  ;;  %v11809_v57 = vld [vmem:[%s16667_s11 + $0x1] ss:$0 sm:$0xff] }
0x3228   : > { %v10731_v6 = vadd.f32 %v12383_v62, %v10683_v27 }
0x322a   : > { %v10779_v52 = vadd.f32 %v12411_v47, %v10731_v6  ;;  %v11810_v6 = vld [vmem:[%s16668_s12 + $0x1] ss:$0 sm:$0xff] }
0x323d   : > { %v12431_v1 = vpop.f32.mrb[64].mxu0  ;;  %v12459_v19 = vpop.f32.mrb[64].mxu1 }
0x323e   : > { %v12432_v7 = vpop.f32.mrb[65].mxu0  ;;  %v12460_v25 = vpop.f32.mrb[65].mxu1 }
0x323f   : > { %v12433_v24 = vadd.f32 %v12432_v7, %v12431_v1  ;;  %v12461_v61 = vadd.f32 %v12460_v25, %v12459_v19  ;;  %v12434_v22 = vpop.f32.mrb[66].mxu0  ;;  %v12462_v55 = vpop.f32.mrb[66].mxu1 }
0x3240   : > { %v12435_v10 = vpop.f32.mrb[67].mxu0  ;;  %v12463_v11 = vpop.f32.mrb[67].mxu1 }
0x3241   : > { %v10819_v39 = vadd.f32 %v12433_v24, %v10771_v43  ;;  %v12436_v60 = vadd.f32 %v12435_v10, %v12434_v22  ;;  %v12464_v14 = vadd.f32 %v12463_v11, %v12462_v55 }
0x3243   : > { %v10867_v9 = vadd.f32 %v12461_v61, %v10819_v39  ;;  %v10822_v56 = vadd.f32 %v12436_v60, %v10774_v4 }
0x3245   : > { %v10870_v17 = vadd.f32 %v12464_v14, %v10822_v56  ;;  %v12437_v3 = vpop.f32.mrb[68].mxu0  ;;  %v12465_v2 = vpop.f32.mrb[68].mxu1  ;;  %v10880_v23 = vadd.f32 %v10867_v9, %v15921_v59 }
0x3246   : > { %v12438_v26 = vpop.f32.mrb[69].mxu0  ;;  %v12466_v16 = vpop.f32.mrb[69].mxu1 }
0x3247   : > { %v12439_v29 = vadd.f32 %v12438_v26, %v12437_v3  ;;  %v12467_v0 = vadd.f32 %v12466_v16, %v12465_v2  ;;  %v12440_v37 = vpop.f32.mrb[70].mxu0  ;;  %v12468_v41 = vpop.f32.mrb[70].mxu1  ;;  %v10887_v38 = vsel %vm471_vm0, %v10880_v23, 0.0  ;;  %v10881_v20 = vadd.f32 %v10870_v17, %v15923_v12 }
0x3248   : > { %v12441_v8 = vpop.f32.mrb[71].mxu0  ;;  %v12469_v5 = vpop.f32.mrb[71].mxu1  ;;  %10888 = vadd.xlane.f32.xlu1 %v10887_v38 }
0x3249   : > { %v10827_v18 = vadd.f32 %v12439_v29, %v10779_v52  ;;  %v10890_v35 = vsel %vm471_vm0, %v10881_v20, 0.0 }
0x324a   : > { %10891 = vadd.xlane.f32.xlu0 %v10890_v35 }
0x324b   : > { %v10875_v54 = vadd.f32 %v12467_v0, %v10827_v18 }
0x324d   : > { %v10882_v59 = vadd.f32 %v10875_v54, %v15956_v50 }
0x324f   : > { %v10893_v27 = vsel %vm471_vm0, %v10882_v59, 0.0 }
0x3250   : > { %10894 = vadd.xlane.f32.xlu1 %v10893_v27 }
0x32d5   : > { %v10889_v36 = vpop.xlane.xlu1 %10888 }
0x32d6   : > { %v10896_v48 = vmul.f32 0.03125, %v10889_v36 }
0x32d7   : > { %v10892_v30 = vpop.xlane.xlu0 %10891 }
0x32d8   : > { %v10899_v49 = vsub.f32 %v10880_v23, %v10896_v48  ;;  %v10897_v15 = vmul.f32 0.03125, %v10892_v30 }
0x32da   : > { %v10900_v34 = vsub.f32 %v10881_v20, %v10897_v15  ;;  %v10902_v12 = vmul.f32 %v10899_v49, %v10899_v49 }
0x32dc   : > { %v10905_v28 = vsel %vm471_vm0, %v10902_v12, 0.0  ;;  %v10903_v46 = vmul.f32 %v10900_v34, %v10900_v34 }
0x32dd   : > { %10906 = vadd.xlane.f32.xlu0 %v10905_v28  ;;  %v10895_v42 = vpop.xlane.xlu1 %10894 }
0x32de   : > { %v10898_v45 = vmul.f32 0.03125, %v10895_v42  ;;  %v10908_v53 = vsel %vm471_vm0, %v10903_v46, 0.0 }
0x32df   : > { %10909 = vadd.xlane.f32.xlu1 %v10908_v53 }
0x32e0   : > { %v10901_v50 = vsub.f32 %v10882_v59, %v10898_v45 }
0x32e2   : > { %v10904_v51 = vmul.f32 %v10901_v50, %v10901_v50 }
0x32e4   : > { %v10911_v58 = vsel %vm471_vm0, %v10904_v51, 0.0 }
0x32e5   : > { %10912 = vadd.xlane.f32.xlu0 %v10911_v58 }
0x336a   : > { %v10907_v43 = vpop.xlane.xlu0 %10906 }
0x336b   : > { %v10914_v63 = vmul.f32 0.03125, %v10907_v43 }
0x336c   : > { %v10910_v4 = vpop.xlane.xlu1 %10909 }
0x336d   : > { %v10917_v40 = vadd.f32 1e-05, %v10914_v63  ;;  %v10915_v44 = vmul.f32 0.03125, %v10910_v4 }
0x336f   : > { %13697 = vrsqrt.f32 %v10917_v40  ;;  %v10918_v13 = vadd.f32 1e-05, %v10915_v44 }
0x3371   : > { %13699 = vrsqrt.f32 %v10918_v13 }
0x3372   : > { %v10913_v33 = vpop.xlane.xlu0 %10912 }
0x3373   : > { %v10916_v62 = vmul.f32 0.03125, %v10913_v33 }
0x3375   : > { %v10919_v47 = vadd.f32 1e-05, %v10916_v62 }
0x3377   : > { %13701 = vrsqrt.f32 %v10919_v47 }
0x3379   : > { %v13698_v32 = vpop.eup %13697 }
0x337a   : > { %v10923_v21 = vmul.f32 %v13698_v32, %v10899_v49 }
0x337b   : > { %v13700_v31 = vpop.eup %13699 }
0x337c   : > { %v10932_v52 = vmul.f32 %v11809_v57, %v10923_v21  ;;  %v10924_v1 = vmul.f32 %v13700_v31, %v10900_v34 }
0x337e   : > { %v10941_v19 = vadd.f32 %v11810_v6, %v10932_v52  ;;  %v10933_v7 = vmul.f32 %v11809_v57, %v10924_v1 }
0x3380   : > { %v10942_v25 = vadd.f32 %v11810_v6, %v10933_v7  ;;  %10944 = vst.msk [vmem:[%s434_s17] sm:$0xff] %vm471_vm0, %v10941_v19 }
0x3381   : > { %v13702_v24 = vpop.eup %13701 }
0x3382   : > { %v10925_v61 = vmul.f32 %v13702_v24, %v10901_v50  ;;  %10945 = vst.msk [vmem:[%s434_s17 + $0x8] sm:$0xff] %vm471_vm0, %v10942_v25 }
0x3384   : > { %v10934_v22 = vmul.f32 %v11809_v57, %v10925_v61 }
0x3386   : > { %v10943_v55 = vadd.f32 %v11810_v6, %v10934_v22 }
0x3388   : > { %10946 = vst.msk [vmem:[%s434_s17 + $0x10] sm:$0xff] %vm471_vm0, %v10943_v55 }
0x3389   : > { %13719 = shalt.err (!%p13716_p3)
}
0x338a   : > { %s13720_s1 = scalar_lea.hbm %s16609_s30, 384  ;;  %s13724_s21 = scalar_lea.hbm %s16669_s13, 768 }
0x338b   : > { %p13721_p4 = scmp.ne.s32.totalorder %s16609_s30, %s13720_s1  ;;  %p13725_p9 = scmp.lt.u32.totalorder %s16609_s30, %s16669_s13 }
0x338c   : > { %p13726_p10 = scmp.lt.u32.totalorder %s13724_s21, %s13720_s1  ;;  %p13728_p12 = scmp.lt.u32.totalorder %s13720_s1, %s16609_s30 }
0x338d   : > { %p13722_p7 = pnand %p13721_p4, %p13913_p5 }
0x338e   : > { %p13727_p11 = por %p13726_p10, %p13725_p9 }
0x338f   : > { %p13723_p8 = pneg %p13722_p7 }
0x3390   : > { %p13729_p13 = por %p13728_p12, %p13727_p11 }
0x3392   : > { %p13730_p0 = pnand %p13729_p13, %p13723_p8 }
0x3394   : > { %13733 = shalt.err (!%p13730_p0)
}
0x3395   : > { %s13804_s29 = smov 128  }
0x3396   : > { %13080 = dma.vmem_to_hbm [thread:$0]  (%p13913_p5), %s16611_s0, 384, %s16609_s30, %s16614_s15, %s13804_s29, %s13804_s29, %s16761_s16  }
0x3397 PF: > { %p13086_p1 = scmp.ge.s32.totalorder %s13768_s28, 2  ;;  %s10976_s20 = sand.u32 1, %s13756_s25  }
0x3398   : > { %s10977_s1 = scalar_lea.sflag [#allocation3], %s10976_s20 }
0x3399   : > { %p13083_p2 = pnand %p13086_p1, %p13917_p6 }
0x339b   : > { %13751 = dma.done.wait (!%p13083_p2), %s10977_s1, 384  }
0x339c   : > { %13753 = vsyncadd (!%p13083_p2), %s10977_s1, 4294966912  ;;  %s16767_s18 = sld [smem:[#allocation5_spill]]  ;;  %p23_p3 = scmp.ge.s32.totalorder %s13900_s14, 4  }
0x339d   : > { %s16768_s25 = smov %s13760_s26  ;;  %s16769_s26 = smov %s13764_s27 }
0x339e   : > { %s16771_s28 = smov %s13900_s14  ;;  %25 = sbr.rel (!%p23_p3) target bundleno = 6 (0x6), region = 119 }
0x33a2   : > { %s16770_s27 = smov %s16767_s18 }
0x33a5   :  { %10982 = vsyncpa [#allocation3], 1 }
0x33a6   :  { %10984 = vsyncpa [#allocation3 + $0x1], 1 }

</bundles_post_ra>
